<compile_context>
chip_gen: v5e
topology: v5e:2x2
jax: 0.10.0
libtpu: 0.0.40
codegen_flags: <defaults>
</compile_context>

<pallas_src>
import jax
import jax.numpy as jnp
from jax.experimental import pallas as pl
from jax.experimental.pallas import tpu as pltpu

NEG_SLOPE = 0.01            # nn.LeakyReLU() default
EPS = 1e-5                  # nn.InstanceNorm2d() default (affine=False)
COMPUTE_DTYPE = jnp.bfloat16  # HBM / MXU dtype; epilogue math is f32
OUT_PAD = 128               # lane-padded channel width of the final RGB output


# ----------------------------------------------------------------------------
# In-kernel helpers (operate on VMEM refs / f32 values)
# ----------------------------------------------------------------------------
def _conv3x3_im2col_matmul(xpad_ref, w_ref, b_ref, H, W):
    """3x3 'same' conv as a single MXU matmul.

    xpad_ref: (H+2, W+2, Cin) f32 VMEM scratch with a zeroed 1-px halo.
    w_ref:    (9*Cin, Cout) bf16, flattened on host in (dy, dx, cin) order.
    b_ref:    (1, Cout) f32.
    Returns f32 (H*W, Cout) = conv + bias.
    """
    taps = []
    for dy in range(3):                 # static: 9 VMEM loads, no matmuls here
        for dx in range(3):
            taps.append(xpad_ref[dy:dy + H, dx:dx + W, :])
    patch = jnp.concatenate(taps, axis=-1)          # (H, W, 9*Cin), f32
    # W is a multiple of 8, so collapsing (H, W) is layout-preserving for f32.
    patch = patch.reshape(H * W, patch.shape[-1])
    acc = jnp.dot(patch.astype(w_ref.dtype), w_ref[...],
                  preferred_element_type=jnp.float32)   # one big MXU matmul
    return acc + b_ref[...]


def _instance_norm_leaky_relu(x):
    """x: (H*W, C) f32.  InstanceNorm2d (per-channel over spatial, biased var,
    single-pass stats) followed by LeakyReLU(0.01)."""
    inv_n = 1.0 / x.shape[0]
    mean = jnp.sum(x, axis=0, keepdims=True) * inv_n
    ex2 = jnp.sum(x * x, axis=0, keepdims=True) * inv_n
    var = jnp.maximum(ex2 - mean * mean, 0.0)       # clamp cancellation error
    x = (x - mean) * jax.lax.rsqrt(var + EPS)
    return jnp.where(x >= 0, x, NEG_SLOPE * x)


# ----------------------------------------------------------------------------
# Fused RefinementModule kernel:
#   concat(layout, feats) -> pad -> conv3x3+IN+lrelu -> pad -> conv3x3+IN+lrelu
# ----------------------------------------------------------------------------
def _make_module_kernel(H, W, L, Cf, C):
    def kernel(layout_ref, feats_ref, w1_ref, b1_ref, w2_ref, b2_ref,
               o_ref, xpad_ref, hpad_ref):
        # conv1 input: channel-concat of layout & feats written into a
        # zero-haloed f32 VMEM scratch (no HBM pad / concat round trip).
        xpad_ref[...] = jnp.zeros_like(xpad_ref)
        net_in = jnp.concatenate([layout_ref[0], feats_ref[0]], axis=-1)
        xpad_ref[1:1 + H, 1:1 + W, :] = net_in.astype(xpad_ref.dtype)

        h = _conv3x3_im2col_matmul(xpad_ref, w1_ref, b1_ref, H, W)
        h = _instance_norm_leaky_relu(h)

        # conv2 input: intermediate stays resident in VMEM scratch.
        hpad_ref[...] = jnp.zeros_like(hpad_ref)
        hpad_ref[1:1 + H, 1:1 + W, :] = h.reshape(H, W, C)

        h2 = _conv3x3_im2col_matmul(hpad_ref, w2_ref, b2_ref, H, W)
        h2 = _instance_norm_leaky_relu(h2)

        o_ref[0] = h2.reshape(H, W, C).astype(o_ref.dtype)
    return kernel


def refinement_module(layout, feats, w1, b1, w2, b2):
    """layout: (N, H, W, L) bf16 (already pooled to feats resolution);
       feats:  (N, H, W, Cf) bf16 (already 2x-upsampled);
       w1: (9*(L+Cf), C) bf16; b1: (C,) f32; w2: (9*C, C) bf16; b2: (C,) f32."""
    N, H, W, L = layout.shape
    Cf = feats.shape[-1]
    C = w1.shape[-1]
    Cin1 = L + Cf
    return pl.pallas_call(
        _make_module_kernel(H, W, L, Cf, C),
        out_shape=jax.ShapeDtypeStruct((N, H, W, C), COMPUTE_DTYPE),
        grid=(N,),
        in_specs=[
            pl.BlockSpec((1, H, W, L), lambda n: (n, 0, 0, 0)),
            pl.BlockSpec((1, H, W, Cf), lambda n: (n, 0, 0, 0)),
            pl.BlockSpec((9 * Cin1, C), lambda n: (0, 0)),
            pl.BlockSpec((1, C), lambda n: (0, 0)),
            pl.BlockSpec((9 * C, C), lambda n: (0, 0)),
            pl.BlockSpec((1, C), lambda n: (0, 0)),
        ],
        out_specs=pl.BlockSpec((1, H, W, C), lambda n: (n, 0, 0, 0)),
        scratch_shapes=[
            pltpu.VMEM((H + 2, W + 2, Cin1), jnp.float32),  # padded conv1 input
            pltpu.VMEM((H + 2, W + 2, C), jnp.float32),     # padded conv2 input
        ],
        compiler_params=pltpu.CompilerParams(
            dimension_semantics=("parallel",)),
    )(layout, feats, w1, b1.reshape(1, C), w2, b2.reshape(1, C))


# ----------------------------------------------------------------------------
# Fused output head: conv3x3 + LeakyReLU + conv1x1 (lane-padded output)
# ----------------------------------------------------------------------------
def _make_output_kernel(H, W, D, Cpad):
    def kernel(x_ref, w3_ref, b3_ref, w4_ref, b4_ref, o_ref, xpad_ref):
        xpad_ref[...] = jnp.zeros_like(xpad_ref)
        xpad_ref[1:1 + H, 1:1 + W, :] = x_ref[0].astype(xpad_ref.dtype)

        h = _conv3x3_im2col_matmul(xpad_ref, w3_ref, b3_ref, H, W)
        h = jnp.where(h >= 0, h, NEG_SLOPE * h)     # LeakyReLU, no norm here

        # fused 1x1 conv on data already in vregs: (H*W, D) x (D, Cpad)
        out = jnp.dot(h.astype(w4_ref.dtype), w4_ref[...],
                      preferred_element_type=jnp.float32) + b4_ref[...]
        o_ref[0] = out.reshape(H, W, Cpad).astype(o_ref.dtype)
    return kernel


def output_conv(feats, w3, b3, w4p, b4p):
    N, H, W, D = feats.shape
    Cpad = w4p.shape[-1]
    return pl.pallas_call(
        _make_output_kernel(H, W, D, Cpad),
        out_shape=jax.ShapeDtypeStruct((N, H, W, Cpad), jnp.float32),
        grid=(N,),
        in_specs=[
            pl.BlockSpec((1, H, W, D), lambda n: (n, 0, 0, 0)),
            pl.BlockSpec((9 * D, D), lambda n: (0, 0)),
            pl.BlockSpec((1, D), lambda n: (0, 0)),
            pl.BlockSpec((D, Cpad), lambda n: (0, 0)),
            pl.BlockSpec((1, Cpad), lambda n: (0, 0)),
        ],
        out_specs=pl.BlockSpec((1, H, W, Cpad), lambda n: (n, 0, 0, 0)),
        scratch_shapes=[pltpu.VMEM((H + 2, W + 2, D), jnp.float32)],
        compiler_params=pltpu.CompilerParams(
            dimension_semantics=("parallel",)),
    )(feats, w3, b3.reshape(1, D), w4p, b4p.reshape(1, Cpad))


# ----------------------------------------------------------------------------
# Plain-JAX glue (cheap reshape/broadcast ops, not worth a kernel at this size)
# ----------------------------------------------------------------------------
def avg_pool_nhwc(x, factor):
    N, H, W, C = x.shape
    x = x.reshape(N, H // factor, factor, W // factor, factor, C)
    return x.mean(axis=(2, 4))


def upsample2x_nearest(x):
    N, H, W, C = x.shape
    x = jnp.broadcast_to(x[:, :, None, :, None, :], (N, H, 2, W, 2, C))
    return x.reshape(N, 2 * H, 2 * W, C)


# ----------------------------------------------------------------------------
# Parameter init (mirrors shapes of the PyTorch __init__; kaiming_normal)
# ----------------------------------------------------------------------------
def _kaiming_normal(key, K, Cin, Cout):
    fan_in = Cin * K * K
    std = (2.0 / fan_in) ** 0.5
    return std * jax.random.normal(key, (K, K, Cin, Cout), jnp.float32)


def _conv_bias(key, K, Cin, Cout):
    bound = 1.0 / (Cin * K * K) ** 0.5
    return jax.random.uniform(key, (Cout,), jnp.float32, -bound, bound)


def init_params(key, dims):
    """Weights are flattened to (9*Cin, Cout) on host (tap-major, matching the
    in-kernel im2col order) and cast to bf16; biases stay f32."""
    layout_dim = dims[0]
    keys = iter(jax.random.split(key, 4 * len(dims) + 8))
    modules = []
    for i in range(1, len(dims)):
        in_dim = 1 if i == 1 else dims[i - 1]
        cin = layout_dim + in_dim
        cout = dims[i]
        w1 = _kaiming_normal(next(keys), 3, cin, cout).reshape(9 * cin, cout)
        b1 = _conv_bias(next(keys), 3, cin, cout)
        w2 = _kaiming_normal(next(keys), 3, cout, cout).reshape(9 * cout, cout)
        b2 = _conv_bias(next(keys), 3, cout, cout)
        modules.append((w1.astype(COMPUTE_DTYPE), b1,
                        w2.astype(COMPUTE_DTYPE), b2))
    d = dims[-1]
    w3 = _kaiming_normal(next(keys), 3, d, d).reshape(9 * d, d)
    b3 = _conv_bias(next(keys), 3, d, d)
    w4 = _kaiming_normal(next(keys), 1, d, 3).reshape(d, 3)
    b4 = _conv_bias(next(keys), 1, d, 3)
    # Lane-pad the 1x1 conv to OUT_PAD channels so the final store is lane-dense;
    # the wrapper slices the 3 real RGB channels.
    w4p = jnp.zeros((d, OUT_PAD), jnp.float32).at[:, :3].set(w4)
    b4p = jnp.zeros((OUT_PAD,), jnp.float32).at[:3].set(b4)
    return {"modules": modules,
            "out": (w3.astype(COMPUTE_DTYPE), b3,
                    w4p.astype(COMPUTE_DTYPE), b4p)}


# ----------------------------------------------------------------------------
# Forward pass (semantics of RefinementNetwork.forward)
# ----------------------------------------------------------------------------
def refinement_network_forward(params, layout_nchw):
    layout = jnp.transpose(layout_nchw, (0, 2, 3, 1)).astype(COMPUTE_DTYPE)
    N, H, W, _ = layout.shape
    n_mods = len(params["modules"])

    input_H, input_W = H, W
    for _ in range(n_mods):
        input_H //= 2
        input_W //= 2
    assert input_H != 0 and input_W != 0

    # Layout pyramid: repeated pool-by-2 == pool-by-2^k directly (mean of means).
    pyramid = [layout]
    for _ in range(n_mods - 1):
        pyramid.append(avg_pool_nhwc(pyramid[-1], 2))
    pyramid = pyramid[::-1]   # coarsest first, matching module order

    feats = jnp.zeros((N, input_H, input_W, 1), COMPUTE_DTYPE)
    for (w1, b1, w2, b2), lay in zip(params["modules"], pyramid):
        feats = upsample2x_nearest(feats)
        feats = refinement_module(lay, feats, w1, b1, w2, b2)

    w3, b3, w4p, b4p = params["out"]
    out_padded = output_conv(feats, w3, b3, w4p, b4p)   # (N, H, W, OUT_PAD) f32
    out = out_padded[..., :3]
    return jnp.transpose(out, (0, 3, 1, 2))             # NHWC -> NCHW


# ----------------------------------------------------------------------------
if __name__ == "__main__":
    key = jax.random.PRNGKey(0)
    k_layout, k_params = jax.random.split(key)

    # dims = (layout_dim, d1, d2): layout_dim=4, two refinement modules
    dims = (4, 8, 16)
    N, H, W = 2, 16, 16
    layout = jax.random.normal(k_layout, (N, dims[0], H, W), jnp.float32)  # NCHW

    params = init_params(k_params, dims)
    fwd = jax.jit(refinement_network_forward)
    out = fwd(params, layout)
    out = jax.block_until_ready(out)

    assert out.shape == (N, 3, H, W), out.shape
    assert jnp.all(jnp.isfinite(out))
    print("KERNEL_OK")
</pallas_src>

<mosaic_0001>
module attributes {stable_mosaic.version = 11 : i64} {
  func.func @kernel(%arg0: i32, %arg1: memref<1x8x8x4xbf16, #tpu.memory_space<vmem>>, %arg2: memref<1x8x8x1xbf16, #tpu.memory_space<vmem>>, %arg3: memref<45x8xbf16, #tpu.memory_space<vmem>>, %arg4: memref<1x8xf32, #tpu.memory_space<vmem>>, %arg5: memref<72x8xbf16, #tpu.memory_space<vmem>>, %arg6: memref<1x8xf32, #tpu.memory_space<vmem>>, %arg7: memref<1x8x8x8xbf16, #tpu.memory_space<vmem>>, %arg8: memref<10x10x5xf32, #tpu.memory_space<vmem>>, %arg9: memref<10x10x8xf32, #tpu.memory_space<vmem>>) attributes {dimension_semantics = [#tpu.dimension_semantics<parallel>], iteration_bounds = array<i64: 2>, scalar_prefetch = 0 : i64, scratch_operands = 2 : i64, tpu.core_type = #tpu.core_type<tc>, window_params = [{transform_indices = @transform_0, window_bounds = array<i64: 1, 8, 8, 4>}, {transform_indices = @transform_1, window_bounds = array<i64: 1, 8, 8, 1>}, {pipeline_mode = #tpu.pipeline_mode<synchronous>, transform_indices = @transform_2, window_bounds = array<i64: 45, 8>}, {pipeline_mode = #tpu.pipeline_mode<synchronous>, transform_indices = @transform_3, window_bounds = array<i64: 1, 8>}, {pipeline_mode = #tpu.pipeline_mode<synchronous>, transform_indices = @transform_4, window_bounds = array<i64: 72, 8>}, {pipeline_mode = #tpu.pipeline_mode<synchronous>, transform_indices = @transform_5, window_bounds = array<i64: 1, 8>}, {transform_indices = @transform_6, window_bounds = array<i64: 1, 8, 8, 8>}]} {
    %cst = arith.constant 0.000000e+00 : f32
    %0 = vector.broadcast %cst : f32 to vector<10x10x5xf32>
    %c0 = arith.constant 0 : index
    %c0_0 = arith.constant 0 : index
    %c0_1 = arith.constant 0 : index
    %1 = vector.load %arg8[%c0, %c0_0, %c0_1] : memref<10x10x5xf32, #tpu.memory_space<vmem>>, vector<10x10x5xf32>
    tpu.vector_store %arg8[%c0, %c0_0, %c0_1], %0 {strides = array<i32>} : memref<10x10x5xf32, #tpu.memory_space<vmem>>, vector<10x10x5xf32>,
    %c0_2 = arith.constant 0 : index
    %c0_3 = arith.constant 0 : index
    %c0_4 = arith.constant 0 : index
    %c0_5 = arith.constant 0 : index
    %2 = vector.load %arg1[%c0_2, %c0_3, %c0_4, %c0_5] : memref<1x8x8x4xbf16, #tpu.memory_space<vmem>>, vector<1x8x8x4xbf16>
    %3 = vector.shape_cast %2 : vector<1x8x8x4xbf16> to vector<8x8x4xbf16>
    %c0_6 = arith.constant 0 : index
    %c0_7 = arith.constant 0 : index
    %c0_8 = arith.constant 0 : index
    %c0_9 = arith.constant 0 : index
    %4 = vector.load %arg2[%c0_6, %c0_7, %c0_8, %c0_9] : memref<1x8x8x1xbf16, #tpu.memory_space<vmem>>, vector<1x8x8x1xbf16>
    %5 = vector.shape_cast %4 : vector<1x8x8x1xbf16> to vector<8x8x1xbf16>
    %6 = tpu.concatenate %3, %5 in 2 : vector<8x8x4xbf16>, vector<8x8x1xbf16> -> vector<8x8x5xbf16>
    %7 = arith.extf %6 : vector<8x8x5xbf16> to vector<8x8x5xf32>
    %c1 = arith.constant 1 : index
    %c1_10 = arith.constant 1 : index
    %c0_11 = arith.constant 0 : index
    %8 = vector.load %arg8[%c1, %c1_10, %c0_11] : memref<10x10x5xf32, #tpu.memory_space<vmem>>, vector<8x8x5xf32>
    tpu.vector_store %arg8[%c1, %c1_10, %c0_11], %7 {strides = array<i32>} : memref<10x10x5xf32, #tpu.memory_space<vmem>>, vector<8x8x5xf32>,
    %c0_12 = arith.constant 0 : index
    %c0_13 = arith.constant 0 : index
    %c0_14 = arith.constant 0 : index
    %9 = vector.load %arg8[%c0_12, %c0_13, %c0_14] : memref<10x10x5xf32, #tpu.memory_space<vmem>>, vector<8x8x5xf32>
    %c0_15 = arith.constant 0 : index
    %c1_16 = arith.constant 1 : index
    %c0_17 = arith.constant 0 : index
    %10 = vector.load %arg8[%c0_15, %c1_16, %c0_17] : memref<10x10x5xf32, #tpu.memory_space<vmem>>, vector<8x8x5xf32>
    %c0_18 = arith.constant 0 : index
    %c2 = arith.constant 2 : index
    %c0_19 = arith.constant 0 : index
    %11 = vector.load %arg8[%c0_18, %c2, %c0_19] : memref<10x10x5xf32, #tpu.memory_space<vmem>>, vector<8x8x5xf32>
    %c1_20 = arith.constant 1 : index
    %c0_21 = arith.constant 0 : index
    %c0_22 = arith.constant 0 : index
    %12 = vector.load %arg8[%c1_20, %c0_21, %c0_22] : memref<10x10x5xf32, #tpu.memory_space<vmem>>, vector<8x8x5xf32>
    %c1_23 = arith.constant 1 : index
    %c1_24 = arith.constant 1 : index
    %c0_25 = arith.constant 0 : index
    %13 = vector.load %arg8[%c1_23, %c1_24, %c0_25] : memref<10x10x5xf32, #tpu.memory_space<vmem>>, vector<8x8x5xf32>
    %c1_26 = arith.constant 1 : index
    %c2_27 = arith.constant 2 : index
    %c0_28 = arith.constant 0 : index
    %14 = vector.load %arg8[%c1_26, %c2_27, %c0_28] : memref<10x10x5xf32, #tpu.memory_space<vmem>>, vector<8x8x5xf32>
    %c2_29 = arith.constant 2 : index
    %c0_30 = arith.constant 0 : index
    %c0_31 = arith.constant 0 : index
    %15 = vector.load %arg8[%c2_29, %c0_30, %c0_31] : memref<10x10x5xf32, #tpu.memory_space<vmem>>, vector<8x8x5xf32>
    %c2_32 = arith.constant 2 : index
    %c1_33 = arith.constant 1 : index
    %c0_34 = arith.constant 0 : index
    %16 = vector.load %arg8[%c2_32, %c1_33, %c0_34] : memref<10x10x5xf32, #tpu.memory_space<vmem>>, vector<8x8x5xf32>
    %c2_35 = arith.constant 2 : index
    %c2_36 = arith.constant 2 : index
    %c0_37 = arith.constant 0 : index
    %17 = vector.load %arg8[%c2_35, %c2_36, %c0_37] : memref<10x10x5xf32, #tpu.memory_space<vmem>>, vector<8x8x5xf32>
    %18 = tpu.concatenate %9, %10, %11, %12, %13, %14, %15, %16, %17 in 2 : vector<8x8x5xf32>, vector<8x8x5xf32>, vector<8x8x5xf32>, vector<8x8x5xf32>, vector<8x8x5xf32>, vector<8x8x5xf32>, vector<8x8x5xf32>, vector<8x8x5xf32>, vector<8x8x5xf32> -> vector<8x8x45xf32>
    %19 = vector.shape_cast %18 : vector<8x8x45xf32> to vector<64x45xf32>
    %20 = arith.truncf %19 : vector<64x45xf32> to vector<64x45xbf16>
    %c0_38 = arith.constant 0 : index
    %c0_39 = arith.constant 0 : index
    %21 = vector.load %arg3[%c0_38, %c0_39] : memref<45x8xbf16, #tpu.memory_space<vmem>>, vector<45x8xbf16>
    %cst_40 = arith.constant dense<0.000000e+00> : vector<64x8xf32>
    %22 = tpu.matmul %20, %21, %cst_40 {dimension_numbers = #tpu.dot_dimension_numbers<[1], [0], [0], [1], [0, 0, 1, 1], [], []>} : vector<64x45xbf16>, vector<45x8xbf16>, vector<64x8xf32> -> vector<64x8xf32>
    %c0_41 = arith.constant 0 : index
    %c0_42 = arith.constant 0 : index
    %23 = vector.load %arg4[%c0_41, %c0_42] : memref<1x8xf32, #tpu.memory_space<vmem>>, vector<1x8xf32>
    %24 = vector.broadcast %23 : vector<1x8xf32> to vector<64x8xf32>
    %25 = arith.addf %22, %24 : vector<64x8xf32>
    %cst_43 = arith.constant dense<0.000000e+00> : vector<8xf32>
    %26 = vector.multi_reduction <add>, %25, %cst_43 [0] : vector<64x8xf32> to vector<8xf32>
    %27 = vector.shape_cast %26 : vector<8xf32> to vector<1x8xf32>
    %cst_44 = arith.constant 1.562500e-02 : f32
    %28 = vector.broadcast %cst_44 : f32 to vector<1x8xf32>
    %29 = arith.mulf %27, %28 : vector<1x8xf32>
    %30 = arith.mulf %25, %25 : vector<64x8xf32>
    %cst_45 = arith.constant dense<0.000000e+00> : vector<8xf32>
    %31 = vector.multi_reduction <add>, %30, %cst_45 [0] : vector<64x8xf32> to vector<8xf32>
    %32 = vector.shape_cast %31 : vector<8xf32> to vector<1x8xf32>
    %cst_46 = arith.constant 1.562500e-02 : f32
    %33 = vector.broadcast %cst_46 : f32 to vector<1x8xf32>
    %34 = arith.mulf %32, %33 : vector<1x8xf32>
    %35 = arith.mulf %29, %29 : vector<1x8xf32>
    %36 = arith.subf %34, %35 : vector<1x8xf32>
    %cst_47 = arith.constant 0.000000e+00 : f32
    %37 = vector.broadcast %cst_47 : f32 to vector<1x8xf32>
    %38 = arith.maximumf %36, %37 : vector<1x8xf32>
    %39 = vector.broadcast %29 : vector<1x8xf32> to vector<64x8xf32>
    %40 = arith.subf %25, %39 : vector<64x8xf32>
    %cst_48 = arith.constant 9.99999974E-6 : f32
    %41 = vector.broadcast %cst_48 : f32 to vector<1x8xf32>
    %42 = arith.addf %38, %41 : vector<1x8xf32>
    %43 = math.rsqrt %42 : vector<1x8xf32>
    %44 = vector.broadcast %43 : vector<1x8xf32> to vector<64x8xf32>
    %45 = arith.mulf %40, %44 : vector<64x8xf32>
    %cst_49 = arith.constant 0.000000e+00 : f32
    %46 = vector.broadcast %cst_49 : f32 to vector<64x8xf32>
    %47 = arith.cmpf oge, %45, %46 : vector<64x8xf32>
    %cst_50 = arith.constant 0.00999999977 : f32
    %48 = vector.broadcast %cst_50 : f32 to vector<64x8xf32>
    %49 = arith.mulf %48, %45 : vector<64x8xf32>
    %50 = arith.select %47, %45, %49 : vector<64x8xi1>, vector<64x8xf32>
    %cst_51 = arith.constant 0.000000e+00 : f32
    %51 = vector.broadcast %cst_51 : f32 to vector<10x10x8xf32>
    %c0_52 = arith.constant 0 : index
    %c0_53 = arith.constant 0 : index
    %c0_54 = arith.constant 0 : index
    %52 = vector.load %arg9[%c0_52, %c0_53, %c0_54] : memref<10x10x8xf32, #tpu.memory_space<vmem>>, vector<10x10x8xf32>
    tpu.vector_store %arg9[%c0_52, %c0_53, %c0_54], %51 {strides = array<i32>} : memref<10x10x8xf32, #tpu.memory_space<vmem>>, vector<10x10x8xf32>,
    %53 = vector.shape_cast %50 : vector<64x8xf32> to vector<8x8x8xf32>
    %c1_55 = arith.constant 1 : index
    %c1_56 = arith.constant 1 : index
    %c0_57 = arith.constant 0 : index
    %54 = vector.load %arg9[%c1_55, %c1_56, %c0_57] : memref<10x10x8xf32, #tpu.memory_space<vmem>>, vector<8x8x8xf32>
    tpu.vector_store %arg9[%c1_55, %c1_56, %c0_57], %53 {strides = array<i32>} : memref<10x10x8xf32, #tpu.memory_space<vmem>>, vector<8x8x8xf32>,
    %c0_58 = arith.constant 0 : index
    %c0_59 = arith.constant 0 : index
    %c0_60 = arith.constant 0 : index
    %55 = vector.load %arg9[%c0_58, %c0_59, %c0_60] : memref<10x10x8xf32, #tpu.memory_space<vmem>>, vector<8x8x8xf32>
    %c0_61 = arith.constant 0 : index
    %c1_62 = arith.constant 1 : index
    %c0_63 = arith.constant 0 : index
    %56 = vector.load %arg9[%c0_61, %c1_62, %c0_63] : memref<10x10x8xf32, #tpu.memory_space<vmem>>, vector<8x8x8xf32>
    %c0_64 = arith.constant 0 : index
    %c2_65 = arith.constant 2 : index
    %c0_66 = arith.constant 0 : index
    %57 = vector.load %arg9[%c0_64, %c2_65, %c0_66] : memref<10x10x8xf32, #tpu.memory_space<vmem>>, vector<8x8x8xf32>
    %c1_67 = arith.constant 1 : index
    %c0_68 = arith.constant 0 : index
    %c0_69 = arith.constant 0 : index
    %58 = vector.load %arg9[%c1_67, %c0_68, %c0_69] : memref<10x10x8xf32, #tpu.memory_space<vmem>>, vector<8x8x8xf32>
    %c1_70 = arith.constant 1 : index
    %c1_71 = arith.constant 1 : index
    %c0_72 = arith.constant 0 : index
    %59 = vector.load %arg9[%c1_70, %c1_71, %c0_72] : memref<10x10x8xf32, #tpu.memory_space<vmem>>, vector<8x8x8xf32>
    %c1_73 = arith.constant 1 : index
    %c2_74 = arith.constant 2 : index
    %c0_75 = arith.constant 0 : index
    %60 = vector.load %arg9[%c1_73, %c2_74, %c0_75] : memref<10x10x8xf32, #tpu.memory_space<vmem>>, vector<8x8x8xf32>
    %c2_76 = arith.constant 2 : index
    %c0_77 = arith.constant 0 : index
    %c0_78 = arith.constant 0 : index
    %61 = vector.load %arg9[%c2_76, %c0_77, %c0_78] : memref<10x10x8xf32, #tpu.memory_space<vmem>>, vector<8x8x8xf32>
    %c2_79 = arith.constant 2 : index
    %c1_80 = arith.constant 1 : index
    %c0_81 = arith.constant 0 : index
    %62 = vector.load %arg9[%c2_79, %c1_80, %c0_81] : memref<10x10x8xf32, #tpu.memory_space<vmem>>, vector<8x8x8xf32>
    %c2_82 = arith.constant 2 : index
    %c2_83 = arith.constant 2 : index
    %c0_84 = arith.constant 0 : index
    %63 = vector.load %arg9[%c2_82, %c2_83, %c0_84] : memref<10x10x8xf32, #tpu.memory_space<vmem>>, vector<8x8x8xf32>
    %64 = tpu.concatenate %55, %56, %57, %58, %59, %60, %61, %62, %63 in 2 : vector<8x8x8xf32>, vector<8x8x8xf32>, vector<8x8x8xf32>, vector<8x8x8xf32>, vector<8x8x8xf32>, vector<8x8x8xf32>, vector<8x8x8xf32>, vector<8x8x8xf32>, vector<8x8x8xf32> -> vector<8x8x72xf32>
    %65 = vector.shape_cast %64 : vector<8x8x72xf32> to vector<64x72xf32>
    %66 = arith.truncf %65 : vector<64x72xf32> to vector<64x72xbf16>
    %c0_85 = arith.constant 0 : index
    %c0_86 = arith.constant 0 : index
    %67 = vector.load %arg5[%c0_85, %c0_86] : memref<72x8xbf16, #tpu.memory_space<vmem>>, vector<72x8xbf16>
    %cst_87 = arith.constant dense<0.000000e+00> : vector<64x8xf32>
    %68 = tpu.matmul %66, %67, %cst_87 {dimension_numbers = #tpu.dot_dimension_numbers<[1], [0], [0], [1], [0, 0, 1, 1], [], []>} : vector<64x72xbf16>, vector<72x8xbf16>, vector<64x8xf32> -> vector<64x8xf32>
    %c0_88 = arith.constant 0 : index
    %c0_89 = arith.constant 0 : index
    %69 = vector.load %arg6[%c0_88, %c0_89] : memref<1x8xf32, #tpu.memory_space<vmem>>, vector<1x8xf32>
    %70 = vector.broadcast %69 : vector<1x8xf32> to vector<64x8xf32>
    %71 = arith.addf %68, %70 : vector<64x8xf32>
    %cst_90 = arith.constant dense<0.000000e+00> : vector<8xf32>
    %72 = vector.multi_reduction <add>, %71, %cst_90 [0] : vector<64x8xf32> to vector<8xf32>
    %73 = vector.shape_cast %72 : vector<8xf32> to vector<1x8xf32>
    %cst_91 = arith.constant 1.562500e-02 : f32
    %74 = vector.broadcast %cst_91 : f32 to vector<1x8xf32>
    %75 = arith.mulf %73, %74 : vector<1x8xf32>
    %76 = arith.mulf %71, %71 : vector<64x8xf32>
    %cst_92 = arith.constant dense<0.000000e+00> : vector<8xf32>
    %77 = vector.multi_reduction <add>, %76, %cst_92 [0] : vector<64x8xf32> to vector<8xf32>
    %78 = vector.shape_cast %77 : vector<8xf32> to vector<1x8xf32>
    %cst_93 = arith.constant 1.562500e-02 : f32
    %79 = vector.broadcast %cst_93 : f32 to vector<1x8xf32>
    %80 = arith.mulf %78, %79 : vector<1x8xf32>
    %81 = arith.mulf %75, %75 : vector<1x8xf32>
    %82 = arith.subf %80, %81 : vector<1x8xf32>
    %cst_94 = arith.constant 0.000000e+00 : f32
    %83 = vector.broadcast %cst_94 : f32 to vector<1x8xf32>
    %84 = arith.maximumf %82, %83 : vector<1x8xf32>
    %85 = vector.broadcast %75 : vector<1x8xf32> to vector<64x8xf32>
    %86 = arith.subf %71, %85 : vector<64x8xf32>
    %cst_95 = arith.constant 9.99999974E-6 : f32
    %87 = vector.broadcast %cst_95 : f32 to vector<1x8xf32>
    %88 = arith.addf %84, %87 : vector<1x8xf32>
    %89 = math.rsqrt %88 : vector<1x8xf32>
    %90 = vector.broadcast %89 : vector<1x8xf32> to vector<64x8xf32>
    %91 = arith.mulf %86, %90 : vector<64x8xf32>
    %cst_96 = arith.constant 0.000000e+00 : f32
    %92 = vector.broadcast %cst_96 : f32 to vector<64x8xf32>
    %93 = arith.cmpf oge, %91, %92 : vector<64x8xf32>
    %cst_97 = arith.constant 0.00999999977 : f32
    %94 = vector.broadcast %cst_97 : f32 to vector<64x8xf32>
    %95 = arith.mulf %94, %91 : vector<64x8xf32>
    %96 = arith.select %93, %91, %95 : vector<64x8xi1>, vector<64x8xf32>
    %97 = vector.shape_cast %96 : vector<64x8xf32> to vector<8x8x8xf32>
    %98 = arith.truncf %97 : vector<8x8x8xf32> to vector<8x8x8xbf16>
    %c0_98 = arith.constant 0 : index
    %c0_99 = arith.constant 0 : index
    %c0_100 = arith.constant 0 : index
    %c0_101 = arith.constant 0 : index
    %99 = vector.load %arg7[%c0_98, %c0_99, %c0_100, %c0_101] : memref<1x8x8x8xbf16, #tpu.memory_space<vmem>>, vector<1x8x8x8xbf16>
    %100 = vector.shape_cast %99 : vector<1x8x8x8xbf16> to vector<8x8x8xbf16>
    %101 = vector.shape_cast %98 : vector<8x8x8xbf16> to vector<1x8x8x8xbf16>
    tpu.vector_store %arg7[%c0_98, %c0_99, %c0_100, %c0_101], %101 {strides = array<i32>} : memref<1x8x8x8xbf16, #tpu.memory_space<vmem>>, vector<1x8x8x8xbf16>,
    return
  }
  func.func @transform_0(%arg0: i32) -> (i32, i32, i32, i32) {
    %c0_i32 = arith.constant 0 : i32
    %c0_i32_0 = arith.constant 0 : i32
    %c0_i32_1 = arith.constant 0 : i32
    %c0_i32_2 = arith.constant 0 : i32
    return %arg0, %c0_i32, %c0_i32_0, %c0_i32_1 : i32, i32, i32, i32
  }
  func.func @transform_1(%arg0: i32) -> (i32, i32, i32, i32) {
    %c0_i32 = arith.constant 0 : i32
    %c0_i32_0 = arith.constant 0 : i32
    %c0_i32_1 = arith.constant 0 : i32
    %c0_i32_2 = arith.constant 0 : i32
    return %arg0, %c0_i32, %c0_i32_0, %c0_i32_1 : i32, i32, i32, i32
  }
  func.func @transform_2(%arg0: i32) -> (i32, i32) {
    %c0_i32 = arith.constant 0 : i32
    %c0_i32_0 = arith.constant 0 : i32
    %c0_i32_1 = arith.constant 0 : i32
    return %c0_i32, %c0_i32_0 : i32, i32
  }
  func.func @transform_3(%arg0: i32) -> (i32, i32) {
    %c0_i32 = arith.constant 0 : i32
    %c0_i32_0 = arith.constant 0 : i32
    %c0_i32_1 = arith.constant 0 : i32
    return %c0_i32, %c0_i32_0 : i32, i32
  }
  func.func @transform_4(%arg0: i32) -> (i32, i32) {
    %c0_i32 = arith.constant 0 : i32
    %c0_i32_0 = arith.constant 0 : i32
    %c0_i32_1 = arith.constant 0 : i32
    return %c0_i32, %c0_i32_0 : i32, i32
  }
  func.func @transform_5(%arg0: i32) -> (i32, i32) {
    %c0_i32 = arith.constant 0 : i32
    %c0_i32_0 = arith.constant 0 : i32
    %c0_i32_1 = arith.constant 0 : i32
    return %c0_i32, %c0_i32_0 : i32, i32
  }
  func.func @transform_6(%arg0: i32) -> (i32, i32, i32, i32) {
    %c0_i32 = arith.constant 0 : i32
    %c0_i32_0 = arith.constant 0 : i32
    %c0_i32_1 = arith.constant 0 : i32
    %c0_i32_2 = arith.constant 0 : i32
    return %arg0, %c0_i32, %c0_i32_0, %c0_i32_1 : i32, i32, i32, i32
  }
}

module attributes {stable_mosaic.version = 11 : i64} {
  func.func @kernel(%arg0: i32, %arg1: memref<1x16x16x4xbf16, #tpu.memory_space<vmem>>, %arg2: memref<1x16x16x8xbf16, #tpu.memory_space<vmem>>, %arg3: memref<108x16xbf16, #tpu.memory_space<vmem>>, %arg4: memref<1x16xf32, #tpu.memory_space<vmem>>, %arg5: memref<144x16xbf16, #tpu.memory_space<vmem>>, %arg6: memref<1x16xf32, #tpu.memory_space<vmem>>, %arg7: memref<1x16x16x16xbf16, #tpu.memory_space<vmem>>, %arg8: memref<18x18x12xf32, #tpu.memory_space<vmem>>, %arg9: memref<18x18x16xf32, #tpu.memory_space<vmem>>) attributes {dimension_semantics = [#tpu.dimension_semantics<parallel>], iteration_bounds = array<i64: 2>, scalar_prefetch = 0 : i64, scratch_operands = 2 : i64, tpu.core_type = #tpu.core_type<tc>, window_params = [{transform_indices = @transform_0, window_bounds = array<i64: 1, 16, 16, 4>}, {transform_indices = @transform_1, window_bounds = array<i64: 1, 16, 16, 8>}, {pipeline_mode = #tpu.pipeline_mode<synchronous>, transform_indices = @transform_2, window_bounds = array<i64: 108, 16>}, {pipeline_mode = #tpu.pipeline_mode<synchronous>, transform_indices = @transform_3, window_bounds = array<i64: 1, 16>}, {pipeline_mode = #tpu.pipeline_mode<synchronous>, transform_indices = @transform_4, window_bounds = array<i64: 144, 16>}, {pipeline_mode = #tpu.pipeline_mode<synchronous>, transform_indices = @transform_5, window_bounds = array<i64: 1, 16>}, {transform_indices = @transform_6, window_bounds = array<i64: 1, 16, 16, 16>}]} {
    %cst = arith.constant 0.000000e+00 : f32
    %0 = vector.broadcast %cst : f32 to vector<18x18x12xf32>
    %c0 = arith.constant 0 : index
    %c0_0 = arith.constant 0 : index
    %c0_1 = arith.constant 0 : index
    %1 = vector.load %arg8[%c0, %c0_0, %c0_1] : memref<18x18x12xf32, #tpu.memory_space<vmem>>, vector<18x18x12xf32>
    tpu.vector_store %arg8[%c0, %c0_0, %c0_1], %0 {strides = array<i32>} : memref<18x18x12xf32, #tpu.memory_space<vmem>>, vector<18x18x12xf32>,
    %c0_2 = arith.constant 0 : index
    %c0_3 = arith.constant 0 : index
    %c0_4 = arith.constant 0 : index
    %c0_5 = arith.constant 0 : index
    %2 = vector.load %arg1[%c0_2, %c0_3, %c0_4, %c0_5] : memref<1x16x16x4xbf16, #tpu.memory_space<vmem>>, vector<1x16x16x4xbf16>
    %3 = vector.shape_cast %2 : vector<1x16x16x4xbf16> to vector<16x16x4xbf16>
    %c0_6 = arith.constant 0 : index
    %c0_7 = arith.constant 0 : index
    %c0_8 = arith.constant 0 : index
    %c0_9 = arith.constant 0 : index
    %4 = vector.load %arg2[%c0_6, %c0_7, %c0_8, %c0_9] : memref<1x16x16x8xbf16, #tpu.memory_space<vmem>>, vector<1x16x16x8xbf16>
    %5 = vector.shape_cast %4 : vector<1x16x16x8xbf16> to vector<16x16x8xbf16>
    %6 = tpu.concatenate %3, %5 in 2 : vector<16x16x4xbf16>, vector<16x16x8xbf16> -> vector<16x16x12xbf16>
    %7 = arith.extf %6 : vector<16x16x12xbf16> to vector<16x16x12xf32>
    %c1 = arith.constant 1 : index
    %c1_10 = arith.constant 1 : index
    %c0_11 = arith.constant 0 : index
    %8 = vector.load %arg8[%c1, %c1_10, %c0_11] : memref<18x18x12xf32, #tpu.memory_space<vmem>>, vector<16x16x12xf32>
    tpu.vector_store %arg8[%c1, %c1_10, %c0_11], %7 {strides = array<i32>} : memref<18x18x12xf32, #tpu.memory_space<vmem>>, vector<16x16x12xf32>,
    %c0_12 = arith.constant 0 : index
    %c0_13 = arith.constant 0 : index
    %c0_14 = arith.constant 0 : index
    %9 = vector.load %arg8[%c0_12, %c0_13, %c0_14] : memref<18x18x12xf32, #tpu.memory_space<vmem>>, vector<16x16x12xf32>
    %c0_15 = arith.constant 0 : index
    %c1_16 = arith.constant 1 : index
    %c0_17 = arith.constant 0 : index
    %10 = vector.load %arg8[%c0_15, %c1_16, %c0_17] : memref<18x18x12xf32, #tpu.memory_space<vmem>>, vector<16x16x12xf32>
    %c0_18 = arith.constant 0 : index
    %c2 = arith.constant 2 : index
    %c0_19 = arith.constant 0 : index
    %11 = vector.load %arg8[%c0_18, %c2, %c0_19] : memref<18x18x12xf32, #tpu.memory_space<vmem>>, vector<16x16x12xf32>
    %c1_20 = arith.constant 1 : index
    %c0_21 = arith.constant 0 : index
    %c0_22 = arith.constant 0 : index
    %12 = vector.load %arg8[%c1_20, %c0_21, %c0_22] : memref<18x18x12xf32, #tpu.memory_space<vmem>>, vector<16x16x12xf32>
    %c1_23 = arith.constant 1 : index
    %c1_24 = arith.constant 1 : index
    %c0_25 = arith.constant 0 : index
    %13 = vector.load %arg8[%c1_23, %c1_24, %c0_25] : memref<18x18x12xf32, #tpu.memory_space<vmem>>, vector<16x16x12xf32>
    %c1_26 = arith.constant 1 : index
    %c2_27 = arith.constant 2 : index
    %c0_28 = arith.constant 0 : index
    %14 = vector.load %arg8[%c1_26, %c2_27, %c0_28] : memref<18x18x12xf32, #tpu.memory_space<vmem>>, vector<16x16x12xf32>
    %c2_29 = arith.constant 2 : index
    %c0_30 = arith.constant 0 : index
    %c0_31 = arith.constant 0 : index
    %15 = vector.load %arg8[%c2_29, %c0_30, %c0_31] : memref<18x18x12xf32, #tpu.memory_space<vmem>>, vector<16x16x12xf32>
    %c2_32 = arith.constant 2 : index
    %c1_33 = arith.constant 1 : index
    %c0_34 = arith.constant 0 : index
    %16 = vector.load %arg8[%c2_32, %c1_33, %c0_34] : memref<18x18x12xf32, #tpu.memory_space<vmem>>, vector<16x16x12xf32>
    %c2_35 = arith.constant 2 : index
    %c2_36 = arith.constant 2 : index
    %c0_37 = arith.constant 0 : index
    %17 = vector.load %arg8[%c2_35, %c2_36, %c0_37] : memref<18x18x12xf32, #tpu.memory_space<vmem>>, vector<16x16x12xf32>
    %18 = tpu.concatenate %9, %10, %11, %12, %13, %14, %15, %16, %17 in 2 : vector<16x16x12xf32>, vector<16x16x12xf32>, vector<16x16x12xf32>, vector<16x16x12xf32>, vector<16x16x12xf32>, vector<16x16x12xf32>, vector<16x16x12xf32>, vector<16x16x12xf32>, vector<16x16x12xf32> -> vector<16x16x108xf32>
    %19 = vector.shape_cast %18 : vector<16x16x108xf32> to vector<256x108xf32>
    %20 = arith.truncf %19 : vector<256x108xf32> to vector<256x108xbf16>
    %c0_38 = arith.constant 0 : index
    %c0_39 = arith.constant 0 : index
    %21 = vector.load %arg3[%c0_38, %c0_39] : memref<108x16xbf16, #tpu.memory_space<vmem>>, vector<108x16xbf16>
    %cst_40 = arith.constant dense<0.000000e+00> : vector<256x16xf32>
    %22 = tpu.matmul %20, %21, %cst_40 {dimension_numbers = #tpu.dot_dimension_numbers<[1], [0], [0], [1], [0, 0, 1, 1], [], []>} : vector<256x108xbf16>, vector<108x16xbf16>, vector<256x16xf32> -> vector<256x16xf32>
    %c0_41 = arith.constant 0 : index
    %c0_42 = arith.constant 0 : index
    %23 = vector.load %arg4[%c0_41, %c0_42] : memref<1x16xf32, #tpu.memory_space<vmem>>, vector<1x16xf32>
    %24 = vector.broadcast %23 : vector<1x16xf32> to vector<256x16xf32>
    %25 = arith.addf %22, %24 : vector<256x16xf32>
    %cst_43 = arith.constant dense<0.000000e+00> : vector<16xf32>
    %26 = vector.multi_reduction <add>, %25, %cst_43 [0] : vector<256x16xf32> to vector<16xf32>
    %27 = vector.shape_cast %26 : vector<16xf32> to vector<1x16xf32>
    %cst_44 = arith.constant 3.906250e-03 : f32
    %28 = vector.broadcast %cst_44 : f32 to vector<1x16xf32>
    %29 = arith.mulf %27, %28 : vector<1x16xf32>
    %30 = arith.mulf %25, %25 : vector<256x16xf32>
    %cst_45 = arith.constant dense<0.000000e+00> : vector<16xf32>
    %31 = vector.multi_reduction <add>, %30, %cst_45 [0] : vector<256x16xf32> to vector<16xf32>
    %32 = vector.shape_cast %31 : vector<16xf32> to vector<1x16xf32>
    %cst_46 = arith.constant 3.906250e-03 : f32
    %33 = vector.broadcast %cst_46 : f32 to vector<1x16xf32>
    %34 = arith.mulf %32, %33 : vector<1x16xf32>
    %35 = arith.mulf %29, %29 : vector<1x16xf32>
    %36 = arith.subf %34, %35 : vector<1x16xf32>
    %cst_47 = arith.constant 0.000000e+00 : f32
    %37 = vector.broadcast %cst_47 : f32 to vector<1x16xf32>
    %38 = arith.maximumf %36, %37 : vector<1x16xf32>
    %39 = vector.broadcast %29 : vector<1x16xf32> to vector<256x16xf32>
    %40 = arith.subf %25, %39 : vector<256x16xf32>
    %cst_48 = arith.constant 9.99999974E-6 : f32
    %41 = vector.broadcast %cst_48 : f32 to vector<1x16xf32>
    %42 = arith.addf %38, %41 : vector<1x16xf32>
    %43 = math.rsqrt %42 : vector<1x16xf32>
    %44 = vector.broadcast %43 : vector<1x16xf32> to vector<256x16xf32>
    %45 = arith.mulf %40, %44 : vector<256x16xf32>
    %cst_49 = arith.constant 0.000000e+00 : f32
    %46 = vector.broadcast %cst_49 : f32 to vector<256x16xf32>
    %47 = arith.cmpf oge, %45, %46 : vector<256x16xf32>
    %cst_50 = arith.constant 0.00999999977 : f32
    %48 = vector.broadcast %cst_50 : f32 to vector<256x16xf32>
    %49 = arith.mulf %48, %45 : vector<256x16xf32>
    %50 = arith.select %47, %45, %49 : vector<256x16xi1>, vector<256x16xf32>
    %cst_51 = arith.constant 0.000000e+00 : f32
    %51 = vector.broadcast %cst_51 : f32 to vector<18x18x16xf32>
    %c0_52 = arith.constant 0 : index
    %c0_53 = arith.constant 0 : index
    %c0_54 = arith.constant 0 : index
    %52 = vector.load %arg9[%c0_52, %c0_53, %c0_54] : memref<18x18x16xf32, #tpu.memory_space<vmem>>, vector<18x18x16xf32>
    tpu.vector_store %arg9[%c0_52, %c0_53, %c0_54], %51 {strides = array<i32>} : memref<18x18x16xf32, #tpu.memory_space<vmem>>, vector<18x18x16xf32>,
    %53 = vector.shape_cast %50 : vector<256x16xf32> to vector<16x16x16xf32>
    %c1_55 = arith.constant 1 : index
    %c1_56 = arith.constant 1 : index
    %c0_57 = arith.constant 0 : index
    %54 = vector.load %arg9[%c1_55, %c1_56, %c0_57] : memref<18x18x16xf32, #tpu.memory_space<vmem>>, vector<16x16x16xf32>
    tpu.vector_store %arg9[%c1_55, %c1_56, %c0_57], %53 {strides = array<i32>} : memref<18x18x16xf32, #tpu.memory_space<vmem>>, vector<16x16x16xf32>,
    %c0_58 = arith.constant 0 : index
    %c0_59 = arith.constant 0 : index
    %c0_60 = arith.constant 0 : index
    %55 = vector.load %arg9[%c0_58, %c0_59, %c0_60] : memref<18x18x16xf32, #tpu.memory_space<vmem>>, vector<16x16x16xf32>
    %c0_61 = arith.constant 0 : index
    %c1_62 = arith.constant 1 : index
    %c0_63 = arith.constant 0 : index
    %56 = vector.load %arg9[%c0_61, %c1_62, %c0_63] : memref<18x18x16xf32, #tpu.memory_space<vmem>>, vector<16x16x16xf32>
    %c0_64 = arith.constant 0 : index
    %c2_65 = arith.constant 2 : index
    %c0_66 = arith.constant 0 : index
    %57 = vector.load %arg9[%c0_64, %c2_65, %c0_66] : memref<18x18x16xf32, #tpu.memory_space<vmem>>, vector<16x16x16xf32>
    %c1_67 = arith.constant 1 : index
    %c0_68 = arith.constant 0 : index
    %c0_69 = arith.constant 0 : index
    %58 = vector.load %arg9[%c1_67, %c0_68, %c0_69] : memref<18x18x16xf32, #tpu.memory_space<vmem>>, vector<16x16x16xf32>
    %c1_70 = arith.constant 1 : index
    %c1_71 = arith.constant 1 : index
    %c0_72 = arith.constant 0 : index
    %59 = vector.load %arg9[%c1_70, %c1_71, %c0_72] : memref<18x18x16xf32, #tpu.memory_space<vmem>>, vector<16x16x16xf32>
    %c1_73 = arith.constant 1 : index
    %c2_74 = arith.constant 2 : index
    %c0_75 = arith.constant 0 : index
    %60 = vector.load %arg9[%c1_73, %c2_74, %c0_75] : memref<18x18x16xf32, #tpu.memory_space<vmem>>, vector<16x16x16xf32>
    %c2_76 = arith.constant 2 : index
    %c0_77 = arith.constant 0 : index
    %c0_78 = arith.constant 0 : index
    %61 = vector.load %arg9[%c2_76, %c0_77, %c0_78] : memref<18x18x16xf32, #tpu.memory_space<vmem>>, vector<16x16x16xf32>
    %c2_79 = arith.constant 2 : index
    %c1_80 = arith.constant 1 : index
    %c0_81 = arith.constant 0 : index
    %62 = vector.load %arg9[%c2_79, %c1_80, %c0_81] : memref<18x18x16xf32, #tpu.memory_space<vmem>>, vector<16x16x16xf32>
    %c2_82 = arith.constant 2 : index
    %c2_83 = arith.constant 2 : index
    %c0_84 = arith.constant 0 : index
    %63 = vector.load %arg9[%c2_82, %c2_83, %c0_84] : memref<18x18x16xf32, #tpu.memory_space<vmem>>, vector<16x16x16xf32>
    %64 = tpu.concatenate %55, %56, %57, %58, %59, %60, %61, %62, %63 in 2 : vector<16x16x16xf32>, vector<16x16x16xf32>, vector<16x16x16xf32>, vector<16x16x16xf32>, vector<16x16x16xf32>, vector<16x16x16xf32>, vector<16x16x16xf32>, vector<16x16x16xf32>, vector<16x16x16xf32> -> vector<16x16x144xf32>
    %65 = vector.shape_cast %64 : vector<16x16x144xf32> to vector<256x144xf32>
    %66 = arith.truncf %65 : vector<256x144xf32> to vector<256x144xbf16>
    %c0_85 = arith.constant 0 : index
    %c0_86 = arith.constant 0 : index
    %67 = vector.load %arg5[%c0_85, %c0_86] : memref<144x16xbf16, #tpu.memory_space<vmem>>, vector<144x16xbf16>
    %cst_87 = arith.constant dense<0.000000e+00> : vector<256x16xf32>
    %68 = tpu.matmul %66, %67, %cst_87 {dimension_numbers = #tpu.dot_dimension_numbers<[1], [0], [0], [1], [0, 0, 1, 1], [], []>} : vector<256x144xbf16>, vector<144x16xbf16>, vector<256x16xf32> -> vector<256x16xf32>
    %c0_88 = arith.constant 0 : index
    %c0_89 = arith.constant 0 : index
    %69 = vector.load %arg6[%c0_88, %c0_89] : memref<1x16xf32, #tpu.memory_space<vmem>>, vector<1x16xf32>
    %70 = vector.broadcast %69 : vector<1x16xf32> to vector<256x16xf32>
    %71 = arith.addf %68, %70 : vector<256x16xf32>
    %cst_90 = arith.constant dense<0.000000e+00> : vector<16xf32>
    %72 = vector.multi_reduction <add>, %71, %cst_90 [0] : vector<256x16xf32> to vector<16xf32>
    %73 = vector.shape_cast %72 : vector<16xf32> to vector<1x16xf32>
    %cst_91 = arith.constant 3.906250e-03 : f32
    %74 = vector.broadcast %cst_91 : f32 to vector<1x16xf32>
    %75 = arith.mulf %73, %74 : vector<1x16xf32>
    %76 = arith.mulf %71, %71 : vector<256x16xf32>
    %cst_92 = arith.constant dense<0.000000e+00> : vector<16xf32>
    %77 = vector.multi_reduction <add>, %76, %cst_92 [0] : vector<256x16xf32> to vector<16xf32>
    %78 = vector.shape_cast %77 : vector<16xf32> to vector<1x16xf32>
    %cst_93 = arith.constant 3.906250e-03 : f32
    %79 = vector.broadcast %cst_93 : f32 to vector<1x16xf32>
    %80 = arith.mulf %78, %79 : vector<1x16xf32>
    %81 = arith.mulf %75, %75 : vector<1x16xf32>
    %82 = arith.subf %80, %81 : vector<1x16xf32>
    %cst_94 = arith.constant 0.000000e+00 : f32
    %83 = vector.broadcast %cst_94 : f32 to vector<1x16xf32>
    %84 = arith.maximumf %82, %83 : vector<1x16xf32>
    %85 = vector.broadcast %75 : vector<1x16xf32> to vector<256x16xf32>
    %86 = arith.subf %71, %85 : vector<256x16xf32>
    %cst_95 = arith.constant 9.99999974E-6 : f32
    %87 = vector.broadcast %cst_95 : f32 to vector<1x16xf32>
    %88 = arith.addf %84, %87 : vector<1x16xf32>
    %89 = math.rsqrt %88 : vector<1x16xf32>
    %90 = vector.broadcast %89 : vector<1x16xf32> to vector<256x16xf32>
    %91 = arith.mulf %86, %90 : vector<256x16xf32>
    %cst_96 = arith.constant 0.000000e+00 : f32
    %92 = vector.broadcast %cst_96 : f32 to vector<256x16xf32>
    %93 = arith.cmpf oge, %91, %92 : vector<256x16xf32>
    %cst_97 = arith.constant 0.00999999977 : f32
    %94 = vector.broadcast %cst_97 : f32 to vector<256x16xf32>
    %95 = arith.mulf %94, %91 : vector<256x16xf32>
    %96 = arith.select %93, %91, %95 : vector<256x16xi1>, vector<256x16xf32>
    %97 = vector.shape_cast %96 : vector<256x16xf32> to vector<16x16x16xf32>
    %98 = arith.truncf %97 : vector<16x16x16xf32> to vector<16x16x16xbf16>
    %c0_98 = arith.constant 0 : index
    %c0_99 = arith.constant 0 : index
    %c0_100 = arith.constant 0 : index
    %c0_101 = arith.constant 0 : index
    %99 = vector.load %arg7[%c0_98, %c0_99, %c0_100, %c0_101] : memref<1x16x16x16xbf16, #tpu.memory_space<vmem>>, vector<1x16x16x16xbf16>
    %100 = vector.shape_cast %99 : vector<1x16x16x16xbf16> to vector<16x16x16xbf16>
    %101 = vector.shape_cast %98 : vector<16x16x16xbf16> to vector<1x16x16x16xbf16>
    tpu.vector_store %arg7[%c0_98, %c0_99, %c0_100, %c0_101], %101 {strides = array<i32>} : memref<1x16x16x16xbf16, #tpu.memory_space<vmem>>, vector<1x16x16x16xbf16>,
    return
  }
  func.func @transform_0(%arg0: i32) -> (i32, i32, i32, i32) {
    %c0_i32 = arith.constant 0 : i32
    %c0_i32_0 = arith.constant 0 : i32
    %c0_i32_1 = arith.constant 0 : i32
    %c0_i32_2 = arith.constant 0 : i32
    return %arg0, %c0_i32, %c0_i32_0, %c0_i32_1 : i32, i32, i32, i32
  }
  func.func @transform_1(%arg0: i32) -> (i32, i32, i32, i32) {
    %c0_i32 = arith.constant 0 : i32
    %c0_i32_0 = arith.constant 0 : i32
    %c0_i32_1 = arith.constant 0 : i32
    %c0_i32_2 = arith.constant 0 : i32
    return %arg0, %c0_i32, %c0_i32_0, %c0_i32_1 : i32, i32, i32, i32
  }
  func.func @transform_2(%arg0: i32) -> (i32, i32) {
    %c0_i32 = arith.constant 0 : i32
    %c0_i32_0 = arith.constant 0 : i32
    %c0_i32_1 = arith.constant 0 : i32
    return %c0_i32, %c0_i32_0 : i32, i32
  }
  func.func @transform_3(%arg0: i32) -> (i32, i32) {
    %c0_i32 = arith.constant 0 : i32
    %c0_i32_0 = arith.constant 0 : i32
    %c0_i32_1 = arith.constant 0 : i32
    return %c0_i32, %c0_i32_0 : i32, i32
  }
  func.func @transform_4(%arg0: i32) -> (i32, i32) {
    %c0_i32 = arith.constant 0 : i32
    %c0_i32_0 = arith.constant 0 : i32
    %c0_i32_1 = arith.constant 0 : i32
    return %c0_i32, %c0_i32_0 : i32, i32
  }
  func.func @transform_5(%arg0: i32) -> (i32, i32) {
    %c0_i32 = arith.constant 0 : i32
    %c0_i32_0 = arith.constant 0 : i32
    %c0_i32_1 = arith.constant 0 : i32
    return %c0_i32, %c0_i32_0 : i32, i32
  }
  func.func @transform_6(%arg0: i32) -> (i32, i32, i32, i32) {
    %c0_i32 = arith.constant 0 : i32
    %c0_i32_0 = arith.constant 0 : i32
    %c0_i32_1 = arith.constant 0 : i32
    %c0_i32_2 = arith.constant 0 : i32
    return %arg0, %c0_i32, %c0_i32_0, %c0_i32_1 : i32, i32, i32, i32
  }
}

module attributes {stable_mosaic.version = 11 : i64} {
  func.func @kernel(%arg0: i32, %arg1: memref<1x16x16x16xbf16, #tpu.memory_space<vmem>>, %arg2: memref<144x16xbf16, #tpu.memory_space<vmem>>, %arg3: memref<1x16xf32, #tpu.memory_space<vmem>>, %arg4: memref<16x128xbf16, #tpu.memory_space<vmem>>, %arg5: memref<1x128xf32, #tpu.memory_space<vmem>>, %arg6: memref<1x16x16x128xf32, #tpu.memory_space<vmem>>, %arg7: memref<18x18x16xf32, #tpu.memory_space<vmem>>) attributes {dimension_semantics = [#tpu.dimension_semantics<parallel>], iteration_bounds = array<i64: 2>, scalar_prefetch = 0 : i64, scratch_operands = 1 : i64, tpu.core_type = #tpu.core_type<tc>, window_params = [{transform_indices = @transform_0, window_bounds = array<i64: 1, 16, 16, 16>}, {pipeline_mode = #tpu.pipeline_mode<synchronous>, transform_indices = @transform_1, window_bounds = array<i64: 144, 16>}, {pipeline_mode = #tpu.pipeline_mode<synchronous>, transform_indices = @transform_2, window_bounds = array<i64: 1, 16>}, {pipeline_mode = #tpu.pipeline_mode<synchronous>, transform_indices = @transform_3, window_bounds = array<i64: 16, 128>}, {pipeline_mode = #tpu.pipeline_mode<synchronous>, transform_indices = @transform_4, window_bounds = array<i64: 1, 128>}, {transform_indices = @transform_5, window_bounds = array<i64: 1, 16, 16, 128>}]} {
    %cst = arith.constant 0.000000e+00 : f32
    %0 = vector.broadcast %cst : f32 to vector<18x18x16xf32>
    %c0 = arith.constant 0 : index
    %c0_0 = arith.constant 0 : index
    %c0_1 = arith.constant 0 : index
    %1 = vector.load %arg7[%c0, %c0_0, %c0_1] : memref<18x18x16xf32, #tpu.memory_space<vmem>>, vector<18x18x16xf32>
    tpu.vector_store %arg7[%c0, %c0_0, %c0_1], %0 {strides = array<i32>} : memref<18x18x16xf32, #tpu.memory_space<vmem>>, vector<18x18x16xf32>,
    %c0_2 = arith.constant 0 : index
    %c0_3 = arith.constant 0 : index
    %c0_4 = arith.constant 0 : index
    %c0_5 = arith.constant 0 : index
    %2 = vector.load %arg1[%c0_2, %c0_3, %c0_4, %c0_5] : memref<1x16x16x16xbf16, #tpu.memory_space<vmem>>, vector<1x16x16x16xbf16>
    %3 = vector.shape_cast %2 : vector<1x16x16x16xbf16> to vector<16x16x16xbf16>
    %4 = arith.extf %3 : vector<16x16x16xbf16> to vector<16x16x16xf32>
    %c1 = arith.constant 1 : index
    %c1_6 = arith.constant 1 : index
    %c0_7 = arith.constant 0 : index
    %5 = vector.load %arg7[%c1, %c1_6, %c0_7] : memref<18x18x16xf32, #tpu.memory_space<vmem>>, vector<16x16x16xf32>
    tpu.vector_store %arg7[%c1, %c1_6, %c0_7], %4 {strides = array<i32>} : memref<18x18x16xf32, #tpu.memory_space<vmem>>, vector<16x16x16xf32>,
    %c0_8 = arith.constant 0 : index
    %c0_9 = arith.constant 0 : index
    %c0_10 = arith.constant 0 : index
    %6 = vector.load %arg7[%c0_8, %c0_9, %c0_10] : memref<18x18x16xf32, #tpu.memory_space<vmem>>, vector<16x16x16xf32>
    %c0_11 = arith.constant 0 : index
    %c1_12 = arith.constant 1 : index
    %c0_13 = arith.constant 0 : index
    %7 = vector.load %arg7[%c0_11, %c1_12, %c0_13] : memref<18x18x16xf32, #tpu.memory_space<vmem>>, vector<16x16x16xf32>
    %c0_14 = arith.constant 0 : index
    %c2 = arith.constant 2 : index
    %c0_15 = arith.constant 0 : index
    %8 = vector.load %arg7[%c0_14, %c2, %c0_15] : memref<18x18x16xf32, #tpu.memory_space<vmem>>, vector<16x16x16xf32>
    %c1_16 = arith.constant 1 : index
    %c0_17 = arith.constant 0 : index
    %c0_18 = arith.constant 0 : index
    %9 = vector.load %arg7[%c1_16, %c0_17, %c0_18] : memref<18x18x16xf32, #tpu.memory_space<vmem>>, vector<16x16x16xf32>
    %c1_19 = arith.constant 1 : index
    %c1_20 = arith.constant 1 : index
    %c0_21 = arith.constant 0 : index
    %10 = vector.load %arg7[%c1_19, %c1_20, %c0_21] : memref<18x18x16xf32, #tpu.memory_space<vmem>>, vector<16x16x16xf32>
    %c1_22 = arith.constant 1 : index
    %c2_23 = arith.constant 2 : index
    %c0_24 = arith.constant 0 : index
    %11 = vector.load %arg7[%c1_22, %c2_23, %c0_24] : memref<18x18x16xf32, #tpu.memory_space<vmem>>, vector<16x16x16xf32>
    %c2_25 = arith.constant 2 : index
    %c0_26 = arith.constant 0 : index
    %c0_27 = arith.constant 0 : index
    %12 = vector.load %arg7[%c2_25, %c0_26, %c0_27] : memref<18x18x16xf32, #tpu.memory_space<vmem>>, vector<16x16x16xf32>
    %c2_28 = arith.constant 2 : index
    %c1_29 = arith.constant 1 : index
    %c0_30 = arith.constant 0 : index
    %13 = vector.load %arg7[%c2_28, %c1_29, %c0_30] : memref<18x18x16xf32, #tpu.memory_space<vmem>>, vector<16x16x16xf32>
    %c2_31 = arith.constant 2 : index
    %c2_32 = arith.constant 2 : index
    %c0_33 = arith.constant 0 : index
    %14 = vector.load %arg7[%c2_31, %c2_32, %c0_33] : memref<18x18x16xf32, #tpu.memory_space<vmem>>, vector<16x16x16xf32>
    %15 = tpu.concatenate %6, %7, %8, %9, %10, %11, %12, %13, %14 in 2 : vector<16x16x16xf32>, vector<16x16x16xf32>, vector<16x16x16xf32>, vector<16x16x16xf32>, vector<16x16x16xf32>, vector<16x16x16xf32>, vector<16x16x16xf32>, vector<16x16x16xf32>, vector<16x16x16xf32> -> vector<16x16x144xf32>
    %16 = vector.shape_cast %15 : vector<16x16x144xf32> to vector<256x144xf32>
    %17 = arith.truncf %16 : vector<256x144xf32> to vector<256x144xbf16>
    %c0_34 = arith.constant 0 : index
    %c0_35 = arith.constant 0 : index
    %18 = vector.load %arg2[%c0_34, %c0_35] : memref<144x16xbf16, #tpu.memory_space<vmem>>, vector<144x16xbf16>
    %cst_36 = arith.constant dense<0.000000e+00> : vector<256x16xf32>
    %19 = tpu.matmul %17, %18, %cst_36 {dimension_numbers = #tpu.dot_dimension_numbers<[1], [0], [0], [1], [0, 0, 1, 1], [], []>} : vector<256x144xbf16>, vector<144x16xbf16>, vector<256x16xf32> -> vector<256x16xf32>
    %c0_37 = arith.constant 0 : index
    %c0_38 = arith.constant 0 : index
    %20 = vector.load %arg3[%c0_37, %c0_38] : memref<1x16xf32, #tpu.memory_space<vmem>>, vector<1x16xf32>
    %21 = vector.broadcast %20 : vector<1x16xf32> to vector<256x16xf32>
    %22 = arith.addf %19, %21 : vector<256x16xf32>
    %cst_39 = arith.constant 0.000000e+00 : f32
    %23 = vector.broadcast %cst_39 : f32 to vector<256x16xf32>
    %24 = arith.cmpf oge, %22, %23 : vector<256x16xf32>
    %cst_40 = arith.constant 0.00999999977 : f32
    %25 = vector.broadcast %cst_40 : f32 to vector<256x16xf32>
    %26 = arith.mulf %25, %22 : vector<256x16xf32>
    %27 = arith.select %24, %22, %26 : vector<256x16xi1>, vector<256x16xf32>
    %28 = arith.truncf %27 : vector<256x16xf32> to vector<256x16xbf16>
    %c0_41 = arith.constant 0 : index
    %c0_42 = arith.constant 0 : index
    %29 = vector.load %arg4[%c0_41, %c0_42] : memref<16x128xbf16, #tpu.memory_space<vmem>>, vector<16x128xbf16>
    %cst_43 = arith.constant dense<0.000000e+00> : vector<256x128xf32>
    %30 = tpu.matmul %28, %29, %cst_43 {dimension_numbers = #tpu.dot_dimension_numbers<[1], [0], [0], [1], [0, 0, 1, 1], [], []>} : vector<256x16xbf16>, vector<16x128xbf16>, vector<256x128xf32> -> vector<256x128xf32>
    %c0_44 = arith.constant 0 : index
    %c0_45 = arith.constant 0 : index
    %31 = vector.load %arg5[%c0_44, %c0_45] : memref<1x128xf32, #tpu.memory_space<vmem>>, vector<1x128xf32>
    %32 = vector.broadcast %31 : vector<1x128xf32> to vector<256x128xf32>
    %33 = arith.addf %30, %32 : vector<256x128xf32>
    %34 = vector.shape_cast %33 : vector<256x128xf32> to vector<16x16x128xf32>
    %c0_46 = arith.constant 0 : index
    %c0_47 = arith.constant 0 : index
    %c0_48 = arith.constant 0 : index
    %c0_49 = arith.constant 0 : index
    %35 = vector.load %arg6[%c0_46, %c0_47, %c0_48, %c0_49] : memref<1x16x16x128xf32, #tpu.memory_space<vmem>>, vector<1x16x16x128xf32>
    %36 = vector.shape_cast %35 : vector<1x16x16x128xf32> to vector<16x16x128xf32>
    %37 = vector.shape_cast %34 : vector<16x16x128xf32> to vector<1x16x16x128xf32>
    tpu.vector_store %arg6[%c0_46, %c0_47, %c0_48, %c0_49], %37 {strides = array<i32>} : memref<1x16x16x128xf32, #tpu.memory_space<vmem>>, vector<1x16x16x128xf32>,
    return
  }
  func.func @transform_0(%arg0: i32) -> (i32, i32, i32, i32) {
    %c0_i32 = arith.constant 0 : i32
    %c0_i32_0 = arith.constant 0 : i32
    %c0_i32_1 = arith.constant 0 : i32
    %c0_i32_2 = arith.constant 0 : i32
    return %arg0, %c0_i32, %c0_i32_0, %c0_i32_1 : i32, i32, i32, i32
  }
  func.func @transform_1(%arg0: i32) -> (i32, i32) {
    %c0_i32 = arith.constant 0 : i32
    %c0_i32_0 = arith.constant 0 : i32
    %c0_i32_1 = arith.constant 0 : i32
    return %c0_i32, %c0_i32_0 : i32, i32
  }
  func.func @transform_2(%arg0: i32) -> (i32, i32) {
    %c0_i32 = arith.constant 0 : i32
    %c0_i32_0 = arith.constant 0 : i32
    %c0_i32_1 = arith.constant 0 : i32
    return %c0_i32, %c0_i32_0 : i32, i32
  }
  func.func @transform_3(%arg0: i32) -> (i32, i32) {
    %c0_i32 = arith.constant 0 : i32
    %c0_i32_0 = arith.constant 0 : i32
    %c0_i32_1 = arith.constant 0 : i32
    return %c0_i32, %c0_i32_0 : i32, i32
  }
  func.func @transform_4(%arg0: i32) -> (i32, i32) {
    %c0_i32 = arith.constant 0 : i32
    %c0_i32_0 = arith.constant 0 : i32
    %c0_i32_1 = arith.constant 0 : i32
    return %c0_i32, %c0_i32_0 : i32, i32
  }
  func.func @transform_5(%arg0: i32) -> (i32, i32, i32, i32) {
    %c0_i32 = arith.constant 0 : i32
    %c0_i32_0 = arith.constant 0 : i32
    %c0_i32_1 = arith.constant 0 : i32
    %c0_i32_2 = arith.constant 0 : i32
    return %arg0, %c0_i32, %c0_i32_0, %c0_i32_1 : i32, i32, i32, i32
  }
}

</mosaic_0001>

<bundles_post_ra>
// kernel: refinement_network_forward.3
= control target key start
LH: loop header
LB: loop body
LE: loop exit
PB: predicated region body
PF: predicated region fallthrough
CT: control target
= control target key end

     0   :  { %s2196_s21 = smov 0   ;;  %s2796_s0 = inlined_call_operand.vmem [shape: bf16[2,8,8,4], index: 0, kind: input, shape index: {}]   ;;  %s2797_s1 = inlined_call_operand.vmem [shape: bf16[2,8,8,1], index: 1, kind: input, shape index: {}]   ;;  %s2798_s2 = inlined_call_operand.vmem [shape: bf16[45,8], index: 2, kind: input, shape index: {}]   ;;  %s2799_s3 = inlined_call_operand.vmem [shape: f32[1,8], index: 3, kind: input, shape index: {}]   ;;  %s2800_s4 = inlined_call_operand.vmem [shape: bf16[72,8], index: 4, kind: input, shape index: {}]   ;;  %s2801_s5 = inlined_call_operand.vmem [shape: f32[1,8], index: 5, kind: input, shape index: {}]   ;;  %s2802_s6 = inlined_call_operand.vmem [shape: bf16[2,8,8,8], index: 6, kind: output, shape index: {}]  }
   0x1 LB: > { %s1697_s22 = sadd.s32 4294967295, %s2141_s21   ;;  %p1701_p0 = scmp.ge.s32.totalorder %s2141_s21, 1  ;;  %s2141_s21 = sphi %s2196_s21, %s16_s21  }
   0x2   : > { %p222_p1 = scmp.lt.s32.totalorder %s2141_s21, 3 }
   0x4   : > { %p223_p2 = pnand %p1701_p0, %p222_p1 }
   0x5   : > { %p257_p3 = scmp.lt.s32.totalorder (!%p223_p2), %s1697_s22, 1  ;;  %s2144_s27 = smov (!%p223_p2), 4  }
   0x6   : > { %226 = sbr.rel (%p223_p2) target bundleno = 963 (0x3c3), region = 44  ;;  %s2145_s7 = smov (!%p223_p2), 15  }
   0x7   : > { %s2146_s8 = smov (!%p223_p2), 10   ;;  %s2147_s9 = smov (!%p223_p2), 5  }
   0x8   : > { %s2148_s10 = smov (!%p223_p2), 30   ;;  %s2149_s11 = smov (!%p223_p2), 25  }
   0x9   : > { %s2150_s12 = smov (!%p223_p2), 20   ;;  %s2151_s13 = smov (!%p223_p2), 40  }
   0xa   : > { %s2152_s14 = smov (!%p223_p2), 35   ;;  %s2155_s28 = smov (!%p223_p2), 16  }
   0xb   : > { %vm273_vm0 = vcmask 39936   ;;  %vm275_vm1 = vcmask 33792   ;;  %v2143_v0 = vmov 0.0   ;;  %s2804_s22 = smov (!%p257_p3, %s1697_s22), 1  ;;  %vm351_vm2 = vcmask 31744   ;;  %s2156_s29 = smov 32  }
   0xc   : > { %279 = vst.msk [vmem:[#allocation2 + $0x20] sm:$0xff] %vm273_vm0, %v2143_v0  ;;  %s2210_s23 = sshll.u32 %s2804_s22, 5  ;;  %vm845_vm3 = vcmask 1045504   ;;  %vm846_vm4 = vcmask 1046528   ;;  %vm738_vm5 = vcmask 80896   ;;  %vm747_vm6 = vcmask 121856  }
   0xd   : > { %280 = vst.msk [vmem:[#allocation2 + $0x28] sm:$0x3] %vm275_vm1, %v2143_v0  ;;  %s266_s26 = scalar_lea.vmem %s2797_s1, %s2210_s23  ;;  %s2254_s30 = scalar_lea.vmem %s2796_s0, %s2210_s23  ;;  %vm756_vm7 = vcmask 162816   ;;  %vm765_vm8 = vcmask 203776   ;;  %vm774_vm9 = vcmask 244736   ;;  %vm783_vm10 = vcmask 285696  }
   0xe   : > { %274 = vst.msk [vmem:[#allocation2] sm:$0xff] %vm273_vm0, %v2143_v0  ;;  %v1757_v1 = vld [vmem:[%s266_s26] sm:$0xff]   ;;  %v1772_v2 = vld [vmem:[%s266_s26 + $0x8] sm:$0xff]   ;;  %v1773_v5 = vld [vmem:[%s266_s26 + $0x10] sm:$0xff]   ;;  %vm792_vm11 = vcmask 326656   ;;  %vm832_vm12 = vcmask 367616  }
   0xf   : > { %276 = vst.msk [vmem:[#allocation2 + $0x8] sm:$0x3] %vm275_vm1, %v2143_v0  ;;  %v1759_v3 = vunpack.c.h.b16 %v1757_v1  ;;  %v1763_v4 = vunpack.c.h.b16 %v1772_v2  ;;  %v1767_v6 = vunpack.c.h.b16 %v1773_v5  ;;  %v1762_v10 = vunpack.c.l.b16 %v1772_v2  ;;  %v1774_v12 = vld [vmem:[%s266_s26 + $0x18] sm:$0xff]   ;;  %v300_v22 = vld [vmem:[%s2254_s30 + $0x14] sm:$0xf]  ;;  %s271_s26 = scalar_lea.vmem %s2802_s6, %s2210_s23 }
  0x10   : > { %277 = vst.msk [vmem:[#allocation2 + $0x10] sm:$0xff] %vm273_vm0, %v2143_v0  ;;  %v1766_v11 = vunpack.c.l.b16 %v1773_v5  ;;  %v1770_v13 = vunpack.c.l.b16 %v1774_v12  ;;  %v1758_v17 = vunpack.c.l.b16 %v1757_v1  ;;  %v1771_v18 = vunpack.c.h.b16 %v1774_v12  ;;  %v296_v25 = vld [vmem:[%s2254_s30 + $0x4] sm:$0xf]  ;;  %v298_v26 = vld [vmem:[%s2254_s30 + $0xc] sm:$0xf] }
  0x11   : > { %278 = vst.msk [vmem:[#allocation2 + $0x18] sm:$0x3] %vm275_vm1, %v2143_v0  ;;  %v328_v7 = vpack.c.b16 %v1759_v3, %v1759_v3  ;;  %v330_v8 = vpack.c.b16 %v1763_v4, %v1763_v4  ;;  %v332_v9 = vpack.c.b16 %v1767_v6, %v1767_v6  ;;  %v329_v14 = vpack.c.b16 %v1762_v10, %v1762_v10  ;;  %v301_v28 = vld [vmem:[%s2254_s30 + $0x18] sm:$0xf]  ;;  %v297_v37 = vld [vmem:[%s2254_s30 + $0x8] sm:$0xf] }
  0x12   : > { %281 = vst.msk [vmem:[#allocation2 + $0x30] sm:$0xff] %vm273_vm0, %v2143_v0  ;;  %v331_v15 = vpack.c.b16 %v1766_v11, %v1766_v11  ;;  %v333_v16 = vpack.c.b16 %v1770_v13, %v1770_v13  ;;  %v327_v19 = vpack.c.b16 %v1758_v17, %v1758_v17  ;;  %v334_v20 = vpack.c.b16 %v1771_v18, %v1771_v18  ;;  %v299_v38 = vld [vmem:[%s2254_s30 + $0x10] sm:$0xf]  ;;  %v295_v45 = vld [vmem:[%s2254_s30] sm:$0xf] }
  0x13   : > { %282 = vst.msk [vmem:[#allocation2 + $0x38] sm:$0x3] %vm275_vm1, %v2143_v0  ;;  %337 = vrot.lane.b32.xlu0 %v328_v7, %s2144_s27  ;;  %341 = vrot.lane.b32.xlu1 %v330_v8, %s2144_s27  ;;  %v302_v46 = vld [vmem:[%s2254_s30 + $0x1c] sm:$0xf]  ;;  %vm881_vm13 = vcmask 64512   ;;  %vm989_vm14 = vcmask 58368  }
  0x14   : > { %283 = vst.msk [vmem:[#allocation2 + $0x40] sm:$0xff] %vm273_vm0, %v2143_v0  ;;  %345 = vrot.lane.b32.xlu2 %v332_v9, %s2144_s27  ;;  %s2157_s30 = smov 24  }
  0x15   : > { %284 = vst.msk [vmem:[#allocation2 + $0x48] sm:$0x3] %vm275_vm1, %v2143_v0 }
  0x16   : > { %285 = vst.msk [vmem:[#allocation2 + $0x50] sm:$0xff] %vm273_vm0, %v2143_v0 }
  0x17   : > { %286 = vst.msk [vmem:[#allocation2 + $0x58] sm:$0x3] %vm275_vm1, %v2143_v0 }
  0x18   : > { %287 = vst.msk [vmem:[#allocation2 + $0x60] sm:$0xff] %vm273_vm0, %v2143_v0 }
  0x19   : > { %288 = vst.msk [vmem:[#allocation2 + $0x68] sm:$0x3] %vm275_vm1, %v2143_v0 }
  0x1a   : > { %289 = vst.msk [vmem:[#allocation2 + $0x70] sm:$0xff] %vm273_vm0, %v2143_v0 }
  0x1b   : > { %290 = vst.msk [vmem:[#allocation2 + $0x78] sm:$0x3] %vm275_vm1, %v2143_v0  ;;  %339 = vrot.lane.b32.xlu0 %v329_v14, %s2144_s27  ;;  %343 = vrot.lane.b32.xlu1 %v331_v15, %s2144_s27 }
  0x1c   : > { %291 = vst.msk [vmem:[#allocation2 + $0x80] sm:$0xff] %vm273_vm0, %v2143_v0  ;;  %347 = vrot.lane.b32.xlu2 %v333_v16, %s2144_s27 }
  0x1d   : > { %292 = vst.msk [vmem:[#allocation2 + $0x88] sm:$0x3] %vm275_vm1, %v2143_v0 }
  0x1e   : > { %293 = vst.msk [vmem:[#allocation2 + $0x90] sm:$0xff] %vm273_vm0, %v2143_v0 }
  0x1f   : > { %294 = vst.msk [vmem:[#allocation2 + $0x98] sm:$0x3] %vm275_vm1, %v2143_v0 }
  0x20   : > { %988 = vst.msk [vmem:[#allocation3] sm:$0xff] %vm881_vm13, %v2143_v0 }
  0x21   : > { %991 = vst.msk [vmem:[#allocation3 + $0x10] sm:$0xff] %vm881_vm13, %v2143_v0 }
  0x22   : > { %993 = vst.msk [vmem:[#allocation3 + $0x20] sm:$0xff] %vm881_vm13, %v2143_v0 }
  0x23   : > { %335 = vrot.lane.b32.xlu0 %v327_v19, %s2144_s27  ;;  %349 = vrot.lane.b32.xlu1 %v334_v20, %s2144_s27  ;;  %v417_v19 = vld [vmem:[#allocation2 + $0x2] sm:$0xff]  ;;  %995 = vst.msk [vmem:[#allocation3 + $0x30] sm:$0xff] %vm881_vm13, %v2143_v0  ;;  %s2154_s27 = smov 8  }
  0x24   : > { %v409_v20 = vld [vmem:[#allocation2 + $0x1] sm:$0xff]  ;;  %997 = vst.msk [vmem:[#allocation3 + $0x40] sm:$0xff] %vm881_vm13, %v2143_v0 }
  0x25   : > { %999 = vst.msk [vmem:[#allocation3 + $0x50] sm:$0xff] %vm881_vm13, %v2143_v0 }
  0x26   : > { %1001 = vst.msk [vmem:[#allocation3 + $0x60] sm:$0xff] %vm881_vm13, %v2143_v0 }
  0x27   : > { %1003 = vst.msk [vmem:[#allocation3 + $0x70] sm:$0xff] %vm881_vm13, %v2143_v0 }
  0x28   : > { %1005 = vst.msk [vmem:[#allocation3 + $0x80] sm:$0xff] %vm881_vm13, %v2143_v0 }
  0x29   : > { %1007 = vst.msk [vmem:[#allocation3 + $0x90] sm:$0xff] %vm881_vm13, %v2143_v0 }
  0x2a   : > { %1006 = vst.msk [vmem:[#allocation3 + $0x88] sm:$0x3] %vm989_vm14, %v2143_v0 }
  0x2b   : > { %990 = vst.msk [vmem:[#allocation3 + $0x8] sm:$0x3] %vm989_vm14, %v2143_v0 }
  0x2c   : > { %992 = vst.msk [vmem:[#allocation3 + $0x18] sm:$0x3] %vm989_vm14, %v2143_v0 }
  0x2d   : > { %994 = vst.msk [vmem:[#allocation3 + $0x28] sm:$0x3] %vm989_vm14, %v2143_v0 }
  0x2e   : > { %996 = vst.msk [vmem:[#allocation3 + $0x38] sm:$0x3] %vm989_vm14, %v2143_v0 }
  0x2f   : > { %998 = vst.msk [vmem:[#allocation3 + $0x48] sm:$0x3] %vm989_vm14, %v2143_v0 }
  0x30   : > { %1000 = vst.msk [vmem:[#allocation3 + $0x58] sm:$0x3] %vm989_vm14, %v2143_v0 }
  0x31   : > { %1002 = vst.msk [vmem:[#allocation3 + $0x68] sm:$0x3] %vm989_vm14, %v2143_v0 }
  0x32   : > { %1004 = vst.msk [vmem:[#allocation3 + $0x78] sm:$0x3] %vm989_vm14, %v2143_v0 }
  0x33   : > { %1008 = vst.msk [vmem:[#allocation3 + $0x98] sm:$0x3] %vm989_vm14, %v2143_v0  ;;  %vm1364_vm14 = vcmask 195584  }
  0x6e   : > { %v346_v21 = vpop.permute.xlu2 %345 }
  0x6f   : > { %v374_v23 = vsel %vm351_vm2, %v300_v22, %v346_v21 }
  0x70   : > { %v389_v24 = vunpack.c.l.bf16 %v374_v23 }
  0x72   : > { %398 = vst.msk [vmem:[#allocation2 + $0x61] sm:$0xff] %vm273_vm0, %v389_v24 }
  0x76   : > { %v348_v27 = vpop.permute.xlu2 %347 }
  0x77   : > { %v378_v31 = vsel %vm351_vm2, %v301_v28, %v348_v27 }
  0x78   : > { %v390_v34 = vunpack.c.l.bf16 %v378_v31 }
  0x79   : > { %v438_v9 = vld [vmem:[#allocation2 + $0x61] sm:$0xff] }
  0x7a   : > { %399 = vst.msk [vmem:[#allocation2 + $0x71] sm:$0xff] %vm273_vm0, %v390_v34  ;;  %v2311_v10 = vld [vmem:[#allocation2 + $0x60] sm:$0xff] }
  0x7b   : > { %v446_v15 = vld [vmem:[#allocation2 + $0x62] sm:$0xff] }
  0x81   : > { %v463_v13 = vld [vmem:[#allocation2 + $0x71] sm:$0xff] }
  0x82   : > { %v2318_v14 = vld [vmem:[#allocation2 + $0x70] sm:$0xff]  ;;  %v1879_v16 = vpack.i.bf16 %v463_v13, %v438_v9 }
  0x83   : > { %v1874_v17 = vpack.i.bf16 %v2318_v14, %v2311_v10  ;;  %v471_v23 = vld [vmem:[#allocation2 + $0x72] sm:$0xff] }
  0x85   : > { %v338_v29 = vpop.permute.xlu0 %337  ;;  %v342_v30 = vpop.permute.xlu1 %341 }
  0x86   : > { %v358_v32 = vsel %vm351_vm2, %v296_v25, %v338_v29  ;;  %v366_v33 = vsel %vm351_vm2, %v298_v26, %v342_v30  ;;  %v1884_v26 = vpack.i.bf16 %v471_v23, %v446_v15 }
  0x87   : > { %v385_v35 = vunpack.c.l.bf16 %v358_v32  ;;  %v387_v36 = vunpack.c.l.bf16 %v366_v33 }
  0x89   : > { %394 = vst.msk [vmem:[#allocation2 + $0x21] sm:$0xff] %vm273_vm0, %v385_v35  ;;  %v457_v35 = vld [vmem:[#allocation2 + $0x90] sm:$0xff] }
  0x8a   : > { %396 = vst.msk [vmem:[#allocation2 + $0x41] sm:$0xff] %vm273_vm0, %v387_v36 }
  0x8d   : > { %v340_v39 = vpop.permute.xlu0 %339  ;;  %v344_v40 = vpop.permute.xlu1 %343 }
  0x8e   : > { %v362_v41 = vsel %vm351_vm2, %v297_v37, %v340_v39  ;;  %v370_v42 = vsel %vm351_vm2, %v299_v38, %v344_v40 }
  0x8f   : > { %v386_v43 = vunpack.c.l.bf16 %v362_v41  ;;  %v388_v44 = vunpack.c.l.bf16 %v370_v42  ;;  %v473_v41 = vld [vmem:[#allocation2 + $0x92] sm:$0xff] }
  0x90   : > { %v2280_v53 = vld [vmem:[#allocation2 + $0x22] sm:$0xff]  ;;  %v465_v42 = vld [vmem:[#allocation2 + $0x91] sm:$0xff] }
  0x91   : > { %395 = vst.msk [vmem:[#allocation2 + $0x31] sm:$0xff] %vm273_vm0, %v386_v43  ;;  %v2277_v50 = vld [vmem:[#allocation2 + $0x40] sm:$0xff] }
  0x92   : > { %397 = vst.msk [vmem:[#allocation2 + $0x51] sm:$0xff] %vm273_vm0, %v388_v44  ;;  %v2282_v54 = vld [vmem:[#allocation2 + $0x21] sm:$0xff] }
  0x93   : > { %v444_v63 = vld [vmem:[#allocation2 + $0x42] sm:$0xff] }
  0x94   : > { %v436_v1 = vld [vmem:[#allocation2 + $0x41] sm:$0xff] }
  0x95   : > { %v336_v47 = vpop.permute.xlu0 %335  ;;  %v350_v48 = vpop.permute.xlu1 %349  ;;  %v426_v28 = vld [vmem:[#allocation2 + $0x20] sm:$0xff] }
  0x96   : > { %v354_v49 = vsel %vm351_vm2, %v295_v45, %v336_v47  ;;  %v382_v51 = vsel %vm351_vm2, %v302_v46, %v350_v48  ;;  %v1718_v46 = vld [vmem:[%s2798_s2 + $0x10] sm:$0xf]  ;;  %v1751_v47 = vld [vmem:[%s2798_s2 + $0x10] sm:$0x70] }
  0x97   : > { %v384_v52 = vunpack.c.l.bf16 %v354_v49  ;;  %v391_v55 = vunpack.c.l.bf16 %v382_v51  ;;  %v1719_v48 = vor.u32 %v1751_v47, %v1718_v46  ;;  %v2153_v49 = vmov 65535  }
  0x98   : > { %v2284_v56 = vld [vmem:[#allocation2 + $0x30] sm:$0xff]  ;;  %v847_v51 = vsel %vm845_vm3, 4294967295, %v2153_v49 }
  0x99   : > { %v420_v57 = vld [vmem:[#allocation2 + $0x32] sm:$0xff]  ;;  %393 = vst.msk [vmem:[#allocation2 + $0x11] sm:$0xff] %vm273_vm0, %v384_v52  ;;  %v1819_v59 = vpack.i.bf16 %v2277_v50, %v2284_v56  ;;  %v1914_v32 = vpack.i.bf16 %v2284_v56, %v426_v28  ;;  %v848_v52 = vsel %vm846_vm4, %v847_v51, 0 }
  0x9a   : > { %v412_v58 = vld [vmem:[#allocation2 + $0x31] sm:$0xff]  ;;  %v2290_v60 = vpack.i.bf16 %v420_v57, %v2280_v53  ;;  %400 = vst.msk [vmem:[#allocation2 + $0x81] sm:$0xff] %vm273_vm0, %v391_v55  ;;  %v1829_v3 = vpack.i.bf16 %v444_v63, %v420_v57  ;;  %v1749_v57 = vld [vmem:[%s2798_s2] sm:$0xff] }
  0x9b   : > { %v2293_v61 = vpack.i.bf16 %v412_v58, %v2282_v54  ;;  %1820 = vrot.lane.b32.xlu1 %v1819_v59, %s2145_s7  ;;  %v2301_v62 = vld [vmem:[#allocation2 + $0x50] sm:$0xff]  ;;  %v1824_v4 = vpack.i.bf16 %v436_v1, %v412_v58 }
  0x9c   : > { %1815 = vrot.lane.b32.xlu0 %v2290_v60, %s2146_s8  ;;  %v1834_v2 = vpack.i.bf16 %v2301_v62, %v2277_v50  ;;  %v414_v5 = vld [vmem:[#allocation2 + $0x51] sm:$0xff]  ;;  %v1859_v12 = vpack.i.bf16 %v2311_v10, %v2301_v62 }
  0x9d   : > { %1810 = vrot.lane.b32.xlu2 %v2293_v61, %s2147_s9  ;;  %v469_v6 = vld [vmem:[#allocation2 + $0x52] sm:$0xff]  ;;  %v1849_v7 = vpack.i.bf16 %v414_v5, %v436_v1  ;;  %v1864_v11 = vpack.i.bf16 %v438_v9, %v414_v5 }
  0x9e   : > { %v1844_v8 = vpack.i.bf16 %v469_v6, %v444_v63  ;;  %v1869_v18 = vpack.i.bf16 %v446_v15, %v469_v6 }
  0xa0   : > { %v418_v21 = vld [vmem:[#allocation2 + $0x12] sm:$0xff] }
  0xa1   : > { %v410_v22 = vld [vmem:[#allocation2 + $0x11] sm:$0xff]  ;;  %v1894_v24 = vpack.i.bf16 %v418_v21, %v417_v19  ;;  %v1909_v29 = vpack.i.bf16 %v2280_v53, %v418_v21  ;;  %v432_v33 = vld [vmem:[#allocation2 + $0x80] sm:$0xff]  ;;  %v850_v53 = vand.u32 %v1719_v48, %v848_v52 }
  0xa2   : > { %v1889_v25 = vpack.i.bf16 %v410_v22, %v409_v20  ;;  %v2328_v27 = vld [vmem:[#allocation2 + $0x10] sm:$0xff]  ;;  %v1904_v30 = vpack.i.bf16 %v2282_v54, %v410_v22  ;;  %v1939_v34 = vpack.i.bf16 %v432_v33, %v2318_v14  ;;  %v448_v36 = vld [vmem:[#allocation2 + $0x82] sm:$0xff]  ;;  %v1954_v38 = vpack.i.bf16 %v457_v35, %v432_v33 }
  0xa3   : > { %1835 = vrot.lane.b32.xlu1 %v1834_v2, %s2148_s10  ;;  %v1899_v31 = vpack.i.bf16 %v426_v28, %v2328_v27  ;;  %v440_v37 = vld [vmem:[#allocation2 + $0x81] sm:$0xff]  ;;  %v1949_v39 = vpack.i.bf16 %v448_v36, %v471_v23  ;;  %v1964_v43 = vpack.i.bf16 %v473_v41, %v448_v36  ;;  %1775 = vmatpush.bf16.msra.mxu3 %v850_v53 }
  0xa4   : > { %1830 = vrot.lane.b32.xlu0 %v1829_v3, %s2149_s11  ;;  %v1944_v40 = vpack.i.bf16 %v440_v37, %v463_v13  ;;  %v1959_v44 = vpack.i.bf16 %v465_v42, %v440_v37  ;;  %v1750_v54 = vld [vmem:[%s2798_s2 + $0x8] sm:$0xff]  ;;  %857 = vmatpush.bf16.msra.mxu0 %v850_v53 }
  0xa5   : > { %1825 = vrot.lane.b32.xlu2 %v1824_v4, %s2150_s12 }
  0xa7   : > { %1776 = vmatpush.bf16.msra.mxu3 %v1750_v54 }
  0xa8   : > { %858 = vmatpush.bf16.msra.mxu0 %v1750_v54 }
  0xab   : > { %1850 = vrot.lane.b32.xlu1 %v1849_v7, %s2147_s9  ;;  %1777 = vmatpush.bf16.msra.mxu3 %v1749_v57 }
  0xac   : > { %1845 = vrot.lane.b32.xlu0 %v1844_v8, %s2151_s13  ;;  %859 = vmatpush.bf16.msra.mxu0 %v1749_v57 }
  0xad   : > { %1840 = vrot.lane.b32.xlu2 %v1849_v7, %s2152_s14 }
  0xb3   : > { %1865 = vrot.lane.b32.xlu1 %v1864_v11, %s2150_s12 }
  0xb4   : > { %1860 = vrot.lane.b32.xlu0 %v1859_v12, %s2145_s7 }
  0xb5   : > { %1855 = vrot.lane.b32.xlu2 %v1844_v8, %s2146_s8 }
  0xbb   : > { %1880 = vrot.lane.b32.xlu1 %v1879_v16, %s2152_s14 }
  0xbc   : > { %1875 = vrot.lane.b32.xlu0 %v1874_v17, %s2148_s10 }
  0xbd   : > { %1870 = vrot.lane.b32.xlu2 %v1869_v18, %s2149_s11 }
  0xc3   : > { %1895 = vrot.lane.b32.xlu1 %v1894_v24, %s2146_s8 }
  0xc4   : > { %1890 = vrot.lane.b32.xlu0 %v1889_v25, %s2147_s9 }
  0xc5   : > { %1885 = vrot.lane.b32.xlu2 %v1884_v26, %s2151_s13 }
  0xcb   : > { %1910 = vrot.lane.b32.xlu1 %v1909_v29, %s2149_s11 }
  0xcc   : > { %1905 = vrot.lane.b32.xlu0 %v1904_v30, %s2150_s12 }
  0xcd   : > { %1900 = vrot.lane.b32.xlu2 %v1899_v31, %s2145_s7 }
  0xd3   : > { %1925 = vrot.lane.b32.xlu1 %v2293_v61, %s2152_s14 }
  0xd4   : > { %1920 = vrot.lane.b32.xlu0 %v1879_v16, %s2147_s9  ;;  %s2160_s9 = smov 64  }
  0xd5   : > { %1915 = vrot.lane.b32.xlu2 %v1914_v32, %s2148_s10 }
  0xdb   : > { %1940 = vrot.lane.b32.xlu1 %v1939_v34, %s2145_s7  ;;  %s2158_s7 = smov 56  }
  0xdc   : > { %1935 = vrot.lane.b32.xlu0 %v2290_v60, %s2151_s13 }
  0xdd   : > { %1930 = vrot.lane.b32.xlu2 %v1884_v26, %s2146_s8  ;;  %s2159_s8 = smov 48  }
  0xe3   : > { %1955 = vrot.lane.b32.xlu1 %v1954_v38, %s2148_s10 }
  0xe4   : > { %1950 = vrot.lane.b32.xlu0 %v1949_v39, %s2149_s11 }
  0xe5   : > { %1945 = vrot.lane.b32.xlu2 %v1944_v40, %s2150_s12 }
  0xec   : > { %1965 = vrot.lane.b32.xlu0 %v1964_v43, %s2151_s13 }
  0xed   : > { %1960 = vrot.lane.b32.xlu2 %v1959_v44, %s2152_s14 }
  0xf7   : > { %v1811_v45 = vpop.permute.xlu2 %1810 }
  0xf8   : > { %v1813_v59 = vunpack.i.h.bf16 %v1811_v45  ;;  %v1812_v60 = vunpack.i.l.bf16 %v1811_v45 }
  0xfa   : > { %v733_v4 = vsel %vm273_vm0, %v2284_v56, %v1813_v59  ;;  %v732_v5 = vsel %vm273_vm0, %v426_v28, %v1812_v60 }
  0xff   : > { %v1826_v55 = vpop.permute.xlu2 %1825 }
 0x100   : > { %v1828_v16 = vunpack.i.h.bf16 %v1826_v55  ;;  %v1827_v17 = vunpack.i.l.bf16 %v1826_v55 }
 0x107   : > { %v1841_v58 = vpop.permute.xlu2 %1840 }
 0x108   : > { %v1843_v29 = vunpack.i.h.bf16 %v1841_v58  ;;  %v1842_v30 = vunpack.i.l.bf16 %v1841_v58 }
 0x10d   : > { %v1821_v61 = vpop.permute.xlu1 %1820 }
 0x10e   : > { %v1816_v63 = vpop.permute.xlu0 %1815  ;;  %v1823_v6 = vunpack.i.h.bf16 %v1821_v61  ;;  %v1822_v7 = vunpack.i.l.bf16 %v1821_v61 }
 0x10f   : > { %v1818_v1 = vunpack.i.h.bf16 %v1816_v63  ;;  %v1817_v2 = vunpack.i.l.bf16 %v1816_v63  ;;  %v1856_v3 = vpop.permute.xlu2 %1855 }
 0x110   : > { %v1858_v47 = vunpack.i.h.bf16 %v1856_v3  ;;  %v1857_v48 = vunpack.i.l.bf16 %v1856_v3 }
 0x111   : > { %v741_v8 = vsel %vm738_vm5, %v732_v5, %v1817_v2  ;;  %v742_v9 = vsel %vm738_vm5, %v733_v4, %v1818_v1 }
 0x112   : > { %v750_v11 = vsel %vm747_vm6, %v741_v8, %v1822_v7  ;;  %v751_v12 = vsel %vm747_vm6, %v742_v9, %v1823_v6 }
 0x113   : > { %v759_v21 = vsel %vm756_vm7, %v750_v11, %v1827_v17  ;;  %v760_v22 = vsel %vm756_vm7, %v751_v12, %v1828_v16 }
 0x115   : > { %v1836_v13 = vpop.permute.xlu1 %1835 }
 0x116   : > { %v1831_v15 = vpop.permute.xlu0 %1830  ;;  %v1838_v19 = vunpack.i.h.bf16 %v1836_v13  ;;  %v1837_v20 = vunpack.i.l.bf16 %v1836_v13 }
 0x117   : > { %v1833_v56 = vunpack.i.h.bf16 %v1831_v15  ;;  %v1832_v18 = vunpack.i.l.bf16 %v1831_v15  ;;  %v1871_v23 = vpop.permute.xlu2 %1870 }
 0x118   : > { %v1873_v60 = vunpack.i.h.bf16 %v1871_v23  ;;  %v1872_v61 = vunpack.i.l.bf16 %v1871_v23  ;;  %v401_v23 = vld [vmem:[#allocation2] sm:$0xff] }
 0x119   : > { %v768_v24 = vsel %vm765_vm8, %v759_v21, %v1832_v18  ;;  %v769_v25 = vsel %vm765_vm8, %v760_v22, %v1833_v56 }
 0x11a   : > { %v777_v26 = vsel %vm774_vm9, %v768_v24, %v1837_v20  ;;  %v778_v28 = vsel %vm774_vm9, %v769_v25, %v1838_v19 }
 0x11b   : > { %v786_v35 = vsel %vm783_vm10, %v777_v26, %v1842_v30  ;;  %v787_v36 = vsel %vm783_vm10, %v778_v28, %v1843_v29 }
 0x11d   : > { %v1851_v31 = vpop.permute.xlu1 %1850 }
 0x11e   : > { %v1846_v32 = vpop.permute.xlu0 %1845  ;;  %v1853_v39 = vunpack.i.h.bf16 %v1851_v31  ;;  %v1852_v40 = vunpack.i.l.bf16 %v1851_v31 }
 0x11f   : > { %v1848_v33 = vunpack.i.h.bf16 %v1846_v32  ;;  %v1847_v34 = vunpack.i.l.bf16 %v1846_v32  ;;  %v1886_v42 = vpop.permute.xlu2 %1885 }
 0x120   : > { %v735_v43 = vsel %vm273_vm0, %v2301_v62, %v1853_v39  ;;  %v734_v44 = vsel %vm273_vm0, %v2277_v50, %v1852_v40  ;;  %v1888_v8 = vunpack.i.h.bf16 %v1886_v42  ;;  %v1887_v9 = vunpack.i.l.bf16 %v1886_v42 }
 0x121   : > { %v795_v37 = vsel %vm792_vm11, %v786_v35, %v1847_v34  ;;  %v796_v38 = vsel %vm792_vm11, %v787_v36, %v1848_v33  ;;  %v743_v54 = vsel %vm738_vm5, %v734_v44, %v1857_v48  ;;  %v744_v55 = vsel %vm738_vm5, %v735_v43, %v1858_v47 }
 0x122   : > { %v802_v41 = vpack.c.bf16 %v796_v38, %v795_v37 }
 0x124   : > { %1721 = vmatmul.msk.bf16.vlgmr.msra.gmra.mxu3 %vm832_vm12, %v802_v41 }
 0x125   : > { %v1866_v45 = vpop.permute.xlu1 %1865 }
 0x126   : > { %v1861_v46 = vpop.permute.xlu0 %1860  ;;  %v1868_v52 = vunpack.i.h.bf16 %v1866_v45  ;;  %v1867_v53 = vunpack.i.l.bf16 %v1866_v45 }
 0x127   : > { %v1863_v49 = vunpack.i.h.bf16 %v1861_v46  ;;  %v1862_v51 = vunpack.i.l.bf16 %v1861_v46  ;;  %v1901_v59 = vpop.permute.xlu2 %1900 }
 0x128   : > { %v1903_v36 = vunpack.i.h.bf16 %v1901_v59  ;;  %v1902_v37 = vunpack.i.l.bf16 %v1901_v59 }
 0x129   : > { %v752_v57 = vsel %vm747_vm6, %v743_v54, %v1862_v51  ;;  %v753_v58 = vsel %vm747_vm6, %v744_v55, %v1863_v49 }
 0x12a   : > { %v761_v62 = vsel %vm756_vm7, %v752_v57, %v1867_v53  ;;  %v762_v50 = vsel %vm756_vm7, %v753_v58, %v1868_v52 }
 0x12b   : > { %v770_v6 = vsel %vm765_vm8, %v761_v62, %v1872_v61  ;;  %v771_v7 = vsel %vm765_vm8, %v762_v50, %v1873_v60 }
 0x12d   : > { %v1881_v63 = vpop.permute.xlu1 %1880 }
 0x12e   : > { %v1876_v1 = vpop.permute.xlu0 %1875  ;;  %v1883_v2 = vunpack.i.h.bf16 %v1881_v63  ;;  %v1882_v3 = vunpack.i.l.bf16 %v1881_v63 }
 0x12f   : > { %v1878_v4 = vunpack.i.h.bf16 %v1876_v1  ;;  %v1877_v5 = vunpack.i.l.bf16 %v1876_v1  ;;  %v1916_v20 = vpop.permute.xlu2 %1915 }
 0x130   : > { %v1918_v51 = vunpack.i.h.bf16 %v1916_v20  ;;  %v1917_v52 = vunpack.i.l.bf16 %v1916_v20 }
 0x131   : > { %v779_v11 = vsel %vm774_vm9, %v770_v6, %v1877_v5  ;;  %v780_v12 = vsel %vm774_vm9, %v771_v7, %v1878_v4 }
 0x132   : > { %v788_v13 = vsel %vm783_vm10, %v779_v11, %v1882_v3  ;;  %v789_v15 = vsel %vm783_vm10, %v780_v12, %v1883_v2 }
 0x133   : > { %v797_v16 = vsel %vm792_vm11, %v788_v13, %v1887_v9  ;;  %v798_v17 = vsel %vm792_vm11, %v789_v15, %v1888_v8 }
 0x134   : > { %v803_v56 = vpack.c.bf16 %v798_v17, %v797_v16 }
 0x135   : > { %v1896_v18 = vpop.permute.xlu1 %1895 }
 0x136   : > { %1722 = vmatmul.msk.bf16.gmra.mxu3 %vm832_vm12, %v803_v56  ;;  %v1891_v19 = vpop.permute.xlu0 %1890  ;;  %v1898_v26 = vunpack.i.h.bf16 %v1896_v18  ;;  %v1897_v28 = vunpack.i.l.bf16 %v1896_v18 }
 0x137   : > { %v1893_v21 = vunpack.i.h.bf16 %v1891_v19  ;;  %v1892_v22 = vunpack.i.l.bf16 %v1891_v19  ;;  %v1931_v29 = vpop.permute.xlu2 %1930 }
 0x138   : > { %v1933_v55 = vunpack.i.h.bf16 %v1931_v29  ;;  %v1932_v57 = vunpack.i.l.bf16 %v1931_v29 }
 0x139   : > { %v730_v30 = vsel %vm273_vm0, %v401_v23, %v1892_v22  ;;  %v731_v31 = vsel %vm273_vm0, %v2328_v27, %v1893_v21 }
 0x13a   : > { %v739_v32 = vsel %vm738_vm5, %v730_v30, %v1897_v28  ;;  %v740_v33 = vsel %vm738_vm5, %v731_v31, %v1898_v26 }
 0x13b   : > { %v748_v42 = vsel %vm747_vm6, %v739_v32, %v1902_v37  ;;  %v749_v43 = vsel %vm747_vm6, %v740_v33, %v1903_v36 }
 0x13d   : > { %v1911_v24 = vpop.permute.xlu1 %1910 }
 0x13e   : > { %v1906_v25 = vpop.permute.xlu0 %1905  ;;  %v1913_v40 = vunpack.i.h.bf16 %v1911_v24  ;;  %v1912_v41 = vunpack.i.l.bf16 %v1911_v24 }
 0x13f   : > { %v1908_v34 = vunpack.i.h.bf16 %v1906_v25  ;;  %v1907_v35 = vunpack.i.l.bf16 %v1906_v25  ;;  %v1946_v47 = vpop.permute.xlu2 %1945 }
 0x140   : > { %v1948_v50 = vunpack.i.h.bf16 %v1946_v47  ;;  %v1947_v59 = vunpack.i.l.bf16 %v1946_v47 }
 0x141   : > { %v757_v44 = vsel %vm756_vm7, %v748_v42, %v1907_v35  ;;  %v758_v27 = vsel %vm756_vm7, %v749_v43, %v1908_v34  ;;  %v2129_v42 = vld [vmem:[%s2799_s3] ss:$0 sm:$0xff] }
 0x142   : > { %v766_v48 = vsel %vm765_vm8, %v757_v44, %v1912_v41  ;;  %v767_v49 = vsel %vm765_vm8, %v758_v27, %v1913_v40 }
 0x143   : > { %v775_v60 = vsel %vm774_vm9, %v766_v48, %v1917_v52  ;;  %v776_v61 = vsel %vm774_vm9, %v767_v49, %v1918_v51 }
 0x145   : > { %v1926_v38 = vpop.permute.xlu1 %1925 }
 0x146   : > { %v1921_v39 = vpop.permute.xlu0 %1920  ;;  %v1928_v53 = vunpack.i.h.bf16 %v1926_v38  ;;  %v1927_v54 = vunpack.i.l.bf16 %v1926_v38 }
 0x147   : > { %v1923_v45 = vunpack.i.h.bf16 %v1921_v39  ;;  %v1922_v46 = vunpack.i.l.bf16 %v1921_v39  ;;  %v1961_v17 = vpop.permute.xlu2 %1960 }
 0x148   : > { %v784_v6 = vsel %vm783_vm10, %v775_v60, %v1927_v54  ;;  %v785_v7 = vsel %vm783_vm10, %v776_v61, %v1928_v53  ;;  %v1963_v23 = vunpack.i.h.bf16 %v1961_v17  ;;  %v1962_v24 = vunpack.i.l.bf16 %v1961_v17 }
 0x149   : > { %v737_v58 = vsel %vm273_vm0, %v2318_v14, %v1923_v45  ;;  %v736_v62 = vsel %vm273_vm0, %v2311_v10, %v1922_v46 }
 0x14a   : > { %v745_v14 = vsel %vm738_vm5, %v736_v62, %v1932_v57  ;;  %v746_v10 = vsel %vm738_vm5, %v737_v58, %v1933_v55 }
 0x14d   : > { %v1941_v63 = vpop.permute.xlu1 %1940 }
 0x14e   : > { %v1936_v1 = vpop.permute.xlu0 %1935  ;;  %v1943_v2 = vunpack.i.h.bf16 %v1941_v63  ;;  %v1942_v3 = vunpack.i.l.bf16 %v1941_v63 }
 0x14f   : > { %v1938_v4 = vunpack.i.h.bf16 %v1936_v1  ;;  %v1937_v5 = vunpack.i.l.bf16 %v1936_v1 }
 0x150   : > { %v754_v8 = vsel %vm747_vm6, %v745_v14, %v1942_v3  ;;  %v755_v9 = vsel %vm747_vm6, %v746_v10, %v1943_v2 }
 0x151   : > { %v793_v11 = vsel %vm792_vm11, %v784_v6, %v1937_v5  ;;  %v794_v12 = vsel %vm792_vm11, %v785_v7, %v1938_v4  ;;  %v763_v15 = vsel %vm756_vm7, %v754_v8, %v1947_v59  ;;  %v764_v16 = vsel %vm756_vm7, %v755_v9, %v1948_v50 }
 0x152   : > { %v801_v13 = vpack.c.bf16 %v794_v12, %v793_v11 }
 0x154   : > { %1720 = vmatmul.msk.bf16.vlgmr.msra.gmra.mxu0 %vm832_vm12, %v801_v13 }
 0x155   : > { %v1956_v56 = vpop.permute.xlu1 %1955 }
 0x156   : > { %v1951_v18 = vpop.permute.xlu0 %1950  ;;  %v1958_v19 = vunpack.i.h.bf16 %v1956_v56  ;;  %v1957_v20 = vunpack.i.l.bf16 %v1956_v56 }
 0x157   : > { %v1953_v21 = vunpack.i.h.bf16 %v1951_v18  ;;  %v1952_v22 = vunpack.i.l.bf16 %v1951_v18 }
 0x159   : > { %v772_v25 = vsel %vm765_vm8, %v763_v15, %v1952_v22  ;;  %v773_v26 = vsel %vm765_vm8, %v764_v16, %v1953_v21 }
 0x15a   : > { %v781_v28 = vsel %vm774_vm9, %v772_v25, %v1957_v20  ;;  %v782_v29 = vsel %vm774_vm9, %v773_v26, %v1958_v19 }
 0x15b   : > { %v790_v30 = vsel %vm783_vm10, %v781_v28, %v1962_v24  ;;  %v791_v31 = vsel %vm783_vm10, %v782_v29, %v1963_v23  ;;  %vm1474_vm10 = vcmask 1043456  }
 0x15e   : > { %v1966_v32 = vpop.permute.xlu0 %1965 }
 0x15f   : > { %v1968_v33 = vunpack.i.h.bf16 %v1966_v32  ;;  %v1967_v34 = vunpack.i.l.bf16 %v1966_v32 }
 0x161   : > { %v799_v35 = vsel %vm792_vm11, %v790_v30, %v1967_v34  ;;  %v800_v36 = vsel %vm792_vm11, %v791_v31, %v1968_v33 }
 0x162   : > { %v804_v37 = vpack.c.bf16 %v800_v36, %v799_v35 }
 0x164   : > { %1723 = vmatmul.msk.bf16.gmra.mxu3 %vm832_vm12, %v804_v37  ;;  %vm1355_vm12 = vcmask 130048  }
 0x1a7   : > { %v866_v38 = vpop.f32.mrf.mxu3 }
 0x1a8   : > { %v2464_v45 = vadd.f32 %v2129_v42, %v866_v38 }
 0x1aa   : > { %v906_v54 = vmul.f32 %v2464_v45, %v2464_v45  ;;  %v885_v62 = vsel %vm881_vm13, %v2464_v45, 0.0 }
 0x1ac   : > { %v915_v59 = vsel %vm881_vm13, %v906_v54, 0.0 }
 0x1af   : > { %v868_v39 = vpop.f32.mrf.mxu3 }
 0x1b0   : > { %v2477_v55 = vadd.f32 %v2129_v42, %v868_v39 }
 0x1b2   : > { %v907_v60 = vmul.f32 %v2477_v55, %v2477_v55  ;;  %v887_v1 = vsel %vm881_vm13, %v2477_v55, 0.0 }
 0x1b4   : > { %v917_v4 = vsel %vm881_vm13, %v907_v60, 0.0 }
 0x1b9   : > { %v871_v41 = vpop.f32.mrf.mxu3 }
 0x1ba   : > { %v2485_v61 = vadd.f32 %v2129_v42, %v871_v41 }
 0x1bc   : > { %v908_v5 = vmul.f32 %v2485_v61, %v2485_v61  ;;  %v889_v10 = vsel %vm881_vm13, %v2485_v61, 0.0 }
 0x1be   : > { %v919_v9 = vsel %vm881_vm13, %v908_v5, 0.0 }
 0x1c1   : > { %v873_v52 = vpop.f32.mrf.mxu3 }
 0x1c2   : > { %v2492_v6 = vadd.f32 %v2129_v42, %v873_v52 }
 0x1c4   : > { %v909_v11 = vmul.f32 %v2492_v6, %v2492_v6  ;;  %v891_v15 = vsel %vm881_vm13, %v2492_v6, 0.0 }
 0x1c6   : > { %v921_v18 = vsel %vm881_vm13, %v909_v11, 0.0 }
 0x1d1   : > { %v861_v40 = vpop.f32.mrf.mxu0 }
 0x1d2   : > { %v2460_v43 = vadd.f32 %v2129_v42, %v861_v40 }
 0x1d4   : > { %v904_v46 = vmul.f32 %v2460_v43, %v2460_v43  ;;  %v882_v49 = vsel %vm881_vm13, %v2460_v43, 0.0 }
 0x1d6   : > { %v912_v57 = vsel %vm881_vm13, %v904_v46, 0.0 }
 0x1d9   : > { %v863_v44 = vpop.f32.mrf.mxu0 }
 0x1da   : > { %v2462_v27 = vadd.f32 %v2129_v42, %v863_v44 }
 0x1dc   : > { %v883_v47 = vsel %vm881_vm13, %v2462_v27, 0.0  ;;  %v905_v48 = vmul.f32 %v2462_v27, %v2462_v27 }
 0x1dd   : > { %v884_v53 = vadd.f32 %v883_v47, %v882_v49 }
 0x1de   : > { %v913_v51 = vsel %vm881_vm13, %v905_v48, 0.0 }
 0x1df   : > { %v914_v58 = vadd.f32 %v913_v51, %v912_v57  ;;  %v886_v50 = vadd.f32 %v885_v62, %v884_v53 }
 0x1e1   : > { %v916_v63 = vadd.f32 %v915_v59, %v914_v58  ;;  %v888_v2 = vadd.f32 %v887_v1, %v886_v50 }
 0x1e3   : > { %v918_v14 = vadd.f32 %v917_v4, %v916_v63  ;;  %v890_v8 = vadd.f32 %v889_v10, %v888_v2 }
 0x1e5   : > { %v920_v13 = vadd.f32 %v919_v9, %v918_v14  ;;  %v892_v17 = vadd.f32 %v891_v15, %v890_v8 }
 0x1e7   : > { %v876_v3 = vpop.f32.mrf.mxu3  ;;  %v922_v22 = vadd.f32 %v921_v18, %v920_v13 }
 0x1e8   : > { %v2494_v7 = vadd.f32 %v2129_v42, %v876_v3 }
 0x1ea   : > { %v910_v12 = vmul.f32 %v2494_v7, %v2494_v7  ;;  %v893_v16 = vsel %vm881_vm13, %v2494_v7, 0.0 }
 0x1eb   : > { %v894_v21 = vadd.f32 %v893_v16, %v892_v17 }
 0x1ec   : > { %v923_v19 = vsel %vm881_vm13, %v910_v12, 0.0 }
 0x1ed   : > { %v924_v25 = vadd.f32 %v923_v19, %v922_v22 }
 0x1ef   : > { %v878_v56 = vpop.f32.mrf.mxu3 }
 0x1f0   : > { %v2509_v20 = vadd.f32 %v2129_v42, %v878_v56 }
 0x1f2   : > { %v895_v23 = vsel %vm881_vm13, %v2509_v20, 0.0  ;;  %v911_v24 = vmul.f32 %v2509_v20, %v2509_v20 }
 0x1f3   : > { %v896_v26 = vadd.f32 %v895_v23, %v894_v21  ;;  %v1034_v23 = vld [vmem:[#allocation3 + $0x2] sm:$0xff] }
 0x1f4   : > { %v925_v28 = vsel %vm881_vm13, %v911_v24, 0.0  ;;  %v1026_v24 = vld [vmem:[#allocation3 + $0x1] sm:$0xff] }
 0x1f5   : > { %v897_v29 = vrot.slane %v896_v26, 4  ;;  %v926_v30 = vadd.f32 %v925_v28, %v924_v25 }
 0x1f7   : > { %v898_v31 = vadd.f32 %v897_v29, %v896_v26  ;;  %v927_v32 = vrot.slane %v926_v30, 4 }
 0x1f9   : > { %v899_v33 = vrot.slane %v898_v31, 2  ;;  %v928_v34 = vadd.f32 %v927_v32, %v926_v30 }
 0x1fb   : > { %v900_v35 = vadd.f32 %v899_v33, %v898_v31  ;;  %v929_v36 = vrot.slane %v928_v34, 2 }
 0x1fd   : > { %v901_v37 = vrot.slane %v900_v35, 1  ;;  %v930_v38 = vadd.f32 %v929_v36, %v928_v34 }
 0x1ff   : > { %v902_v39 = vadd.f32 %v901_v37, %v900_v35  ;;  %v931_v40 = vrot.slane %v930_v38, 1 }
 0x201   : > { %v903_v41 = vmul.f32 0.015625, %v902_v39  ;;  %v932_v42 = vadd.f32 %v931_v40, %v930_v38 }
 0x203   : > { %v933_v44 = vmul.f32 0.015625, %v932_v42  ;;  %v934_v46 = vmul.f32 %v903_v41, %v903_v41  ;;  %v937_v58 = vsub.f32 %v2460_v43, %v903_v41  ;;  %v938_v50 = vsub.f32 %v2462_v27, %v903_v41 }
 0x204   : > { %v939_v59 = vsub.f32 %v2464_v45, %v903_v41  ;;  %v940_v60 = vsub.f32 %v2477_v55, %v903_v41  ;;  %v941_v63 = vsub.f32 %v2485_v61, %v903_v41  ;;  %v942_v0 = vsub.f32 %v2492_v6, %v903_v41 }
 0x205   : > { %v935_v47 = vsub.f32 %v933_v44, %v934_v46  ;;  %v943_v1 = vsub.f32 %v2494_v7, %v903_v41  ;;  %v944_v2 = vsub.f32 %v2509_v20, %v903_v41 }
 0x207   : > { %v936_v48 = vmax.f32 %v935_v47, 0.0 }
 0x209   : > { %v945_v49 = vadd.f32 1e-05, %v936_v48 }
 0x20b   : > { %2131 = vrsqrt.f32 %v945_v49  ;;  %vm952_vm0 = vweird.f32 %v945_v49 }
 0x211   : > { %v2132_v51 = vpop.eup %2131 }
 0x212   : > { %v947_v52 = vmul.f32 %v2132_v51, %v945_v49  ;;  %vm953_vm15 = vweird.f32 %v2132_v51 }
 0x213   : > { %vm954_vm1 = vmor %vm952_vm0, %vm953_vm15  ;;  %vm1373_vm15 = vcmask 261120   ;;  %vm1390_vm0 = vcmask 392192  }
 0x214   : > { %v948_v53 = vmul.f32 %v2132_v51, %v947_v52 }
 0x216   : > { %v949_v54 = vmul.f32 0.5, %v948_v53 }
 0x218   : > { %v950_v57 = vsub.f32 1.5, %v949_v54 }
 0x21a   : > { %v951_v62 = vmul.f32 %v2132_v51, %v950_v57 }
 0x21c   : > { %v955_v3 = vsel %vm954_vm1, %v2132_v51, %v951_v62  ;;  %vm1399_vm1 = vcmask 457728  }
 0x21d   : > { %v956_v4 = vmul.f32 %v955_v3, %v937_v58  ;;  %v957_v43 = vmul.f32 %v955_v3, %v938_v50  ;;  %v958_v5 = vmul.f32 %v955_v3, %v939_v59  ;;  %v959_v14 = vmul.f32 %v955_v3, %v940_v60 }
 0x21e   : > { %v960_v10 = vmul.f32 %v955_v3, %v941_v63  ;;  %v961_v27 = vmul.f32 %v955_v3, %v942_v0  ;;  %v963_v8 = vmul.f32 %v955_v3, %v944_v2  ;;  %v962_v45 = vmul.f32 %v955_v3, %v943_v1 }
 0x21f   : > { %v972_v9 = vmul.f32 0.01, %v956_v4  ;;  %v973_v55 = vmul.f32 0.01, %v957_v43  ;;  %v975_v61 = vmul.f32 0.01, %v959_v14 }
 0x220   : > { %vm971_vm2 = vcmp.ge.f32.partialorder %v963_v8, 0.0  ;;  %v976_v11 = vmul.f32 0.01, %v960_v10  ;;  %vm967_vm3 = vcmp.ge.f32.partialorder %v959_v14, 0.0  ;;  %v974_v6 = vmul.f32 0.01, %v958_v5 }
 0x221   : > { %v977_v12 = vmul.f32 0.01, %v961_v27  ;;  %v979_v7 = vmul.f32 0.01, %v963_v8  ;;  %vm968_vm4 = vcmp.ge.f32.partialorder %v960_v10, 0.0  ;;  %v983_v13 = vsel %vm967_vm3, %v959_v14, %v975_v61 }
 0x222   : > { %vm964_vm5 = vcmp.ge.f32.partialorder %v956_v4, 0.0  ;;  %vm965_vm6 = vcmp.ge.f32.partialorder %v957_v43, 0.0  ;;  %v978_v15 = vmul.f32 0.01, %v962_v45  ;;  %v984_v17 = vsel %vm968_vm4, %v960_v10, %v976_v11  ;;  %1013 = vst.msk [vmem:[#allocation3 + $0x41] sm:$0xff] %vm881_vm13, %v983_v13  ;;  %v1090_v11 = vld [vmem:[#allocation3 + $0x92] sm:$0xff] }
 0x223   : > { %v987_v16 = vsel %vm971_vm2, %v963_v8, %v979_v7  ;;  %v980_v56 = vsel %vm964_vm5, %v956_v4, %v972_v9  ;;  %v981_v18 = vsel %vm965_vm6, %v957_v43, %v973_v55  ;;  %vm969_vm7 = vcmp.ge.f32.partialorder %v961_v27, 0.0  ;;  %1014 = vst.msk [vmem:[#allocation3 + $0x51] sm:$0xff] %vm881_vm13, %v984_v17  ;;  %v1074_v55 = vld [vmem:[#allocation3 + $0x90] sm:$0xff] }
 0x224   : > { %1017 = vst.msk [vmem:[#allocation3 + $0x81] sm:$0xff] %vm881_vm13, %v987_v16  ;;  %vm966_vm8 = vcmp.ge.f32.partialorder %v958_v5, 0.0  ;;  %vm970_vm9 = vcmp.ge.f32.partialorder %v962_v45, 0.0  ;;  %v985_v19 = vsel %vm969_vm7, %v961_v27, %v977_v12  ;;  %vm1408_vm2 = vcmask 523264  }
 0x225   : > { %1010 = vst.msk [vmem:[#allocation3 + $0x11] sm:$0xff] %vm881_vm13, %v980_v56  ;;  %v982_v20 = vsel %vm966_vm8, %v958_v5, %v974_v6  ;;  %v986_v21 = vsel %vm970_vm9, %v962_v45, %v978_v15  ;;  %v1082_v6 = vld [vmem:[#allocation3 + $0x91] sm:$0xff]  ;;  %v1429_v15 = vld [vmem:[%s2800_s4 + $0x20] sm:$0xf]  ;;  %vm1461_vm3 = vcmask 588800   ;;  %vm1621_vm5 = vcmask 60416  }
 0x226   : > { %1011 = vst.msk [vmem:[#allocation3 + $0x21] sm:$0xff] %vm881_vm13, %v981_v18  ;;  %v1451_v16 = vunpack.c.l.b16 %v1429_v15  ;;  %v1755_v18 = vld [vmem:[%s2800_s4 + $0x18] sm:$0xff] }
 0x227   : > { %1015 = vst.msk [vmem:[#allocation3 + $0x61] sm:$0xff] %vm881_vm13, %v985_v19 }
 0x228   : > { %1012 = vst.msk [vmem:[#allocation3 + $0x31] sm:$0xff] %vm881_vm13, %v982_v20  ;;  %v1456_v17 = vpack.c.b16 %v1451_v16, %v1451_v16  ;;  %v1754_v20 = vld [vmem:[%s2800_s4 + $0x10] sm:$0xff] }
 0x229   : > { %v2541_v22 = vld [vmem:[#allocation3 + $0x41] sm:$0xff]  ;;  %1016 = vst.msk [vmem:[#allocation3 + $0x71] sm:$0xff] %vm881_vm13, %v986_v21 }
 0x22a   : > { %v1031_v25 = vld [vmem:[#allocation3 + $0x51] sm:$0xff]  ;;  %v1038_v33 = vld [vmem:[#allocation3 + $0x42] sm:$0xff]  ;;  %v1476_v56 = vsel %vm1474_vm10, %v1456_v17, 0 }
 0x22b   : > { %v2545_v26 = vpack.i.bf16 %v1031_v25, %v2541_v22  ;;  %v1039_v34 = vld [vmem:[#allocation3 + $0x52] sm:$0xff]  ;;  %v2589_v2 = vld [vmem:[#allocation3 + $0x40] sm:$0xff]  ;;  %1481 = vmatpush.bf16.msra.mxu1 %v1476_v56  ;;  %1778 = vmatpush.bf16.msra.mxu2 %v1476_v56  ;;  %v1753_v21 = vld [vmem:[%s2800_s4 + $0x8] sm:$0xff] }
 0x22c   : > { %v1035_v28 = vld [vmem:[#allocation3 + $0x12] sm:$0xff]  ;;  %v2555_v38 = vpack.i.bf16 %v1039_v34, %v1038_v33  ;;  %v1049_v4 = vld [vmem:[#allocation3 + $0x80] sm:$0xff] }
 0x22d   : > { %v1027_v29 = vld [vmem:[#allocation3 + $0x11] sm:$0xff]  ;;  %v1974_v30 = vpack.i.bf16 %v1035_v28, %v1034_v23  ;;  %1980 = vrot.lane.b32.xlu0 %v2545_v26, %s2154_s27  ;;  %v1051_v32 = vld [vmem:[#allocation3 + $0x21] sm:$0xff]  ;;  %v2109_v61 = vpack.i.bf16 %v1074_v55, %v1049_v4 }
 0x22e   : > { %v1969_v31 = vpack.i.bf16 %v1027_v29, %v1026_v24  ;;  %v2551_v35 = vld [vmem:[#allocation3 + $0x10] sm:$0xff]  ;;  %v2553_v36 = vld [vmem:[#allocation3 + $0x20] sm:$0xff]  ;;  %v1994_v37 = vpack.i.bf16 %v1051_v32, %v1027_v29 }
 0x22f   : > { %1975 = vrot.lane.b32.xlu2 %v1974_v30, %s2155_s28  ;;  %v1984_v39 = vpack.i.bf16 %v2553_v36, %v2551_v35  ;;  %v1055_v40 = vld [vmem:[#allocation3 + $0x61] sm:$0xff]  ;;  %v2563_v42 = vld [vmem:[#allocation3 + $0x50] sm:$0xff]  ;;  %1482 = vmatpush.bf16.msra.mxu1 %v1755_v18 }
 0x230   : > { %1970 = vrot.lane.b32.xlu1 %v1969_v31, %s2154_s27  ;;  %v1059_v41 = vld [vmem:[#allocation3 + $0x22] sm:$0xff]  ;;  %v2009_v46 = vpack.i.bf16 %v1055_v40, %v1031_v25  ;;  %v1076_v49 = vld [vmem:[#allocation3 + $0x31] sm:$0xff]  ;;  %v2094_v45 = vpack.i.bf16 %v2563_v42, %v2589_v2  ;;  %1779 = vmatpush.bf16.msra.mxu2 %v1755_v18 }
 0x231   : > { %v2565_v44 = vld [vmem:[#allocation3 + $0x60] sm:$0xff]  ;;  %v2004_v47 = vpack.i.bf16 %v1059_v41, %v1035_v28  ;;  %v2572_v52 = vld [vmem:[#allocation3 + $0x30] sm:$0xff]  ;;  %v2024_v53 = vpack.i.bf16 %v1076_v49, %v1051_v32  ;;  %v2074_v14 = vpack.i.bf16 %v2541_v22, %v1076_v49 }
 0x232   : > { %v1999_v48 = vpack.i.bf16 %v2565_v44, %v2563_v42  ;;  %v1063_v51 = vld [vmem:[#allocation3 + $0x62] sm:$0xff]  ;;  %v2014_v57 = vpack.i.bf16 %v2572_v52, %v2553_v36  ;;  %v1080_v58 = vld [vmem:[#allocation3 + $0x71] sm:$0xff]  ;;  %v2064_v3 = vpack.i.bf16 %v2589_v2, %v2572_v52 }
 0x233   : > { %v2019_v54 = vpack.i.bf16 %v1063_v51, %v1039_v34  ;;  %v1084_v62 = vld [vmem:[#allocation3 + $0x32] sm:$0xff]  ;;  %v2039_v59 = vpack.i.bf16 %v1080_v58, %v1055_v40  ;;  %v1065_v10 = vld [vmem:[#allocation3 + $0x82] sm:$0xff]  ;;  %1483 = vmatpush.bf16.msra.mxu1 %v1754_v20 }
 0x234   : > { %v2579_v50 = vld [vmem:[#allocation3 + $0x70] sm:$0xff]  ;;  %v2034_v60 = vpack.i.bf16 %v1084_v62, %v1059_v41  ;;  %v2084_v43 = vpack.i.bf16 %v1038_v33, %v1084_v62  ;;  %v1057_v27 = vld [vmem:[#allocation3 + $0x81] sm:$0xff]  ;;  %v2124_v12 = vpack.i.bf16 %v1090_v11, %v1065_v10  ;;  %1780 = vmatpush.bf16.msra.mxu2 %v1754_v20 }
 0x235   : > { %1995 = vrot.lane.b32.xlu0 %v1994_v37, %s2156_s29  ;;  %v2029_v63 = vpack.i.bf16 %v2579_v50, %v2565_v44  ;;  %v1088_v0 = vld [vmem:[#allocation3 + $0x72] sm:$0xff]  ;;  %v2079_v5 = vpack.i.bf16 %v1049_v4, %v2579_v50  ;;  %v2089_v9 = vpack.i.bf16 %v1057_v27, %v1080_v58  ;;  %v2119_v7 = vpack.i.bf16 %v1082_v6, %v1057_v27  ;;  %v1752_v22 = vld [vmem:[%s2800_s4] sm:$0xff] }
 0x236   : > { %v2044_v1 = vpack.i.bf16 %v1088_v0, %v1063_v51  ;;  %v2099_v8 = vpack.i.bf16 %v1065_v10, %v1088_v0  ;;  %v1018_v32 = vld [vmem:[#allocation3] sm:$0xff] }
 0x237   : > { %1990 = vrot.lane.b32.xlu2 %v2555_v38, %s2155_s28  ;;  %1484 = vmatpush.bf16.msra.mxu1 %v1753_v21 }
 0x238   : > { %1985 = vrot.lane.b32.xlu1 %v1984_v39, %s2157_s30  ;;  %1781 = vmatpush.bf16.msra.mxu2 %v1753_v21 }
 0x23b   : > { %1485 = vmatpush.bf16.msra.mxu1 %v1752_v22 }
 0x23c   : > { %1782 = vmatpush.bf16.msra.mxu2 %v1752_v22 }
 0x23d   : > { %2010 = vrot.lane.b32.xlu0 %v2009_v46, %s2156_s29 }
 0x23f   : > { %2005 = vrot.lane.b32.xlu2 %v2004_v47, %s2151_s13 }
 0x240   : > { %2000 = vrot.lane.b32.xlu1 %v1999_v48, %s2157_s30 }
 0x245   : > { %2025 = vrot.lane.b32.xlu0 %v2024_v53, %s2158_s7 }
 0x247   : > { %2020 = vrot.lane.b32.xlu2 %v2019_v54, %s2151_s13 }
 0x248   : > { %2015 = vrot.lane.b32.xlu1 %v2014_v57, %s2159_s8 }
 0x24d   : > { %2040 = vrot.lane.b32.xlu0 %v2039_v59, %s2158_s7 }
 0x24f   : > { %2035 = vrot.lane.b32.xlu2 %v2034_v60, %s2160_s9 }
 0x250   : > { %2030 = vrot.lane.b32.xlu1 %v2029_v63, %s2159_s8 }
 0x255   : > { %2055 = vrot.lane.b32.xlu0 %v2034_v60, %s2155_s28 }
 0x257   : > { %2050 = vrot.lane.b32.xlu2 %v2024_v53, %s2154_s27 }
 0x258   : > { %2045 = vrot.lane.b32.xlu1 %v2044_v1, %s2160_s9 }
 0x25d   : > { %2070 = vrot.lane.b32.xlu0 %v2044_v1, %s2155_s28 }
 0x25f   : > { %2065 = vrot.lane.b32.xlu2 %v2064_v3, %s2157_s30 }
 0x260   : > { %2060 = vrot.lane.b32.xlu1 %v2039_v59, %s2154_s27 }
 0x265   : > { %2085 = vrot.lane.b32.xlu0 %v2084_v43, %s2151_s13 }
 0x267   : > { %2080 = vrot.lane.b32.xlu2 %v2079_v5, %s2157_s30 }
 0x268   : > { %2075 = vrot.lane.b32.xlu1 %v2074_v14, %s2156_s29 }
 0x26d   : > { %2100 = vrot.lane.b32.xlu0 %v2099_v8, %s2151_s13 }
 0x26f   : > { %2095 = vrot.lane.b32.xlu2 %v2094_v45, %s2159_s8 }
 0x270   : > { %2090 = vrot.lane.b32.xlu1 %v2089_v9, %s2156_s29 }
 0x275   : > { %2115 = vrot.lane.b32.xlu0 %v2555_v38, %s2160_s9 }
 0x277   : > { %2110 = vrot.lane.b32.xlu2 %v2109_v61, %s2159_s8 }
 0x278   : > { %2105 = vrot.lane.b32.xlu1 %v2545_v26, %s2158_s7 }
 0x27f   : > { %2125 = vrot.lane.b32.xlu2 %v2124_v12, %s2160_s9 }
 0x280   : > { %2120 = vrot.lane.b32.xlu1 %v2119_v7, %s2158_s7 }
 0x289   : > { %v1976_v13 = vpop.permute.xlu2 %1975 }
 0x28a   : > { %v1978_v41 = vunpack.i.h.bf16 %v1976_v13  ;;  %v1977_v46 = vunpack.i.l.bf16 %v1976_v13 }
 0x291   : > { %v2619_v19 = vpop.permute.xlu2 %1990 }
 0x292   : > { %v1993_v62 = vunpack.i.h.bf16 %v2619_v19  ;;  %v1992_v13 = vunpack.i.l.bf16 %v2619_v19 }
 0x299   : > { %v2006_v23 = vpop.permute.xlu2 %2005 }
 0x29a   : > { %v2008_v59 = vunpack.i.h.bf16 %v2006_v23  ;;  %v2007_v1 = vunpack.i.l.bf16 %v2006_v23 }
 0x29f   : > { %v1981_v24 = vpop.permute.xlu0 %1980 }
 0x2a0   : > { %v1983_v58 = vunpack.i.h.bf16 %v1981_v24 }
 0x2a1   : > { %v2630_v29 = vpop.permute.xlu2 %2020 }
 0x2a2   : > { %v1971_v25 = vpop.permute.xlu1 %1970  ;;  %v1352_v5 = vsel %vm881_vm13, %v2563_v42, %v1983_v58 }
 0x2a3   : > { %v1973_v30 = vunpack.i.h.bf16 %v1971_v25  ;;  %v1972_v31 = vunpack.i.l.bf16 %v1971_v25  ;;  %v1361_v21 = vsel %vm1355_vm12, %v1352_v5, %v1993_v62 }
 0x2a5   : > { %v1347_v34 = vsel %vm881_vm13, %v1018_v32, %v1972_v31  ;;  %v1348_v37 = vsel %vm881_vm13, %v2551_v35, %v1973_v30  ;;  %v1982_v35 = vunpack.i.l.bf16 %v1981_v24  ;;  %v2023_v31 = vunpack.i.h.bf16 %v2630_v29 }
 0x2a6   : > { %v1356_v51 = vsel %vm1355_vm12, %v1347_v34, %v1977_v46  ;;  %v1357_v53 = vsel %vm1355_vm12, %v1348_v37, %v1978_v41  ;;  %v2022_v32 = vunpack.i.l.bf16 %v2630_v29 }
 0x2a7   : > { %v1996_v26 = vpop.permute.xlu0 %1995  ;;  %v1351_v27 = vsel %vm881_vm13, %v2589_v2, %v1982_v35 }
 0x2a8   : > { %v1998_v47 = vunpack.i.h.bf16 %v1996_v26  ;;  %v1997_v48 = vunpack.i.l.bf16 %v1996_v26  ;;  %v1360_v20 = vsel %vm1355_vm12, %v1351_v27, %v1992_v13 }
 0x2a9   : > { %v2036_v49 = vpop.permute.xlu2 %2035 }
 0x2aa   : > { %v1986_v28 = vpop.permute.xlu1 %1985  ;;  %v2038_v9 = vunpack.i.h.bf16 %v2036_v49  ;;  %v2037_v55 = vunpack.i.l.bf16 %v2036_v49 }
 0x2ab   : > { %v1988_v38 = vunpack.i.h.bf16 %v1986_v28  ;;  %v1987_v39 = vunpack.i.l.bf16 %v1986_v28 }
 0x2ad   : > { %v1365_v54 = vsel %vm1364_vm14, %v1356_v51, %v1987_v39  ;;  %v1366_v57 = vsel %vm1364_vm14, %v1357_v53, %v1988_v38 }
 0x2ae   : > { %v1374_v60 = vsel %vm1373_vm15, %v1365_v54, %v1997_v48  ;;  %v1375_v63 = vsel %vm1373_vm15, %v1366_v57, %v1998_v47 }
 0x2af   : > { %v2632_v33 = vpop.permute.xlu0 %2010  ;;  %v1382_v8 = vsel %vm792_vm11, %v1374_v60, %v2007_v1  ;;  %v1383_v45 = vsel %vm792_vm11, %v1375_v63, %v2008_v59 }
 0x2b0   : > { %v2013_v56 = vunpack.i.h.bf16 %v2632_v33  ;;  %v2012_v18 = vunpack.i.l.bf16 %v2632_v33 }
 0x2b1   : > { %v2051_v2 = vpop.permute.xlu2 %2050 }
 0x2b2   : > { %v2001_v40 = vpop.permute.xlu1 %2000  ;;  %v2053_v63 = vunpack.i.h.bf16 %v2051_v2 }
 0x2b3   : > { %v2003_v6 = vunpack.i.h.bf16 %v2001_v40  ;;  %v2002_v12 = vunpack.i.l.bf16 %v2001_v40 }
 0x2b5   : > { %v1370_v23 = vsel %vm1364_vm14, %v1361_v21, %v2003_v6  ;;  %v1369_v19 = vsel %vm1364_vm14, %v1360_v20, %v2002_v12 }
 0x2b6   : > { %v1379_v25 = vsel %vm1373_vm15, %v1370_v23, %v2013_v56  ;;  %v1378_v26 = vsel %vm1373_vm15, %v1369_v19, %v2012_v18 }
 0x2b7   : > { %v2026_v0 = vpop.permute.xlu0 %2025  ;;  %v1386_v37 = vsel %vm792_vm11, %v1378_v26, %v2022_v32  ;;  %v1387_v38 = vsel %vm792_vm11, %v1379_v25, %v2023_v31 }
 0x2b8   : > { %v2028_v3 = vunpack.i.h.bf16 %v2026_v0  ;;  %v2027_v4 = vunpack.i.l.bf16 %v2026_v0  ;;  %v2052_v0 = vunpack.i.l.bf16 %v2051_v2 }
 0x2b9   : > { %v2066_v39 = vpop.permute.xlu2 %2065 }
 0x2ba   : > { %v2016_v43 = vpop.permute.xlu1 %2015  ;;  %v1349_v5 = vsel %vm881_vm13, %v2553_v36, %v2052_v0 }
 0x2bb   : > { %v2018_v14 = vunpack.i.h.bf16 %v2016_v43  ;;  %v2017_v10 = vunpack.i.l.bf16 %v2016_v43  ;;  %v1350_v43 = vsel %vm881_vm13, %v2572_v52, %v2053_v63 }
 0x2bd   : > { %v1391_v61 = vsel %vm1390_vm0, %v1382_v8, %v2017_v10  ;;  %v1392_v11 = vsel %vm1390_vm0, %v1383_v45, %v2018_v14  ;;  %v2068_v14 = vunpack.i.h.bf16 %v2066_v39  ;;  %v2067_v10 = vunpack.i.l.bf16 %v2066_v39 }
 0x2be   : > { %v1400_v42 = vsel %vm1399_vm1, %v1391_v61, %v2027_v4  ;;  %v1401_v7 = vsel %vm1399_vm1, %v1392_v11, %v2028_v3 }
 0x2bf   : > { %v1409_v15 = vsel %vm1408_vm2, %v1400_v42, %v2037_v55  ;;  %v1410_v16 = vsel %vm1408_vm2, %v1401_v7, %v2038_v9  ;;  %v2041_v22 = vpop.permute.xlu0 %2040 }
 0x2c0   : > { %v1417_v17 = vpack.c.bf16 %v1410_v16, %v1409_v15  ;;  %v2043_v33 = vunpack.i.h.bf16 %v2041_v22  ;;  %v2042_v34 = vunpack.i.l.bf16 %v2041_v22 }
 0x2c1   : > { %v2081_v62 = vpop.permute.xlu2 %2080 }
 0x2c2   : > { %v2031_v24 = vpop.permute.xlu1 %2030  ;;  %1740 = vmatmul.msk.bf16.vlgmr.msra.gmra.mxu1 %vm1461_vm3, %v1417_v17  ;;  %v2083_v18 = vunpack.i.h.bf16 %v2081_v62  ;;  %v2082_v20 = vunpack.i.l.bf16 %v2081_v62 }
 0x2c3   : > { %v2033_v28 = vunpack.i.h.bf16 %v2031_v24  ;;  %v2032_v30 = vunpack.i.l.bf16 %v2031_v24 }
 0x2c5   : > { %v1395_v40 = vsel %vm1390_vm0, %v1386_v37, %v2032_v30  ;;  %v1396_v41 = vsel %vm1390_vm0, %v1387_v38, %v2033_v28 }
 0x2c6   : > { %v1404_v51 = vsel %vm1399_vm1, %v1395_v40, %v2042_v34  ;;  %v1405_v53 = vsel %vm1399_vm1, %v1396_v41, %v2043_v33 }
 0x2c7   : > { %v2056_v46 = vpop.permute.xlu0 %2055 }
 0x2c8   : > { %v2058_v1 = vunpack.i.h.bf16 %v2056_v46  ;;  %v2057_v3 = vunpack.i.l.bf16 %v2056_v46 }
 0x2c9   : > { %v2096_v4 = vpop.permute.xlu2 %2095 }
 0x2ca   : > { %v2046_v47 = vpop.permute.xlu1 %2045  ;;  %v1358_v27 = vsel %vm1355_vm12, %v1349_v5, %v2057_v3  ;;  %v1359_v8 = vsel %vm1355_vm12, %v1350_v43, %v2058_v1  ;;  %v2098_v21 = vunpack.i.h.bf16 %v2096_v4  ;;  %v2097_v22 = vunpack.i.l.bf16 %v2096_v4 }
 0x2cb   : > { %v2048_v48 = vunpack.i.h.bf16 %v2046_v47  ;;  %v2047_v49 = vunpack.i.l.bf16 %v2046_v47  ;;  %v1367_v12 = vsel %vm1364_vm14, %v1358_v27, %v2067_v10  ;;  %v1368_v42 = vsel %vm1364_vm14, %v1359_v8, %v2068_v14 }
 0x2cd   : > { %v1413_v29 = vsel %vm1408_vm2, %v1404_v51, %v2047_v49  ;;  %v1414_v54 = vsel %vm1408_vm2, %v1405_v53, %v2048_v48 }
 0x2ce   : > { %v1419_v57 = vpack.c.bf16 %v1414_v54, %v1413_v29 }
 0x2cf   : > { %v2071_v58 = vpop.permute.xlu0 %2070 }
 0x2d0   : > { %1742 = vmatmul.msk.bf16.vlgmr.msra.gmra.mxu2 %vm1461_vm3, %v1419_v57  ;;  %v2073_v52 = vunpack.i.h.bf16 %v2071_v58  ;;  %v2072_v7 = vunpack.i.l.bf16 %v2071_v58 }
 0x2d1   : > { %v2111_v56 = vpop.permute.xlu2 %2110 }
 0x2d2   : > { %v2061_v35 = vpop.permute.xlu1 %2060  ;;  %v2112_v62 = vunpack.i.l.bf16 %v2111_v56 }
 0x2d3   : > { %v2063_v9 = vunpack.i.h.bf16 %v2061_v35  ;;  %v2062_v55 = vunpack.i.l.bf16 %v2061_v35  ;;  %v2113_v35 = vunpack.i.h.bf16 %v2111_v56 }
 0x2d5   : > { %v1354_v2 = vsel %vm881_vm13, %v2579_v50, %v2063_v9  ;;  %v1353_v15 = vsel %vm881_vm13, %v2565_v44, %v2062_v55  ;;  %v2130_v55 = vld [vmem:[%s2801_s5] ss:$0 sm:$0xff] }
 0x2d6   : > { %v1363_v23 = vsel %vm1355_vm12, %v1354_v2, %v2073_v52  ;;  %v1362_v19 = vsel %vm1355_vm12, %v1353_v15, %v2072_v7 }
 0x2d7   : > { %v2086_v59 = vpop.permute.xlu0 %2085  ;;  %v1371_v34 = vsel %vm1364_vm14, %v1362_v19, %v2082_v20  ;;  %v1372_v37 = vsel %vm1364_vm14, %v1363_v23, %v2083_v18 }
 0x2d8   : > { %v2088_v13 = vunpack.i.h.bf16 %v2086_v59  ;;  %v2087_v36 = vunpack.i.l.bf16 %v2086_v59 }
 0x2d9   : > { %v2126_v54 = vpop.permute.xlu2 %2125 }
 0x2da   : > { %v2076_v60 = vpop.permute.xlu1 %2075  ;;  %v2128_v0 = vunpack.i.h.bf16 %v2126_v54  ;;  %v2127_v1 = vunpack.i.l.bf16 %v2126_v54 }
 0x2db   : > { %v2078_v61 = vunpack.i.h.bf16 %v2076_v60  ;;  %v2077_v11 = vunpack.i.l.bf16 %v2076_v60 }
 0x2dd   : > { %v1377_v16 = vsel %vm1373_vm15, %v1368_v42, %v2078_v61  ;;  %v1376_v17 = vsel %vm1373_vm15, %v1367_v12, %v2077_v11 }
 0x2de   : > { %v1385_v24 = vsel %vm792_vm11, %v1377_v16, %v2088_v13  ;;  %v1384_v50 = vsel %vm792_vm11, %v1376_v17, %v2087_v36 }
 0x2df   : > { %v2101_v45 = vpop.permute.xlu0 %2100  ;;  %v1393_v38 = vsel %vm1390_vm0, %v1384_v50, %v2097_v22  ;;  %v1394_v39 = vsel %vm1390_vm0, %v1385_v24, %v2098_v21 }
 0x2e0   : > { %v2103_v40 = vunpack.i.h.bf16 %v2101_v45  ;;  %v2102_v41 = vunpack.i.l.bf16 %v2101_v45 }
 0x2e2   : > { %v2091_v6 = vpop.permute.xlu1 %2090 }
 0x2e3   : > { %v2093_v26 = vunpack.i.h.bf16 %v2091_v6  ;;  %v2092_v44 = vunpack.i.l.bf16 %v2091_v6 }
 0x2e5   : > { %v1380_v48 = vsel %vm1373_vm15, %v1371_v34, %v2092_v44  ;;  %v1381_v49 = vsel %vm1373_vm15, %v1372_v37, %v2093_v26 }
 0x2e6   : > { %v1388_v57 = vsel %vm792_vm11, %v1380_v48, %v2102_v41  ;;  %v1389_v58 = vsel %vm792_vm11, %v1381_v49, %v2103_v40 }
 0x2e7   : > { %v2116_v25 = vpop.permute.xlu0 %2115  ;;  %v1397_v3 = vsel %vm1390_vm0, %v1388_v57, %v2112_v62  ;;  %v1398_v4 = vsel %vm1390_vm0, %v1389_v58, %v2113_v35 }
 0x2e8   : > { %v2118_v28 = vunpack.i.h.bf16 %v2116_v25  ;;  %v2117_v30 = vunpack.i.l.bf16 %v2116_v25 }
 0x2ea   : > { %v2106_v31 = vpop.permute.xlu1 %2105 }
 0x2eb   : > { %v2108_v32 = vunpack.i.h.bf16 %v2106_v31  ;;  %v2107_v33 = vunpack.i.l.bf16 %v2106_v31 }
 0x2ed   : > { %v1402_v46 = vsel %vm1399_vm1, %v1393_v38, %v2107_v33  ;;  %v1403_v47 = vsel %vm1399_vm1, %v1394_v39, %v2108_v32 }
 0x2ee   : > { %v1411_v51 = vsel %vm1408_vm2, %v1402_v46, %v2117_v30  ;;  %v1412_v53 = vsel %vm1408_vm2, %v1403_v47, %v2118_v28 }
 0x2ef   : > { %v1418_v29 = vpack.c.bf16 %v1412_v53, %v1411_v51 }
 0x2f1   : > { %1741 = vmatmul.msk.bf16.gmra.mxu1 %vm1461_vm3, %v1418_v29 }
 0x2f2   : > { %v2121_v59 = vpop.permute.xlu1 %2120 }
 0x2f3   : > { %v2123_v60 = vunpack.i.h.bf16 %v2121_v59  ;;  %v2122_v63 = vunpack.i.l.bf16 %v2121_v59 }
 0x2f5   : > { %v1406_v43 = vsel %vm1399_vm1, %v1397_v3, %v2122_v63  ;;  %v1407_v5 = vsel %vm1399_vm1, %v1398_v4, %v2123_v60 }
 0x2f6   : > { %v1415_v14 = vsel %vm1408_vm2, %v1406_v43, %v2127_v1  ;;  %v1416_v10 = vsel %vm1408_vm2, %v1407_v5, %v2128_v0 }
 0x2f7   : > { %v1420_v27 = vpack.c.bf16 %v1416_v10, %v1415_v14 }
 0x2f9   : > { %1743 = vmatmul.msk.bf16.gmra.mxu2 %vm1461_vm3, %v1420_v27 }
 0x33f   : > { %v1487_v8 = vpop.f32.mrf.mxu1 }
 0x340   : > { %v2720_v6 = vadd.f32 %v2130_v55, %v1487_v8 }
 0x342   : > { %v1529_v52 = vmul.f32 %v2720_v6, %v2720_v6  ;;  %v1507_v2 = vsel %vm881_vm13, %v2720_v6, 0.0 }
 0x344   : > { %v1537_v18 = vsel %vm881_vm13, %v1529_v52, 0.0 }
 0x347   : > { %v1489_v45 = vpop.f32.mrf.mxu1 }
 0x348   : > { %v2718_v61 = vadd.f32 %v2130_v55, %v1489_v45 }
 0x34a   : > { %v1530_v42 = vmul.f32 %v2718_v61, %v2718_v61  ;;  %v1508_v7 = vsel %vm881_vm13, %v2718_v61, 0.0 }
 0x34b   : > { %v1509_v17 = vadd.f32 %v1508_v7, %v1507_v2 }
 0x34c   : > { %v1538_v15 = vsel %vm881_vm13, %v1530_v42, 0.0 }
 0x34d   : > { %v1539_v23 = vadd.f32 %v1538_v15, %v1537_v18 }
 0x353   : > { %v1497_v9 = vpop.f32.mrf.mxu2 }
 0x354   : > { %v2738_v20 = vadd.f32 %v2130_v55, %v1497_v9 }
 0x356   : > { %v1533_v44 = vmul.f32 %v2738_v20, %v2738_v20  ;;  %v1514_v33 = vsel %vm881_vm13, %v2738_v20, 0.0 }
 0x358   : > { %v1544_v38 = vsel %vm881_vm13, %v1533_v44, 0.0 }
 0x35b   : > { %v1499_v36 = vpop.f32.mrf.mxu2 }
 0x35c   : > { %v2749_v28 = vadd.f32 %v2130_v55, %v1499_v36 }
 0x35e   : > { %v1534_v39 = vmul.f32 %v2749_v28, %v2749_v28  ;;  %v1516_v41 = vsel %vm881_vm13, %v2749_v28, 0.0 }
 0x360   : > { %v1546_v48 = vsel %vm881_vm13, %v1534_v39, 0.0 }
 0x36e   : > { %v1492_v11 = vpop.f32.mrf.mxu1 }
 0x36f   : > { %v2722_v12 = vadd.f32 %v2130_v55, %v1492_v11 }
 0x371   : > { %v1531_v13 = vmul.f32 %v2722_v12, %v2722_v12  ;;  %v1510_v16 = vsel %vm881_vm13, %v2722_v12, 0.0 }
 0x372   : > { %v1511_v19 = vadd.f32 %v1510_v16, %v1509_v17 }
 0x373   : > { %v1540_v21 = vsel %vm881_vm13, %v1531_v13, 0.0 }
 0x374   : > { %v1541_v25 = vadd.f32 %v1540_v21, %v1539_v23 }
 0x376   : > { %v1494_v56 = vpop.f32.mrf.mxu1 }
 0x377   : > { %v2741_v22 = vadd.f32 %v2130_v55, %v1494_v56 }
 0x379   : > { %v1512_v24 = vsel %vm881_vm13, %v2741_v22, 0.0  ;;  %v1532_v50 = vmul.f32 %v2741_v22, %v2741_v22 }
 0x37a   : > { %v1513_v26 = vadd.f32 %v1512_v24, %v1511_v19 }
 0x37b   : > { %v1542_v30 = vsel %vm881_vm13, %v1532_v50, 0.0 }
 0x37c   : > { %v1543_v31 = vadd.f32 %v1542_v30, %v1541_v25  ;;  %v1502_v32 = vpop.f32.mrf.mxu2  ;;  %v1515_v37 = vadd.f32 %v1514_v33, %v1513_v26 }
 0x37d   : > { %v2754_v34 = vadd.f32 %v2130_v55, %v1502_v32 }
 0x37e   : > { %v1545_v40 = vadd.f32 %v1544_v38, %v1543_v31  ;;  %v1517_v47 = vadd.f32 %v1516_v41, %v1515_v37 }
 0x37f   : > { %v1535_v46 = vmul.f32 %v2754_v34, %v2754_v34  ;;  %v1518_v49 = vsel %vm881_vm13, %v2754_v34, 0.0 }
 0x380   : > { %v1547_v51 = vadd.f32 %v1546_v48, %v1545_v40  ;;  %v1519_v57 = vadd.f32 %v1518_v49, %v1517_v47 }
 0x381   : > { %v1548_v29 = vsel %vm881_vm13, %v1535_v46, 0.0 }
 0x382   : > { %v1549_v62 = vadd.f32 %v1548_v29, %v1547_v51 }
 0x384   : > { %v1504_v53 = vpop.f32.mrf.mxu2 }
 0x385   : > { %v1505_v54 = vadd.f32 %v2130_v55, %v1504_v53 }
 0x387   : > { %v1520_v58 = vsel %vm881_vm13, %v1505_v54, 0.0  ;;  %v1536_v35 = vmul.f32 %v1505_v54, %v1505_v54 }
 0x388   : > { %v1521_v59 = vadd.f32 %v1520_v58, %v1519_v57 }
 0x389   : > { %v1550_v60 = vsel %vm881_vm13, %v1536_v35, 0.0 }
 0x38a   : > { %v1522_v63 = vrot.slane %v1521_v59, 4  ;;  %v1551_v0 = vadd.f32 %v1550_v60, %v1549_v62 }
 0x38c   : > { %v1523_v1 = vadd.f32 %v1522_v63, %v1521_v59  ;;  %v1552_v3 = vrot.slane %v1551_v0, 4 }
 0x38e   : > { %v1524_v4 = vrot.slane %v1523_v1, 2  ;;  %v1553_v43 = vadd.f32 %v1552_v3, %v1551_v0 }
 0x390   : > { %v1525_v5 = vadd.f32 %v1524_v4, %v1523_v1  ;;  %v1554_v14 = vrot.slane %v1553_v43, 2 }
 0x392   : > { %v1526_v10 = vrot.slane %v1525_v5, 1  ;;  %v1555_v27 = vadd.f32 %v1554_v14, %v1553_v43 }
 0x394   : > { %v1527_v8 = vadd.f32 %v1526_v10, %v1525_v5  ;;  %v1556_v45 = vrot.slane %v1555_v27, 1 }
 0x396   : > { %v1528_v9 = vmul.f32 0.015625, %v1527_v8  ;;  %v1557_v55 = vadd.f32 %v1556_v45, %v1555_v27 }
 0x398   : > { %v1558_v11 = vmul.f32 0.015625, %v1557_v55  ;;  %v1559_v42 = vmul.f32 %v1528_v9, %v1528_v9  ;;  %v1562_v56 = vsub.f32 %v2720_v6, %v1528_v9  ;;  %v1563_v21 = vsub.f32 %v2718_v61, %v1528_v9 }
 0x399   : > { %v1564_v23 = vsub.f32 %v2722_v12, %v1528_v9  ;;  %v1565_v19 = vsub.f32 %v2741_v22, %v1528_v9  ;;  %v1566_v24 = vsub.f32 %v2738_v20, %v1528_v9  ;;  %v1567_v50 = vsub.f32 %v2749_v28, %v1528_v9 }
 0x39a   : > { %v1560_v52 = vsub.f32 %v1558_v11, %v1559_v42  ;;  %v1568_v25 = vsub.f32 %v2754_v34, %v1528_v9  ;;  %v1569_v26 = vsub.f32 %v1505_v54, %v1528_v9 }
 0x39c   : > { %v1561_v7 = vmax.f32 %v1560_v52, 0.0 }
 0x39e   : > { %v1570_v13 = vadd.f32 1e-05, %v1561_v7 }
 0x3a0   : > { %2133 = vrsqrt.f32 %v1570_v13  ;;  %vm1577_vm13 = vweird.f32 %v1570_v13 }
 0x3a6   : > { %v2134_v36 = vpop.eup %2133 }
 0x3a7   : > { %v1572_v2 = vmul.f32 %v2134_v36, %v1570_v13  ;;  %vm1578_vm11 = vweird.f32 %v2134_v36 }
 0x3a8   : > { %vm1579_vm4 = vmor %vm1577_vm13, %vm1578_vm11 }
 0x3a9   : > { %v1573_v15 = vmul.f32 %v2134_v36, %v1572_v2 }
 0x3ab   : > { %v1574_v16 = vmul.f32 0.5, %v1573_v15 }
 0x3ad   : > { %v1575_v17 = vsub.f32 1.5, %v1574_v16 }
 0x3af   : > { %v1576_v18 = vmul.f32 %v2134_v36, %v1575_v17 }
 0x3b1   : > { %v1580_v44 = vsel %vm1579_vm4, %v2134_v36, %v1576_v18 }
 0x3b2   : > { %v1581_v30 = vmul.f32 %v1580_v44, %v1562_v56  ;;  %v1582_v31 = vmul.f32 %v1580_v44, %v1563_v21  ;;  %v1583_v6 = vmul.f32 %v1580_v44, %v1564_v23  ;;  %v1584_v32 = vmul.f32 %v1580_v44, %v1565_v19 }
 0x3b3   : > { %v1585_v33 = vmul.f32 %v1580_v44, %v1566_v24  ;;  %v1586_v37 = vmul.f32 %v1580_v44, %v1567_v50  ;;  %v1587_v61 = vmul.f32 %v1580_v44, %v1568_v25  ;;  %v1588_v12 = vmul.f32 %v1580_v44, %v1569_v26 }
 0x3b4   : > { %vm1589_vm6 = vcmp.ge.f32.partialorder %v1581_v30, 0.0  ;;  %vm1590_vm7 = vcmp.ge.f32.partialorder %v1582_v31, 0.0  ;;  %vm1591_vm8 = vcmp.ge.f32.partialorder %v1583_v6, 0.0  ;;  %vm1592_vm9 = vcmp.ge.f32.partialorder %v1584_v32, 0.0 }
 0x3b5   : > { %vm1593_vm10 = vcmp.ge.f32.partialorder %v1585_v33, 0.0  ;;  %vm1594_vm12 = vcmp.ge.f32.partialorder %v1586_v37, 0.0  ;;  %vm1595_vm14 = vcmp.ge.f32.partialorder %v1587_v61, 0.0  ;;  %v1597_v20 = vmul.f32 0.01, %v1581_v30 }
 0x3b6   : > { %v1598_v22 = vmul.f32 0.01, %v1582_v31  ;;  %v1599_v28 = vmul.f32 0.01, %v1583_v6  ;;  %v1600_v34 = vmul.f32 0.01, %v1584_v32 }
 0x3b7   : > { %v1601_v38 = vmul.f32 0.01, %v1585_v33  ;;  %v1602_v39 = vmul.f32 0.01, %v1586_v37  ;;  %v1603_v40 = vmul.f32 0.01, %v1587_v61  ;;  %v1605_v46 = vsel %vm1589_vm6, %v1581_v30, %v1597_v20 }
 0x3b8   : > { %v1604_v41 = vmul.f32 0.01, %v1588_v12  ;;  %v1606_v47 = vsel %vm1590_vm7, %v1582_v31, %v1598_v22  ;;  %vm1596_vm15 = vcmp.ge.f32.partialorder %v1588_v12, 0.0  ;;  %v1607_v48 = vsel %vm1591_vm8, %v1583_v6, %v1599_v28 }
 0x3b9   : > { %v1608_v49 = vsel %vm1592_vm9, %v1584_v32, %v1600_v34  ;;  %v1609_v51 = vsel %vm1593_vm10, %v1585_v33, %v1601_v38  ;;  %v1610_v53 = vsel %vm1594_vm12, %v1586_v37, %v1602_v39  ;;  %v1613_v29 = vpack.c.bf16 %v1605_v46, %v1605_v46 }
 0x3ba   : > { %v1614_v54 = vpack.c.bf16 %v1606_v47, %v1606_v47  ;;  %v1611_v57 = vsel %vm1595_vm14, %v1587_v61, %v1603_v40  ;;  %v1615_v58 = vpack.c.bf16 %v1607_v48, %v1607_v48  ;;  %v1616_v35 = vpack.c.bf16 %v1608_v49, %v1608_v49 }
 0x3bb   : > { %v1612_v62 = vsel %vm1596_vm15, %v1588_v12, %v1604_v41  ;;  %v1617_v59 = vpack.c.bf16 %v1609_v51, %v1609_v51  ;;  %1622 = vst.msk [vmem:[%s271_s26] sm:$0xf] %vm1621_vm5, %v1613_v29  ;;  %v1618_v60 = vpack.c.bf16 %v1610_v53, %v1610_v53  ;;  %v1619_v63 = vpack.c.bf16 %v1611_v57, %v1611_v57 }
 0x3bc   : > { %1623 = vst.msk [vmem:[%s271_s26 + $0x4] sm:$0xf] %vm1621_vm5, %v1614_v54  ;;  %v1620_v0 = vpack.c.bf16 %v1612_v62, %v1612_v62 }
 0x3bd   : > { %1624 = vst.msk [vmem:[%s271_s26 + $0x8] sm:$0xf] %vm1621_vm5, %v1615_v58 }
 0x3be   : > { %1625 = vst.msk [vmem:[%s271_s26 + $0xc] sm:$0xf] %vm1621_vm5, %v1616_v35 }
 0x3bf   : > { %1626 = vst.msk [vmem:[%s271_s26 + $0x10] sm:$0xf] %vm1621_vm5, %v1617_v59 }
 0x3c0   : > { %1627 = vst.msk [vmem:[%s271_s26 + $0x14] sm:$0xf] %vm1621_vm5, %v1618_v60 }
 0x3c1   : > { %1628 = vst.msk [vmem:[%s271_s26 + $0x18] sm:$0xf] %vm1621_vm5, %v1619_v63 }
 0x3c2   : > { %1629 = vst.msk [vmem:[%s271_s26 + $0x1c] sm:$0xf] %vm1621_vm5, %v1620_v0 }
 0x3c3 PF: > { %s16_s21 = sadd.s32 1, %s2141_s21  }
 0x3c4   : > { %p13_p4 = scmp.ge.s32.totalorder %s16_s21, 4  }
 0x3c6   :  { %15 = sbr.rel (!%p13_p4) target bundleno = 1 (0x1), region = 81 }

// kernel: refinement_network_forward.5
= control target key start
LH: loop header
LB: loop body
LE: loop exit
PB: predicated region body
PF: predicated region fallthrough
CT: control target
= control target key end

     0   :  { %s3284_s18 = smov 0   ;;  %s4553_s0 = inlined_call_operand.vmem [shape: bf16[2,16,16,16], index: 0, kind: input, shape index: {}]   ;;  %s4554_s1 = inlined_call_operand.vmem [shape: bf16[144,16], index: 1, kind: input, shape index: {}]   ;;  %s4555_s2 = inlined_call_operand.vmem [shape: f32[1,16], index: 2, kind: input, shape index: {}]   ;;  %s4556_s3 = inlined_call_operand.vmem [shape: bf16[16,128], index: 3, kind: input, shape index: {}]   ;;  %s4557_s4 = inlined_call_operand.vmem [shape: f32[1,128], index: 4, kind: input, shape index: {}]   ;;  %s4558_s5 = inlined_call_operand.vmem [shape: f32[2,16,16,128], index: 5, kind: output, shape index: {}]  }
   0x1 LB: > { %s2476_s19 = sadd.s32 4294967295, %s3244_s18   ;;  %p2480_p0 = scmp.ge.s32.totalorder %s3244_s18, 1  ;;  %s3244_s18 = sphi %s3284_s18, %s15_s18  }
   0x2   : > { %p187_p1 = scmp.lt.s32.totalorder %s3244_s18, 3 }
   0x4   : > { %p188_p2 = pnand %p2480_p0, %p187_p1 }
   0x6   : > { %191 = sbr.rel (%p188_p2) target bundleno = 791 (0x317), region = 40 }
   0xb   : > { %vm226_vm0 = vcmask 130048   ;;  %vm229_vm1 = vcmask 123904   ;;  %v3246_v0 = vmov 0.0   ;;  %s3247_s20 = smov 16   ;;  %p215_p3 = scmp.lt.s32.totalorder %s2476_s19, 1  ;;  %vm1596_vm2 = vcmask 261120  }
   0xc   : > { %227 = vst.msk [vmem:[#allocation2] sm:$0xff] %vm226_vm0, %v3246_v0  ;;  %s3248_s25 = smov 32   ;;  %s3249_s28 = smov 64   ;;  %vm1629_vm3 = vcmask 392192   ;;  %vm1662_vm4 = vcmask 523264   ;;  %vm1695_vm5 = vcmask 654336  }
   0xd   : > { %228 = vst.msk [vmem:[#allocation2 + $0x8] sm:$0xff] %vm226_vm0, %v3246_v0  ;;  %s4577_s19 = smov (!%p215_p3, %s2476_s19), 1  ;;  %s3250_s29 = smov 48   ;;  %vm1728_vm6 = vcmask 785408   ;;  %vm1761_vm7 = vcmask 916480  }
   0xe   : > { %230 = vst.msk [vmem:[#allocation2 + $0x10] sm:$0x3] %vm229_vm1, %v3246_v0  ;;  %s2559_s21 = sshll.u32 %s4577_s19, 7  ;;  %s3251_s30 = smov 80  }
   0xf   : > { %231 = vst.msk [vmem:[#allocation2 + $0x18] sm:$0xff] %vm226_vm0, %v3246_v0  ;;  %s3393_s24 = scalar_lea.vmem %s4553_s0, %s2559_s21  ;;  %s3252_s6 = smov 112  }
  0x10   : > { %232 = vst.msk [vmem:[#allocation2 + $0x20] sm:$0xff] %vm226_vm0, %v3246_v0  ;;  %v2637_v4 = vld [vmem:[%s3393_s24 + $0x18] sm:$0xff]   ;;  %v2635_v5 = vld [vmem:[%s3393_s24 + $0x8] sm:$0xff]   ;;  %v2572_v8 = vld [vmem:[%s3393_s24] sm:$0xff]   ;;  %s3253_s7 = smov 96  }
  0x11   : > { %233 = vst.msk [vmem:[#allocation2 + $0x28] sm:$0x3] %vm229_vm1, %v3246_v0  ;;  %v2585_v6 = vunpack.c.l.bf16 %v2637_v4  ;;  %v2586_v7 = vunpack.c.h.bf16 %v2637_v4  ;;  %v2577_v9 = vunpack.c.l.bf16 %v2635_v5  ;;  %v2578_v10 = vunpack.c.h.bf16 %v2635_v5  ;;  %v2638_v11 = vld [vmem:[%s3393_s24 + $0x20] sm:$0xff]   ;;  %v2636_v14 = vld [vmem:[%s3393_s24 + $0x10] sm:$0xff]   ;;  %v2639_v17 = vld [vmem:[%s3393_s24 + $0x28] sm:$0xff]  }
  0x12   : > { %234 = vst.msk [vmem:[#allocation2 + $0x30] sm:$0xff] %vm226_vm0, %v3246_v0  ;;  %v2573_v12 = vunpack.c.l.bf16 %v2572_v8  ;;  %v2574_v13 = vunpack.c.h.bf16 %v2572_v8  ;;  %v2589_v15 = vunpack.c.l.bf16 %v2638_v11  ;;  %v2590_v16 = vunpack.c.h.bf16 %v2638_v11  ;;  %v2641_v20 = vld [vmem:[%s3393_s24 + $0x38] sm:$0xff]   ;;  %v2640_v24 = vld [vmem:[%s3393_s24 + $0x30] sm:$0xff]   ;;  %v2642_v30 = vld [vmem:[%s3393_s24 + $0x40] sm:$0xff]  }
  0x13   : > { %235 = vst.msk [vmem:[#allocation2 + $0x38] sm:$0xff] %vm226_vm0, %v3246_v0  ;;  %v2581_v18 = vunpack.c.l.bf16 %v2636_v14  ;;  %v2582_v19 = vunpack.c.h.bf16 %v2636_v14  ;;  %v2593_v21 = vunpack.c.l.bf16 %v2639_v17  ;;  %v2594_v23 = vunpack.c.h.bf16 %v2639_v17  ;;  %v2644_v36 = vld [vmem:[%s3393_s24 + $0x50] sm:$0xff]   ;;  %v2643_v42 = vld [vmem:[%s3393_s24 + $0x48] sm:$0xff]   ;;  %v2645_v48 = vld [vmem:[%s3393_s24 + $0x58] sm:$0xff]  }
  0x14   : > { %v411_v1 = vld [vmem:[#allocation2 + $0x1] sm:$0xff]  ;;  %236 = vst.msk [vmem:[#allocation2 + $0x40] sm:$0x3] %vm229_vm1, %v3246_v0  ;;  %v2601_v26 = vunpack.c.l.bf16 %v2641_v20  ;;  %v2602_v29 = vunpack.c.h.bf16 %v2641_v20  ;;  %v2597_v32 = vunpack.c.l.bf16 %v2640_v24  ;;  %v2598_v35 = vunpack.c.h.bf16 %v2640_v24 }
  0x15   : > { %v412_v2 = vld [vmem:[#allocation2 + $0x9] sm:$0xff]  ;;  %237 = vst.msk [vmem:[#allocation2 + $0x48] sm:$0xff] %vm226_vm0, %v3246_v0  ;;  %v2605_v38 = vunpack.c.l.bf16 %v2642_v30  ;;  %v2606_v41 = vunpack.c.h.bf16 %v2642_v30  ;;  %v2613_v44 = vunpack.c.l.bf16 %v2644_v36  ;;  %v2614_v47 = vunpack.c.h.bf16 %v2644_v36  ;;  %v2646_v59 = vld [vmem:[%s3393_s24 + $0x60] sm:$0xff]  }
  0x16   : > { %v2676_v3 = vpack.i.bf16 %v412_v2, %v411_v1  ;;  %238 = vst.msk [vmem:[#allocation2 + $0x50] sm:$0xff] %vm226_vm0, %v3246_v0  ;;  %v2609_v50 = vunpack.c.l.bf16 %v2643_v42  ;;  %v2610_v53 = vunpack.c.h.bf16 %v2643_v42  ;;  %v2647_v54 = vld [vmem:[%s3393_s24 + $0x68] sm:$0xff]   ;;  %v2617_v56 = vunpack.c.l.bf16 %v2645_v48 }
  0x17   : > { %239 = vst.msk [vmem:[#allocation2 + $0x58] sm:$0x3] %vm229_vm1, %v3246_v0  ;;  %v2618_v58 = vunpack.c.h.bf16 %v2645_v48  ;;  %v2625_v62 = vunpack.c.l.bf16 %v2647_v54  ;;  %v2626_v63 = vunpack.c.h.bf16 %v2647_v54  ;;  %v2622_v5 = vunpack.c.h.bf16 %v2646_v59 }
  0x18   : > { %2677 = vrot.lane.b32.xlu0 %v2676_v3, %s3247_s20  ;;  %240 = vst.msk [vmem:[#allocation2 + $0x60] sm:$0xff] %vm226_vm0, %v3246_v0  ;;  %v2621_v3 = vunpack.c.l.bf16 %v2646_v59 }
  0x19   : > { %241 = vst.msk [vmem:[#allocation2 + $0x68] sm:$0xff] %vm226_vm0, %v3246_v0 }
  0x1a   : > { %242 = vst.msk [vmem:[#allocation2 + $0x70] sm:$0x3] %vm229_vm1, %v3246_v0 }
  0x1b   : > { %243 = vst.msk [vmem:[#allocation2 + $0x78] sm:$0xff] %vm226_vm0, %v3246_v0 }
  0x1c   : > { %244 = vst.msk [vmem:[#allocation2 + $0x80] sm:$0xff] %vm226_vm0, %v3246_v0 }
  0x1d   : > { %245 = vst.msk [vmem:[#allocation2 + $0x88] sm:$0x3] %vm229_vm1, %v3246_v0 }
  0x1e   : > { %246 = vst.msk [vmem:[#allocation2 + $0x90] sm:$0xff] %vm226_vm0, %v3246_v0 }
  0x1f   : > { %247 = vst.msk [vmem:[#allocation2 + $0x98] sm:$0xff] %vm226_vm0, %v3246_v0 }
  0x20   : > { %248 = vst.msk [vmem:[#allocation2 + $0xa0] sm:$0x3] %vm229_vm1, %v3246_v0 }
  0x21   : > { %249 = vst.msk [vmem:[#allocation2 + $0xa8] sm:$0xff] %vm226_vm0, %v3246_v0 }
  0x22   : > { %250 = vst.msk [vmem:[#allocation2 + $0xb0] sm:$0xff] %vm226_vm0, %v3246_v0 }
  0x23   : > { %251 = vst.msk [vmem:[#allocation2 + $0xb8] sm:$0x3] %vm229_vm1, %v3246_v0 }
  0x24   : > { %252 = vst.msk [vmem:[#allocation2 + $0xc0] sm:$0xff] %vm226_vm0, %v3246_v0 }
  0x25   : > { %253 = vst.msk [vmem:[#allocation2 + $0xc8] sm:$0xff] %vm226_vm0, %v3246_v0 }
  0x26   : > { %254 = vst.msk [vmem:[#allocation2 + $0xd0] sm:$0x3] %vm229_vm1, %v3246_v0 }
  0x27   : > { %255 = vst.msk [vmem:[#allocation2 + $0xd8] sm:$0xff] %vm226_vm0, %v3246_v0 }
  0x28   : > { %256 = vst.msk [vmem:[#allocation2 + $0xe0] sm:$0xff] %vm226_vm0, %v3246_v0 }
  0x29   : > { %257 = vst.msk [vmem:[#allocation2 + $0xe8] sm:$0x3] %vm229_vm1, %v3246_v0 }
  0x2a   : > { %258 = vst.msk [vmem:[#allocation2 + $0xf0] sm:$0xff] %vm226_vm0, %v3246_v0 }
  0x2b   : > { %259 = vst.msk [vmem:[#allocation2 + $0xf8] sm:$0xff] %vm226_vm0, %v3246_v0 }
  0x2c   : > { %260 = vst.msk [vmem:[#allocation2 + $0x100] sm:$0x3] %vm229_vm1, %v3246_v0 }
  0x2d   : > { %261 = vst.msk [vmem:[#allocation2 + $0x108] sm:$0xff] %vm226_vm0, %v3246_v0 }
  0x2e   : > { %262 = vst.msk [vmem:[#allocation2 + $0x110] sm:$0xff] %vm226_vm0, %v3246_v0 }
  0x2f   : > { %263 = vst.msk [vmem:[#allocation2 + $0x118] sm:$0x3] %vm229_vm1, %v3246_v0 }
  0x30   : > { %264 = vst.msk [vmem:[#allocation2 + $0x120] sm:$0xff] %vm226_vm0, %v3246_v0 }
  0x31   : > { %265 = vst.msk [vmem:[#allocation2 + $0x128] sm:$0xff] %vm226_vm0, %v3246_v0 }
  0x32   : > { %266 = vst.msk [vmem:[#allocation2 + $0x130] sm:$0x3] %vm229_vm1, %v3246_v0 }
  0x33   : > { %267 = vst.msk [vmem:[#allocation2 + $0x138] sm:$0xff] %vm226_vm0, %v3246_v0 }
  0x34   : > { %268 = vst.msk [vmem:[#allocation2 + $0x140] sm:$0xff] %vm226_vm0, %v3246_v0 }
  0x35   : > { %269 = vst.msk [vmem:[#allocation2 + $0x148] sm:$0x3] %vm229_vm1, %v3246_v0 }
  0x36   : > { %270 = vst.msk [vmem:[#allocation2 + $0x150] sm:$0xff] %vm226_vm0, %v3246_v0 }
  0x37   : > { %271 = vst.msk [vmem:[#allocation2 + $0x158] sm:$0xff] %vm226_vm0, %v3246_v0 }
  0x38   : > { %272 = vst.msk [vmem:[#allocation2 + $0x160] sm:$0x3] %vm229_vm1, %v3246_v0 }
  0x39   : > { %273 = vst.msk [vmem:[#allocation2 + $0x168] sm:$0xff] %vm226_vm0, %v3246_v0 }
  0x3a   : > { %274 = vst.msk [vmem:[#allocation2 + $0x170] sm:$0xff] %vm226_vm0, %v3246_v0 }
  0x3b   : > { %275 = vst.msk [vmem:[#allocation2 + $0x178] sm:$0x3] %vm229_vm1, %v3246_v0 }
  0x3c   : > { %276 = vst.msk [vmem:[#allocation2 + $0x180] sm:$0xff] %vm226_vm0, %v3246_v0 }
  0x3d   : > { %277 = vst.msk [vmem:[#allocation2 + $0x188] sm:$0xff] %vm226_vm0, %v3246_v0 }
  0x3e   : > { %278 = vst.msk [vmem:[#allocation2 + $0x190] sm:$0x3] %vm229_vm1, %v3246_v0 }
  0x3f   : > { %279 = vst.msk [vmem:[#allocation2 + $0x198] sm:$0xff] %vm226_vm0, %v3246_v0 }
  0x40   : > { %280 = vst.msk [vmem:[#allocation2 + $0x1a0] sm:$0xff] %vm226_vm0, %v3246_v0 }
  0x41   : > { %281 = vst.msk [vmem:[#allocation2 + $0x1a8] sm:$0x3] %vm229_vm1, %v3246_v0  ;;  %v2648_v0 = vld [vmem:[%s3393_s24 + $0x70] sm:$0xff]  }
  0x42   : > { %353 = vst.msk [vmem:[#allocation2 + $0x61] sm:$0xff] %vm226_vm0, %v2585_v6  ;;  %v2629_v8 = vunpack.c.l.bf16 %v2648_v0 }
  0x43   : > { %354 = vst.msk [vmem:[#allocation2 + $0x69] sm:$0xff] %vm226_vm0, %v2586_v7 }
  0x44   : > { %349 = vst.msk [vmem:[#allocation2 + $0x31] sm:$0xff] %vm226_vm0, %v2577_v9 }
  0x45   : > { %350 = vst.msk [vmem:[#allocation2 + $0x39] sm:$0xff] %vm226_vm0, %v2578_v10  ;;  %v2630_v10 = vunpack.c.h.bf16 %v2648_v0 }
  0x46   : > { %347 = vst.msk [vmem:[#allocation2 + $0x19] sm:$0xff] %vm226_vm0, %v2573_v12 }
  0x47   : > { %348 = vst.msk [vmem:[#allocation2 + $0x21] sm:$0xff] %vm226_vm0, %v2574_v13 }
  0x48   : > { %355 = vst.msk [vmem:[#allocation2 + $0x79] sm:$0xff] %vm226_vm0, %v2589_v15 }
  0x49   : > { %v419_v22 = vld [vmem:[#allocation2 + $0x61] sm:$0xff]  ;;  %356 = vst.msk [vmem:[#allocation2 + $0x81] sm:$0xff] %vm226_vm0, %v2590_v16 }
  0x4a   : > { %v420_v25 = vld [vmem:[#allocation2 + $0x69] sm:$0xff]  ;;  %351 = vst.msk [vmem:[#allocation2 + $0x49] sm:$0xff] %vm226_vm0, %v2581_v18 }
  0x4b   : > { %v3430_v27 = vpack.i.bf16 %v420_v25, %v419_v22  ;;  %v415_v28 = vld [vmem:[#allocation2 + $0x31] sm:$0xff]  ;;  %352 = vst.msk [vmem:[#allocation2 + $0x51] sm:$0xff] %vm226_vm0, %v2582_v19  ;;  %v3507_v42 = vld [vmem:[#allocation2 + $0x62] sm:$0xff] }
  0x4c   : > { %v416_v31 = vld [vmem:[#allocation2 + $0x39] sm:$0xff]  ;;  %357 = vst.msk [vmem:[#allocation2 + $0x91] sm:$0xff] %vm226_vm0, %v2593_v21 }
  0x4d   : > { %2697 = vrot.lane.b32.xlu2 %v3430_v27, %s3247_s20  ;;  %v3437_v33 = vpack.i.bf16 %v416_v31, %v415_v28  ;;  %v413_v34 = vld [vmem:[#allocation2 + $0x19] sm:$0xff]  ;;  %358 = vst.msk [vmem:[#allocation2 + $0x99] sm:$0xff] %vm226_vm0, %v2594_v23 }
  0x4e   : > { %v414_v37 = vld [vmem:[#allocation2 + $0x21] sm:$0xff]  ;;  %361 = vst.msk [vmem:[#allocation2 + $0xc1] sm:$0xff] %vm226_vm0, %v2601_v26 }
  0x4f   : > { %2687 = vrot.lane.b32.xlu1 %v3437_v33, %s3247_s20  ;;  %v3444_v39 = vpack.i.bf16 %v414_v37, %v413_v34  ;;  %v421_v40 = vld [vmem:[#allocation2 + $0x79] sm:$0xff]  ;;  %362 = vst.msk [vmem:[#allocation2 + $0xc9] sm:$0xff] %vm226_vm0, %v2602_v29  ;;  %v443_v34 = vld [vmem:[#allocation2 + $0x2] sm:$0xff] }
  0x50   : > { %v422_v43 = vld [vmem:[#allocation2 + $0x81] sm:$0xff]  ;;  %359 = vst.msk [vmem:[#allocation2 + $0xa9] sm:$0xff] %vm226_vm0, %v2597_v32  ;;  %v447_v37 = vld [vmem:[#allocation2 + $0x32] sm:$0xff] }
  0x51   : > { %2682 = vrot.lane.b32.xlu0 %v3444_v39, %s3247_s20  ;;  %v3451_v45 = vpack.i.bf16 %v422_v43, %v421_v40  ;;  %v417_v46 = vld [vmem:[#allocation2 + $0x49] sm:$0xff]  ;;  %360 = vst.msk [vmem:[#allocation2 + $0xb1] sm:$0xff] %vm226_vm0, %v2598_v35  ;;  %v445_v31 = vld [vmem:[#allocation2 + $0x1a] sm:$0xff] }
  0x52   : > { %v418_v49 = vld [vmem:[#allocation2 + $0x51] sm:$0xff]  ;;  %363 = vst.msk [vmem:[#allocation2 + $0xd9] sm:$0xff] %vm226_vm0, %v2605_v38  ;;  %v446_v32 = vld [vmem:[#allocation2 + $0x22] sm:$0xff]  ;;  %v448_v38 = vld [vmem:[#allocation2 + $0x3a] sm:$0xff] }
  0x53   : > { %v3456_v51 = vpack.i.bf16 %v418_v49, %v417_v46  ;;  %v423_v52 = vld [vmem:[#allocation2 + $0x91] sm:$0xff]  ;;  %364 = vst.msk [vmem:[#allocation2 + $0xe1] sm:$0xff] %vm226_vm0, %v2606_v41  ;;  %v2761_v36 = vpack.i.bf16 %v446_v32, %v445_v31  ;;  %v2766_v41 = vpack.i.bf16 %v448_v38, %v447_v37  ;;  %v3517_v48 = vld [vmem:[#allocation2 + $0x7a] sm:$0xff]  ;;  %v3519_v49 = vld [vmem:[#allocation2 + $0x82] sm:$0xff] }
  0x54   : > { %v424_v55 = vld [vmem:[#allocation2 + $0x99] sm:$0xff]  ;;  %367 = vst.msk [vmem:[#allocation2 + $0x109] sm:$0xff] %vm226_vm0, %v2613_v44  ;;  %v444_v35 = vld [vmem:[#allocation2 + $0xa] sm:$0xff] }
  0x55   : > { %2702 = vrot.lane.b32.xlu2 %v3451_v45, %s3247_s20  ;;  %v3463_v57 = vpack.i.bf16 %v424_v55, %v423_v52  ;;  %368 = vst.msk [vmem:[#allocation2 + $0x111] sm:$0xff] %vm226_vm0, %v2614_v47  ;;  %v427_v60 = vld [vmem:[#allocation2 + $0xc1] sm:$0xff]  ;;  %v2756_v40 = vpack.i.bf16 %v444_v35, %v443_v34  ;;  %v3509_v43 = vld [vmem:[#allocation2 + $0x6a] sm:$0xff]  ;;  %v450_v46 = vld [vmem:[#allocation2 + $0x52] sm:$0xff]  ;;  %v3525_v52 = vpack.i.bf16 %v3519_v49, %v3517_v48 }
  0x56   : > { %v428_v61 = vld [vmem:[#allocation2 + $0xc9] sm:$0xff]  ;;  %365 = vst.msk [vmem:[#allocation2 + $0xf1] sm:$0xff] %vm226_vm0, %v2609_v50  ;;  %v3515_v47 = vpack.i.bf16 %v3509_v43, %v3507_v42  ;;  %v3532_v55 = vld [vmem:[#allocation2 + $0x92] sm:$0xff]  ;;  %v3560_v0 = vld [vmem:[#allocation2 + $0x20] sm:$0xff] }
  0x57   : > { %2692 = vrot.lane.b32.xlu1 %v3456_v51, %s3247_s20  ;;  %366 = vst.msk [vmem:[#allocation2 + $0xf9] sm:$0xff] %vm226_vm0, %v2610_v53  ;;  %v425_v1 = vld [vmem:[#allocation2 + $0xa9] sm:$0xff]  ;;  %v3475_v4 = vpack.i.bf16 %v428_v61, %v427_v60 }
  0x58   : > { %v426_v2 = vld [vmem:[#allocation2 + $0xb1] sm:$0xff]  ;;  %369 = vst.msk [vmem:[#allocation2 + $0x121] sm:$0xff] %vm226_vm0, %v2617_v56  ;;  %v3534_v56 = vld [vmem:[#allocation2 + $0x9a] sm:$0xff]  ;;  %v3542_v59 = vld [vmem:[#allocation2 + $0xc2] sm:$0xff] }
  0x59   : > { %2707 = vrot.lane.b32.xlu0 %v3463_v57, %s3247_s20  ;;  %370 = vst.msk [vmem:[#allocation2 + $0x129] sm:$0xff] %vm226_vm0, %v2618_v58  ;;  %v429_v6 = vld [vmem:[#allocation2 + $0xd9] sm:$0xff]  ;;  %v3479_v9 = vpack.i.bf16 %v426_v2, %v425_v1  ;;  %v449_v44 = vld [vmem:[#allocation2 + $0x4a] sm:$0xff]  ;;  %v3548_v61 = vpack.i.bf16 %v3534_v56, %v3532_v55 }
  0x5a   : > { %v430_v7 = vld [vmem:[#allocation2 + $0xe1] sm:$0xff]  ;;  %373 = vst.msk [vmem:[#allocation2 + $0x151] sm:$0xff] %vm226_vm0, %v2625_v62  ;;  %v2771_v50 = vpack.i.bf16 %v450_v46, %v449_v44  ;;  %v3527_v53 = vld [vmem:[#allocation2 + $0xaa] sm:$0xff]  ;;  %v3529_v54 = vld [vmem:[#allocation2 + $0xb2] sm:$0xff] }
  0x5b   : > { %374 = vst.msk [vmem:[#allocation2 + $0x159] sm:$0xff] %vm226_vm0, %v2626_v63  ;;  %v2721_v11 = vpack.i.bf16 %v430_v7, %v429_v6  ;;  %v433_v12 = vld [vmem:[#allocation2 + $0x109] sm:$0xff]  ;;  %v3540_v58 = vpack.i.bf16 %v3529_v54, %v3527_v53  ;;  %v3558_v63 = vld [vmem:[#allocation2 + $0x18] sm:$0xff]  ;;  %v3567_v1 = vld [vmem:[%s4554_s1 + $0x40] sm:$0xff] }
  0x5c   : > { %371 = vst.msk [vmem:[#allocation2 + $0x139] sm:$0xff] %vm226_vm0, %v2621_v3  ;;  %v434_v13 = vld [vmem:[#allocation2 + $0x111] sm:$0xff]  ;;  %v2801_v2 = vpack.i.bf16 %v3560_v0, %v3558_v63  ;;  %v1795_v3 = vpack.c.bf16 %v448_v38, %v447_v37  ;;  %2046 = vmatpush.bf16.msra.mxu1 %v3567_v1  ;;  %v3627_v31 = vld [vmem:[#allocation2 + $0xc8] sm:$0xff] }
  0x5d   : > { %2717 = vrot.lane.b32.xlu2 %v3475_v4, %s3247_s20  ;;  %372 = vst.msk [vmem:[#allocation2 + $0x141] sm:$0xff] %vm226_vm0, %v2622_v5  ;;  %v431_v14 = vld [vmem:[#allocation2 + $0xf1] sm:$0xff]  ;;  %v2731_v16 = vpack.i.bf16 %v434_v13, %v433_v12  ;;  %v387_v12 = vld [vmem:[#allocation2 + $0x60] sm:$0xff]  ;;  %v388_v13 = vld [vmem:[#allocation2 + $0x68] sm:$0xff] }
  0x5e   : > { %375 = vst.msk [vmem:[#allocation2 + $0x169] sm:$0xff] %vm226_vm0, %v2629_v8  ;;  %v432_v15 = vld [vmem:[#allocation2 + $0xf9] sm:$0xff]  ;;  %v3544_v60 = vld [vmem:[#allocation2 + $0xca] sm:$0xff] }
  0x5f   : > { %2712 = vrot.lane.b32.xlu1 %v3479_v9, %s3247_s20  ;;  %376 = vst.msk [vmem:[#allocation2 + $0x171] sm:$0xff] %vm226_vm0, %v2630_v10  ;;  %v435_v17 = vld [vmem:[#allocation2 + $0x121] sm:$0xff]  ;;  %v2726_v19 = vpack.i.bf16 %v432_v15, %v431_v14  ;;  %v3554_v62 = vpack.i.bf16 %v3544_v60, %v3542_v59  ;;  %2521 = vmatmul.msk.bf16.vlgmr.msra.gmra.mxu1 %vm226_vm0, %v1795_v3  ;;  %v3576_v5 = vld [vmem:[#allocation2 + $0x30] sm:$0xff]  ;;  %v3578_v6 = vld [vmem:[#allocation2 + $0x38] sm:$0xff] }
  0x60   : > { %v436_v18 = vld [vmem:[#allocation2 + $0x129] sm:$0xff]  ;;  %v2816_v7 = vpack.i.bf16 %v3578_v6, %v3576_v5  ;;  %v1797_v10 = vpack.c.bf16 %v450_v46, %v449_v44  ;;  %v581_v44 = vld [vmem:[#allocation2 + $0x98] sm:$0xff] }
  0x61   : > { %2722 = vrot.lane.b32.xlu0 %v2721_v11, %s3247_s20  ;;  %v2736_v20 = vpack.i.bf16 %v436_v18, %v435_v17  ;;  %v439_v21 = vld [vmem:[#allocation2 + $0x151] sm:$0xff]  ;;  %v2866_v17 = vpack.i.bf16 %v388_v13, %v387_v12 }
  0x62   : > { %v440_v22 = vld [vmem:[#allocation2 + $0x159] sm:$0xff]  ;;  %v3589_v8 = vld [vmem:[#allocation2 + $0x50] sm:$0xff] }
  0x63   : > { %v437_v23 = vld [vmem:[#allocation2 + $0x139] sm:$0xff]  ;;  %v3494_v25 = vpack.i.bf16 %v440_v22, %v439_v21 }
  0x64   : > { %v438_v24 = vld [vmem:[#allocation2 + $0x141] sm:$0xff] }
  0x65   : > { %2732 = vrot.lane.b32.xlu2 %v2731_v16, %s3247_s20  ;;  %v441_v26 = vld [vmem:[#allocation2 + $0x169] sm:$0xff]  ;;  %v3496_v29 = vpack.i.bf16 %v438_v24, %v437_v23  ;;  %v390_v23 = vld [vmem:[#allocation2 + $0x80] sm:$0xff] }
  0x66   : > { %v442_v28 = vld [vmem:[#allocation2 + $0x171] sm:$0xff] }
  0x67   : > { %2727 = vrot.lane.b32.xlu1 %v2726_v19, %s3247_s20  ;;  %v3500_v30 = vpack.i.bf16 %v442_v28, %v441_v26  ;;  %v1799_v19 = vpack.c.bf16 %v3509_v43, %v3507_v42  ;;  %v3625_v28 = vld [vmem:[#allocation2 + $0xc0] sm:$0xff]  ;;  %v580_v43 = vld [vmem:[#allocation2 + $0x90] sm:$0xff] }
  0x69   : > { %2737 = vrot.lane.b32.xlu0 %v2736_v20, %s3247_s20 }
  0x6d   : > { %2747 = vrot.lane.b32.xlu2 %v3494_v25, %s3247_s20 }
  0x6f   : > { %2742 = vrot.lane.b32.xlu1 %v3496_v29, %s3247_s20  ;;  %2522 = vmatmul.msk.bf16.gmra.mxu1 %vm226_vm0, %v1797_v10 }
  0x71   : > { %2752 = vrot.lane.b32.xlu0 %v3500_v30, %s3247_s20 }
  0x75   : > { %2762 = vrot.lane.b32.xlu2 %v2761_v36, %s3248_s25 }
  0x77   : > { %2757 = vrot.lane.b32.xlu1 %v2756_v40, %s3248_s25  ;;  %v1801_v40 = vpack.c.bf16 %v3519_v49, %v3517_v48  ;;  %v3658_v48 = vld [vmem:[#allocation2 + $0x150] sm:$0xff]  ;;  %v3660_v49 = vld [vmem:[#allocation2 + $0x158] sm:$0xff] }
  0x79   : > { %2767 = vrot.lane.b32.xlu0 %v2766_v41, %s3248_s25 }
  0x7d   : > { %2777 = vrot.lane.b32.xlu2 %v3515_v47, %s3248_s25 }
  0x7f   : > { %2772 = vrot.lane.b32.xlu1 %v2771_v50, %s3248_s25  ;;  %2523 = vmatmul.msk.bf16.gmra.mxu1 %vm226_vm0, %v1799_v19 }
  0x81   : > { %2782 = vrot.lane.b32.xlu0 %v3525_v52, %s3248_s25 }
  0x85   : > { %2792 = vrot.lane.b32.xlu2 %v3540_v58, %s3248_s25 }
  0x87   : > { %2787 = vrot.lane.b32.xlu1 %v3548_v61, %s3248_s25 }
  0x89   : > { %2797 = vrot.lane.b32.xlu0 %v3554_v62, %s3248_s25 }
  0x8d   : > { %2807 = vrot.lane.b32.xlu2 %v3444_v39, %s3249_s28  ;;  %v3587_v39 = vld [vmem:[#allocation2 + $0x48] sm:$0xff] }
  0x8e   : > { %v2841_v11 = vpack.i.bf16 %v3589_v8, %v3587_v39 }
  0x8f   : > { %2802 = vrot.lane.b32.xlu1 %v2801_v2, %s3250_s29  ;;  %2524 = vmatmul.msk.bf16.gmra.mxu1 %vm226_vm0, %v1801_v40  ;;  %v2567_v40 = vld [vmem:[%s4554_s1 + $0x30] sm:$0xff] }
  0x91   : > { %2812 = vrot.lane.b32.xlu0 %v2761_v36, %s3251_s30  ;;  %v3631_v36 = vpop.permute.xlu0 %2677 }
  0x95   : > { %2822 = vrot.lane.b32.xlu2 %v3437_v33, %s3252_s6 }
  0x97   : > { %2817 = vrot.lane.b32.xlu1 %v2816_v7, %s3253_s7 }
  0x99   : > { %2827 = vrot.lane.b32.xlu0 %v2816_v7, %s3250_s29 }
  0x9d   : > { %2837 = vrot.lane.b32.xlu2 %v2766_v41, %s3251_s30 }
  0x9f   : > { %2832 = vrot.lane.b32.xlu1 %v3437_v33, %s3249_s28 }
  0xa1   : > { %2842 = vrot.lane.b32.xlu0 %v2841_v11, %s3253_s7 }
  0xa5   : > { %2852 = vrot.lane.b32.xlu2 %v2841_v11, %s3250_s29 }
  0xa7   : > { %2847 = vrot.lane.b32.xlu1 %v3456_v51, %s3252_s6  ;;  %v2698_v14 = vpop.permute.xlu2 %2697 }
  0xa8   : > { %v2700_v15 = vunpack.i.h.bf16 %v2698_v14  ;;  %v2699_v16 = vunpack.i.l.bf16 %v2698_v14 }
  0xa9   : > { %2857 = vrot.lane.b32.xlu0 %v3456_v51, %s3249_s28  ;;  %v389_v51 = vld [vmem:[#allocation2 + $0x78] sm:$0xff] }
  0xaa   : > { %v3604_v33 = vsel %vm226_vm0, %v387_v12, %v2699_v16  ;;  %v3607_v18 = vsel %vm226_vm0, %v388_v13, %v2700_v15  ;;  %v2891_v38 = vpack.i.bf16 %v390_v23, %v389_v51  ;;  %v393_v15 = vld [vmem:[#allocation2 + $0xa8] sm:$0xff]  ;;  %v394_v16 = vld [vmem:[#allocation2 + $0xb0] sm:$0xff] }
  0xad   : > { %2867 = vrot.lane.b32.xlu2 %v2866_v17, %s3253_s7 }
  0xaf   : > { %2862 = vrot.lane.b32.xlu1 %v2771_v50, %s3251_s30  ;;  %v2703_v20 = vpop.permute.xlu2 %2702 }
  0xb0   : > { %v2705_v21 = vunpack.i.h.bf16 %v2703_v20  ;;  %v2704_v22 = vunpack.i.l.bf16 %v2703_v20 }
  0xb1   : > { %2872 = vrot.lane.b32.xlu0 %v3430_v27, %s3252_s6 }
  0xb2   : > { %v3617_v24 = vsel %vm226_vm0, %v390_v23, %v2705_v21  ;;  %v3620_v26 = vsel %vm226_vm0, %v389_v51, %v2704_v22  ;;  %v3689_v21 = vpack.i.bf16 %v394_v16, %v393_v15  ;;  %v2568_v22 = vld [vmem:[%s4554_s1 + $0x38] sm:$0xff] }
  0xb3   : > { %1950 = vmatpush.bf16.msra.mxu0 %v2568_v22  ;;  %2650 = vmatpush.bf16.msra.mxu3 %v2568_v22 }
  0xb5   : > { %2882 = vrot.lane.b32.xlu2 %v3430_v27, %s3249_s28 }
  0xb7   : > { %2877 = vrot.lane.b32.xlu1 %v2866_v17, %s3250_s29  ;;  %v2718_v32 = vpop.permute.xlu2 %2717  ;;  %v1803_v17 = vpack.c.bf16 %v3534_v56, %v3532_v55  ;;  %v3694_v55 = vld [vmem:[#allocation2 + $0xd8] sm:$0xff]  ;;  %v3696_v56 = vld [vmem:[#allocation2 + $0xe0] sm:$0xff]  ;;  %1951 = vmatpush.bf16.msra.mxu0 %v2567_v40 }
  0xb8   : > { %v2720_v34 = vunpack.i.h.bf16 %v2718_v32  ;;  %v2719_v35 = vunpack.i.l.bf16 %v2718_v32  ;;  %2651 = vmatpush.bf16.msra.mxu3 %v2567_v40 }
  0xb9   : > { %2887 = vrot.lane.b32.xlu0 %v3515_v47, %s3251_s30  ;;  %v2916_v47 = vpack.i.bf16 %v581_v44, %v580_v43  ;;  %2525 = vmatmul.msk.bf16.gmra.mxu1 %vm226_vm0, %v1803_v17 }
  0xba   : > { %v3635_v37 = vsel %vm226_vm0, %v3627_v31, %v2720_v34  ;;  %v3639_v27 = vsel %vm226_vm0, %v3625_v28, %v2719_v35 }
  0xbd   : > { %2897 = vrot.lane.b32.xlu2 %v3451_v45, %s3252_s6 }
  0xbf   : > { %2892 = vrot.lane.b32.xlu1 %v2891_v38, %s3253_s7  ;;  %v3646_v41 = vpop.permute.xlu2 %2732 }
  0xc0   : > { %4560 = vst [vmem:[#allocation3_spill] sm:$0xff] %v3646_v41 }
  0xc1   : > { %2902 = vrot.lane.b32.xlu0 %v2891_v38, %s3250_s29  ;;  %v3650_v42 = vpop.permute.xlu1 %2687 }
  0xc3   : > { %v3652_v46 = vpop.permute.xlu0 %2682 }
  0xc5   : > { %2912 = vrot.lane.b32.xlu2 %v3525_v52, %s3251_s30 }
  0xc7   : > { %2907 = vrot.lane.b32.xlu1 %v3451_v45, %s3249_s28  ;;  %v2748_v50 = vpop.permute.xlu2 %2747 }
  0xc8   : > { %v2750_v2 = vunpack.i.h.bf16 %v2748_v50  ;;  %v2749_v3 = vunpack.i.l.bf16 %v2748_v50  ;;  %v500_v50 = vld [vmem:[#allocation2 + $0x140] sm:$0xff] }
  0xc9   : > { %2917 = vrot.lane.b32.xlu0 %v2916_v47, %s3253_s7  ;;  %v3663_v7 = vpop.permute.xlu1 %2692 }
  0xca   : > { %v3667_v10 = vsel %vm226_vm0, %v3660_v49, %v2750_v2  ;;  %v3671_v52 = vsel %vm226_vm0, %v3658_v48, %v2749_v3 }
  0xcb   : > { %v2708_v45 = vpop.permute.xlu0 %2707 }
  0xcc   : > { %v2710_v11 = vunpack.i.h.bf16 %v2708_v45  ;;  %v2709_v12 = vunpack.i.l.bf16 %v2708_v45 }
  0xcd   : > { %2927 = vrot.lane.b32.xlu2 %v2916_v47, %s3250_s29  ;;  %v499_v47 = vld [vmem:[#allocation2 + $0x138] sm:$0xff] }
  0xce   : > { %v3675_v13 = vsel %vm226_vm0, %v581_v44, %v2710_v11  ;;  %v3678_v14 = vsel %vm226_vm0, %v580_v43, %v2709_v12  ;;  %v3715_v11 = vld [vmem:[#allocation2 + $0x122] sm:$0xff]  ;;  %v3717_v12 = vld [vmem:[#allocation2 + $0x12a] sm:$0xff] }
  0xcf   : > { %2922 = vrot.lane.b32.xlu1 %v3463_v57, %s3252_s6  ;;  %v3684_v19 = vpop.permute.xlu2 %2762 }
  0xd1   : > { %2932 = vrot.lane.b32.xlu0 %v3463_v57, %s3249_s28  ;;  %v2713_v20 = vpop.permute.xlu1 %2712 }
  0xd2   : > { %v2715_v51 = vunpack.i.h.bf16 %v2713_v20  ;;  %v2714_v23 = vunpack.i.l.bf16 %v2713_v20  ;;  %v2956_v20 = vpack.i.bf16 %v500_v50, %v499_v47 }
  0xd3   : > { %v2723_v32 = vpop.permute.xlu0 %2722 }
  0xd4   : > { %v1579_v34 = vsel %vm226_vm0, %v394_v16, %v2715_v51  ;;  %v1578_v57 = vsel %vm226_vm0, %v393_v15, %v2714_v23  ;;  %v2725_v35 = vunpack.i.h.bf16 %v2723_v32  ;;  %v2724_v38 = vunpack.i.l.bf16 %v2723_v32  ;;  %v3721_v15 = vld [vmem:[#allocation2 + $0xf0] sm:$0xff]  ;;  %v3723_v16 = vld [vmem:[#allocation2 + $0xf8] sm:$0xff] }
  0xd5   : > { %2942 = vrot.lane.b32.xlu2 %v3689_v21, %s3253_s7 }
  0xd6   : > { %v3707_v43 = vsel %vm226_vm0, %v3696_v56, %v2725_v35  ;;  %v3711_v44 = vsel %vm226_vm0, %v3694_v55, %v2724_v38  ;;  %v2951_v38 = vpack.i.bf16 %v3717_v12, %v3715_v11 }
  0xd7   : > { %4561 = vst [vmem:[#allocation4_spill] sm:$0xff] %v3707_v43  ;;  %2937 = vrot.lane.b32.xlu1 %v3548_v61, %s3251_s30  ;;  %v2778_v2 = vpop.permute.xlu2 %2777  ;;  %v2566_v61 = vld [vmem:[%s4554_s1 + $0x28] sm:$0xff] }
  0xd8   : > { %4562 = vst [vmem:[#allocation5_spill] sm:$0xff] %v3711_v44  ;;  %v2780_v3 = vunpack.i.h.bf16 %v2778_v2  ;;  %v2779_v45 = vunpack.i.l.bf16 %v2778_v2  ;;  %1952 = vmatpush.bf16.msra.mxu0 %v2566_v61  ;;  %2652 = vmatpush.bf16.msra.mxu3 %v2566_v61 }
  0xd9   : > { %2947 = vrot.lane.b32.xlu0 %v3479_v9, %s3252_s6  ;;  %v2728_v17 = vpop.permute.xlu1 %2727 }
  0xda   : > { %v2730_v22 = vunpack.i.h.bf16 %v2728_v17  ;;  %v2729_v51 = vunpack.i.l.bf16 %v2728_v17  ;;  %v3730_v23 = vsel %vm1596_vm2, %v3607_v18, %v2780_v3  ;;  %v3734_v32 = vsel %vm1596_vm2, %v3604_v33, %v2779_v45  ;;  %v2565_v33 = vld [vmem:[%s4554_s1 + $0x20] sm:$0xff] }
  0xdb   : > { %v3736_v35 = vpop.permute.xlu0 %2737  ;;  %v1805_v18 = vpack.c.bf16 %v3529_v54, %v3527_v53  ;;  %v3764_v53 = vpack.i.bf16 %v3660_v49, %v3658_v48  ;;  %v2564_v54 = vld [vmem:[%s4554_s1 + $0x18] sm:$0xff] }
  0xdc   : > { %v3742_v40 = vsel %vm226_vm0, %v3723_v16, %v2730_v22  ;;  %v3746_v2 = vsel %vm226_vm0, %v3721_v15, %v2729_v51  ;;  %1953 = vmatpush.bf16.msra.mxu0 %v2565_v33  ;;  %v3755_v22 = vld [vmem:[#allocation2 + $0x13a] sm:$0xff]  ;;  %v3757_v51 = vld [vmem:[#allocation2 + $0x142] sm:$0xff]  ;;  %2653 = vmatpush.bf16.msra.mxu3 %v2565_v33 }
  0xdd   : > { %4563 = vst [vmem:[#allocation6_spill] sm:$0xff] %v3742_v40  ;;  %2957 = vrot.lane.b32.xlu2 %v2956_v20, %s3250_s29  ;;  %2526 = vmatmul.msk.bf16.gmra.mxu1 %vm226_vm0, %v1805_v18  ;;  %v3775_v33 = vld [vmem:[#allocation2 + $0x168] sm:$0xff]  ;;  %v2966_v48 = vpack.i.bf16 %v3757_v51, %v3755_v22 }
  0xde   : > { %4564 = vst [vmem:[#allocation7_spill] sm:$0xff] %v3746_v2 }
  0xdf   : > { %2952 = vrot.lane.b32.xlu1 %v2951_v38, %s3248_s25  ;;  %v2793_v3 = vpop.permute.xlu2 %2792 }
  0xe0   : > { %v2795_v45 = vunpack.i.h.bf16 %v2793_v3  ;;  %v2794_v17 = vunpack.i.l.bf16 %v2793_v3  ;;  %1954 = vmatpush.bf16.msra.mxu0 %v2564_v54  ;;  %2654 = vmatpush.bf16.msra.mxu3 %v2564_v54  ;;  %v2562_v54 = vld [vmem:[%s4554_s1 + $0x8] sm:$0xff] }
  0xe1   : > { %2962 = vrot.lane.b32.xlu0 %v3496_v29, %s3249_s28  ;;  %v2743_v20 = vpop.permute.xlu1 %2742  ;;  %v3777_v29 = vld [vmem:[#allocation2 + $0x170] sm:$0xff] }
  0xe2   : > { %v2745_v61 = vunpack.i.h.bf16 %v2743_v20  ;;  %v2744_v38 = vunpack.i.l.bf16 %v2743_v20  ;;  %v3770_v3 = vsel %vm1596_vm2, %v1579_v34, %v2795_v45  ;;  %v3773_v18 = vsel %vm1596_vm2, %v1578_v57, %v2794_v17  ;;  %v2563_v57 = vld [vmem:[%s4554_s1 + $0x10] sm:$0xff] }
  0xe3   : > { %v2753_v41 = vpop.permute.xlu0 %2752  ;;  %v3905_v44 = vpack.i.bf16 %v3777_v29, %v3775_v33 }
  0xe4   : > { %v3782_v49 = vsel %vm226_vm0, %v500_v50, %v2745_v61  ;;  %v3785_v20 = vsel %vm226_vm0, %v499_v47, %v2744_v38  ;;  %v2755_v34 = vunpack.i.h.bf16 %v2753_v41  ;;  %v2754_v45 = vunpack.i.l.bf16 %v2753_v41  ;;  %1955 = vmatpush.bf16.msra.mxu0 %v2563_v57  ;;  %2655 = vmatpush.bf16.msra.mxu3 %v2563_v57  ;;  %v2561_v38 = vld [vmem:[%s4554_s1] sm:$0xff] }
  0xe5   : > { %2972 = vrot.lane.b32.xlu2 %v3764_v53, %s3253_s7 }
  0xe6   : > { %v3794_v17 = vsel %vm226_vm0, %v3777_v29, %v2755_v34  ;;  %v3798_v50 = vsel %vm226_vm0, %v3775_v33, %v2754_v45  ;;  %v2695_v34 = vunpack.i.h.bf16 %v3663_v7  ;;  %v2694_v45 = vunpack.i.l.bf16 %v3663_v7 }
  0xe7   : > { %4565 = vst [vmem:[#allocation8_spill] sm:$0xff] %v3794_v17  ;;  %2967 = vrot.lane.b32.xlu1 %v2966_v48, %s3251_s30  ;;  %v3801_v47 = vpop.permute.xlu2 %2807 }
  0xe8   : > { %4566 = vst [vmem:[#allocation9_spill] sm:$0xff] %v3798_v50  ;;  %1956 = vmatpush.bf16.msra.mxu0 %v2562_v54  ;;  %2656 = vmatpush.bf16.msra.mxu3 %v2562_v54  ;;  %v1571_v7 = vsel %vm226_vm0, %v3589_v8, %v2695_v34  ;;  %v1570_v54 = vsel %vm226_vm0, %v3587_v39, %v2694_v45  ;;  %v3860_v45 = vld [vmem:[#allocation2 + $0x15a] sm:$0xff]  ;;  %v2810_v50 = vunpack.i.h.bf16 %v3801_v47 }
  0xe9   : > { %2977 = vrot.lane.b32.xlu0 %v3689_v21, %s3250_s29  ;;  %v3805_v41 = vpop.permute.xlu1 %2757  ;;  %v1807_v21 = vpack.c.bf16 %v3544_v60, %v3542_v59 }
  0xeb   : > { %v3810_v61 = vpop.permute.xlu0 %2767 }
  0xec   : > { %1957 = vmatpush.bf16.msra.mxu0 %v2561_v38  ;;  %2657 = vmatpush.bf16.msra.mxu3 %v2561_v38 }
  0xed   : > { %2987 = vrot.lane.b32.xlu2 %v3479_v9, %s3249_s28  ;;  %2527 = vmatmul.msk.bf16.gmra.mxu1 %vm226_vm0, %v1807_v21  ;;  %v2996_v21 = vpack.i.bf16 %v3627_v31, %v3625_v28 }
  0xef   : > { %2982 = vrot.lane.b32.xlu1 %v3494_v25, %s3252_s6  ;;  %v3823_v57 = vpop.permute.xlu2 %2822 }
  0xf0   : > { %2658 = vmatpush.bf16.msrb.mxu3 %v3567_v1 }
  0xf1   : > { %2992 = vrot.lane.b32.xlu0 %v3540_v58, %s3251_s30  ;;  %v2773_v9 = vpop.permute.xlu1 %2772 }
  0xf2   : > { %v2775_v59 = vunpack.i.h.bf16 %v2773_v9  ;;  %v2774_v60 = vunpack.i.l.bf16 %v2773_v9  ;;  %v2649_v9 = vld [vmem:[%s3393_s24 + $0x78] sm:$0xff]  }
  0xf3   : > { %v2783_v2 = vpop.permute.xlu0 %2782  ;;  %v2633_v28 = vunpack.c.l.bf16 %v2649_v9  ;;  %v2634_v31 = vunpack.c.h.bf16 %v2649_v9  ;;  %v3884_v9 = vld [vmem:[#allocation2 + $0xda] sm:$0xff] }
  0xf4   : > { %v3836_v38 = vsel %vm1596_vm2, %v1570_v54, %v2774_v60  ;;  %v3839_v58 = vsel %vm1596_vm2, %v1571_v7, %v2775_v59  ;;  %v2785_v40 = vunpack.i.h.bf16 %v2783_v2  ;;  %v2784_v1 = vunpack.i.l.bf16 %v2783_v2 }
  0xf5   : > { %3002 = vrot.lane.b32.xlu2 %v3475_v4, %s3252_s6  ;;  %377 = vst.msk [vmem:[#allocation2 + $0x181] sm:$0xff] %vm226_vm0, %v2633_v28  ;;  %v2680_v28 = vunpack.i.h.bf16 %v3631_v36 }
  0xf6   : > { %v3846_v8 = vsel %vm1596_vm2, %v3617_v24, %v2785_v40  ;;  %v3850_v39 = vsel %vm1596_vm2, %v3620_v26, %v2784_v1  ;;  %378 = vst.msk [vmem:[#allocation2 + $0x189] sm:$0xff] %vm226_vm0, %v2634_v31  ;;  %v3858_v40 = vld [vmem:[#allocation2 + $0x152] sm:$0xff] }
  0xf7   : > { %2997 = vrot.lane.b32.xlu1 %v2996_v21, %s3253_s7  ;;  %v3853_v34 = vpop.permute.xlu2 %2837  ;;  %v3874_v54 = vpack.i.bf16 %v3860_v45, %v3858_v40 }
  0xf9   : > { %3007 = vrot.lane.b32.xlu0 %v2966_v48, %s3248_s25  ;;  %v2788_v4 = vpop.permute.xlu1 %2787 }
  0xfa   : > { %v2790_v2 = vunpack.i.h.bf16 %v2788_v4  ;;  %v2789_v24 = vunpack.i.l.bf16 %v2788_v4  ;;  %v380_v4 = vld [vmem:[#allocation2 + $0x8] sm:$0xff] }
  0xfb   : > { %v2798_v26 = vpop.permute.xlu0 %2797 }
  0xfc   : > { %v3864_v59 = vsel %vm1596_vm2, %v3678_v14, %v2789_v24  ;;  %v3868_v60 = vsel %vm1596_vm2, %v3675_v13, %v2790_v2  ;;  %v2800_v7 = vunpack.i.h.bf16 %v2798_v26  ;;  %v2799_v48 = vunpack.i.l.bf16 %v2798_v26  ;;  %v3886_v13 = vld [vmem:[#allocation2 + $0xe2] sm:$0xff] }
  0xfd   : > { %3017 = vrot.lane.b32.xlu2 %v3494_v25, %s3249_s28  ;;  %v2679_v25 = vunpack.i.l.bf16 %v3631_v36  ;;  %v379_v2 = vld [vmem:[#allocation2] sm:$0xff]  ;;  %v2759_v24 = vunpack.i.l.bf16 %v3805_v41 }
  0xfe   : > { %v3878_v1 = vsel %vm1596_vm2, %v3635_v37, %v2800_v7  ;;  %v3882_v14 = vsel %vm1596_vm2, %v3639_v27, %v2799_v48  ;;  %v1809_v37 = vpack.c.bf16 %v3886_v13, %v3884_v9  ;;  %v2760_v27 = vunpack.i.h.bf16 %v3805_v41 }
  0xff   : > { %4567 = vst [vmem:[#allocation10_spill] sm:$0xff] %v3878_v1  ;;  %3012 = vrot.lane.b32.xlu1 %v3764_v53, %s3250_s29  ;;  %v3892_v31 = vpop.permute.xlu2 %2852  ;;  %v1565_v7 = vsel %vm226_vm0, %v380_v4, %v2680_v28  ;;  %v1564_v48 = vsel %vm226_vm0, %v379_v2, %v2679_v25  ;;  %v522_v2 = vld [vmem:[#allocation2 + $0xc9] sm:$0xff] }
 0x100   : > { %2528 = vmatmul.msk.bf16.gmra.mxu1 %vm226_vm0, %v1809_v37  ;;  %v1598_v41 = vsel %vm1596_vm2, %v1565_v7, %v2760_v27  ;;  %v1597_v17 = vsel %vm1596_vm2, %v1564_v48, %v2759_v24  ;;  %v2809_v37 = vunpack.i.l.bf16 %v3801_v47  ;;  %v521_v47 = vld [vmem:[#allocation2 + $0xc1] sm:$0xff]  ;;  %v2825_v27 = vunpack.i.h.bf16 %v3823_v57 }
 0x101   : > { %3022 = vrot.lane.b32.xlu0 %v3874_v54, %s3251_s30  ;;  %v2803_v26 = vpop.permute.xlu1 %2802 }
 0x102   : > { %v2805_v36 = vunpack.i.h.bf16 %v2803_v26  ;;  %v2804_v53 = vunpack.i.l.bf16 %v2803_v26 }
 0x103   : > { %v2813_v43 = vpop.permute.xlu0 %2812 }
 0x104   : > { %v1631_v1 = vsel %vm1629_vm3, %v1598_v41, %v2805_v36  ;;  %v1630_v26 = vsel %vm1629_vm3, %v1597_v17, %v2804_v53  ;;  %v2815_v28 = vunpack.i.h.bf16 %v2813_v43  ;;  %v2814_v25 = vunpack.i.l.bf16 %v2813_v43 }
 0x105   : > { %3032 = vrot.lane.b32.xlu2 %v2996_v21, %s3250_s29  ;;  %v1663_v29 = vsel %vm1662_vm4, %v1630_v26, %v2809_v37  ;;  %v1664_v4 = vsel %vm1662_vm4, %v1631_v1, %v2810_v50  ;;  %v2824_v17 = vunpack.i.l.bf16 %v3823_v57  ;;  %v3041_v1 = vpack.i.bf16 %v522_v2, %v521_v47 }
 0x106   : > { %v1697_v36 = vsel %vm1695_vm5, %v1664_v4, %v2815_v28  ;;  %v1696_v53 = vsel %vm1695_vm5, %v1663_v29, %v2814_v25  ;;  %v2685_v37 = vunpack.i.h.bf16 %v3652_v46  ;;  %v2684_v26 = vunpack.i.l.bf16 %v3652_v46  ;;  %v3938_v25 = vpop.f32.mrf.mxu1  ;;  %v3940_v29 = vld [vmem:[#allocation2 + $0xf2] sm:$0xff]  ;;  %v3942_v4 = vld [vmem:[#allocation2 + $0xfa] sm:$0xff] }
 0x107   : > { %3027 = vrot.lane.b32.xlu1 %v3905_v44, %s3253_s7  ;;  %v3916_v33 = vpop.permute.xlu2 %2867  ;;  %v1811_v47 = vpack.c.bf16 %v3942_v4, %v3940_v29 }
 0x109   : > { %3037 = vrot.lane.b32.xlu0 %v3500_v30, %s3252_s6  ;;  %v2818_v43 = vpop.permute.xlu1 %2817  ;;  %v3932_v30 = vpack.i.bf16 %v3696_v56, %v3694_v55  ;;  %v2764_v55 = vunpack.i.l.bf16 %v3684_v19 }
 0x10a   : > { %v2820_v21 = vunpack.i.h.bf16 %v2818_v43  ;;  %v2819_v24 = vunpack.i.l.bf16 %v2818_v43 }
 0x10b   : > { %v2828_v50 = vpop.permute.xlu0 %2827 }
 0x10c   : > { %v1729_v7 = vsel %vm1728_vm6, %v1696_v53, %v2819_v24  ;;  %v1730_v48 = vsel %vm1728_vm6, %v1697_v36, %v2820_v21  ;;  %v2830_v2 = vunpack.i.h.bf16 %v2828_v50  ;;  %v2829_v46 = vunpack.i.l.bf16 %v2828_v50 }
 0x10d   : > { %3047 = vrot.lane.b32.xlu2 %v3554_v62, %s3251_s30  ;;  %v1762_v57 = vsel %vm1761_vm7, %v1729_v7, %v2824_v17  ;;  %v1763_v41 = vsel %vm1761_vm7, %v1730_v48, %v2825_v27  ;;  %v2765_v62 = vunpack.i.h.bf16 %v3684_v19  ;;  %v618_v27 = vld [vmem:[#allocation2 + $0xd9] sm:$0xff]  ;;  %v619_v17 = vld [vmem:[#allocation2 + $0xe1] sm:$0xff]  ;;  %v1566_v19 = vsel %vm226_vm0, %v3558_v63, %v2684_v26 }
 0x10e   : > { %v1794_v28 = vpack.c.bf16 %v1763_v41, %v1762_v57  ;;  %v1567_v21 = vsel %vm226_vm0, %v3560_v0, %v2685_v37  ;;  %v1599_v53 = vsel %vm1596_vm2, %v1566_v19, %v2764_v55  ;;  %v3960_v7 = vpack.i.bf16 %v619_v17, %v618_v27  ;;  %v567_v37 = vld [vmem:[#allocation2 + $0x16a] sm:$0xff] }
 0x10f   : > { %3042 = vrot.lane.b32.xlu1 %v3041_v1, %s3249_s28  ;;  %v3947_v56 = vpop.permute.xlu2 %2882  ;;  %v1600_v50 = vsel %vm1596_vm2, %v1567_v21, %v2765_v62  ;;  %v2840_v48 = vunpack.i.h.bf16 %v3853_v34  ;;  %v2839_v57 = vunpack.i.l.bf16 %v3853_v34  ;;  %v1632_v41 = vsel %vm1629_vm3, %v1599_v53, %v2829_v46  ;;  %v3970_v62 = vpop.f32.mrf.mxu1  ;;  %v535_v46 = vld [vmem:[#allocation2 + $0x169] sm:$0xff] }
 0x110   : > { %1958 = vmatmul.bf16.vlgmr.msra.gmra.mxu0 %v1794_v28  ;;  %2529 = vmatmul.msk.bf16.gmra.mxu1 %vm226_vm0, %v1811_v47  ;;  %v1633_v63 = vsel %vm1629_vm3, %v1600_v50, %v2830_v2  ;;  %v568_v28 = vld [vmem:[#allocation2 + $0x172] sm:$0xff] }
 0x111   : > { %3052 = vrot.lane.b32.xlu0 %v3932_v30, %s3253_s7  ;;  %v2833_v43 = vpop.permute.xlu1 %2832  ;;  %v536_v2 = vld [vmem:[#allocation2 + $0x171] sm:$0xff] }
 0x112   : > { %v2835_v24 = vunpack.i.h.bf16 %v2833_v43  ;;  %v2834_v36 = vunpack.i.l.bf16 %v2833_v43  ;;  %v3980_v43 = vpack.i.bf16 %v568_v28, %v567_v37  ;;  %v3071_v50 = vpack.i.bf16 %v536_v2, %v535_v46  ;;  %v632_v2 = vld [vmem:[#allocation2 + $0x181] sm:$0xff] }
 0x113   : > { %v2843_v1 = vpop.permute.xlu0 %2842  ;;  %v2769_v46 = vunpack.i.l.bf16 %v3810_v61 }
 0x114   : > { %v1665_v26 = vsel %vm1662_vm4, %v1632_v41, %v2834_v36  ;;  %v1666_v0 = vsel %vm1662_vm4, %v1633_v63, %v2835_v24  ;;  %v2845_v55 = vunpack.i.h.bf16 %v2843_v1  ;;  %v2844_v47 = vunpack.i.l.bf16 %v2843_v1  ;;  %v600_v24 = vld [vmem:[#allocation2 + $0x180] sm:$0xff]  ;;  %v601_v36 = vld [vmem:[#allocation2 + $0x188] sm:$0xff] }
 0x115   : > { %3062 = vrot.lane.b32.xlu2 %v3874_v54, %s3248_s25  ;;  %v1698_v27 = vsel %vm1695_vm5, %v1665_v26, %v2839_v57  ;;  %v1699_v17 = vsel %vm1695_vm5, %v1666_v0, %v2840_v48  ;;  %v2690_v57 = vunpack.i.h.bf16 %v3650_v42  ;;  %v3989_v26 = vld [vmem:[#allocation2 + $0x112] sm:$0xff]  ;;  %v2689_v0 = vunpack.i.l.bf16 %v3650_v42 }
 0x116   : > { %v1731_v1 = vsel %vm1728_vm6, %v1698_v27, %v2844_v47  ;;  %v1732_v41 = vsel %vm1728_vm6, %v1699_v17, %v2845_v55  ;;  %v3994_v37 = vpack.i.bf16 %v601_v36, %v600_v24  ;;  %v2770_v47 = vunpack.i.h.bf16 %v3810_v61  ;;  %v633_v27 = vld [vmem:[#allocation2 + $0x189] sm:$0xff] }
 0x117   : > { %3057 = vrot.lane.b32.xlu1 %v3960_v7, %s3252_s6  ;;  %v3974_v34 = vpop.permute.xlu2 %2897  ;;  %v4000_v17 = vpop.f32.mrf.mxu1  ;;  %v2854_v42 = vunpack.i.l.bf16 %v3892_v31  ;;  %v1568_v36 = vsel %vm226_vm0, %v3576_v5, %v2689_v0  ;;  %v1569_v61 = vsel %vm226_vm0, %v3578_v6, %v2690_v57  ;;  %v2870_v6 = vunpack.i.h.bf16 %v3916_v33 }
 0x118   : > { %v2869_v57 = vunpack.i.l.bf16 %v3916_v33 }
 0x119   : > { %3067 = vrot.lane.b32.xlu0 %v3905_v44, %s3250_s29  ;;  %v2848_v54 = vpop.permute.xlu1 %2847  ;;  %v3987_v44 = vld [vmem:[#allocation2 + $0x10a] sm:$0xff] }
 0x11a   : > { %v2850_v19 = vunpack.i.h.bf16 %v2848_v54  ;;  %v2849_v21 = vunpack.i.l.bf16 %v2848_v54  ;;  %v1813_v55 = vpack.c.bf16 %v3989_v26, %v3987_v44  ;;  %v2855_v54 = vunpack.i.h.bf16 %v3892_v31 }
 0x11b   : > { %v2858_v53 = vpop.permute.xlu0 %2857  ;;  %v1602_v31 = vsel %vm1596_vm2, %v1569_v61, %v2770_v47 }
 0x11c   : > { %v1764_v48 = vsel %vm1761_vm7, %v1731_v1, %v2849_v21  ;;  %v1765_v63 = vsel %vm1761_vm7, %v1732_v41, %v2850_v19  ;;  %v2860_v21 = vunpack.i.h.bf16 %v2858_v53  ;;  %v2859_v24 = vunpack.i.l.bf16 %v2858_v53 }
 0x11d   : > { %3077 = vrot.lane.b32.xlu2 %v3980_v43, %s3251_s30  ;;  %v1796_v28 = vpack.c.bf16 %v1765_v63, %v1764_v48  ;;  %v4013_v41 = vpack.i.bf16 %v633_v27, %v632_v2  ;;  %v1635_v5 = vsel %vm1629_vm3, %v1602_v31, %v2855_v54  ;;  %v620_v31 = vld [vmem:[#allocation2 + $0xf1] sm:$0xff] }
 0x11e   : > { %v1668_v2 = vsel %vm1662_vm4, %v1635_v5, %v2860_v21  ;;  %v2885_v5 = vunpack.i.h.bf16 %v3947_v56 }
 0x11f   : > { %3072 = vrot.lane.b32.xlu1 %v3071_v50, %s3249_s28  ;;  %v4005_v19 = vpop.permute.xlu2 %2912  ;;  %v1601_v50 = vsel %vm1596_vm2, %v1568_v36, %v2769_v46  ;;  %v4028_v46 = vpop.f32.mrf.mxu1  ;;  %v4040_v36 = vpack.i.bf16 %v3723_v16, %v3721_v15 }
 0x120   : > { %1963 = vmatmul.bf16.gmra.mxu0 %v1796_v28  ;;  %2530 = vmatmul.msk.bf16.gmra.mxu1 %vm226_vm0, %v1813_v55  ;;  %v1634_v63 = vsel %vm1629_vm3, %v1601_v50, %v2854_v42  ;;  %v621_v50 = vld [vmem:[#allocation2 + $0xf9] sm:$0xff] }
 0x121   : > { %3082 = vrot.lane.b32.xlu0 %v3994_v37, %s3253_s7  ;;  %v2863_v1 = vpop.permute.xlu1 %2862  ;;  %v1667_v28 = vsel %vm1662_vm4, %v1634_v63, %v2859_v24 }
 0x122   : > { %v2865_v53 = vunpack.i.h.bf16 %v2863_v1  ;;  %v2864_v48 = vunpack.i.l.bf16 %v2863_v1 }
 0x123   : > { %v2873_v0 = vpop.permute.xlu0 %2872 }
 0x124   : > { %v1700_v55 = vsel %vm1695_vm5, %v1667_v28, %v2864_v48  ;;  %v1701_v47 = vsel %vm1695_vm5, %v1668_v2, %v2865_v53  ;;  %v2875_v27 = vunpack.i.h.bf16 %v2873_v0  ;;  %v2874_v54 = vunpack.i.l.bf16 %v2873_v0 }
 0x125   : > { %3092 = vrot.lane.b32.xlu2 %v4013_v41, %s3252_s6  ;;  %v1733_v33 = vsel %vm1728_vm6, %v1700_v55, %v2869_v57  ;;  %v1734_v21 = vsel %vm1728_vm6, %v1701_v47, %v2870_v6  ;;  %v4054_v0 = vpack.i.bf16 %v621_v50, %v620_v31  ;;  %v2900_v2 = vunpack.i.h.bf16 %v3974_v34 }
 0x126   : > { %v1766_v48 = vsel %vm1761_vm7, %v1733_v33, %v2874_v54  ;;  %v1767_v63 = vsel %vm1761_vm7, %v1734_v21, %v2875_v27  ;;  %v2899_v55 = vunpack.i.l.bf16 %v3974_v34 }
 0x127   : > { %3087 = vrot.lane.b32.xlu1 %v3932_v30, %s3250_s29  ;;  %v4032_v42 = vpop.permute.xlu2 %2927  ;;  %v3101_v30 = vpack.i.bf16 %v3886_v13, %v3884_v9  ;;  %v1815_v9 = vpack.c.bf16 %v3717_v12, %v3715_v11  ;;  %v1798_v13 = vpack.c.bf16 %v1767_v63, %v1766_v48  ;;  %v4058_v6 = vpop.f32.mrf.mxu1  ;;  %v4084_v63 = vld [vmem:[#allocation2 + $0x182] sm:$0xff] }
 0x129   : > { %3097 = vrot.lane.b32.xlu0 %v3960_v7, %s3249_s28  ;;  %v2878_v24 = vpop.permute.xlu1 %2877  ;;  %v2884_v7 = vunpack.i.l.bf16 %v3947_v56 }
 0x12a   : > { %v2880_v61 = vunpack.i.h.bf16 %v2878_v24  ;;  %v2879_v1 = vunpack.i.l.bf16 %v2878_v24 }
 0x12b   : > { %v2888_v53 = vpop.permute.xlu0 %2887 }
 0x12c   : > { %v1637_v15 = vsel %vm1629_vm3, %v3839_v58, %v2880_v61  ;;  %v1636_v16 = vsel %vm1629_vm3, %v3836_v38, %v2879_v1  ;;  %v2890_v57 = vunpack.i.h.bf16 %v2888_v53  ;;  %v2889_v28 = vunpack.i.l.bf16 %v2888_v53 }
 0x12d   : > { %3107 = vrot.lane.b32.xlu2 %v4040_v36, %s3253_s7  ;;  %v1669_v58 = vsel %vm1662_vm4, %v1636_v16, %v2884_v7  ;;  %v1670_v38 = vsel %vm1662_vm4, %v1637_v15, %v2885_v5  ;;  %v4086_v5 = vld [vmem:[#allocation2 + $0x18a] sm:$0xff]  ;;  %v602_v16 = vld [vmem:[#allocation2 + $0x198] sm:$0xff] }
 0x12e   : > { %v1703_v27 = vsel %vm1695_vm5, %v1670_v38, %v2890_v57  ;;  %v1702_v54 = vsel %vm1695_vm5, %v1669_v58, %v2889_v28  ;;  %v2915_v57 = vunpack.i.h.bf16 %v4005_v19  ;;  %v2914_v28 = vunpack.i.l.bf16 %v4005_v19 }
 0x12f   : > { %3102 = vrot.lane.b32.xlu1 %v3101_v30, %s3251_s30  ;;  %v4061_v56 = vpop.permute.xlu2 %2942  ;;  %v4078_v31 = vpop.f32.mrf.mxu1  ;;  %v1817_v19 = vpack.c.bf16 %v3757_v51, %v3755_v22 }
 0x130   : > { %1968 = vmatmul.bf16.gmra.mxu0 %v1798_v13  ;;  %2531 = vmatmul.msk.bf16.gmra.mxu1 %vm226_vm0, %v1815_v9  ;;  %v603_v9 = vld [vmem:[#allocation2 + $0x1a0] sm:$0xff] }
 0x131   : > { %3112 = vrot.lane.b32.xlu0 %v4054_v0, %s3252_s6  ;;  %v2893_v11 = vpop.permute.xlu1 %2892 }
 0x132   : > { %v2895_v12 = vunpack.i.h.bf16 %v2893_v11  ;;  %v2894_v47 = vunpack.i.l.bf16 %v2893_v11  ;;  %v634_v11 = vld [vmem:[#allocation2 + $0x199] sm:$0xff] }
 0x133   : > { %v2903_v33 = vpop.permute.xlu0 %2902 }
 0x134   : > { %v1735_v21 = vsel %vm1728_vm6, %v1702_v54, %v2894_v47  ;;  %v1736_v24 = vsel %vm1728_vm6, %v1703_v27, %v2895_v12  ;;  %v2905_v53 = vunpack.i.h.bf16 %v2903_v33  ;;  %v2904_v48 = vunpack.i.l.bf16 %v2903_v33  ;;  %v635_v12 = vld [vmem:[#allocation2 + $0x1a1] sm:$0xff] }
 0x135   : > { %3122 = vrot.lane.b32.xlu2 %v3994_v37, %s3250_s29  ;;  %v1768_v34 = vsel %vm1761_vm7, %v1735_v21, %v2899_v55  ;;  %v1769_v61 = vsel %vm1761_vm7, %v1736_v24, %v2900_v2  ;;  %v3141_v55 = vpack.i.bf16 %v603_v9, %v602_v16  ;;  %v3151_v21 = vpack.i.bf16 %v635_v12, %v634_v11  ;;  %v622_v11 = vld [vmem:[#allocation2 + $0x109] sm:$0xff]  ;;  %v623_v12 = vld [vmem:[#allocation2 + $0x111] sm:$0xff] }
 0x136   : > { %v1800_v1 = vpack.c.bf16 %v1769_v61, %v1768_v34  ;;  %v1639_v58 = vsel %vm1629_vm3, %v3730_v23, %v2905_v53  ;;  %v1638_v38 = vsel %vm1629_vm3, %v3734_v32, %v2904_v48 }
 0x137   : > { %3117 = vrot.lane.b32.xlu1 %v3980_v43, %s3248_s25  ;;  %v4082_v50 = vpop.permute.xlu2 %2957  ;;  %v3131_v43 = vpack.i.bf16 %v4086_v5, %v4084_v63  ;;  %v4101_v47 = vpop.f32.mrf.mxu1 }
 0x139   : > { %3127 = vrot.lane.b32.xlu0 %v4013_v41, %s3249_s28  ;;  %v2908_v37 = vpop.permute.xlu1 %2907 }
 0x13a   : > { %v2910_v7 = vunpack.i.h.bf16 %v2908_v37  ;;  %v2909_v15 = vunpack.i.l.bf16 %v2908_v37  ;;  %v2930_v37 = vunpack.i.h.bf16 %v4032_v42 }
 0x13b   : > { %v2918_v13 = vpop.permute.xlu0 %2917 }
 0x13c   : > { %v1671_v41 = vsel %vm1662_vm4, %v1638_v38, %v2909_v15  ;;  %v1672_v2 = vsel %vm1662_vm4, %v1639_v58, %v2910_v7  ;;  %v2920_v27 = vunpack.i.h.bf16 %v2918_v13  ;;  %v2919_v54 = vunpack.i.l.bf16 %v2918_v13 }
 0x13d   : > { %3137 = vrot.lane.b32.xlu2 %v3101_v30, %s3248_s25  ;;  %v1704_v32 = vsel %vm1695_vm5, %v1671_v41, %v2914_v28  ;;  %v1705_v33 = vsel %vm1695_vm5, %v1672_v2, %v2915_v57  ;;  %v2929_v7 = vunpack.i.l.bf16 %v4032_v42  ;;  %v591_v57 = vld [vmem:[#allocation2 + $0x110] sm:$0xff]  ;;  %v2945_v28 = vunpack.i.h.bf16 %v4061_v56 }
 0x13e   : > { %v1737_v51 = vsel %vm1728_vm6, %v1704_v32, %v2919_v54  ;;  %v1738_v61 = vsel %vm1728_vm6, %v1705_v33, %v2920_v27  ;;  %v2944_v58 = vunpack.i.l.bf16 %v4061_v56  ;;  %v1641_v2 = vsel %vm1629_vm3, %v3846_v8, %v2930_v37 }
 0x13f   : > { %3132 = vrot.lane.b32.xlu1 %v3131_v43, %s3251_s30  ;;  %v4106_v23 = vpop.permute.xlu2 %2972  ;;  %v4119_v15 = vpop.f32.mrf.mxu1  ;;  %v590_v43 = vld [vmem:[#allocation2 + $0x108] sm:$0xff]  ;;  %v1640_v41 = vsel %vm1629_vm3, %v3850_v39, %v2929_v7  ;;  %v2739_v37 = vunpack.i.l.bf16 %v3736_v35  ;;  %v403_v7 = vld [vmem:[#allocation2 + $0x120] sm:$0xff] }
 0x140   : > { %1973 = vmatmul.bf16.gmra.mxu0 %v1800_v1  ;;  %2532 = vmatmul.msk.bf16.gmra.mxu1 %vm226_vm0, %v1817_v19  ;;  %v3166_v42 = vpack.i.bf16 %v591_v57, %v590_v43  ;;  %v592_v43 = vld [vmem:[#allocation2 + $0x120] sm:$0xff] }
 0x141   : > { %3142 = vrot.lane.b32.xlu0 %v3141_v55, %s3253_s7  ;;  %v2923_v30 = vpop.permute.xlu1 %2922 }
 0x142   : > { %v2925_v24 = vunpack.i.h.bf16 %v2923_v30  ;;  %v2924_v34 = vunpack.i.l.bf16 %v2923_v30  ;;  %v3171_v30 = vpack.i.bf16 %v623_v12, %v622_v11  ;;  %v625_v11 = vld [vmem:[#allocation2 + $0x129] sm:$0xff] }
 0x143   : > { %v2933_v22 = vpop.permute.xlu0 %2932 }
 0x144   : > { %v1770_v53 = vsel %vm1761_vm7, %v1737_v51, %v2924_v34  ;;  %v1771_v1 = vsel %vm1761_vm7, %v1738_v61, %v2925_v24  ;;  %v2935_v16 = vunpack.i.h.bf16 %v2933_v22  ;;  %v2934_v9 = vunpack.i.l.bf16 %v2933_v22 }
 0x145   : > { %v1802_v48 = vpack.c.bf16 %v1771_v1, %v1770_v53  ;;  %3152 = vrot.lane.b32.xlu2 %v3151_v21, %s3252_s6  ;;  %v2740_v1 = vunpack.i.h.bf16 %v3736_v35  ;;  %v2960_v35 = vunpack.i.h.bf16 %v4082_v50 }
 0x146   : > { %v1673_v19 = vsel %vm1662_vm4, %v1640_v41, %v2934_v9  ;;  %v1674_v27 = vsel %vm1662_vm4, %v1641_v2, %v2935_v16  ;;  %v404_v16 = vld [vmem:[#allocation2 + $0x128] sm:$0xff] }
 0x147   : > { %3147 = vrot.lane.b32.xlu1 %v4040_v36, %s3250_s29  ;;  %v4123_v13 = vpop.permute.xlu2 %2987  ;;  %v4144_v22 = vpop.f32.mrf.mxu1 }
 0x149   : > { %3157 = vrot.lane.b32.xlu0 %v4054_v0, %s3249_s28  ;;  %v2938_v38 = vpop.permute.xlu1 %2937  ;;  %v3161_v0 = vpack.i.bf16 %v3942_v4, %v3940_v29  ;;  %v1819_v29 = vpack.c.bf16 %v3860_v45, %v3858_v40 }
 0x14a   : > { %v2940_v36 = vunpack.i.h.bf16 %v2938_v38  ;;  %v2939_v55 = vunpack.i.l.bf16 %v2938_v38  ;;  %v2959_v38 = vunpack.i.l.bf16 %v4082_v50 }
 0x14b   : > { %v2948_v56 = vpop.permute.xlu0 %2947 }
 0x14c   : > { %v1706_v54 = vsel %vm1695_vm5, %v1673_v19, %v2939_v55  ;;  %v1707_v32 = vsel %vm1695_vm5, %v1674_v27, %v2940_v36  ;;  %v2950_v39 = vunpack.i.h.bf16 %v2948_v56  ;;  %v2949_v33 = vunpack.i.l.bf16 %v2948_v56  ;;  %v624_v55 = vld [vmem:[#allocation2 + $0x121] sm:$0xff] }
 0x14d   : > { %v1739_v8 = vsel %vm1728_vm6, %v1706_v54, %v2944_v58  ;;  %v1740_v21 = vsel %vm1728_vm6, %v1707_v32, %v2945_v28  ;;  %3167 = vrot.lane.b32.xlu2 %v3166_v42, %s3253_s7  ;;  %v1589_v28 = vsel %vm226_vm0, %v404_v16, %v2740_v1  ;;  %v1588_v58 = vsel %vm226_vm0, %v403_v7, %v2739_v37 }
 0x14e   : > { %v1772_v24 = vsel %vm1761_vm7, %v1739_v8, %v2949_v33  ;;  %v1773_v34 = vsel %vm1761_vm7, %v1740_v21, %v2950_v39  ;;  %v3191_v56 = vpack.i.bf16 %v3989_v26, %v3987_v44  ;;  %v3201_v39 = vpack.i.bf16 %v625_v11, %v624_v55  ;;  %v562_v55 = vld [vmem:[#allocation2 + $0x12a] sm:$0xff] }
 0x14f   : > { %3162 = vrot.lane.b32.xlu1 %v3161_v0, %s3251_s30  ;;  %v4149_v4 = vpop.permute.xlu2 %3002  ;;  %v1804_v51 = vpack.c.bf16 %v1773_v34, %v1772_v24  ;;  %v4156_v45 = vpop.f32.mrf.mxu1  ;;  %v2974_v8 = vunpack.i.l.bf16 %v4106_v23 }
 0x150   : > { %1978 = vmatmul.bf16.gmra.mxu0 %v1802_v48  ;;  %2533 = vmatmul.msk.bf16.gmra.mxu1 %vm226_vm0, %v1819_v29  ;;  %v593_v48 = vld [vmem:[#allocation2 + $0x128] sm:$0xff]  ;;  %v3005_v11 = vunpack.i.h.bf16 %v4149_v4 }
 0x151   : > { %v2953_v61 = vpop.permute.xlu1 %2952  ;;  %3172 = vrot.lane.b32.xlu0 %v3171_v30, %s3252_s6  ;;  %v3196_v36 = vpack.i.bf16 %v593_v48, %v592_v43  ;;  %v2989_v48 = vunpack.i.l.bf16 %v4123_v13 }
 0x152   : > { %v2955_v9 = vunpack.i.h.bf16 %v2953_v61  ;;  %v2954_v40 = vunpack.i.l.bf16 %v2953_v61 }
 0x153   : > { %v2963_v53 = vpop.permute.xlu0 %2962 }
 0x154   : > { %v1621_v41 = vsel %vm1596_vm2, %v1588_v58, %v2954_v40  ;;  %v2965_v12 = vunpack.i.h.bf16 %v2963_v53  ;;  %v2964_v19 = vunpack.i.l.bf16 %v2963_v53  ;;  %v594_v58 = vld [vmem:[#allocation2 + $0x138] sm:$0xff] }
 0x155   : > { %3182 = vrot.lane.b32.xlu2 %v3166_v42, %s3250_s29  ;;  %v1622_v42 = vsel %vm1596_vm2, %v1589_v28, %v2955_v9 }
 0x156   : > { %v1655_v50 = vsel %vm1629_vm3, %v1622_v42, %v2960_v35  ;;  %v595_v35 = vld [vmem:[#allocation2 + $0x140] sm:$0xff] }
 0x157   : > { %3177 = vrot.lane.b32.xlu1 %v3161_v0, %s3248_s25  ;;  %v4159_v57 = vpop.permute.xlu2 %3017  ;;  %v1654_v0 = vsel %vm1629_vm3, %v1621_v41, %v2959_v38  ;;  %v1688_v24 = vsel %vm1662_vm4, %v1655_v50, %v2965_v12 }
 0x158   : > { %v1687_v21 = vsel %vm1662_vm4, %v1654_v0, %v2964_v19  ;;  %v3226_v19 = vpack.i.bf16 %v595_v35, %v594_v58 }
 0x159   : > { %v2968_v2 = vpop.permute.xlu1 %2967  ;;  %3187 = vrot.lane.b32.xlu0 %v3171_v30, %s3249_s28  ;;  %v2975_v30 = vunpack.i.h.bf16 %v4106_v23 }
 0x15a   : > { %v2970_v54 = vunpack.i.h.bf16 %v2968_v2  ;;  %v2969_v32 = vunpack.i.l.bf16 %v2968_v2  ;;  %v4173_v33 = vpop.f32.mrf.mxu1 }
 0x15b   : > { %v2978_v27 = vpop.permute.xlu0 %2977 }
 0x15c   : > { %v1720_v44 = vsel %vm1695_vm5, %v1687_v21, %v2969_v32  ;;  %v1721_v26 = vsel %vm1695_vm5, %v1688_v24, %v2970_v54  ;;  %v2980_v1 = vunpack.i.h.bf16 %v2978_v27  ;;  %v2979_v23 = vunpack.i.l.bf16 %v2978_v27  ;;  %v627_v54 = vld [vmem:[#allocation2 + $0x141] sm:$0xff] }
 0x15d   : > { %3197 = vrot.lane.b32.xlu2 %v3196_v36, %s3253_s7  ;;  %v1753_v7 = vsel %vm1728_vm6, %v1720_v44, %v2974_v8  ;;  %v1754_v16 = vsel %vm1728_vm6, %v1721_v26, %v2975_v30 }
 0x15e   : > { %v1642_v38 = vsel %vm1629_vm3, %v3864_v59, %v2979_v23  ;;  %v1643_v41 = vsel %vm1629_vm3, %v3868_v60, %v2980_v1 }
 0x15f   : > { %3192 = vrot.lane.b32.xlu1 %v3191_v56, %s3251_s30  ;;  %v4182_v34 = vpop.permute.xlu2 %3032  ;;  %v1675_v59 = vsel %vm1662_vm4, %v1642_v38, %v2989_v48 }
 0x160   : > { %1983 = vmatmul.bf16.gmra.mxu0 %v1804_v51  ;;  %v2990_v51 = vunpack.i.h.bf16 %v4123_v13  ;;  %v3004_v13 = vunpack.i.l.bf16 %v4149_v4 }
 0x161   : > { %v2983_v29 = vpop.permute.xlu1 %2982  ;;  %3202 = vrot.lane.b32.xlu0 %v3201_v39, %s3252_s6 }
 0x162   : > { %v2985_v61 = vunpack.i.h.bf16 %v2983_v29  ;;  %v2984_v53 = vunpack.i.l.bf16 %v2983_v29  ;;  %v4192_v28 = vpop.f32.mrf.mxu1  ;;  %v1676_v27 = vsel %vm1662_vm4, %v1643_v41, %v2990_v51 }
 0x163   : > { %v2993_v37 = vpop.permute.xlu0 %2992 }
 0x164   : > { %v1786_v9 = vsel %vm1761_vm7, %v1753_v7, %v2984_v53  ;;  %v1787_v40 = vsel %vm1761_vm7, %v1754_v16, %v2985_v61  ;;  %v2995_v42 = vunpack.i.h.bf16 %v2993_v37  ;;  %v2994_v2 = vunpack.i.l.bf16 %v2993_v37 }
 0x165   : > { %v1818_v43 = vpack.c.bf16 %v1787_v40, %v1786_v9  ;;  %3212 = vrot.lane.b32.xlu2 %v3196_v36, %s3250_s29  ;;  %v561_v36 = vld [vmem:[#allocation2 + $0x122] sm:$0xff]  ;;  %v3020_v9 = vunpack.i.h.bf16 %v4159_v57  ;;  %v3019_v40 = vunpack.i.l.bf16 %v4159_v57 }
 0x166   : > { %v1708_v32 = vsel %vm1695_vm5, %v1675_v59, %v2994_v2  ;;  %v1709_v30 = vsel %vm1695_vm5, %v1676_v27, %v2995_v42  ;;  %v3221_v4 = vpack.i.bf16 %v562_v55, %v561_v36 }
 0x167   : > { %3207 = vrot.lane.b32.xlu1 %v3191_v56, %s3248_s25  ;;  %2018 = vmatmul.bf16.vlgmr.msra.gmra.mxu3 %v1818_v43  ;;  %v4204_v50 = vpop.permute.xlu2 %3047  ;;  %v626_v56 = vld [vmem:[#allocation2 + $0x139] sm:$0xff] }
 0x168   : > { %v3231_v26 = vpack.i.bf16 %v627_v54, %v626_v56 }
 0x169   : > { %v2998_v12 = vpop.permute.xlu1 %2997  ;;  %3217 = vrot.lane.b32.xlu0 %v3201_v39, %s3249_s28 }
 0x16a   : > { %v3000_v60 = vunpack.i.h.bf16 %v2998_v12  ;;  %v2999_v0 = vunpack.i.l.bf16 %v2998_v12  ;;  %v4214_v1 = vpop.f32.mrf.mxu1 }
 0x16b   : > { %v3008_v8 = vpop.permute.xlu0 %3007 }
 0x16c   : > { %v1741_v21 = vsel %vm1728_vm6, %v1708_v32, %v2999_v0  ;;  %v1742_v39 = vsel %vm1728_vm6, %v1709_v30, %v3000_v60  ;;  %v3010_v61 = vunpack.i.h.bf16 %v3008_v8  ;;  %v3009_v53 = vunpack.i.l.bf16 %v3008_v8  ;;  %v2570_v60 = vld [vmem:[%s4556_s3] sm:$0xff] }
 0x16d   : > { %v1774_v24 = vsel %vm1761_vm7, %v1741_v21, %v3004_v13  ;;  %v1775_v44 = vsel %vm1761_vm7, %v1742_v39, %v3005_v11  ;;  %3227 = vrot.lane.b32.xlu2 %v3226_v19, %s3253_s7  ;;  %2307 = vmatpush.bf16.msra.mxu2 %v2570_v60  ;;  %v3035_v30 = vunpack.i.h.bf16 %v4182_v34  ;;  %v3034_v8 = vunpack.i.l.bf16 %v4182_v34 }
 0x16e   : > { %v1806_v29 = vpack.c.bf16 %v1775_v44, %v1774_v24  ;;  %v1624_v43 = vsel %vm1596_vm2, %v3782_v49, %v3010_v61  ;;  %v1623_v51 = vsel %vm1596_vm2, %v3785_v20, %v3009_v53  ;;  %2659 = vmatpush.bf16.msra.mxu3 %v2570_v60  ;;  %v3049_v61 = vunpack.i.l.bf16 %v4204_v50 }
 0x16f   : > { %3222 = vrot.lane.b32.xlu1 %v3221_v4, %s3251_s30  ;;  %v4223_v48 = vpop.permute.xlu2 %3062  ;;  %v1644_v44 = vsel %vm1629_vm3, %v3773_v18, %v3034_v8  ;;  %s2560_s30 = sshll.u32 %s4577_s19, 8 }
 0x170   : > { %1988 = vmatmul.bf16.gmra.mxu0 %v1806_v29  ;;  %v3050_v29 = vunpack.i.h.bf16 %v4204_v50  ;;  %s4439_s10 = scalar_lea.vmem %s4558_s5, %s2560_s30 }
 0x171   : > { %v3013_v23 = vpop.permute.xlu1 %3012  ;;  %3232 = vrot.lane.b32.xlu0 %v3231_v26, %s3252_s6  ;;  %v1645_v26 = vsel %vm1629_vm3, %v3770_v3, %v3035_v30 }
 0x172   : > { %v3015_v37 = vunpack.i.h.bf16 %v3013_v23  ;;  %v3014_v7 = vunpack.i.l.bf16 %v3013_v23  ;;  %v4229_v11 = vpop.f32.mrf.mxu1 }
 0x173   : > { %v3023_v16 = vpop.permute.xlu0 %3022 }
 0x174   : > { %v1656_v58 = vsel %vm1629_vm3, %v1623_v51, %v3014_v7  ;;  %v1657_v35 = vsel %vm1629_vm3, %v1624_v43, %v3015_v37  ;;  %v3025_v38 = vunpack.i.h.bf16 %v3023_v16  ;;  %v3024_v41 = vunpack.i.l.bf16 %v3023_v16 }
 0x175   : > { %v1689_v42 = vsel %vm1662_vm4, %v1656_v58, %v3019_v40  ;;  %v1690_v2 = vsel %vm1662_vm4, %v1657_v35, %v3020_v9 }
 0x176   : > { %v1722_v49 = vsel %vm1695_vm5, %v1689_v42, %v3024_v41  ;;  %v1723_v20 = vsel %vm1695_vm5, %v1690_v2, %v3025_v38  ;;  %v4263_v41 = vld [vmem:[%s4555_s2] ss:$0 sm:$0xff] }
 0x177   : > { %v4238_v0 = vpop.permute.xlu2 %3077 }
 0x179   : > { %v3028_v36 = vpop.permute.xlu1 %3027 }
 0x17a   : > { %v3030_v57 = vunpack.i.h.bf16 %v3028_v36  ;;  %v3029_v55 = vunpack.i.l.bf16 %v3028_v36  ;;  %v3065_v36 = vunpack.i.h.bf16 %v4223_v48 }
 0x17b   : > { %v3038_v13 = vpop.permute.xlu0 %3037 }
 0x17c   : > { %v3040_v12 = vunpack.i.h.bf16 %v3038_v13  ;;  %v3039_v19 = vunpack.i.l.bf16 %v3038_v13  ;;  %v1755_v59 = vsel %vm1728_vm6, %v1722_v49, %v3029_v55  ;;  %v1756_v27 = vsel %vm1728_vm6, %v1723_v20, %v3030_v57 }
 0x17d   : > { %v4250_v53 = vpop.f32.mrf.mxu1  ;;  %v3064_v57 = vunpack.i.l.bf16 %v4223_v48  ;;  %v3080_v13 = vunpack.i.h.bf16 %v4238_v0 }
 0x17e   : > { %v1788_v56 = vsel %vm1761_vm7, %v1755_v59, %v3039_v19  ;;  %v1789_v54 = vsel %vm1761_vm7, %v1756_v27, %v3040_v12  ;;  %v3079_v12 = vunpack.i.l.bf16 %v4238_v0  ;;  %v1626_v27 = vsel %vm1596_vm2, %v3667_v10, %v3065_v36 }
 0x17f   : > { %v1820_v32 = vpack.c.bf16 %v1789_v54, %v1788_v56  ;;  %v3093_v16 = vpop.permute.xlu2 %3092  ;;  %v1625_v60 = vsel %vm1596_vm2, %v3671_v52, %v3064_v57 }
 0x180   : > { %v3094_v30 = vunpack.i.l.bf16 %v3093_v16 }
 0x181   : > { %2023 = vmatmul.bf16.gmra.mxu3 %v1820_v32  ;;  %v3043_v4 = vpop.permute.xlu1 %3042  ;;  %v3095_v32 = vunpack.i.h.bf16 %v3093_v16 }
 0x182   : > { %v3045_v21 = vunpack.i.h.bf16 %v3043_v4  ;;  %v3044_v39 = vunpack.i.l.bf16 %v3043_v4 }
 0x183   : > { %v3053_v24 = vpop.permute.xlu0 %3052 }
 0x184   : > { %v1677_v23 = vsel %vm1662_vm4, %v1644_v44, %v3044_v39  ;;  %v1678_v34 = vsel %vm1662_vm4, %v1645_v26, %v3045_v21  ;;  %v3055_v37 = vunpack.i.h.bf16 %v3053_v24  ;;  %v3054_v7 = vunpack.i.l.bf16 %v3053_v24 }
 0x185   : > { %v1710_v9 = vsel %vm1695_vm5, %v1677_v23, %v3049_v61  ;;  %v1711_v18 = vsel %vm1695_vm5, %v1678_v34, %v3050_v29  ;;  %v4267_v55 = vpop.f32.mrf.mxu1 }
 0x186   : > { %v1743_v58 = vsel %vm1728_vm6, %v1710_v9, %v3054_v7  ;;  %v1744_v50 = vsel %vm1728_vm6, %v1711_v18, %v3055_v37 }
 0x187   : > { %v3108_v56 = vpop.permute.xlu2 %3107 }
 0x189   : > { %v3058_v40 = vpop.permute.xlu1 %3057 }
 0x18a   : > { %v3060_v43 = vunpack.i.h.bf16 %v3058_v40  ;;  %v3059_v3 = vunpack.i.l.bf16 %v3058_v40 }
 0x18b   : > { %v3068_v51 = vpop.permute.xlu0 %3067 }
 0x18c   : > { %v1776_v35 = vsel %vm1761_vm7, %v1743_v58, %v3059_v3  ;;  %v1777_v38 = vsel %vm1761_vm7, %v1744_v50, %v3060_v43  ;;  %v3070_v49 = vunpack.i.h.bf16 %v3068_v51  ;;  %v3069_v20 = vunpack.i.l.bf16 %v3068_v51 }
 0x18d   : > { %v1959_v42 = vpop.f32.mrf.mxu0  ;;  %v1808_v2 = vpack.c.bf16 %v1777_v38, %v1776_v35  ;;  %v4289_v18 = vpop.f32.mrf.mxu1 }
 0x18e   : > { %v1960_v19 = vadd.f32 %v4263_v41, %v1959_v42  ;;  %v1659_v8 = vsel %vm1629_vm3, %v1626_v27, %v3070_v49  ;;  %v1658_v4 = vsel %vm1629_vm3, %v1625_v60, %v3069_v20  ;;  %v4568_v49 = vld [vmem:[#allocation10_spill] sm:$0xff] }
 0x18f   : > { %1993 = vmatmul.bf16.gmra.mxu0 %v1808_v2  ;;  %v3123_v51 = vpop.permute.xlu2 %3122 }
 0x190   : > { %v2049_v10 = vadd.f32 %v3938_v25, %v1960_v19 }
 0x191   : > { %v3073_v59 = vpop.permute.xlu1 %3072 }
 0x192   : > { %v3075_v48 = vunpack.i.h.bf16 %v3073_v59  ;;  %v3074_v54 = vunpack.i.l.bf16 %v3073_v59  ;;  %v2160_v25 = vmul.f32 0.01, %v2049_v10  ;;  %vm2128_vm8 = vcmp.ge.f32.partialorder %v2049_v10, 0.0 }
 0x193   : > { %v3083_v21 = vpop.permute.xlu0 %3082 }
 0x194   : > { %v1691_v0 = vsel %vm1662_vm4, %v1658_v4, %v3074_v54  ;;  %v1692_v39 = vsel %vm1662_vm4, %v1659_v8, %v3075_v48  ;;  %v3085_v24 = vunpack.i.h.bf16 %v3083_v21  ;;  %v3084_v44 = vunpack.i.l.bf16 %v3083_v21 }
 0x195   : > { %v1961_v26 = vpop.f32.mrf.mxu0  ;;  %v1724_v52 = vsel %vm1695_vm5, %v1691_v0, %v3079_v12  ;;  %v1725_v29 = vsel %vm1695_vm5, %v1692_v39, %v3080_v13  ;;  %v2192_v38 = vsel %vm2128_vm8, %v2049_v10, %v2160_v25  ;;  %v3110_v13 = vunpack.i.h.bf16 %v3108_v56  ;;  %v4297_v48 = vpop.f32.mrf.mxu1 }
 0x196   : > { %v1962_v61 = vadd.f32 %v4263_v41, %v1961_v26  ;;  %v1757_v23 = vsel %vm1728_vm6, %v1724_v52, %v3084_v44  ;;  %v1758_v34 = vsel %vm1728_vm6, %v1725_v29, %v3085_v24  ;;  %v3109_v12 = vunpack.i.l.bf16 %v3108_v56 }
 0x197   : > { %v1790_v37 = vsel %vm1761_vm7, %v1757_v23, %v3094_v30  ;;  %v1791_v7 = vsel %vm1761_vm7, %v1758_v34, %v3095_v32  ;;  %v4306_v44 = vpop.permute.xlu2 %3137  ;;  %v3124_v25 = vunpack.i.l.bf16 %v3123_v51 }
 0x198   : > { %v2051_v16 = vadd.f32 %v3970_v62, %v1962_v61  ;;  %v1822_v9 = vpack.c.bf16 %v1791_v7, %v1790_v37 }
 0x199   : > { %v3088_v40 = vpop.permute.xlu1 %3087 }
 0x19a   : > { %vm2129_vm9 = vcmp.ge.f32.partialorder %v2051_v16, 0.0  ;;  %v2161_v43 = vmul.f32 0.01, %v2051_v16  ;;  %2028 = vmatmul.bf16.gmra.mxu3 %v1822_v9  ;;  %v3090_v58 = vunpack.i.h.bf16 %v3088_v40  ;;  %v3089_v50 = vunpack.i.l.bf16 %v3088_v40 }
 0x19b   : > { %v3098_v3 = vpop.permute.xlu0 %3097  ;;  %v3125_v9 = vunpack.i.h.bf16 %v3123_v51 }
 0x19c   : > { %v2193_v42 = vsel %vm2129_vm9, %v2051_v16, %v2161_v43  ;;  %v3100_v36 = vunpack.i.h.bf16 %v3098_v3  ;;  %v3099_v57 = vunpack.i.l.bf16 %v3098_v3  ;;  %v1646_v62 = vsel %vm1629_vm3, %v3882_v14, %v3089_v50  ;;  %v4569_v43 = vld [vmem:[#allocation9_spill] sm:$0xff] }
 0x19d   : > { %v1964_v35 = vpop.f32.mrf.mxu0  ;;  %v2224_v2 = vpack.c.bf16 %v2193_v42, %v2192_v38  ;;  %v1647_v20 = vsel %vm1629_vm3, %v4568_v49, %v3090_v58  ;;  %v4312_v40 = vpop.f32.mrf.mxu1  ;;  %v4570_v58 = vld [vmem:[#allocation8_spill] sm:$0xff] }
 0x19e   : > { %v1965_v19 = vadd.f32 %v4263_v41, %v1964_v35  ;;  %v1679_v54 = vsel %vm1662_vm4, %v1646_v62, %v3099_v57  ;;  %v1680_v32 = vsel %vm1662_vm4, %v1647_v20, %v3100_v36 }
 0x19f   : > { %2541 = vmatmul.msk.bf16.vlgmr.msra.gmra.mxu2 %vm226_vm0, %v2224_v2  ;;  %v3153_v2 = vpop.permute.xlu2 %3152 }
 0x1a0   : > { %v2054_v56 = vadd.f32 %v4000_v17, %v1965_v19 }
 0x1a1   : > { %v3103_v59 = vpop.permute.xlu1 %3102 }
 0x1a2   : > { %v3105_v27 = vunpack.i.h.bf16 %v3103_v59  ;;  %v3104_v60 = vunpack.i.l.bf16 %v3103_v59  ;;  %vm2130_vm10 = vcmp.ge.f32.partialorder %v2054_v56, 0.0  ;;  %v2162_v23 = vmul.f32 0.01, %v2054_v56 }
 0x1a3   : > { %v3113_v30 = vpop.permute.xlu0 %3112 }
 0x1a4   : > { %v1712_v14 = vsel %vm1695_vm5, %v1679_v54, %v3104_v60  ;;  %v1713_v8 = vsel %vm1695_vm5, %v1680_v32, %v3105_v27  ;;  %v3115_v4 = vunpack.i.h.bf16 %v3113_v30  ;;  %v3114_v21 = vunpack.i.l.bf16 %v3113_v30 }
 0x1a5   : > { %v1966_v0 = vpop.f32.mrf.mxu0  ;;  %v1745_v39 = vsel %vm1728_vm6, %v1712_v14, %v3109_v12  ;;  %v1746_v24 = vsel %vm1728_vm6, %v1713_v8, %v3110_v13  ;;  %v2194_v35 = vsel %vm2130_vm10, %v2054_v56, %v2162_v23  ;;  %v3155_v60 = vunpack.i.h.bf16 %v3153_v2 }
 0x1a6   : > { %v1967_v10 = vadd.f32 %v4263_v41, %v1966_v0  ;;  %v1778_v26 = vsel %vm1761_vm7, %v1745_v39, %v3114_v21  ;;  %v1779_v52 = vsel %vm1761_vm7, %v1746_v24, %v3115_v4  ;;  %v3154_v54 = vunpack.i.l.bf16 %v3153_v2 }
 0x1a7   : > { %v1810_v29 = vpack.c.bf16 %v1779_v52, %v1778_v26  ;;  %v3168_v24 = vpop.permute.xlu2 %3167 }
 0x1a8   : > { %v2056_v61 = vadd.f32 %v4028_v46, %v1967_v10  ;;  %v4330_v10 = vpop.f32.mrf.mxu1 }
 0x1a9   : > { %v3118_v34 = vpop.permute.xlu1 %3117  ;;  %1998 = vmatmul.bf16.gmra.mxu0 %v1810_v29 }
 0x1aa   : > { %vm2131_vm11 = vcmp.ge.f32.partialorder %v2056_v61, 0.0  ;;  %v2163_v17 = vmul.f32 0.01, %v2056_v61  ;;  %v3120_v37 = vunpack.i.h.bf16 %v3118_v34  ;;  %v3119_v7 = vunpack.i.l.bf16 %v3118_v34 }
 0x1ab   : > { %v3128_v16 = vpop.permute.xlu0 %3127 }
 0x1ac   : > { %v1627_v3 = vsel %vm1596_vm2, %v4569_v43, %v3119_v7  ;;  %v1628_v50 = vsel %vm1596_vm2, %v4570_v58, %v3120_v37  ;;  %v2195_v38 = vsel %vm2131_vm11, %v2056_v61, %v2163_v17  ;;  %v3130_v36 = vunpack.i.h.bf16 %v3128_v16 }
 0x1ad   : > { %v1969_v46 = vpop.f32.mrf.mxu0  ;;  %v2225_v42 = vpack.c.bf16 %v2195_v38, %v2194_v35  ;;  %v3129_v57 = vunpack.i.l.bf16 %v3128_v16  ;;  %v1660_v62 = vsel %vm1629_vm3, %v1627_v3, %v3124_v25  ;;  %v1661_v49 = vsel %vm1629_vm3, %v1628_v50, %v3125_v9  ;;  %v4571_v50 = vld [vmem:[#allocation5_spill] sm:$0xff] }
 0x1ae   : > { %v1970_v51 = vadd.f32 %v4263_v41, %v1969_v46  ;;  %v1694_v59 = vsel %vm1662_vm4, %v1661_v49, %v3130_v36  ;;  %v3140_v17 = vunpack.i.h.bf16 %v4306_v44  ;;  %v3139_v37 = vunpack.i.l.bf16 %v4306_v44  ;;  %v4572_v46 = vld [vmem:[#allocation4_spill] sm:$0xff] }
 0x1af   : > { %2542 = vmatmul.msk.bf16.gmra.mxu2 %vm226_vm0, %v2225_v42  ;;  %v1693_v19 = vsel %vm1662_vm4, %v1660_v62, %v3129_v57  ;;  %v3183_v44 = vpop.permute.xlu2 %3182 }
 0x1b0   : > { %v2059_v4 = vadd.f32 %v4058_v6, %v1970_v51  ;;  %v1616_v35 = vsel %vm1596_vm2, %v4572_v46, %v3140_v17  ;;  %v4344_v57 = vpop.f32.mrf.mxu1  ;;  %v3170_v51 = vunpack.i.h.bf16 %v3168_v24 }
 0x1b1   : > { %v3133_v20 = vpop.permute.xlu1 %3132 }
 0x1b2   : > { %v3135_v13 = vunpack.i.h.bf16 %v3133_v20  ;;  %v3134_v12 = vunpack.i.l.bf16 %v3133_v20  ;;  %v2164_v23 = vmul.f32 0.01, %v2059_v4  ;;  %vm2132_vm12 = vcmp.ge.f32.partialorder %v2059_v4, 0.0 }
 0x1b3   : > { %v3143_v27 = vpop.permute.xlu0 %3142  ;;  %v3169_v20 = vunpack.i.l.bf16 %v3168_v24 }
 0x1b4   : > { %v1726_v32 = vsel %vm1695_vm5, %v1693_v19, %v3134_v12  ;;  %v1727_v30 = vsel %vm1695_vm5, %v1694_v59, %v3135_v13  ;;  %v3145_v14 = vunpack.i.h.bf16 %v3143_v27  ;;  %v3144_v8 = vunpack.i.l.bf16 %v3143_v27 }
 0x1b5   : > { %v1971_v21 = vpop.f32.mrf.mxu0  ;;  %v2196_v43 = vsel %vm2132_vm12, %v2059_v4, %v2164_v23 }
 0x1b6   : > { %v1972_v56 = vadd.f32 %v4263_v41, %v1971_v21  ;;  %v1759_v0 = vsel %vm1728_vm6, %v1726_v32, %v3144_v8  ;;  %v1760_v39 = vsel %vm1728_vm6, %v1727_v30, %v3145_v14 }
 0x1b7   : > { %v1792_v26 = vsel %vm1761_vm7, %v1759_v0, %v3154_v54  ;;  %v1793_v52 = vsel %vm1761_vm7, %v1760_v39, %v3155_v60  ;;  %v662_v60 = vld [vmem:[#allocation2 + $0x16a] sm:$0xff]  ;;  %v663_v54 = vld [vmem:[#allocation2 + $0x172] sm:$0xff] }
 0x1b8   : > { %v2061_v29 = vadd.f32 %v4078_v31, %v1972_v56  ;;  %v1824_v61 = vpack.c.bf16 %v1793_v52, %v1792_v26  ;;  %v1615_v31 = vsel %vm1596_vm2, %v4571_v50, %v3139_v37  ;;  %v1821_v52 = vpack.c.bf16 %v663_v54, %v662_v60  ;;  %v3198_v37 = vpop.permute.xlu2 %3197 }
 0x1b9   : > { %v3148_v34 = vpop.permute.xlu1 %3147 }
 0x1ba   : > { %vm2133_vm13 = vcmp.ge.f32.partialorder %v2061_v29, 0.0  ;;  %v2165_v6 = vmul.f32 0.01, %v2061_v29  ;;  %2033 = vmatmul.bf16.gmra.mxu3 %v1824_v61  ;;  %v3150_v16 = vunpack.i.h.bf16 %v3148_v34  ;;  %v3149_v9 = vunpack.i.l.bf16 %v3148_v34 }
 0x1bb   : > { %v3158_v7 = vpop.permute.xlu0 %3157 }
 0x1bc   : > { %v2197_v3 = vsel %vm2133_vm13, %v2061_v29, %v2165_v6  ;;  %v3160_v38 = vunpack.i.h.bf16 %v3158_v7  ;;  %v3159_v42 = vunpack.i.l.bf16 %v3158_v7  ;;  %v1648_v2 = vsel %vm1629_vm3, %v1615_v31, %v3149_v9  ;;  %v4359_v7 = vpop.f32.mrf.mxu1 }
 0x1bd   : > { %v1974_v25 = vpop.f32.mrf.mxu0  ;;  %v2226_v58 = vpack.c.bf16 %v2197_v3, %v2196_v43  ;;  %v1649_v36 = vsel %vm1629_vm3, %v1616_v35, %v3150_v16  ;;  %v3185_v9 = vunpack.i.h.bf16 %v3183_v44  ;;  %v4573_v43 = vld [vmem:[#allocation6_spill] sm:$0xff] }
 0x1be   : > { %v1975_v62 = vadd.f32 %v4263_v41, %v1974_v25  ;;  %v1681_v19 = vsel %vm1662_vm4, %v1648_v2, %v3159_v42  ;;  %v1682_v59 = vsel %vm1662_vm4, %v1649_v36, %v3160_v38  ;;  %v3184_v25 = vunpack.i.l.bf16 %v3183_v44 }
 0x1bf   : > { %2543 = vmatmul.msk.bf16.gmra.mxu2 %vm226_vm0, %v2226_v58 }
 0x1c0   : > { %v2064_v4 = vadd.f32 %v4101_v47, %v1975_v62 }
 0x1c1   : > { %v3163_v49 = vpop.permute.xlu1 %3162 }
 0x1c2   : > { %v3165_v13 = vunpack.i.h.bf16 %v3163_v49  ;;  %v3164_v12 = vunpack.i.l.bf16 %v3163_v49  ;;  %vm2134_vm14 = vcmp.ge.f32.partialorder %v2064_v4, 0.0  ;;  %v2166_v23 = vmul.f32 0.01, %v2064_v4 }
 0x1c3   : > { %v3173_v27 = vpop.permute.xlu0 %3172  ;;  %v3200_v49 = vunpack.i.h.bf16 %v3198_v37 }
 0x1c4   : > { %v1714_v32 = vsel %vm1695_vm5, %v1681_v19, %v3164_v12  ;;  %v1715_v30 = vsel %vm1695_vm5, %v1682_v59, %v3165_v13  ;;  %v3175_v14 = vunpack.i.h.bf16 %v3173_v27  ;;  %v3174_v8 = vunpack.i.l.bf16 %v3173_v27 }
 0x1c5   : > { %v1976_v21 = vpop.f32.mrf.mxu0  ;;  %v1747_v56 = vsel %vm1728_vm6, %v1714_v32, %v3169_v20  ;;  %v1748_v0 = vsel %vm1728_vm6, %v1715_v30, %v3170_v51  ;;  %v2198_v31 = vsel %vm2134_vm14, %v2064_v4, %v2166_v23  ;;  %v3199_v51 = vunpack.i.l.bf16 %v3198_v37  ;;  %v3213_v30 = vpop.permute.xlu2 %3212 }
 0x1c6   : > { %v1977_v39 = vadd.f32 %v4263_v41, %v1976_v21  ;;  %v1780_v24 = vsel %vm1761_vm7, %v1747_v56, %v3174_v8  ;;  %v1781_v26 = vsel %vm1761_vm7, %v1748_v0, %v3175_v14  ;;  %v4374_v14 = vpop.f32.mrf.mxu1 }
 0x1c7   : > { %v1812_v29 = vpack.c.bf16 %v1781_v26, %v1780_v24  ;;  %v1823_v26 = vpack.c.bf16 %v4086_v5, %v4084_v63 }
 0x1c8   : > { %v2066_v61 = vadd.f32 %v4119_v15, %v1977_v39  ;;  %v4574_v15 = vld [vmem:[#allocation7_spill] sm:$0xff] }
 0x1c9   : > { %v3178_v34 = vpop.permute.xlu1 %3177  ;;  %2003 = vmatmul.bf16.gmra.mxu0 %v1812_v29  ;;  %v4575_v29 = vld [vmem:[#allocation3_spill] sm:$0xff] }
 0x1ca   : > { %vm2135_vm15 = vcmp.ge.f32.partialorder %v2066_v61, 0.0  ;;  %v2167_v47 = vmul.f32 0.01, %v2066_v61  ;;  %v3180_v6 = vunpack.i.h.bf16 %v3178_v34  ;;  %v3179_v17 = vunpack.i.l.bf16 %v3178_v34  ;;  %2534 = vmatmul.msk.bf16.vlgmr.msrb.gmra.mxu3 %vm226_vm0, %v1821_v52  ;;  %v401_v34 = vld [vmem:[#allocation2 + $0x108] sm:$0xff] }
 0x1cb   : > { %v3188_v16 = vpop.permute.xlu0 %3187  ;;  %v2734_v23 = vunpack.i.l.bf16 %v4575_v29 }
 0x1cc   : > { %v1618_v3 = vsel %vm1596_vm2, %v4573_v43, %v3180_v6  ;;  %v1617_v58 = vsel %vm1596_vm2, %v4574_v15, %v3179_v17  ;;  %v2199_v46 = vsel %vm2135_vm15, %v2066_v61, %v2167_v47  ;;  %v3190_v38 = vunpack.i.h.bf16 %v3188_v16  ;;  %v402_v47 = vld [vmem:[#allocation2 + $0x110] sm:$0xff] }
 0x1cd   : > { %v1979_v50 = vpop.f32.mrf.mxu0  ;;  %v2227_v35 = vpack.c.bf16 %v2199_v46, %v2198_v31  ;;  %v3189_v42 = vunpack.i.l.bf16 %v3188_v16  ;;  %v1651_v2 = vsel %vm1629_vm3, %v1618_v3, %v3185_v9  ;;  %v1650_v36 = vsel %vm1629_vm3, %v1617_v58, %v3184_v25 }
 0x1ce   : > { %v1980_v44 = vadd.f32 %v4263_v41, %v1979_v50  ;;  %v1684_v12 = vsel %vm1662_vm4, %v1651_v2, %v3190_v38  ;;  %v2735_v61 = vunpack.i.h.bf16 %v4575_v29  ;;  %v1586_v25 = vsel %vm226_vm0, %v401_v34, %v2734_v23  ;;  %v4393_v38 = vpop.f32.mrf.mxu1 }
 0x1cf   : > { %2544 = vmatmul.msk.bf16.gmra.mxu2 %vm226_vm0, %v2227_v35  ;;  %v1683_v19 = vsel %vm1662_vm4, %v1650_v36, %v3189_v42  ;;  %v3215_v43 = vunpack.i.h.bf16 %v3213_v30  ;;  %v3214_v3 = vunpack.i.l.bf16 %v3213_v30  ;;  %v3228_v35 = vpop.permute.xlu2 %3227 }
 0x1d0   : > { %v2069_v8 = vadd.f32 %v4144_v22, %v1980_v44  ;;  %v1587_v5 = vsel %vm226_vm0, %v402_v47, %v2735_v61 }
 0x1d1   : > { %v3193_v62 = vpop.permute.xlu1 %3192 }
 0x1d2   : > { %v3195_v20 = vunpack.i.h.bf16 %v3193_v62  ;;  %v3194_v13 = vunpack.i.l.bf16 %v3193_v62  ;;  %vm2136_vm1 = vcmp.ge.f32.partialorder %v2069_v8, 0.0  ;;  %v2168_v6 = vmul.f32 0.01, %v2069_v8 }
 0x1d3   : > { %v3203_v59 = vpop.permute.xlu0 %3202 }
 0x1d4   : > { %v1716_v27 = vsel %vm1695_vm5, %v1683_v19, %v3194_v13  ;;  %v1717_v60 = vsel %vm1695_vm5, %v1684_v12, %v3195_v20  ;;  %v3205_v54 = vunpack.i.h.bf16 %v3203_v59  ;;  %v3204_v32 = vunpack.i.l.bf16 %v3203_v59 }
 0x1d5   : > { %v1981_v4 = vpop.f32.mrf.mxu0  ;;  %v1749_v21 = vsel %vm1728_vm6, %v1716_v27, %v3199_v51  ;;  %v1750_v56 = vsel %vm1728_vm6, %v1717_v60, %v3200_v49  ;;  %v2200_v50 = vsel %vm2136_vm1, %v2069_v8, %v2168_v6  ;;  %v3230_v51 = vunpack.i.h.bf16 %v3228_v35 }
 0x1d6   : > { %v1982_v0 = vadd.f32 %v4263_v41, %v1981_v4  ;;  %v1782_v39 = vsel %vm1761_vm7, %v1749_v21, %v3204_v32  ;;  %v1783_v24 = vsel %vm1761_vm7, %v1750_v56, %v3205_v54  ;;  %v3229_v20 = vunpack.i.l.bf16 %v3228_v35  ;;  %v666_v54 = vld [vmem:[#allocation2 + $0x19a] sm:$0xff]  ;;  %v667_v32 = vld [vmem:[#allocation2 + $0x1a2] sm:$0xff] }
 0x1d7   : > { %v1814_v52 = vpack.c.bf16 %v1783_v24, %v1782_v39 }
 0x1d8   : > { %v2071_v22 = vadd.f32 %v4156_v45, %v1982_v0 }
 0x1d9   : > { %v3208_v17 = vpop.permute.xlu1 %3207  ;;  %2008 = vmatmul.bf16.gmra.mxu0 %v1814_v52  ;;  %v1825_v52 = vpack.c.bf16 %v667_v32, %v666_v54 }
 0x1da   : > { %vm2137_vm8 = vcmp.ge.f32.partialorder %v2071_v22, 0.0  ;;  %v2169_v37 = vmul.f32 0.01, %v2071_v22  ;;  %v3210_v16 = vunpack.i.h.bf16 %v3208_v17  ;;  %v3209_v9 = vunpack.i.l.bf16 %v3208_v17  ;;  %2535 = vmatmul.msk.bf16.gmra.mxu3 %vm226_vm0, %v1823_v26 }
 0x1db   : > { %v3218_v63 = vpop.permute.xlu0 %3217 }
 0x1dc   : > { %v1620_v45 = vsel %vm1596_vm2, %v1587_v5, %v3210_v16  ;;  %v1619_v15 = vsel %vm1596_vm2, %v1586_v25, %v3209_v9  ;;  %v2201_v31 = vsel %vm2137_vm8, %v2071_v22, %v2169_v37  ;;  %v3220_v42 = vunpack.i.h.bf16 %v3218_v63  ;;  %v2108_v22 = vpop.f32.mrf.mxu1 }
 0x1dd   : > { %v1984_v58 = vpop.f32.mrf.mxu0  ;;  %v2228_v46 = vpack.c.bf16 %v2201_v31, %v2200_v50  ;;  %v3219_v2 = vunpack.i.l.bf16 %v3218_v63  ;;  %v1653_v44 = vsel %vm1629_vm3, %v1620_v45, %v3215_v43  ;;  %v1652_v62 = vsel %vm1629_vm3, %v1619_v15, %v3214_v3 }
 0x1de   : > { %v1985_v36 = vadd.f32 %v4263_v41, %v1984_v58  ;;  %v1686_v19 = vsel %vm1662_vm4, %v1653_v44, %v3220_v42 }
 0x1df   : > { %2545 = vmatmul.msk.bf16.gmra.mxu2 %vm226_vm0, %v2228_v46  ;;  %v1685_v59 = vsel %vm1662_vm4, %v1652_v62, %v3219_v2 }
 0x1e0   : > { %v2074_v27 = vadd.f32 %v4173_v33, %v1985_v36 }
 0x1e1   : > { %v3223_v49 = vpop.permute.xlu1 %3222 }
 0x1e2   : > { %v3225_v13 = vunpack.i.h.bf16 %v3223_v49  ;;  %v3224_v12 = vunpack.i.l.bf16 %v3223_v49  ;;  %v2170_v61 = vmul.f32 0.01, %v2074_v27  ;;  %vm2138_vm2 = vcmp.ge.f32.partialorder %v2074_v27, 0.0 }
 0x1e3   : > { %v3233_v60 = vpop.permute.xlu0 %3232 }
 0x1e4   : > { %v1718_v30 = vsel %vm1695_vm5, %v1685_v59, %v3224_v12  ;;  %v1719_v8 = vsel %vm1695_vm5, %v1686_v19, %v3225_v13  ;;  %v3235_v4 = vunpack.i.h.bf16 %v3233_v60  ;;  %v3234_v21 = vunpack.i.l.bf16 %v3233_v60  ;;  %v2110_v25 = vpop.f32.mrf.mxu1 }
 0x1e5   : > { %v1986_v56 = vpop.f32.mrf.mxu0  ;;  %v1751_v0 = vsel %vm1728_vm6, %v1718_v30, %v3229_v20  ;;  %v1752_v39 = vsel %vm1728_vm6, %v1719_v8, %v3230_v51  ;;  %v2202_v6 = vsel %vm2138_vm2, %v2074_v27, %v2170_v61 }
 0x1e6   : > { %v1987_v24 = vadd.f32 %v4263_v41, %v1986_v56  ;;  %v1784_v26 = vsel %vm1761_vm7, %v1751_v0, %v3234_v21  ;;  %v1785_v33 = vsel %vm1761_vm7, %v1752_v39, %v3235_v4 }
 0x1e7   : > { %v1816_v29 = vpack.c.bf16 %v1785_v33, %v1784_v26 }
 0x1e8   : > { %v2076_v23 = vadd.f32 %v4192_v28, %v1987_v24 }
 0x1e9   : > { %2013 = vmatmul.bf16.gmra.mxu0 %v1816_v29 }
 0x1ea   : > { %vm2139_vm3 = vcmp.ge.f32.partialorder %v2076_v23, 0.0  ;;  %v2171_v34 = vmul.f32 0.01, %v2076_v23  ;;  %2536 = vmatmul.msk.bf16.gmra.mxu3 %vm226_vm0, %v1825_v52  ;;  %v2019_v47 = vpop.f32.mrf.mxu3 }
 0x1eb   : > { %v2020_v37 = vadd.f32 %v4263_v41, %v2019_v47 }
 0x1ec   : > { %v2203_v17 = vsel %vm2139_vm3, %v2076_v23, %v2171_v34 }
 0x1ed   : > { %v1989_v16 = vpop.f32.mrf.mxu0  ;;  %v2229_v9 = vpack.c.bf16 %v2203_v17, %v2202_v6  ;;  %v2109_v5 = vadd.f32 %v2108_v22, %v2020_v37 }
 0x1ee   : > { %v1990_v63 = vadd.f32 %v4263_v41, %v1989_v16 }
 0x1ef   : > { %2546 = vmatmul.msk.bf16.gmra.mxu2 %vm226_vm0, %v2229_v9  ;;  %v2184_v45 = vmul.f32 0.01, %v2109_v5  ;;  %vm2152_vm4 = vcmp.ge.f32.partialorder %v2109_v5, 0.0 }
 0x1f0   : > { %v2079_v3 = vadd.f32 %v4214_v1, %v1990_v63 }
 0x1f1   : > { %v4418_v42 = vsel %vm2152_vm4, %v2109_v5, %v2184_v45 }
 0x1f2   : > { %v2021_v28 = vpop.f32.mrf.mxu3  ;;  %v2172_v46 = vmul.f32 0.01, %v2079_v3  ;;  %vm2140_vm6 = vcmp.ge.f32.partialorder %v2079_v3, 0.0 }
 0x1f3   : > { %v2022_v43 = vadd.f32 %v4263_v41, %v2021_v28 }
 0x1f4   : > { %v2204_v44 = vsel %vm2140_vm6, %v2079_v3, %v2172_v46 }
 0x1f5   : > { %v2111_v15 = vadd.f32 %v2110_v25, %v2022_v43  ;;  %v1991_v58 = vpop.f32.mrf.mxu0 }
 0x1f6   : > { %v1992_v50 = vadd.f32 %v4263_v41, %v1991_v58 }
 0x1f7   : > { %vm2153_vm5 = vcmp.ge.f32.partialorder %v2111_v15, 0.0  ;;  %v2185_v31 = vmul.f32 0.01, %v2111_v15 }
 0x1f8   : > { %v2081_v35 = vadd.f32 %v4229_v11, %v1992_v50 }
 0x1f9   : > { %v4420_v2 = vsel %vm2153_vm5, %v2111_v15, %v2185_v31 }
 0x1fa   : > { %v2236_v36 = vpack.c.bf16 %v4420_v2, %v4418_v42  ;;  %vm2141_vm7 = vcmp.ge.f32.partialorder %v2081_v35, 0.0  ;;  %v2173_v1 = vmul.f32 0.01, %v2081_v35 }
 0x1fc   : > { %v2205_v62 = vsel %vm2141_vm7, %v2081_v35, %v2173_v1 }
 0x1fd   : > { %v2230_v49 = vpack.c.bf16 %v2205_v62, %v2204_v44 }
 0x1ff   : > { %2547 = vmatmul.msk.bf16.gmra.mxu2 %vm226_vm0, %v2230_v49 }
 0x204   : > { %v2024_v27 = vpop.f32.mrf.mxu3 }
 0x205   : > { %v2025_v31 = vadd.f32 %v4263_v41, %v2024_v27 }
 0x20c   : > { %v1994_v51 = vpop.f32.mrf.mxu0 }
 0x20d   : > { %v1995_v20 = vadd.f32 %v4263_v41, %v1994_v51 }
 0x20f   : > { %v2084_v11 = vadd.f32 %v4250_v53, %v1995_v20  ;;  %v4434_v53 = vld [vmem:[%s4557_s4] ss:$0 sm:$0xff] }
 0x211   : > { %v2174_v19 = vmul.f32 0.01, %v2084_v11  ;;  %vm2142_vm9 = vcmp.ge.f32.partialorder %v2084_v11, 0.0 }
 0x213   : > { %v2206_v54 = vsel %vm2142_vm9, %v2084_v11, %v2174_v19 }
 0x214   : > { %v1996_v13 = vpop.f32.mrf.mxu0 }
 0x215   : > { %v1997_v12 = vadd.f32 %v4263_v41, %v1996_v13 }
 0x217   : > { %v2086_v59 = vadd.f32 %v4267_v55, %v1997_v12  ;;  %v2026_v55 = vpop.f32.mrf.mxu3 }
 0x218   : > { %v2027_v49 = vadd.f32 %v4263_v41, %v2026_v55 }
 0x219   : > { %vm2143_vm10 = vcmp.ge.f32.partialorder %v2086_v59, 0.0  ;;  %v2175_v60 = vmul.f32 0.01, %v2086_v59 }
 0x21b   : > { %v2207_v32 = vsel %vm2143_vm10, %v2086_v59, %v2175_v60 }
 0x21c   : > { %v2231_v30 = vpack.c.bf16 %v2207_v32, %v2206_v54 }
 0x21e   : > { %2548 = vmatmul.msk.bf16.gmra.mxu2 %vm226_vm0, %v2231_v30 }
 0x21f   : > { %v4444_v0 = vpop.f32.mrf.mxu3 }
 0x222   : > { %v2309_v8 = vpop.f32.mrf.mxu2 }
 0x223   : > { %v2310_v4 = vadd.f32 %v4434_v53, %v2309_v8 }
 0x225   : > { %2389 = vst [vmem:[%s4439_s10] sm:$0xff] %v2310_v4 }
 0x226   : > { %v1999_v21 = vpop.f32.mrf.mxu0 }
 0x227   : > { %v2000_v56 = vadd.f32 %v4263_v41, %v1999_v21  ;;  %v4452_v47 = vpop.f32.mrf.mxu3 }
 0x229   : > { %v2089_v26 = vadd.f32 %v4289_v18, %v2000_v56 }
 0x22a   : > { %v2311_v39 = vpop.f32.mrf.mxu2 }
 0x22b   : > { %v2312_v24 = vadd.f32 %v4434_v53, %v2311_v39  ;;  %v2176_v29 = vmul.f32 0.01, %v2089_v26  ;;  %vm2144_vm11 = vcmp.ge.f32.partialorder %v2089_v26, 0.0  ;;  %v2030_v39 = vadd.f32 %v4263_v41, %v4444_v0 }
 0x22d   : > { %2390 = vst [vmem:[%s4439_s10 + $0x8] sm:$0xff] %v2312_v24  ;;  %v2208_v6 = vsel %vm2144_vm11, %v2089_v26, %v2176_v29 }
 0x22e   : > { %v2001_v33 = vpop.f32.mrf.mxu0 }
 0x22f   : > { %v2002_v52 = vadd.f32 %v4263_v41, %v2001_v33 }
 0x231   : > { %v2091_v61 = vadd.f32 %v4297_v48, %v2002_v52 }
 0x232   : > { %v2314_v22 = vpop.f32.mrf.mxu2 }
 0x233   : > { %vm2145_vm12 = vcmp.ge.f32.partialorder %v2091_v61, 0.0  ;;  %v2177_v23 = vmul.f32 0.01, %v2091_v61  ;;  %v2315_v34 = vadd.f32 %v4434_v53, %v2314_v22 }
 0x235   : > { %v2209_v17 = vsel %vm2145_vm12, %v2091_v61, %v2177_v23  ;;  %2391 = vst [vmem:[%s4439_s10 + $0x10] sm:$0xff] %v2315_v34 }
 0x236   : > { %v2232_v18 = vpack.c.bf16 %v2209_v17, %v2208_v6 }
 0x238   : > { %2549 = vmatmul.msk.bf16.gmra.mxu2 %vm226_vm0, %v2232_v18 }
 0x23a   : > { %v2316_v37 = vpop.f32.mrf.mxu2 }
 0x23b   : > { %v2317_v16 = vadd.f32 %v4434_v53, %v2316_v37 }
 0x23d   : > { %v4457_v48 = vpop.f32.mrf.mxu3  ;;  %2392 = vst [vmem:[%s4439_s10 + $0x18] sm:$0xff] %v2317_v16 }
 0x242   : > { %v2319_v9 = vpop.f32.mrf.mxu2 }
 0x243   : > { %v2320_v63 = vadd.f32 %v4434_v53, %v2319_v9 }
 0x245   : > { %v4461_v5 = vpop.f32.mrf.mxu3  ;;  %2393 = vst [vmem:[%s4439_s10 + $0x20] sm:$0xff] %v2320_v63 }
 0x246   : > { %v2004_v28 = vpop.f32.mrf.mxu0 }
 0x247   : > { %v2005_v25 = vadd.f32 %v4263_v41, %v2004_v28 }
 0x249   : > { %v2094_v45 = vadd.f32 %v4312_v40, %v2005_v25 }
 0x24a   : > { %v2321_v43 = vpop.f32.mrf.mxu2 }
 0x24b   : > { %v2322_v3 = vadd.f32 %v4434_v53, %v2321_v43  ;;  %v2178_v46 = vmul.f32 0.01, %v2094_v45  ;;  %vm2146_vm13 = vcmp.ge.f32.partialorder %v2094_v45, 0.0 }
 0x24d   : > { %v2113_v15 = vpop.f32.mrf.mxu3  ;;  %2394 = vst [vmem:[%s4439_s10 + $0x28] sm:$0xff] %v2322_v3  ;;  %v2210_v20 = vsel %vm2146_vm13, %v2094_v45, %v2178_v46 }
 0x24e   : > { %v2006_v58 = vpop.f32.mrf.mxu0  ;;  %v2114_v1 = vadd.f32 %v2113_v15, %v2025_v31  ;;  %v2035_v15 = vadd.f32 %v4263_v41, %v4457_v48 }
 0x24f   : > { %v2007_v50 = vadd.f32 %v4263_v41, %v2006_v58 }
 0x250   : > { %v2186_v13 = vmul.f32 0.01, %v2114_v1  ;;  %vm2154_vm15 = vcmp.ge.f32.partialorder %v2114_v1, 0.0 }
 0x251   : > { %v2096_v35 = vadd.f32 %v4330_v10, %v2007_v50 }
 0x252   : > { %v2324_v62 = vpop.f32.mrf.mxu2  ;;  %v2218_v60 = vsel %vm2154_vm15, %v2114_v1, %v2186_v13 }
 0x253   : > { %vm2147_vm14 = vcmp.ge.f32.partialorder %v2096_v35, 0.0  ;;  %v2179_v44 = vmul.f32 0.01, %v2096_v35  ;;  %v2325_v40 = vadd.f32 %v4434_v53, %v2324_v62 }
 0x255   : > { %v2115_v51 = vpop.f32.mrf.mxu3  ;;  %v2211_v11 = vsel %vm2147_vm14, %v2096_v35, %v2179_v44  ;;  %2395 = vst [vmem:[%s4439_s10 + $0x30] sm:$0xff] %v2325_v40 }
 0x256   : > { %v2116_v12 = vadd.f32 %v2115_v51, %v2027_v49  ;;  %v2009_v19 = vpop.f32.mrf.mxu0  ;;  %v2233_v59 = vpack.c.bf16 %v2211_v11, %v2210_v20 }
 0x257   : > { %v2010_v27 = vadd.f32 %v4263_v41, %v2009_v19 }
 0x258   : > { %vm2155_vm1 = vcmp.ge.f32.partialorder %v2116_v12, 0.0  ;;  %v2187_v10 = vmul.f32 0.01, %v2116_v12  ;;  %2550 = vmatmul.msk.bf16.gmra.mxu2 %vm226_vm0, %v2233_v59 }
 0x259   : > { %v2099_v8 = vadd.f32 %v4344_v57, %v2010_v27  ;;  %v2032_v57 = vadd.f32 %v4263_v41, %v4452_v47 }
 0x25a   : > { %v2219_v54 = vsel %vm2155_vm1, %v2116_v12, %v2187_v10  ;;  %v2326_v30 = vpop.f32.mrf.mxu2 }
 0x25b   : > { %v2237_v32 = vpack.c.bf16 %v2219_v54, %v2218_v60  ;;  %v2327_v55 = vadd.f32 %v4434_v53, %v2326_v30  ;;  %v2180_v24 = vmul.f32 0.01, %v2099_v8  ;;  %vm2148_vm8 = vcmp.ge.f32.partialorder %v2099_v8, 0.0 }
 0x25d   : > { %v2118_v4 = vpop.f32.mrf.mxu3  ;;  %2554 = vmatmul.msk.bf16.vlgmr.msra.gmra.mxu3 %vm226_vm0, %v2237_v32  ;;  %2396 = vst [vmem:[%s4439_s10 + $0x38] sm:$0xff] %v2327_v55  ;;  %v2212_v22 = vsel %vm2148_vm8, %v2099_v8, %v2180_v24 }
 0x25e   : > { %v2011_v21 = vpop.f32.mrf.mxu0  ;;  %v2119_v33 = vadd.f32 %v2118_v4, %v2030_v39 }
 0x25f   : > { %v2012_v56 = vadd.f32 %v4263_v41, %v2011_v21 }
 0x260   : > { %v2188_v6 = vmul.f32 0.01, %v2119_v33  ;;  %vm2156_vm3 = vcmp.ge.f32.partialorder %v2119_v33, 0.0 }
 0x261   : > { %v2101_v26 = vadd.f32 %v4359_v7, %v2012_v56 }
 0x262   : > { %v2329_v29 = vpop.f32.mrf.mxu2  ;;  %v2220_v16 = vsel %vm2156_vm3, %v2119_v33, %v2188_v6 }
 0x263   : > { %vm2149_vm2 = vcmp.ge.f32.partialorder %v2101_v26, 0.0  ;;  %v2181_v52 = vmul.f32 0.01, %v2101_v26  ;;  %v2330_v61 = vadd.f32 %v4434_v53, %v2329_v29 }
 0x265   : > { %v2120_v23 = vpop.f32.mrf.mxu3  ;;  %v2213_v34 = vsel %vm2149_vm2, %v2101_v26, %v2181_v52  ;;  %2397 = vst [vmem:[%s4439_s10 + $0x40] sm:$0xff] %v2330_v61 }
 0x266   : > { %v2121_v17 = vadd.f32 %v2120_v23, %v2032_v57  ;;  %v2014_v0 = vpop.f32.mrf.mxu0  ;;  %v2234_v18 = vpack.c.bf16 %v2213_v34, %v2212_v22 }
 0x267   : > { %v2015_v37 = vadd.f32 %v4263_v41, %v2014_v0 }
 0x268   : > { %vm2157_vm4 = vcmp.ge.f32.partialorder %v2121_v17, 0.0  ;;  %v2189_v7 = vmul.f32 0.01, %v2121_v17  ;;  %2551 = vmatmul.msk.bf16.gmra.mxu2 %vm226_vm0, %v2234_v18 }
 0x269   : > { %v2104_v25 = vadd.f32 %v4374_v14, %v2015_v37  ;;  %v2037_v14 = vadd.f32 %v4263_v41, %v4461_v5 }
 0x26a   : > { %v2221_v47 = vsel %vm2157_vm4, %v2121_v17, %v2189_v7  ;;  %v2331_v9 = vpop.f32.mrf.mxu2 }
 0x26b   : > { %v2238_v63 = vpack.c.bf16 %v2221_v47, %v2220_v16  ;;  %v2332_v28 = vadd.f32 %v4434_v53, %v2331_v9  ;;  %v2182_v58 = vmul.f32 0.01, %v2104_v25  ;;  %vm2150_vm5 = vcmp.ge.f32.partialorder %v2104_v25, 0.0 }
 0x26d   : > { %v2123_v43 = vpop.f32.mrf.mxu3  ;;  %2555 = vmatmul.msk.bf16.gmra.mxu3 %vm226_vm0, %v2238_v63  ;;  %2398 = vst [vmem:[%s4439_s10 + $0x48] sm:$0xff] %v2332_v28  ;;  %v2214_v62 = vsel %vm2150_vm5, %v2104_v25, %v2182_v58 }
 0x26e   : > { %v2016_v3 = vpop.f32.mrf.mxu0  ;;  %v2124_v31 = vadd.f32 %v2123_v43, %v2035_v15 }
 0x26f   : > { %v2017_v45 = vadd.f32 %v4263_v41, %v2016_v3 }
 0x270   : > { %v2190_v40 = vmul.f32 0.01, %v2124_v31  ;;  %vm2158_vm7 = vcmp.ge.f32.partialorder %v2124_v31, 0.0 }
 0x271   : > { %v2106_v50 = vadd.f32 %v4393_v38, %v2017_v45 }
 0x272   : > { %v2334_v35 = vpop.f32.mrf.mxu2  ;;  %v2222_v20 = vsel %vm2158_vm7, %v2124_v31, %v2190_v40 }
 0x273   : > { %vm2151_vm6 = vcmp.ge.f32.partialorder %v2106_v50, 0.0  ;;  %v2183_v46 = vmul.f32 0.01, %v2106_v50  ;;  %v2335_v1 = vadd.f32 %v4434_v53, %v2334_v35 }
 0x275   : > { %v2125_v44 = vpop.f32.mrf.mxu3  ;;  %v2215_v49 = vsel %vm2151_vm6, %v2106_v50, %v2183_v46  ;;  %2399 = vst [vmem:[%s4439_s10 + $0x50] sm:$0xff] %v2335_v1 }
 0x276   : > { %v2126_v48 = vadd.f32 %v2125_v44, %v2037_v14  ;;  %v2235_v51 = vpack.c.bf16 %v2215_v49, %v2214_v62 }
 0x278   : > { %vm2159_vm9 = vcmp.ge.f32.partialorder %v2126_v48, 0.0  ;;  %v2191_v38 = vmul.f32 0.01, %v2126_v48  ;;  %2552 = vmatmul.msk.bf16.gmra.mxu2 %vm226_vm0, %v2235_v51 }
 0x27a   : > { %v2223_v41 = vsel %vm2159_vm9, %v2126_v48, %v2191_v38  ;;  %v2336_v5 = vpop.f32.mrf.mxu2 }
 0x27b   : > { %v2239_v11 = vpack.c.bf16 %v2223_v41, %v2222_v20  ;;  %v2337_v13 = vadd.f32 %v4434_v53, %v2336_v5 }
 0x27d   : > { %2556 = vmatmul.msk.bf16.gmra.mxu3 %vm226_vm0, %v2239_v11  ;;  %2400 = vst [vmem:[%s4439_s10 + $0x58] sm:$0xff] %v2337_v13 }
 0x282   : > { %v2339_v12 = vpop.f32.mrf.mxu2 }
 0x283   : > { %v2340_v19 = vadd.f32 %v4434_v53, %v2339_v12 }
 0x285   : > { %2401 = vst [vmem:[%s4439_s10 + $0x60] sm:$0xff] %v2340_v19 }
 0x288   : > { %2553 = vmatmul.msk.bf16.gmra.mxu2 %vm226_vm0, %v2236_v36 }
 0x28a   : > { %v2341_v59 = vpop.f32.mrf.mxu2 }
 0x28b   : > { %v2342_v10 = vadd.f32 %v4434_v53, %v2341_v59 }
 0x28d   : > { %2402 = vst [vmem:[%s4439_s10 + $0x68] sm:$0xff] %v2342_v10 }
 0x2a1   : > { %v2344_v27 = vpop.f32.mrf.mxu2 }
 0x2a2   : > { %v2345_v60 = vadd.f32 %v4434_v53, %v2344_v27 }
 0x2a4   : > { %2403 = vst [vmem:[%s4439_s10 + $0x70] sm:$0xff] %v2345_v60 }
 0x2a9   : > { %v2346_v54 = vpop.f32.mrf.mxu2 }
 0x2aa   : > { %v2347_v32 = vadd.f32 %v4434_v53, %v2346_v54 }
 0x2ac   : > { %2404 = vst [vmem:[%s4439_s10 + $0x78] sm:$0xff] %v2347_v32 }
 0x2bb   : > { %v2349_v30 = vpop.f32.mrf.mxu2 }
 0x2bc   : > { %v2350_v42 = vadd.f32 %v4434_v53, %v2349_v30 }
 0x2be   : > { %2405 = vst [vmem:[%s4439_s10 + $0x80] sm:$0xff] %v2350_v42 }
 0x2c3   : > { %v2351_v2 = vpop.f32.mrf.mxu2 }
 0x2c4   : > { %v2352_v36 = vadd.f32 %v4434_v53, %v2351_v2 }
 0x2c6   : > { %2406 = vst [vmem:[%s4439_s10 + $0x88] sm:$0xff] %v2352_v36 }
 0x2db   : > { %v2354_v55 = vpop.f32.mrf.mxu2 }
 0x2dc   : > { %v2355_v8 = vadd.f32 %v4434_v53, %v2354_v55 }
 0x2de   : > { %2407 = vst [vmem:[%s4439_s10 + $0x90] sm:$0xff] %v2355_v8 }
 0x2e0   : > { %v2374_v4 = vpop.f32.mrf.mxu3 }
 0x2e1   : > { %v2375_v21 = vadd.f32 %v4434_v53, %v2374_v4 }
 0x2e3   : > { %2415 = vst [vmem:[%s4439_s10 + $0xd0] sm:$0xff] %v2375_v21  ;;  %v2356_v56 = vpop.f32.mrf.mxu2 }
 0x2e4   : > { %v2357_v39 = vadd.f32 %v4434_v53, %v2356_v56 }
 0x2e6   : > { %2408 = vst [vmem:[%s4439_s10 + $0x98] sm:$0xff] %v2357_v39 }
 0x2e8   : > { %v2376_v24 = vpop.f32.mrf.mxu3 }
 0x2e9   : > { %v2377_v26 = vadd.f32 %v4434_v53, %v2376_v24 }
 0x2eb   : > { %2416 = vst [vmem:[%s4439_s10 + $0xd8] sm:$0xff] %v2377_v26  ;;  %v2359_v33 = vpop.f32.mrf.mxu2 }
 0x2ec   : > { %v2360_v52 = vadd.f32 %v4434_v53, %v2359_v33 }
 0x2ee   : > { %2409 = vst [vmem:[%s4439_s10 + $0xa0] sm:$0xff] %v2360_v52 }
 0x2f0   : > { %v2379_v29 = vpop.f32.mrf.mxu3 }
 0x2f1   : > { %v2380_v57 = vadd.f32 %v4434_v53, %v2379_v29 }
 0x2f3   : > { %2417 = vst [vmem:[%s4439_s10 + $0xe0] sm:$0xff] %v2380_v57  ;;  %v2361_v61 = vpop.f32.mrf.mxu2 }
 0x2f4   : > { %v2362_v23 = vadd.f32 %v4434_v53, %v2361_v61 }
 0x2f6   : > { %2410 = vst [vmem:[%s4439_s10 + $0xa8] sm:$0xff] %v2362_v23 }
 0x2f8   : > { %v2381_v22 = vpop.f32.mrf.mxu3 }
 0x2f9   : > { %v2382_v34 = vadd.f32 %v4434_v53, %v2381_v22 }
 0x2fb   : > { %2418 = vst [vmem:[%s4439_s10 + $0xe8] sm:$0xff] %v2382_v34  ;;  %v2364_v6 = vpop.f32.mrf.mxu2 }
 0x2fc   : > { %v2365_v17 = vadd.f32 %v4434_v53, %v2364_v6 }
 0x2fe   : > { %2411 = vst [vmem:[%s4439_s10 + $0xb0] sm:$0xff] %v2365_v17 }
 0x300   : > { %v2384_v0 = vpop.f32.mrf.mxu3 }
 0x301   : > { %v2385_v18 = vadd.f32 %v4434_v53, %v2384_v0 }
 0x303   : > { %2419 = vst [vmem:[%s4439_s10 + $0xf0] sm:$0xff] %v2385_v18  ;;  %v2366_v7 = vpop.f32.mrf.mxu2 }
 0x304   : > { %v2367_v37 = vadd.f32 %v4434_v53, %v2366_v7 }
 0x306   : > { %2412 = vst [vmem:[%s4439_s10 + $0xb8] sm:$0xff] %v2367_v37 }
 0x308   : > { %v2386_v16 = vpop.f32.mrf.mxu3 }
 0x309   : > { %v2387_v47 = vadd.f32 %v4434_v53, %v2386_v16 }
 0x30b   : > { %2420 = vst [vmem:[%s4439_s10 + $0xf8] sm:$0xff] %v2387_v47  ;;  %v2369_v9 = vpop.f32.mrf.mxu2 }
 0x30c   : > { %v2370_v63 = vadd.f32 %v4434_v53, %v2369_v9 }
 0x30e   : > { %2413 = vst [vmem:[%s4439_s10 + $0xc0] sm:$0xff] %v2370_v63 }
 0x313   : > { %v2371_v28 = vpop.f32.mrf.mxu2 }
 0x314   : > { %v2372_v25 = vadd.f32 %v4434_v53, %v2371_v28 }
 0x316   : > { %2414 = vst [vmem:[%s4439_s10 + $0xc8] sm:$0xff] %v2372_v25 }
 0x317 PF: > { %s15_s18 = sadd.s32 1, %s3244_s18  }
 0x318   : > { %p12_p4 = scmp.ge.s32.totalorder %s15_s18, 4  }
 0x31a   :  { %14 = sbr.rel (!%p12_p4) target bundleno = 1 (0x1), region = 72 }

// kernel: refinement_network_forward.4
= control target key start
LH: loop header
LB: loop body
LE: loop exit
PB: predicated region body
PF: predicated region fallthrough
CT: control target
= control target key end

     0   :  { %s6770_s21 = smov 0   ;;  %s10743_s0 = inlined_call_operand.vmem [shape: bf16[2,16,16,4], index: 0, kind: input, shape index: {}]   ;;  %s10744_s1 = inlined_call_operand.vmem [shape: bf16[2,16,16,8], index: 1, kind: input, shape index: {}]   ;;  %s10745_s2 = inlined_call_operand.vmem [shape: bf16[108,16], index: 2, kind: input, shape index: {}]   ;;  %s10746_s3 = inlined_call_operand.vmem [shape: f32[1,16], index: 3, kind: input, shape index: {}]   ;;  %s10747_s4 = inlined_call_operand.vmem [shape: bf16[144,16], index: 4, kind: input, shape index: {}]   ;;  %s10748_s5 = inlined_call_operand.vmem [shape: f32[1,16], index: 5, kind: input, shape index: {}]   ;;  %s10749_s6 = inlined_call_operand.vmem [shape: bf16[2,16,16,16], index: 6, kind: output, shape index: {}]  }
   0x1 LB: > { %s5168_s22 = sadd.s32 4294967295, %s6718_s21   ;;  %p5172_p0 = scmp.ge.s32.totalorder %s6718_s21, 1  ;;  %s6718_s21 = sphi %s6770_s21, %s16_s21  }
   0x2   : > { %p222_p1 = scmp.lt.s32.totalorder %s6718_s21, 3 }
   0x4   : > { %p223_p2 = pnand %p5172_p0, %p222_p1 }
   0x6   : > { %226 = sbr.rel (%p223_p2) target bundleno = 1578 (0x62a), region = 44 }
   0xb   : > { %p257_p3 = scmp.lt.s32.totalorder %s5168_s22, 1  ;;  %s6720_s27 = smov 4   ;;  %vm273_vm0 = vcmask 97280   ;;  %v10750_v3 = vmov 0.0   ;;  %vm276_vm1 = vcmask 91136   ;;  %vm585_vm2 = vcmask 31744  }
   0xc   : > { %290 = vst.msk [vmem:[#allocation2 + $0x78] sm:$0xff] %vm273_vm0, %v10750_v3  ;;  %s6722_s7 = smov 24   ;;  %s6723_s8 = smov 12   ;;  %vm2415_vm3 = vcmask 1045504   ;;  %vm2060_vm4 = vcmask 195584   ;;  %vm2093_vm5 = vcmask 293888  }
   0xd   : > { %s11021_s22 = smov (!%p257_p3, %s5168_s22), 1  ;;  %291 = vst.msk [vmem:[#allocation2 + $0x80] sm:$0xff] %vm273_vm0, %v10750_v3  ;;  %s6724_s9 = smov 36   ;;  %vm2126_vm6 = vcmask 392192   ;;  %vm2159_vm7 = vcmask 490496   ;;  %vm2192_vm8 = vcmask 588800  }
   0xe   : > { %s6778_s23 = sshll.u32 %s11021_s22, 7  ;;  %292 = vst.msk [vmem:[#allocation2 + $0x88] sm:$0x3] %vm276_vm1, %v10750_v3  ;;  %s6725_s10 = smov 48   ;;  %vm2225_vm9 = vcmask 687104   ;;  %vm2258_vm10 = vcmask 785408  }
   0xf   : > { %s6784_s26 = scalar_lea.vmem %s10744_s1, %s6778_s23  ;;  %274 = vst.msk [vmem:[#allocation2] sm:$0xff] %vm273_vm0, %v10750_v3  ;;  %s6928_s30 = scalar_lea.vmem %s10743_s0, %s6778_s23  ;;  %vm2366_vm11 = vcmask 883712   ;;  %vm2508_vm12 = vcmask 130048   ;;  %vm2857_vm13 = vcmask 123904  }
  0x10   : > { %v5426_v0 = vld [vmem:[%s6784_s26 + $0x10] sm:$0xff]  ;;  %v5424_v1 = vld [vmem:[%s6784_s26] sm:$0xff]  ;;  %v5427_v4 = vld [vmem:[%s6784_s26 + $0x18] sm:$0xff]  ;;  %275 = vst.msk [vmem:[#allocation2 + $0x8] sm:$0xff] %vm273_vm0, %v10750_v3  ;;  %s6726_s11 = smov 60   ;;  %s6727_s12 = smov 72  }
  0x11   : > { %v5428_v2 = vld [vmem:[%s6784_s26 + $0x20] sm:$0xff]  ;;  %557 = vrot.lane.b32.xlu1 %v5426_v0, %s6720_s27  ;;  %553 = vrot.lane.b32.xlu0 %v5424_v1, %s6720_s27  ;;  %v5425_v5 = vld [vmem:[%s6784_s26 + $0x8] sm:$0xff]  ;;  %277 = vst.msk [vmem:[#allocation2 + $0x10] sm:$0x3] %vm276_vm1, %v10750_v3  ;;  %s6728_s13 = smov 84   ;;  %s6729_s14 = smov 96  }
  0x12   : > { %561 = vrot.lane.b32.xlu2 %v5428_v2, %s6720_s27  ;;  %v5429_v6 = vld [vmem:[%s6784_s26 + $0x28] sm:$0xff]  ;;  %278 = vst.msk [vmem:[#allocation2 + $0x18] sm:$0xff] %vm273_vm0, %v10750_v3  ;;  %v5430_v7 = vld [vmem:[%s6784_s26 + $0x30] sm:$0xff]  ;;  %v5431_v8 = vld [vmem:[%s6784_s26 + $0x38] sm:$0xff]  ;;  %s6732_s17 = smov 64   ;;  %s6733_s18 = smov 80  }
  0x13   : > { %279 = vst.msk [vmem:[#allocation2 + $0x20] sm:$0xff] %vm273_vm0, %v10750_v3  ;;  %v5432_v9 = vld [vmem:[%s6784_s26 + $0x40] sm:$0xff]  ;;  %v5433_v10 = vld [vmem:[%s6784_s26 + $0x48] sm:$0xff]  ;;  %v5434_v11 = vld [vmem:[%s6784_s26 + $0x50] sm:$0xff]  ;;  %s6734_s19 = smov 112  }
  0x14   : > { %280 = vst.msk [vmem:[#allocation2 + $0x28] sm:$0x3] %vm276_vm1, %v10750_v3  ;;  %v5435_v12 = vld [vmem:[%s6784_s26 + $0x58] sm:$0xff]  ;;  %v5436_v13 = vld [vmem:[%s6784_s26 + $0x60] sm:$0xff]  ;;  %v5437_v14 = vld [vmem:[%s6784_s26 + $0x68] sm:$0xff] }
  0x15   : > { %281 = vst.msk [vmem:[#allocation2 + $0x30] sm:$0xff] %vm273_vm0, %v10750_v3  ;;  %v5438_v15 = vld [vmem:[%s6784_s26 + $0x70] sm:$0xff]  ;;  %v5412_v16 = vld [vmem:[%s6928_s30 + $0x20] sm:$0xff]  ;;  %v5413_v27 = vld [vmem:[%s6928_s30 + $0x28] sm:$0xff] }
  0x16   : > { %282 = vst.msk [vmem:[#allocation2 + $0x38] sm:$0xff] %vm273_vm0, %v10750_v3  ;;  %v5439_v28 = vld [vmem:[%s6784_s26 + $0x78] sm:$0xff]  ;;  %v5416_v33 = vld [vmem:[%s6928_s30 + $0x40] sm:$0xff]  ;;  %v5410_v38 = vld [vmem:[%s6928_s30 + $0x10] sm:$0xff] }
  0x17   : > { %283 = vst.msk [vmem:[#allocation2 + $0x40] sm:$0x3] %vm276_vm1, %v10750_v3  ;;  %v779_v17 = vld [vmem:[#allocation2 + $0x2] sm:$0xff]  ;;  %v5419_v40 = vld [vmem:[%s6928_s30 + $0x58] sm:$0xff]  ;;  %v5422_v55 = vld [vmem:[%s6928_s30 + $0x70] sm:$0xff] }
  0x18   : > { %284 = vst.msk [vmem:[#allocation2 + $0x48] sm:$0xff] %vm273_vm0, %v10750_v3  ;;  %v780_v18 = vld [vmem:[#allocation2 + $0xa] sm:$0xff]  ;;  %v747_v19 = vld [vmem:[#allocation2 + $0x1] sm:$0xff]  ;;  %v5411_v52 = vld [vmem:[%s6928_s30 + $0x18] sm:$0xff] }
  0x19   : > { %559 = vrot.lane.b32.xlu1 %v5427_v4, %s6720_s27  ;;  %555 = vrot.lane.b32.xlu0 %v5425_v5, %s6720_s27  ;;  %285 = vst.msk [vmem:[#allocation2 + $0x50] sm:$0xff] %vm273_vm0, %v10750_v3  ;;  %v5500_v20 = vpack.i.bf16 %v780_v18, %v779_v17  ;;  %v748_v21 = vld [vmem:[#allocation2 + $0x9] sm:$0xff]  ;;  %v5408_v39 = vld [vmem:[%s6928_s30] sm:$0xff] }
  0x1a   : > { %563 = vrot.lane.b32.xlu2 %v5429_v6, %s6720_s27  ;;  %286 = vst.msk [vmem:[#allocation2 + $0x58] sm:$0x3] %vm276_vm1, %v10750_v3  ;;  %v5495_v22 = vpack.i.bf16 %v748_v21, %v747_v19  ;;  %v5409_v53 = vld [vmem:[%s6928_s30 + $0x8] sm:$0xff] }
  0x1b   : > { %287 = vst.msk [vmem:[#allocation2 + $0x60] sm:$0xff] %vm273_vm0, %v10750_v3 }
  0x1c   : > { %288 = vst.msk [vmem:[#allocation2 + $0x68] sm:$0xff] %vm273_vm0, %v10750_v3 }
  0x1d   : > { %289 = vst.msk [vmem:[#allocation2 + $0x70] sm:$0x3] %vm276_vm1, %v10750_v3 }
  0x1e   : > { %293 = vst.msk [vmem:[#allocation2 + $0x90] sm:$0xff] %vm273_vm0, %v10750_v3 }
  0x1f   : > { %294 = vst.msk [vmem:[#allocation2 + $0x98] sm:$0xff] %vm273_vm0, %v10750_v3 }
  0x20   : > { %295 = vst.msk [vmem:[#allocation2 + $0xa0] sm:$0x3] %vm276_vm1, %v10750_v3 }
  0x21   : > { %565 = vrot.lane.b32.xlu0 %v5430_v7, %s6720_s27  ;;  %567 = vrot.lane.b32.xlu1 %v5431_v8, %s6720_s27  ;;  %296 = vst.msk [vmem:[#allocation2 + $0xa8] sm:$0xff] %vm273_vm0, %v10750_v3  ;;  %v5414_v8 = vld [vmem:[%s6928_s30 + $0x30] sm:$0xff] }
  0x22   : > { %569 = vrot.lane.b32.xlu2 %v5432_v9, %s6720_s27  ;;  %297 = vst.msk [vmem:[#allocation2 + $0xb0] sm:$0xff] %vm273_vm0, %v10750_v3  ;;  %v5415_v9 = vld [vmem:[%s6928_s30 + $0x38] sm:$0xff] }
  0x23   : > { %298 = vst.msk [vmem:[#allocation2 + $0xb8] sm:$0x3] %vm276_vm1, %v10750_v3 }
  0x24   : > { %299 = vst.msk [vmem:[#allocation2 + $0xc0] sm:$0xff] %vm273_vm0, %v10750_v3 }
  0x25   : > { %300 = vst.msk [vmem:[#allocation2 + $0xc8] sm:$0xff] %vm273_vm0, %v10750_v3 }
  0x26   : > { %301 = vst.msk [vmem:[#allocation2 + $0xd0] sm:$0x3] %vm276_vm1, %v10750_v3 }
  0x27   : > { %302 = vst.msk [vmem:[#allocation2 + $0xd8] sm:$0xff] %vm273_vm0, %v10750_v3 }
  0x28   : > { %303 = vst.msk [vmem:[#allocation2 + $0xe0] sm:$0xff] %vm273_vm0, %v10750_v3 }
  0x29   : > { %571 = vrot.lane.b32.xlu0 %v5433_v10, %s6720_s27  ;;  %573 = vrot.lane.b32.xlu1 %v5434_v11, %s6720_s27  ;;  %304 = vst.msk [vmem:[#allocation2 + $0xe8] sm:$0x3] %vm276_vm1, %v10750_v3 }
  0x2a   : > { %575 = vrot.lane.b32.xlu2 %v5435_v12, %s6720_s27  ;;  %305 = vst.msk [vmem:[#allocation2 + $0xf0] sm:$0xff] %vm273_vm0, %v10750_v3 }
  0x2b   : > { %306 = vst.msk [vmem:[#allocation2 + $0xf8] sm:$0xff] %vm273_vm0, %v10750_v3 }
  0x2c   : > { %307 = vst.msk [vmem:[#allocation2 + $0x100] sm:$0x3] %vm276_vm1, %v10750_v3 }
  0x2d   : > { %308 = vst.msk [vmem:[#allocation2 + $0x108] sm:$0xff] %vm273_vm0, %v10750_v3 }
  0x2e   : > { %309 = vst.msk [vmem:[#allocation2 + $0x110] sm:$0xff] %vm273_vm0, %v10750_v3 }
  0x2f   : > { %310 = vst.msk [vmem:[#allocation2 + $0x118] sm:$0x3] %vm276_vm1, %v10750_v3 }
  0x30   : > { %311 = vst.msk [vmem:[#allocation2 + $0x120] sm:$0xff] %vm273_vm0, %v10750_v3 }
  0x31   : > { %577 = vrot.lane.b32.xlu0 %v5436_v13, %s6720_s27  ;;  %579 = vrot.lane.b32.xlu1 %v5437_v14, %s6720_s27  ;;  %312 = vst.msk [vmem:[#allocation2 + $0x128] sm:$0xff] %vm273_vm0, %v10750_v3 }
  0x32   : > { %581 = vrot.lane.b32.xlu2 %v5438_v15, %s6720_s27  ;;  %313 = vst.msk [vmem:[#allocation2 + $0x130] sm:$0x3] %vm276_vm1, %v10750_v3 }
  0x33   : > { %314 = vst.msk [vmem:[#allocation2 + $0x138] sm:$0xff] %vm273_vm0, %v10750_v3 }
  0x34   : > { %315 = vst.msk [vmem:[#allocation2 + $0x140] sm:$0xff] %vm273_vm0, %v10750_v3 }
  0x35   : > { %316 = vst.msk [vmem:[#allocation2 + $0x148] sm:$0x3] %vm276_vm1, %v10750_v3 }
  0x36   : > { %317 = vst.msk [vmem:[#allocation2 + $0x150] sm:$0xff] %vm273_vm0, %v10750_v3 }
  0x37   : > { %318 = vst.msk [vmem:[#allocation2 + $0x158] sm:$0xff] %vm273_vm0, %v10750_v3 }
  0x38   : > { %319 = vst.msk [vmem:[#allocation2 + $0x160] sm:$0x3] %vm276_vm1, %v10750_v3 }
  0x39   : > { %320 = vst.msk [vmem:[#allocation2 + $0x168] sm:$0xff] %vm273_vm0, %v10750_v3  ;;  %5496 = vrot.lane.b32.xlu1 %v5495_v22, %s6723_s8  ;;  %583 = vrot.lane.b32.xlu0 %v5439_v28, %s6720_s27  ;;  %v5417_v28 = vld [vmem:[%s6928_s30 + $0x48] sm:$0xff] }
  0x3a   : > { %321 = vst.msk [vmem:[#allocation2 + $0x170] sm:$0xff] %vm273_vm0, %v10750_v3  ;;  %5501 = vrot.lane.b32.xlu2 %v5500_v20, %s6722_s7 }
  0x3b   : > { %322 = vst.msk [vmem:[#allocation2 + $0x178] sm:$0x3] %vm276_vm1, %v10750_v3 }
  0x3c   : > { %323 = vst.msk [vmem:[#allocation2 + $0x180] sm:$0xff] %vm273_vm0, %v10750_v3 }
  0x3d   : > { %324 = vst.msk [vmem:[#allocation2 + $0x188] sm:$0xff] %vm273_vm0, %v10750_v3 }
  0x3e   : > { %325 = vst.msk [vmem:[#allocation2 + $0x190] sm:$0x3] %vm276_vm1, %v10750_v3 }
  0x3f   : > { %326 = vst.msk [vmem:[#allocation2 + $0x198] sm:$0xff] %vm273_vm0, %v10750_v3 }
  0x40   : > { %327 = vst.msk [vmem:[#allocation2 + $0x1a0] sm:$0xff] %vm273_vm0, %v10750_v3 }
  0x41   : > { %328 = vst.msk [vmem:[#allocation2 + $0x1a8] sm:$0x3] %vm276_vm1, %v10750_v3 }
  0x6c   : > { %v562_v23 = vpop.permute.xlu2 %561 }
  0x6d   : > { %v604_v24 = vsel %vm585_vm2, %v5412_v16, %v562_v23 }
  0x6e   : > { %v658_v25 = vunpack.c.l.bf16 %v604_v24  ;;  %v659_v26 = vunpack.c.h.bf16 %v604_v24 }
  0x70   : > { %691 = vst.msk [vmem:[#allocation2 + $0x79] sm:$0xff] %vm273_vm0, %v658_v25 }
  0x71   : > { %692 = vst.msk [vmem:[#allocation2 + $0x81] sm:$0xff] %vm273_vm0, %v659_v26 }
  0x74   : > { %v564_v29 = vpop.permute.xlu2 %563 }
  0x75   : > { %v608_v30 = vsel %vm585_vm2, %v5413_v27, %v564_v29  ;;  %v5418_v29 = vld [vmem:[%s6928_s30 + $0x50] sm:$0xff] }
  0x76   : > { %v660_v31 = vunpack.c.l.bf16 %v608_v30  ;;  %v661_v32 = vunpack.c.h.bf16 %v608_v30 }
  0x78   : > { %693 = vst.msk [vmem:[#allocation2 + $0x91] sm:$0xff] %vm273_vm0, %v660_v31 }
  0x79   : > { %694 = vst.msk [vmem:[#allocation2 + $0x99] sm:$0xff] %vm273_vm0, %v661_v32 }
  0x7c   : > { %v570_v34 = vpop.permute.xlu2 %569 }
  0x7d   : > { %v620_v35 = vsel %vm585_vm2, %v5416_v33, %v570_v34 }
  0x7e   : > { %v666_v36 = vunpack.c.l.bf16 %v620_v35  ;;  %v667_v37 = vunpack.c.h.bf16 %v620_v35 }
  0x7f   : > { %v759_v14 = vld [vmem:[#allocation2 + $0x91] sm:$0xff] }
  0x80   : > { %699 = vst.msk [vmem:[#allocation2 + $0xd9] sm:$0xff] %vm273_vm0, %v666_v36  ;;  %v760_v15 = vld [vmem:[#allocation2 + $0x99] sm:$0xff] }
  0x81   : > { %700 = vst.msk [vmem:[#allocation2 + $0xe1] sm:$0xff] %vm273_vm0, %v667_v37  ;;  %v6982_v22 = vpack.i.bf16 %v760_v15, %v759_v14 }
  0x83   : > { %v558_v41 = vpop.permute.xlu1 %557  ;;  %v554_v42 = vpop.permute.xlu0 %553 }
  0x84   : > { %v596_v43 = vsel %vm585_vm2, %v5410_v38, %v558_v41  ;;  %v588_v44 = vsel %vm585_vm2, %v5408_v39, %v554_v42  ;;  %v576_v45 = vpop.permute.xlu2 %575  ;;  %v758_v41 = vld [vmem:[#allocation2 + $0x81] sm:$0xff] }
  0x85   : > { %v654_v46 = vunpack.c.l.bf16 %v596_v43  ;;  %v655_v47 = vunpack.c.h.bf16 %v596_v43  ;;  %v650_v48 = vunpack.c.l.bf16 %v588_v44  ;;  %v651_v49 = vunpack.c.h.bf16 %v588_v44 }
  0x86   : > { %v632_v50 = vsel %vm585_vm2, %v5419_v40, %v576_v45  ;;  %v757_v40 = vld [vmem:[#allocation2 + $0x79] sm:$0xff] }
  0x87   : > { %687 = vst.msk [vmem:[#allocation2 + $0x49] sm:$0xff] %vm273_vm0, %v654_v46  ;;  %v672_v51 = vunpack.c.l.bf16 %v632_v50  ;;  %v673_v54 = vunpack.c.h.bf16 %v632_v50  ;;  %v765_v33 = vld [vmem:[#allocation2 + $0xd9] sm:$0xff]  ;;  %v5421_v50 = vld [vmem:[%s6928_s30 + $0x68] sm:$0xff] }
  0x88   : > { %688 = vst.msk [vmem:[#allocation2 + $0x51] sm:$0xff] %vm273_vm0, %v655_v47  ;;  %v766_v34 = vld [vmem:[#allocation2 + $0xe1] sm:$0xff]  ;;  %v7006_v47 = vpack.i.bf16 %v758_v41, %v757_v40 }
  0x89   : > { %683 = vst.msk [vmem:[#allocation2 + $0x19] sm:$0xff] %vm273_vm0, %v650_v48  ;;  %v7002_v43 = vpack.i.bf16 %v766_v34, %v765_v33  ;;  %v792_v33 = vld [vmem:[#allocation2 + $0x9a] sm:$0xff] }
  0x8a   : > { %684 = vst.msk [vmem:[#allocation2 + $0x21] sm:$0xff] %vm273_vm0, %v651_v49  ;;  %v5420_v49 = vld [vmem:[%s6928_s30 + $0x60] sm:$0xff] }
  0x8b   : > { %v560_v56 = vpop.permute.xlu1 %559  ;;  %v556_v57 = vpop.permute.xlu0 %555  ;;  %705 = vst.msk [vmem:[#allocation2 + $0x121] sm:$0xff] %vm273_vm0, %v672_v51 }
  0x8c   : > { %v600_v58 = vsel %vm585_vm2, %v5411_v52, %v560_v56  ;;  %v592_v59 = vsel %vm585_vm2, %v5409_v53, %v556_v57  ;;  %706 = vst.msk [vmem:[#allocation2 + $0x129] sm:$0xff] %vm273_vm0, %v673_v54  ;;  %v582_v60 = vpop.permute.xlu2 %581 }
  0x8d   : > { %v656_v61 = vunpack.c.l.bf16 %v600_v58  ;;  %v657_v62 = vunpack.c.h.bf16 %v600_v58  ;;  %v652_v63 = vunpack.c.l.bf16 %v592_v59  ;;  %v653_v0 = vunpack.c.h.bf16 %v592_v59 }
  0x8e   : > { %v753_v1 = vld [vmem:[#allocation2 + $0x49] sm:$0xff]  ;;  %v644_v2 = vsel %vm585_vm2, %v5422_v55, %v582_v60 }
  0x8f   : > { %689 = vst.msk [vmem:[#allocation2 + $0x61] sm:$0xff] %vm273_vm0, %v656_v61  ;;  %v754_v4 = vld [vmem:[#allocation2 + $0x51] sm:$0xff]  ;;  %v678_v5 = vunpack.c.l.bf16 %v644_v2  ;;  %v679_v10 = vunpack.c.h.bf16 %v644_v2 }
  0x90   : > { %690 = vst.msk [vmem:[#allocation2 + $0x69] sm:$0xff] %vm273_vm0, %v657_v62  ;;  %v6966_v6 = vpack.i.bf16 %v754_v4, %v753_v1  ;;  %v749_v7 = vld [vmem:[#allocation2 + $0x19] sm:$0xff] }
  0x91   : > { %685 = vst.msk [vmem:[#allocation2 + $0x31] sm:$0xff] %vm273_vm0, %v652_v63  ;;  %v750_v11 = vld [vmem:[#allocation2 + $0x21] sm:$0xff] }
  0x92   : > { %686 = vst.msk [vmem:[#allocation2 + $0x39] sm:$0xff] %vm273_vm0, %v653_v0  ;;  %5516 = vrot.lane.b32.xlu1 %v6966_v6, %s6723_s8  ;;  %v6974_v12 = vpack.i.bf16 %v750_v11, %v749_v7  ;;  %v771_v52 = vld [vmem:[#allocation2 + $0x121] sm:$0xff] }
  0x93   : > { %v566_v13 = vpop.permute.xlu0 %565  ;;  %v568_v16 = vpop.permute.xlu1 %567  ;;  %711 = vst.msk [vmem:[#allocation2 + $0x169] sm:$0xff] %vm273_vm0, %v678_v5  ;;  %v772_v53 = vld [vmem:[#allocation2 + $0x129] sm:$0xff] }
  0x94   : > { %5506 = vrot.lane.b32.xlu2 %v6974_v12, %s6723_s8  ;;  %v612_v17 = vsel %vm585_vm2, %v5414_v8, %v566_v13  ;;  %v616_v18 = vsel %vm585_vm2, %v5415_v9, %v568_v16  ;;  %712 = vst.msk [vmem:[#allocation2 + $0x171] sm:$0xff] %vm273_vm0, %v679_v10  ;;  %v7022_v62 = vpack.i.bf16 %v772_v53, %v771_v52  ;;  %v803_v53 = vld [vmem:[#allocation2 + $0x122] sm:$0xff] }
  0x95   : > { %v662_v19 = vunpack.c.l.bf16 %v612_v17  ;;  %v663_v20 = vunpack.c.h.bf16 %v612_v17  ;;  %v664_v21 = vunpack.c.l.bf16 %v616_v18  ;;  %v665_v24 = vunpack.c.h.bf16 %v616_v18 }
  0x96   : > { %v755_v23 = vld [vmem:[#allocation2 + $0x61] sm:$0xff] }
  0x97   : > { %695 = vst.msk [vmem:[#allocation2 + $0xa9] sm:$0xff] %vm273_vm0, %v662_v19  ;;  %v756_v25 = vld [vmem:[#allocation2 + $0x69] sm:$0xff] }
  0x98   : > { %696 = vst.msk [vmem:[#allocation2 + $0xb1] sm:$0xff] %vm273_vm0, %v663_v20  ;;  %v751_v26 = vld [vmem:[#allocation2 + $0x31] sm:$0xff]  ;;  %v6986_v27 = vpack.i.bf16 %v756_v25, %v755_v23  ;;  %v787_v40 = vld [vmem:[#allocation2 + $0x62] sm:$0xff] }
  0x99   : > { %v752_v30 = vld [vmem:[#allocation2 + $0x39] sm:$0xff]  ;;  %697 = vst.msk [vmem:[#allocation2 + $0xc1] sm:$0xff] %vm273_vm0, %v664_v21  ;;  %v785_v20 = vld [vmem:[#allocation2 + $0x4a] sm:$0xff] }
  0x9a   : > { %5531 = vrot.lane.b32.xlu1 %v6982_v22, %s6723_s8  ;;  %v6993_v31 = vpack.i.bf16 %v752_v30, %v751_v26  ;;  %698 = vst.msk [vmem:[#allocation2 + $0xc9] sm:$0xff] %vm273_vm0, %v665_v24  ;;  %v777_v5 = vld [vmem:[#allocation2 + $0x169] sm:$0xff]  ;;  %v783_v16 = vld [vmem:[#allocation2 + $0x32] sm:$0xff]  ;;  %v784_v17 = vld [vmem:[#allocation2 + $0x3a] sm:$0xff] }
  0x9b   : > { %v572_v32 = vpop.permute.xlu0 %571  ;;  %v574_v35 = vpop.permute.xlu1 %573  ;;  %v778_v7 = vld [vmem:[#allocation2 + $0x171] sm:$0xff]  ;;  %v7050_v23 = vpack.i.bf16 %v784_v17, %v783_v16  ;;  %v789_v26 = vld [vmem:[#allocation2 + $0x7a] sm:$0xff]  ;;  %v7114_v16 = vld [vmem:[#allocation2 + $0x48] sm:$0xff] }
  0x9c   : > { %5511 = vrot.lane.b32.xlu0 %v6993_v31, %s6723_s8  ;;  %5521 = vrot.lane.b32.xlu2 %v6986_v27, %s6723_s8  ;;  %v624_v36 = vsel %vm585_vm2, %v5417_v28, %v572_v32  ;;  %v628_v37 = vsel %vm585_vm2, %v5418_v29, %v574_v35  ;;  %v7038_v10 = vpack.i.bf16 %v778_v7, %v777_v5  ;;  %v786_v21 = vld [vmem:[#allocation2 + $0x52] sm:$0xff]  ;;  %v790_v28 = vld [vmem:[#allocation2 + $0x82] sm:$0xff]  ;;  %v781_v30 = vld [vmem:[#allocation2 + $0x1a] sm:$0xff] }
  0x9d   : > { %v668_v38 = vunpack.c.l.bf16 %v624_v36  ;;  %v669_v39 = vunpack.c.h.bf16 %v624_v36  ;;  %v670_v42 = vunpack.c.l.bf16 %v628_v37  ;;  %v671_v45 = vunpack.c.h.bf16 %v628_v37  ;;  %v791_v29 = vld [vmem:[#allocation2 + $0x92] sm:$0xff]  ;;  %v782_v32 = vld [vmem:[#allocation2 + $0x22] sm:$0xff]  ;;  %v788_v41 = vld [vmem:[#allocation2 + $0x6a] sm:$0xff]  ;;  %10839 = vst [vmem:[#allocation6_spill] sm:$0xff] %v7114_v16 }
  0x9e   : > { %v761_v44 = vld [vmem:[#allocation2 + $0xa9] sm:$0xff]  ;;  %v7056_v25 = vpack.i.bf16 %v786_v21, %v785_v20  ;;  %v7062_v34 = vpack.i.bf16 %v790_v28, %v789_v26  ;;  %v7066_v35 = vpack.i.bf16 %v782_v32, %v781_v30  ;;  %v7068_v36 = vpack.i.bf16 %v792_v33, %v791_v29  ;;  %v7134_v21 = vpop.permute.xlu2 %5501  ;;  %v5423_v26 = vld [vmem:[%s6928_s30 + $0x78] sm:$0xff]  ;;  %v7139_v29 = vld [vmem:[#allocation2 + $0x80] sm:$0xff] }
  0x9f   : > { %701 = vst.msk [vmem:[#allocation2 + $0xf1] sm:$0xff] %vm273_vm0, %v668_v38  ;;  %v762_v46 = vld [vmem:[#allocation2 + $0xb1] sm:$0xff]  ;;  %v839_v3 = vld [vmem:[#allocation2 + $0x168] sm:$0xff] }
  0xa0   : > { %702 = vst.msk [vmem:[#allocation2 + $0xf9] sm:$0xff] %vm273_vm0, %v669_v39  ;;  %v7008_v48 = vpack.i.bf16 %v762_v46, %v761_v44  ;;  %v763_v59 = vld [vmem:[#allocation2 + $0xc1] sm:$0xff]  ;;  %v794_v52 = vld [vmem:[#allocation2 + $0xb2] sm:$0xff] }
  0xa1   : > { %703 = vst.msk [vmem:[#allocation2 + $0x109] sm:$0xff] %vm273_vm0, %v670_v42  ;;  %v764_v60 = vld [vmem:[#allocation2 + $0xc9] sm:$0xff]  ;;  %v797_v39 = vld [vmem:[#allocation2 + $0xda] sm:$0xff] }
  0xa2   : > { %5546 = vrot.lane.b32.xlu1 %v7002_v43, %s6723_s8  ;;  %704 = vst.msk [vmem:[#allocation2 + $0x111] sm:$0xff] %vm273_vm0, %v671_v45  ;;  %v7026_v2 = vpack.i.bf16 %v764_v60, %v763_v59  ;;  %v795_v37 = vld [vmem:[#allocation2 + $0xc2] sm:$0xff]  ;;  %v796_v38 = vld [vmem:[#allocation2 + $0xca] sm:$0xff]  ;;  %v7078_v45 = vpack.i.bf16 %v788_v41, %v787_v40  ;;  %v7137_v28 = vld [vmem:[#allocation2 + $0x78] sm:$0xff] }
  0xa3   : > { %v578_v51 = vpop.permute.xlu0 %577  ;;  %v580_v54 = vpop.permute.xlu1 %579  ;;  %v798_v42 = vld [vmem:[#allocation2 + $0xe2] sm:$0xff]  ;;  %v7074_v44 = vpack.i.bf16 %v796_v38, %v795_v37  ;;  %v7116_v17 = vld [vmem:[#allocation2 + $0x50] sm:$0xff]  ;;  %10841 = vst [vmem:[#allocation8_spill] sm:$0xff] %v7137_v28  ;;  %v7141_v33 = vld [vmem:[#allocation2 + $0x18] sm:$0xff]  ;;  %v7148_v40 = vpack.i.bf16 %v7139_v29, %v7137_v28 }
  0xa4   : > { %5526 = vrot.lane.b32.xlu0 %v7006_v47, %s6723_s8  ;;  %5536 = vrot.lane.b32.xlu2 %v7008_v48, %s6723_s8  ;;  %v636_v55 = vsel %vm585_vm2, %v5420_v49, %v578_v51  ;;  %v640_v56 = vsel %vm585_vm2, %v5421_v50, %v580_v54  ;;  %v7080_v46 = vpack.i.bf16 %v798_v42, %v797_v39  ;;  %v793_v51 = vld [vmem:[#allocation2 + $0xaa] sm:$0xff]  ;;  %v7143_v37 = vld [vmem:[#allocation2 + $0x20] sm:$0xff]  ;;  %v822_v38 = vld [vmem:[#allocation2 + $0x98] sm:$0xff] }
  0xa5   : > { %v674_v57 = vunpack.c.l.bf16 %v636_v55  ;;  %v675_v58 = vunpack.c.h.bf16 %v636_v55  ;;  %v676_v61 = vunpack.c.l.bf16 %v640_v56  ;;  %v677_v0 = vunpack.c.h.bf16 %v640_v56  ;;  %v804_v54 = vld [vmem:[#allocation2 + $0x12a] sm:$0xff]  ;;  %10840 = vst [vmem:[#allocation7_spill] sm:$0xff] %v7116_v17 }
  0xa6   : > { %v767_v63 = vld [vmem:[#allocation2 + $0xf1] sm:$0xff]  ;;  %v7088_v56 = vpack.i.bf16 %v794_v52, %v793_v51  ;;  %v7128_v20 = vpack.i.bf16 %v7116_v17, %v7114_v16  ;;  %10842 = vst [vmem:[#allocation9_spill] sm:$0xff] %v7139_v29  ;;  %v7161_v51 = vld [vmem:[#allocation2 + $0xc0] sm:$0xff]  ;;  %v7163_v52 = vld [vmem:[#allocation2 + $0xc8] sm:$0xff] }
  0xa7   : > { %707 = vst.msk [vmem:[#allocation2 + $0x139] sm:$0xff] %vm273_vm0, %v674_v57  ;;  %v768_v1 = vld [vmem:[#allocation2 + $0xf9] sm:$0xff]  ;;  %v7092_v57 = vpack.i.bf16 %v804_v54, %v803_v53  ;;  %v821_v30 = vld [vmem:[#allocation2 + $0x90] sm:$0xff] }
  0xa8   : > { %708 = vst.msk [vmem:[#allocation2 + $0x141] sm:$0xff] %vm273_vm0, %v675_v58  ;;  %v7028_v4 = vpack.i.bf16 %v768_v1, %v767_v63  ;;  %v769_v8 = vld [vmem:[#allocation2 + $0x109] sm:$0xff]  ;;  %v799_v60 = vld [vmem:[#allocation2 + $0xf2] sm:$0xff] }
  0xa9   : > { %709 = vst.msk [vmem:[#allocation2 + $0x151] sm:$0xff] %vm273_vm0, %v676_v61  ;;  %v770_v9 = vld [vmem:[#allocation2 + $0x111] sm:$0xff]  ;;  %v800_v61 = vld [vmem:[#allocation2 + $0xfa] sm:$0xff] }
  0xaa   : > { %5561 = vrot.lane.b32.xlu1 %v7022_v62, %s6723_s8  ;;  %710 = vst.msk [vmem:[#allocation2 + $0x159] sm:$0xff] %vm273_vm0, %v677_v0  ;;  %v7040_v14 = vpack.i.bf16 %v770_v9, %v769_v8  ;;  %v801_v49 = vld [vmem:[#allocation2 + $0x10a] sm:$0xff]  ;;  %v802_v50 = vld [vmem:[#allocation2 + $0x112] sm:$0xff]  ;;  %v7100_v5 = vpack.i.bf16 %v800_v61, %v799_v60  ;;  %v828_v60 = vld [vmem:[#allocation2 + $0xe0] sm:$0xff]  ;;  %v7173_v61 = vpack.i.bf16 %v7163_v52, %v7161_v51 }
  0xab   : > { %v7086_v55 = vpack.i.bf16 %v802_v50, %v801_v49  ;;  %v809_v63 = vld [vmem:[#allocation2 + $0x16a] sm:$0xff]  ;;  %v810_v0 = vld [vmem:[#allocation2 + $0x172] sm:$0xff]  ;;  %v584_v32 = vpop.permute.xlu0 %583  ;;  %v5655_v49 = vpack.i.bf16 %v7143_v37, %v7141_v33  ;;  %v7154_v50 = vpack.i.bf16 %v822_v38, %v821_v30  ;;  %10843 = vst [vmem:[#allocation10_spill] sm:$0xff] %v7161_v51  ;;  %v7189_v30 = vld [vmem:[#allocation2 + $0x120] sm:$0xff] }
  0xac   : > { %5541 = vrot.lane.b32.xlu0 %v7026_v2, %s6723_s8  ;;  %5551 = vrot.lane.b32.xlu2 %v7028_v4, %s6723_s8  ;;  %v7104_v7 = vpack.i.bf16 %v810_v0, %v809_v63  ;;  %v7110_v8 = vld [vmem:[#allocation2 + $0x30] sm:$0xff]  ;;  %v7112_v9 = vld [vmem:[#allocation2 + $0x38] sm:$0xff]  ;;  %v648_v39 = vsel %vm585_vm2, %v5423_v26, %v584_v32  ;;  %10844 = vst [vmem:[#allocation11_spill] sm:$0xff] %v7163_v52  ;;  %v7191_v32 = vld [vmem:[#allocation2 + $0xa8] sm:$0xff] }
  0xad   : > { %10837 = vst [vmem:[#allocation4_spill] sm:$0xff] %v7110_v8  ;;  %v680_v41 = vunpack.c.l.bf16 %v648_v39  ;;  %v681_v42 = vunpack.c.h.bf16 %v648_v39  ;;  %v827_v54 = vld [vmem:[#allocation2 + $0xd8] sm:$0xff]  ;;  %v7193_v38 = vld [vmem:[#allocation2 + $0xb0] sm:$0xff]  ;;  %v7195_v39 = vld [vmem:[#allocation2 + $0x128] sm:$0xff] }
  0xae   : > { %v773_v11 = vld [vmem:[#allocation2 + $0x139] sm:$0xff]  ;;  %10838 = vst [vmem:[#allocation5_spill] sm:$0xff] %v7112_v9  ;;  %v7181_v0 = vpack.i.bf16 %v828_v60, %v827_v54  ;;  %v7209_v54 = vpop.permute.xlu1 %5496  ;;  %v7221_v51 = vld [vmem:[#allocation2 + $0xf0] sm:$0xff] }
  0xaf   : > { %v774_v13 = vld [vmem:[#allocation2 + $0x141] sm:$0xff]  ;;  %713 = vst.msk [vmem:[#allocation2 + $0x181] sm:$0xff] %vm273_vm0, %v680_v41  ;;  %v7223_v52 = vld [vmem:[#allocation2 + $0xf8] sm:$0xff] }
  0xb0   : > { %v7042_v15 = vpack.i.bf16 %v774_v13, %v773_v11  ;;  %v775_v18 = vld [vmem:[#allocation2 + $0x151] sm:$0xff]  ;;  %v805_v11 = vld [vmem:[#allocation2 + $0x13a] sm:$0xff]  ;;  %v806_v13 = vld [vmem:[#allocation2 + $0x142] sm:$0xff]  ;;  %714 = vst.msk [vmem:[#allocation2 + $0x189] sm:$0xff] %vm273_vm0, %v681_v42  ;;  %v7203_v42 = vpack.i.bf16 %v7193_v38, %v7191_v32  ;;  %v7233_v28 = vpack.i.bf16 %v7223_v52, %v7221_v51 }
  0xb1   : > { %v776_v19 = vld [vmem:[#allocation2 + $0x159] sm:$0xff]  ;;  %10845 = vst [vmem:[#allocation12_spill] sm:$0xff] %v7189_v30  ;;  %v7215_v60 = vld [vmem:[#allocation2 + $0x150] sm:$0xff] }
  0xb2   : > { %5576 = vrot.lane.b32.xlu1 %v7038_v10, %s6723_s8  ;;  %v7052_v24 = vpack.i.bf16 %v776_v19, %v775_v18  ;;  %v807_v58 = vld [vmem:[#allocation2 + $0x152] sm:$0xff]  ;;  %v808_v59 = vld [vmem:[#allocation2 + $0x15a] sm:$0xff]  ;;  %v7120_v18 = vpack.i.bf16 %v7112_v9, %v7110_v8  ;;  %v7122_v19 = vpack.i.bf16 %v806_v13, %v805_v11  ;;  %v831_v11 = vld [vmem:[#allocation2 + $0x108] sm:$0xff]  ;;  %10846 = vst [vmem:[#allocation13_spill] sm:$0xff] %v7191_v32 }
  0xb3   : > { %v7098_v1 = vpack.i.bf16 %v808_v59, %v807_v58  ;;  %v7167_v58 = vld [vmem:[#allocation2 + $0x60] sm:$0xff]  ;;  %v7169_v59 = vld [vmem:[#allocation2 + $0x68] sm:$0xff]  ;;  %v832_v13 = vld [vmem:[#allocation2 + $0x110] sm:$0xff]  ;;  %10847 = vst [vmem:[#allocation14_spill] sm:$0xff] %v7195_v39 }
  0xb4   : > { %5556 = vrot.lane.b32.xlu0 %v7040_v14, %s6723_s8  ;;  %5566 = vrot.lane.b32.xlu2 %v7042_v15, %s6723_s8  ;;  %v7179_v63 = vpack.i.bf16 %v7169_v59, %v7167_v58  ;;  %v7197_v41 = vpack.i.bf16 %v832_v13, %v831_v11  ;;  %10848 = vst [vmem:[#allocation15_spill] sm:$0xff] %v7215_v60  ;;  %v7217_v11 = vld [vmem:[#allocation2 + $0x158] sm:$0xff] }
  0xb5   : > { %10849 = vst [vmem:[#allocation16_spill] sm:$0xff] %v7217_v11 }
  0xb6   : > { %10850 = vst [vmem:[#allocation17_spill] sm:$0xff] %v7221_v51  ;;  %v841_v51 = vld [vmem:[#allocation2 + $0x180] sm:$0xff] }
  0xb7   : > { %10851 = vst [vmem:[#allocation18_spill] sm:$0xff] %v7223_v52  ;;  %v842_v52 = vld [vmem:[#allocation2 + $0x188] sm:$0xff] }
  0xb8   : > { %v7265_v32 = vpack.i.bf16 %v842_v52, %v841_v51  ;;  %v874_v52 = vld [vmem:[#allocation2 + $0x189] sm:$0xff] }
  0xba   : > { %5586 = vrot.lane.b32.xlu1 %v7050_v23, %s6722_s7 }
  0xbc   : > { %5571 = vrot.lane.b32.xlu0 %v7052_v24, %s6723_s8  ;;  %5591 = vrot.lane.b32.xlu2 %v7056_v25, %s6722_s7 }
  0xc2   : > { %5601 = vrot.lane.b32.xlu1 %v7062_v34, %s6722_s7 }
  0xc4   : > { %5581 = vrot.lane.b32.xlu0 %v7066_v35, %s6722_s7  ;;  %5606 = vrot.lane.b32.xlu2 %v7068_v36, %s6722_s7 }
  0xca   : > { %5616 = vrot.lane.b32.xlu1 %v7074_v44, %s6722_s7 }
  0xcc   : > { %5596 = vrot.lane.b32.xlu0 %v7078_v45, %s6722_s7  ;;  %5621 = vrot.lane.b32.xlu2 %v7080_v46, %s6722_s7 }
  0xd2   : > { %5631 = vrot.lane.b32.xlu1 %v7086_v55, %s6722_s7 }
  0xd4   : > { %5611 = vrot.lane.b32.xlu0 %v7088_v56, %s6722_s7  ;;  %5636 = vrot.lane.b32.xlu2 %v7092_v57, %s6722_s7 }
  0xda   : > { %5646 = vrot.lane.b32.xlu1 %v7098_v1, %s6722_s7 }
  0xdc   : > { %5626 = vrot.lane.b32.xlu0 %v7100_v5, %s6722_s7  ;;  %5651 = vrot.lane.b32.xlu2 %v7104_v7, %s6722_s7 }
  0xe2   : > { %5661 = vrot.lane.b32.xlu1 %v7120_v18, %s6724_s9 }
  0xe4   : > { %5641 = vrot.lane.b32.xlu0 %v7122_v19, %s6722_s7  ;;  %5666 = vrot.lane.b32.xlu2 %v7128_v20, %s6724_s9 }
  0xea   : > { %5676 = vrot.lane.b32.xlu1 %v7148_v40, %s6724_s9 }
  0xec   : > { %5656 = vrot.lane.b32.xlu0 %v5655_v49, %s6724_s9  ;;  %5681 = vrot.lane.b32.xlu2 %v7154_v50, %s6724_s9  ;;  %v7207_v49 = vpack.i.bf16 %v7195_v39, %v7189_v30  ;;  %v840_v30 = vld [vmem:[#allocation2 + $0x170] sm:$0xff]  ;;  %v7227_v39 = vpack.i.bf16 %v7217_v11, %v7215_v60  ;;  %v7245_v60 = vld [vmem:[#allocation2 + $0x138] sm:$0xff]  ;;  %v7247_v11 = vld [vmem:[#allocation2 + $0x140] sm:$0xff] }
  0xed   : > { %v7235_v29 = vpack.i.bf16 %v840_v30, %v839_v3  ;;  %v7253_v3 = vpack.i.bf16 %v7247_v11, %v7245_v60 }
  0xee   : > { %v7165_v53 = vpop.permute.xlu2 %5506 }
  0xf2   : > { %5691 = vrot.lane.b32.xlu1 %v7173_v61, %s6724_s9 }
  0xf4   : > { %5671 = vrot.lane.b32.xlu0 %v7179_v63, %s6724_s9  ;;  %5696 = vrot.lane.b32.xlu2 %v7181_v0, %s6724_s9 }
  0xf6   : > { %v7187_v26 = vpop.permute.xlu2 %5521 }
  0xfa   : > { %5706 = vrot.lane.b32.xlu1 %v7197_v41, %s6724_s9 }
  0xfc   : > { %5686 = vrot.lane.b32.xlu0 %v7203_v42, %s6724_s9  ;;  %5711 = vrot.lane.b32.xlu2 %v7207_v49, %s6724_s9 }
  0xfe   : > { %v7219_v13 = vpop.permute.xlu2 %5536 }
 0x102   : > { %5721 = vrot.lane.b32.xlu1 %v7227_v39, %s6724_s9 }
 0x104   : > { %5701 = vrot.lane.b32.xlu0 %v7233_v28, %s6724_s9  ;;  %5726 = vrot.lane.b32.xlu2 %v7235_v29, %s6724_s9  ;;  %v7241_v9 = vpop.permute.xlu1 %5516 }
 0x106   : > { %v7243_v8 = vpop.permute.xlu2 %5551 }
 0x10a   : > { %5736 = vrot.lane.b32.xlu1 %v6974_v12, %s6725_s10 }
 0x10c   : > { %5716 = vrot.lane.b32.xlu0 %v7253_v3, %s6724_s9  ;;  %5741 = vrot.lane.b32.xlu2 %v6993_v31, %s6725_s10  ;;  %v7259_v30 = vpop.permute.xlu1 %5531 }
 0x10d   : > { %10852 = vst [vmem:[#allocation19_spill] sm:$0xff] %v7259_v30 }
 0x10e   : > { %v7261_v17 = vpop.permute.xlu0 %5511  ;;  %v7263_v16 = vpop.permute.xlu2 %5566 }
 0x112   : > { %5751 = vrot.lane.b32.xlu1 %v6986_v27, %s6725_s10 }
 0x114   : > { %5731 = vrot.lane.b32.xlu0 %v7265_v32, %s6724_s9  ;;  %5756 = vrot.lane.b32.xlu2 %v7006_v47, %s6725_s10  ;;  %v7273_v12 = vpop.permute.xlu1 %5546 }
 0x115   : > { %10853 = vst [vmem:[#allocation20_spill] sm:$0xff] %v7273_v12 }
 0x116   : > { %v7275_v31 = vpop.permute.xlu0 %5526  ;;  %v7277_v30 = vpop.permute.xlu2 %5591 }
 0x11a   : > { %5766 = vrot.lane.b32.xlu1 %v7008_v48, %s6725_s10 }
 0x11c   : > { %5746 = vrot.lane.b32.xlu0 %v6966_v6, %s6725_s10  ;;  %5771 = vrot.lane.b32.xlu2 %v7026_v2, %s6725_s10  ;;  %v7285_v27 = vpop.permute.xlu1 %5561 }
 0x11e   : > { %v7287_v51 = vpop.permute.xlu0 %5541  ;;  %v7289_v47 = vpop.permute.xlu2 %5606 }
 0x11f   : > { %10854 = vst [vmem:[#allocation21_spill] sm:$0xff] %v7289_v47 }
 0x122   : > { %5781 = vrot.lane.b32.xlu1 %v7028_v4, %s6725_s10 }
 0x124   : > { %5761 = vrot.lane.b32.xlu0 %v6982_v22, %s6725_s10  ;;  %5786 = vrot.lane.b32.xlu2 %v7040_v14, %s6725_s10  ;;  %v7297_v48 = vpop.permute.xlu1 %5576  ;;  %v873_v22 = vld [vmem:[#allocation2 + $0x181] sm:$0xff] }
 0x125   : > { %10855 = vst [vmem:[#allocation22_spill] sm:$0xff] %v7297_v48  ;;  %v938_v48 = vld [vmem:[#allocation2 + $0x198] sm:$0xff] }
 0x126   : > { %v7299_v6 = vpop.permute.xlu0 %5556  ;;  %v7301_v2 = vpop.permute.xlu2 %5621 }
 0x127   : > { %10856 = vst [vmem:[#allocation23_spill] sm:$0xff] %v7299_v6  ;;  %v7315_v6 = vpack.i.bf16 %v874_v52, %v873_v22  ;;  %v905_v52 = vld [vmem:[#allocation2 + $0x182] sm:$0xff] }
 0x128   : > { %10857 = vst [vmem:[#allocation24_spill] sm:$0xff] %v7301_v2 }
 0x12a   : > { %5796 = vrot.lane.b32.xlu1 %v7042_v15, %s6725_s10 }
 0x12c   : > { %5776 = vrot.lane.b32.xlu0 %v7002_v43, %s6725_s10  ;;  %5801 = vrot.lane.b32.xlu2 %v7052_v24, %s6725_s10  ;;  %v7309_v4 = vpop.permute.xlu1 %5586 }
 0x12e   : > { %v7311_v14 = vpop.permute.xlu0 %5571  ;;  %v7313_v12 = vpop.permute.xlu2 %5636 }
 0x132   : > { %5811 = vrot.lane.b32.xlu1 %v7315_v6, %s6725_s10 }
 0x134   : > { %5791 = vrot.lane.b32.xlu0 %v7022_v62, %s6725_s10  ;;  %5816 = vrot.lane.b32.xlu2 %v7066_v35, %s6726_s11  ;;  %v7323_v43 = vpop.permute.xlu1 %5601 }
 0x136   : > { %v7325_v15 = vpop.permute.xlu0 %5581  ;;  %v7327_v24 = vpop.permute.xlu2 %5651 }
 0x137   : > { %10858 = vst [vmem:[#allocation25_spill] sm:$0xff] %v7327_v24  ;;  %v945_v24 = vld [vmem:[#allocation2 + $0x69] sm:$0xff] }
 0x13a   : > { %5826 = vrot.lane.b32.xlu1 %v7056_v25, %s6726_s11 }
 0x13c   : > { %5806 = vrot.lane.b32.xlu0 %v7038_v10, %s6725_s10  ;;  %5831 = vrot.lane.b32.xlu2 %v7078_v45, %s6726_s11  ;;  %v7335_v62 = vpop.permute.xlu1 %5616 }
 0x13e   : > { %v7337_v22 = vpop.permute.xlu0 %5596  ;;  %v7339_v35 = vpop.permute.xlu2 %5666 }
 0x142   : > { %5841 = vrot.lane.b32.xlu1 %v7068_v36, %s6726_s11 }
 0x144   : > { %5821 = vrot.lane.b32.xlu0 %v7050_v23, %s6726_s11  ;;  %5846 = vrot.lane.b32.xlu2 %v7088_v56, %s6726_s11  ;;  %v7347_v25 = vpop.permute.xlu1 %5631 }
 0x145   : > { %10859 = vst [vmem:[#allocation26_spill] sm:$0xff] %v7347_v25  ;;  %v906_v25 = vld [vmem:[#allocation2 + $0x18a] sm:$0xff] }
 0x146   : > { %v7349_v10 = vpop.permute.xlu0 %5611  ;;  %v7351_v45 = vpop.permute.xlu2 %5681  ;;  %v7379_v2 = vpack.i.bf16 %v906_v25, %v905_v52  ;;  %v941_v52 = vld [vmem:[#allocation2 + $0x39] sm:$0xff] }
 0x14a   : > { %5856 = vrot.lane.b32.xlu1 %v7080_v46, %s6726_s11 }
 0x14c   : > { %5836 = vrot.lane.b32.xlu0 %v7062_v34, %s6726_s11  ;;  %5861 = vrot.lane.b32.xlu2 %v7100_v5, %s6726_s11  ;;  %v7359_v36 = vpop.permute.xlu1 %5646 }
 0x14e   : > { %v7361_v23 = vpop.permute.xlu0 %5626  ;;  %v7363_v56 = vpop.permute.xlu2 %5696 }
 0x152   : > { %5871 = vrot.lane.b32.xlu1 %v7092_v57, %s6726_s11 }
 0x154   : > { %5851 = vrot.lane.b32.xlu0 %v7074_v44, %s6726_s11  ;;  %5876 = vrot.lane.b32.xlu2 %v7122_v19, %s6726_s11  ;;  %v7371_v46 = vpop.permute.xlu1 %5661 }
 0x156   : > { %v7373_v34 = vpop.permute.xlu0 %5641  ;;  %v7375_v5 = vpop.permute.xlu2 %5711 }
 0x157   : > { %10860 = vst [vmem:[#allocation27_spill] sm:$0xff] %v7375_v5 }
 0x15a   : > { %5886 = vrot.lane.b32.xlu1 %v7104_v7, %s6726_s11 }
 0x15c   : > { %5866 = vrot.lane.b32.xlu0 %v7086_v55, %s6726_s11  ;;  %5891 = vrot.lane.b32.xlu2 %v7379_v2, %s6726_s11  ;;  %v7385_v44 = vpop.permute.xlu1 %5676 }
 0x15e   : > { %v7387_v57 = vpop.permute.xlu0 %5656  ;;  %v7389_v19 = vpop.permute.xlu2 %5726 }
 0x162   : > { %5901 = vrot.lane.b32.xlu1 %v7128_v20, %s6727_s12 }
 0x164   : > { %5881 = vrot.lane.b32.xlu0 %v7098_v1, %s6726_s11  ;;  %5906 = vrot.lane.b32.xlu2 %v7179_v63, %s6727_s12  ;;  %v7397_v55 = vpop.permute.xlu1 %5691 }
 0x166   : > { %v7399_v7 = vpop.permute.xlu0 %5671  ;;  %v7401_v25 = vpop.permute.xlu2 %5741 }
 0x167   : > { %10861 = vst [vmem:[#allocation28_spill] sm:$0xff] %v7401_v25 }
 0x16a   : > { %5916 = vrot.lane.b32.xlu1 %v7154_v50, %s6727_s12 }
 0x16c   : > { %5896 = vrot.lane.b32.xlu0 %v7120_v18, %s6727_s12  ;;  %5921 = vrot.lane.b32.xlu2 %v7203_v42, %s6727_s12  ;;  %v7409_v20 = vpop.permute.xlu1 %5706 }
 0x16d   : > { %10862 = vst [vmem:[#allocation29_spill] sm:$0xff] %v7409_v20  ;;  %v963_v20 = vld [vmem:[#allocation2 + $0x141] sm:$0xff] }
 0x16e   : > { %v7411_v1 = vpop.permute.xlu0 %5686  ;;  %v7413_v63 = vpop.permute.xlu2 %5756 }
 0x16f   : > { %10863 = vst [vmem:[#allocation30_spill] sm:$0xff] %v7411_v1  ;;  %v943_v1 = vld [vmem:[#allocation2 + $0x51] sm:$0xff] }
 0x170   : > { %10864 = vst [vmem:[#allocation31_spill] sm:$0xff] %v7413_v63  ;;  %v972_v63 = vld [vmem:[#allocation2 + $0x32] sm:$0xff] }
 0x172   : > { %5931 = vrot.lane.b32.xlu1 %v7181_v0, %s6727_s12 }
 0x174   : > { %5911 = vrot.lane.b32.xlu0 %v7148_v40, %s6727_s12  ;;  %5936 = vrot.lane.b32.xlu2 %v7233_v28, %s6727_s12  ;;  %v7421_v50 = vpop.permute.xlu1 %5721 }
 0x175   : > { %10865 = vst [vmem:[#allocation32_spill] sm:$0xff] %v7421_v50  ;;  %v977_v50 = vld [vmem:[#allocation2 + $0x6a] sm:$0xff] }
 0x176   : > { %v7423_v18 = vpop.permute.xlu0 %5701  ;;  %v7425_v42 = vpop.permute.xlu2 %5771 }
 0x177   : > { %10866 = vst [vmem:[#allocation33_spill] sm:$0xff] %v7423_v18  ;;  %v942_v18 = vld [vmem:[#allocation2 + $0x49] sm:$0xff] }
 0x178   : > { %10867 = vst [vmem:[#allocation34_spill] sm:$0xff] %v7425_v42  ;;  %v950_v42 = vld [vmem:[#allocation2 + $0xa9] sm:$0xff] }
 0x17a   : > { %5946 = vrot.lane.b32.xlu1 %v7207_v49, %s6727_s12 }
 0x17c   : > { %5926 = vrot.lane.b32.xlu0 %v7173_v61, %s6727_s12  ;;  %5951 = vrot.lane.b32.xlu2 %v7253_v3, %s6727_s12  ;;  %v7433_v0 = vpop.permute.xlu1 %5736  ;;  %v940_v61 = vld [vmem:[#allocation2 + $0x31] sm:$0xff] }
 0x17d   : > { %v5975_v47 = vpack.i.bf16 %v941_v52, %v940_v61  ;;  %v946_v61 = vld [vmem:[#allocation2 + $0x79] sm:$0xff]  ;;  %v947_v52 = vld [vmem:[#allocation2 + $0x81] sm:$0xff] }
 0x17e   : > { %v7435_v40 = vpop.permute.xlu0 %5716  ;;  %v7437_v28 = vpop.permute.xlu2 %5786 }
 0x17f   : > { %10868 = vst [vmem:[#allocation35_spill] sm:$0xff] %v7435_v40  ;;  %v973_v40 = vld [vmem:[#allocation2 + $0x3a] sm:$0xff] }
 0x180   : > { %10869 = vst [vmem:[#allocation36_spill] sm:$0xff] %v7437_v28 }
 0x182   : > { %5961 = vrot.lane.b32.xlu1 %v7235_v29, %s6727_s12  ;;  %v5980_v29 = vpack.i.bf16 %v943_v1, %v942_v18  ;;  %v5995_v1 = vpack.i.bf16 %v947_v52, %v946_v61  ;;  %v948_v18 = vld [vmem:[#allocation2 + $0x91] sm:$0xff]  ;;  %v952_v61 = vld [vmem:[#allocation2 + $0xc1] sm:$0xff]  ;;  %v953_v52 = vld [vmem:[#allocation2 + $0xc9] sm:$0xff] }
 0x184   : > { %5941 = vrot.lane.b32.xlu0 %v7197_v41, %s6727_s12  ;;  %5966 = vrot.lane.b32.xlu2 %v7265_v32, %s6727_s12  ;;  %v7445_v49 = vpop.permute.xlu1 %5751  ;;  %v944_v41 = vld [vmem:[#allocation2 + $0x61] sm:$0xff] }
 0x185   : > { %10870 = vst [vmem:[#allocation37_spill] sm:$0xff] %v7445_v49  ;;  %v5990_v28 = vpack.i.bf16 %v945_v24, %v944_v41  ;;  %v951_v24 = vld [vmem:[#allocation2 + $0xb1] sm:$0xff] }
 0x186   : > { %v7447_v3 = vpop.permute.xlu0 %5731  ;;  %v7449_v5 = vpop.permute.xlu2 %5801 }
 0x187   : > { %10871 = vst [vmem:[#allocation38_spill] sm:$0xff] %v7447_v3  ;;  %v939_v3 = vld [vmem:[#allocation2 + $0x1a0] sm:$0xff] }
 0x188   : > { %10872 = vst [vmem:[#allocation39_spill] sm:$0xff] %v7449_v5 }
 0x18a   : > { %5976 = vrot.lane.b32.xlu1 %v5975_v47, %s6728_s13  ;;  %v5970_v47 = vpack.i.bf16 %v939_v3, %v938_v48  ;;  %v6010_v3 = vpack.i.bf16 %v951_v24, %v950_v42  ;;  %v956_v24 = vld [vmem:[#allocation2 + $0xf1] sm:$0xff] }
 0x18c   : > { %5956 = vrot.lane.b32.xlu0 %v7227_v39, %s6727_s12  ;;  %5981 = vrot.lane.b32.xlu2 %v5980_v29, %s6728_s13  ;;  %v7455_v32 = vpop.permute.xlu1 %5766  ;;  %v949_v29 = vld [vmem:[#allocation2 + $0x99] sm:$0xff] }
 0x18d   : > { %10873 = vst [vmem:[#allocation40_spill] sm:$0xff] %v7455_v32  ;;  %v6005_v48 = vpack.i.bf16 %v949_v29, %v948_v18  ;;  %v975_v18 = vld [vmem:[#allocation2 + $0x52] sm:$0xff]  ;;  %v979_v29 = vld [vmem:[#allocation2 + $0x82] sm:$0xff] }
 0x18e   : > { %v7457_v49 = vpop.permute.xlu0 %5746  ;;  %v7459_v5 = vpop.permute.xlu2 %5816 }
 0x18f   : > { %10874 = vst [vmem:[#allocation41_spill] sm:$0xff] %v7457_v49 }
 0x192   : > { %5991 = vrot.lane.b32.xlu1 %v5990_v28, %s6728_s13  ;;  %v5985_v28 = vpack.i.bf16 %v973_v40, %v972_v63 }
 0x194   : > { %5971 = vrot.lane.b32.xlu0 %v5970_v47, %s6727_s12  ;;  %5996 = vrot.lane.b32.xlu2 %v5995_v1, %s6728_s13  ;;  %v7464_v39 = vpop.permute.xlu1 %5781  ;;  %s6730_s12 = smov 32  }
 0x195   : > { %10875 = vst [vmem:[#allocation42_spill] sm:$0xff] %v7464_v39  ;;  %v978_v39 = vld [vmem:[#allocation2 + $0x7a] sm:$0xff] }
 0x196   : > { %v7466_v32 = vpop.permute.xlu0 %5761  ;;  %v7468_v49 = vpop.permute.xlu2 %5831  ;;  %v6025_v42 = vpack.i.bf16 %v979_v29, %v978_v39  ;;  %v960_v29 = vld [vmem:[#allocation2 + $0x121] sm:$0xff] }
 0x197   : > { %10876 = vst [vmem:[#allocation43_spill] sm:$0xff] %v7468_v49  ;;  %v974_v49 = vld [vmem:[#allocation2 + $0x4a] sm:$0xff] }
 0x198   : > { %v6000_v63 = vpack.i.bf16 %v975_v18, %v974_v49 }
 0x19a   : > { %6006 = vrot.lane.b32.xlu1 %v6005_v48, %s6728_s13  ;;  %v6020_v48 = vpack.i.bf16 %v953_v52, %v952_v61  ;;  %v981_v61 = vld [vmem:[#allocation2 + $0x9a] sm:$0xff] }
 0x19c   : > { %5986 = vrot.lane.b32.xlu0 %v5985_v28, %s6729_s14  ;;  %6011 = vrot.lane.b32.xlu2 %v6010_v3, %s6728_s13  ;;  %v7473_v41 = vpop.permute.xlu1 %5796  ;;  %v957_v28 = vld [vmem:[#allocation2 + $0xf9] sm:$0xff] }
 0x19d   : > { %10877 = vst [vmem:[#allocation44_spill] sm:$0xff] %v7473_v41  ;;  %v976_v41 = vld [vmem:[#allocation2 + $0x62] sm:$0xff]  ;;  %v6035_v52 = vpack.i.bf16 %v957_v28, %v956_v24  ;;  %v983_v24 = vld [vmem:[#allocation2 + $0xb2] sm:$0xff] }
 0x19e   : > { %v7475_v47 = vpop.permute.xlu0 %5776  ;;  %v7477_v1 = vpop.permute.xlu2 %5846  ;;  %v6015_v49 = vpack.i.bf16 %v977_v50, %v976_v41 }
 0x19f   : > { %10878 = vst [vmem:[#allocation45_spill] sm:$0xff] %v7475_v47  ;;  %v980_v47 = vld [vmem:[#allocation2 + $0x92] sm:$0xff] }
 0x1a0   : > { %10879 = vst [vmem:[#allocation46_spill] sm:$0xff] %v7477_v1  ;;  %v6040_v39 = vpack.i.bf16 %v981_v61, %v980_v47  ;;  %v984_v61 = vld [vmem:[#allocation2 + $0xc2] sm:$0xff] }
 0x1a2   : > { %6021 = vrot.lane.b32.xlu1 %v6020_v48, %s6728_s13  ;;  %v961_v48 = vld [vmem:[#allocation2 + $0x129] sm:$0xff] }
 0x1a3   : > { %v6050_v28 = vpack.i.bf16 %v961_v48, %v960_v29  ;;  %v965_v29 = vld [vmem:[#allocation2 + $0x159] sm:$0xff] }
 0x1a4   : > { %6001 = vrot.lane.b32.xlu0 %v6000_v63, %s6729_s14  ;;  %6026 = vrot.lane.b32.xlu2 %v6025_v42, %s6729_s14  ;;  %v7482_v40 = vpop.permute.xlu1 %5811 }
 0x1a5   : > { %10880 = vst [vmem:[#allocation47_spill] sm:$0xff] %v7482_v40  ;;  %v982_v40 = vld [vmem:[#allocation2 + $0xaa] sm:$0xff] }
 0x1a6   : > { %v7484_v3 = vpop.permute.xlu0 %5791  ;;  %v7486_v1 = vpop.permute.xlu2 %5861  ;;  %v6055_v41 = vpack.i.bf16 %v983_v24, %v982_v40  ;;  %v986_v24 = vld [vmem:[#allocation2 + $0xda] sm:$0xff] }
 0x1a7   : > { %10881 = vst [vmem:[#allocation48_spill] sm:$0xff] %v7484_v3  ;;  %v954_v3 = vld [vmem:[#allocation2 + $0xd9] sm:$0xff] }
 0x1a8   : > { %10882 = vst [vmem:[#allocation49_spill] sm:$0xff] %v7486_v1  ;;  %v955_v1 = vld [vmem:[#allocation2 + $0xe1] sm:$0xff] }
 0x1a9   : > { %v6030_v50 = vpack.i.bf16 %v955_v1, %v954_v3 }
 0x1aa   : > { %6036 = vrot.lane.b32.xlu1 %v6035_v52, %s6728_s13  ;;  %v985_v52 = vld [vmem:[#allocation2 + $0xca] sm:$0xff] }
 0x1ab   : > { %v6065_v48 = vpack.i.bf16 %v985_v52, %v984_v61 }
 0x1ac   : > { %6016 = vrot.lane.b32.xlu0 %v6015_v49, %s6729_s14  ;;  %6041 = vrot.lane.b32.xlu2 %v6040_v39, %s6729_s14  ;;  %v7491_v18 = vpop.permute.xlu1 %5826 }
 0x1ad   : > { %10883 = vst [vmem:[#allocation50_spill] sm:$0xff] %v7491_v18  ;;  %v959_v18 = vld [vmem:[#allocation2 + $0x111] sm:$0xff] }
 0x1ae   : > { %v7493_v63 = vpop.permute.xlu0 %5806  ;;  %v7495_v42 = vpop.permute.xlu2 %5876 }
 0x1af   : > { %10884 = vst [vmem:[#allocation51_spill] sm:$0xff] %v7493_v63  ;;  %v958_v63 = vld [vmem:[#allocation2 + $0x109] sm:$0xff] }
 0x1b0   : > { %10885 = vst [vmem:[#allocation52_spill] sm:$0xff] %v7495_v42  ;;  %v964_v42 = vld [vmem:[#allocation2 + $0x151] sm:$0xff]  ;;  %v6045_v1 = vpack.i.bf16 %v959_v18, %v958_v63 }
 0x1b1   : > { %v6070_v40 = vpack.i.bf16 %v965_v29, %v964_v42  ;;  %v988_v63 = vld [vmem:[#allocation2 + $0xf2] sm:$0xff]  ;;  %v989_v42 = vld [vmem:[#allocation2 + $0xfa] sm:$0xff] }
 0x1b2   : > { %6051 = vrot.lane.b32.xlu1 %v6050_v28, %s6728_s13  ;;  %v987_v28 = vld [vmem:[#allocation2 + $0xe2] sm:$0xff] }
 0x1b4   : > { %6031 = vrot.lane.b32.xlu0 %v6030_v50, %s6728_s13  ;;  %6056 = vrot.lane.b32.xlu2 %v6055_v41, %s6729_s14  ;;  %v7500_v47 = vpop.permute.xlu1 %5841 }
 0x1b6   : > { %v7502_v49 = vpop.permute.xlu0 %5821  ;;  %v7504_v39 = vpop.permute.xlu2 %5891 }
 0x1b7   : > { %10886 = vst [vmem:[#allocation53_spill] sm:$0xff] %v7502_v49  ;;  %v6080_v49 = vpack.i.bf16 %v987_v28, %v986_v24  ;;  %v997_v24 = vld [vmem:[#allocation2 + $0x15a] sm:$0xff]  ;;  %v6095_v28 = vpack.i.bf16 %v989_v42, %v988_v63  ;;  %v999_v63 = vld [vmem:[#allocation2 + $0x172] sm:$0xff] }
 0x1b8   : > { %10887 = vst [vmem:[#allocation54_spill] sm:$0xff] %v7504_v39  ;;  %v962_v39 = vld [vmem:[#allocation2 + $0x139] sm:$0xff] }
 0x1b9   : > { %v6060_v61 = vpack.i.bf16 %v963_v20, %v962_v39  ;;  %v992_v39 = vld [vmem:[#allocation2 + $0x122] sm:$0xff] }
 0x1ba   : > { %6066 = vrot.lane.b32.xlu1 %v6065_v48, %s6729_s14  ;;  %v966_v48 = vld [vmem:[#allocation2 + $0x169] sm:$0xff] }
 0x1bc   : > { %6046 = vrot.lane.b32.xlu0 %v6045_v1, %s6728_s13  ;;  %6071 = vrot.lane.b32.xlu2 %v6070_v40, %s6728_s13  ;;  %v7509_v3 = vpop.permute.xlu1 %5856  ;;  %v967_v1 = vld [vmem:[#allocation2 + $0x171] sm:$0xff] }
 0x1bd   : > { %10888 = vst [vmem:[#allocation55_spill] sm:$0xff] %v7509_v3  ;;  %v996_v40 = vld [vmem:[#allocation2 + $0x152] sm:$0xff]  ;;  %v6075_v20 = vpack.i.bf16 %v967_v1, %v966_v48 }
 0x1be   : > { %v7511_v50 = vpop.permute.xlu0 %5836  ;;  %v7513_v41 = vpop.permute.xlu2 %5906 }
 0x1bf   : > { %10889 = vst [vmem:[#allocation56_spill] sm:$0xff] %v7511_v50  ;;  %v971_v50 = vld [vmem:[#allocation2 + $0x1a1] sm:$0xff] }
 0x1c0   : > { %10890 = vst [vmem:[#allocation57_spill] sm:$0xff] %v7513_v41  ;;  %v998_v41 = vld [vmem:[#allocation2 + $0x16a] sm:$0xff] }
 0x1c1   : > { %v6115_v48 = vpack.i.bf16 %v999_v63, %v998_v41  ;;  %v5333_v41 = vld [vmem:[%s10745_s2 + $0x30] sm:$0xf] }
 0x1c2   : > { %6081 = vrot.lane.b32.xlu1 %v6080_v49, %s6729_s14  ;;  %v6100_v49 = vpack.i.bf16 %v997_v24, %v996_v40  ;;  %v1002_v40 = vld [vmem:[#allocation2 + $0x19a] sm:$0xff]  ;;  %v1003_v24 = vld [vmem:[#allocation2 + $0x1a2] sm:$0xff] }
 0x1c4   : > { %6061 = vrot.lane.b32.xlu0 %v6060_v61, %s6728_s13  ;;  %6086 = vrot.lane.b32.xlu2 %v7315_v6, %s6728_s13  ;;  %v7519_v18 = vpop.permute.xlu1 %5871  ;;  %v993_v61 = vld [vmem:[#allocation2 + $0x12a] sm:$0xff] }
 0x1c5   : > { %10891 = vst [vmem:[#allocation58_spill] sm:$0xff] %v7519_v18  ;;  %v970_v18 = vld [vmem:[#allocation2 + $0x199] sm:$0xff]  ;;  %v6110_v42 = vpack.i.bf16 %v993_v61, %v992_v39 }
 0x1c6   : > { %v7521_v52 = vpop.permute.xlu0 %5851  ;;  %v7523_v29 = vpop.permute.xlu2 %5921 }
 0x1c7   : > { %10892 = vst [vmem:[#allocation59_spill] sm:$0xff] %v7521_v52 }
 0x1ca   : > { %6096 = vrot.lane.b32.xlu1 %v6095_v28, %s6729_s14  ;;  %v6090_v28 = vpack.i.bf16 %v971_v50, %v970_v18  ;;  %v5446_v18 = vld [vmem:[%s10745_s2 + $0x30] sm:$0x30] }
 0x1cb   : > { %v5334_v39 = vor.u32 %v5446_v18, %v5333_v41  ;;  %v5443_v41 = vld [vmem:[%s10745_s2 + $0x18] sm:$0xff]  ;;  %v5499_v18 = vunpack.i.h.bf16 %v7209_v54 }
 0x1cc   : > { %6076 = vrot.lane.b32.xlu0 %v6075_v20, %s6728_s13  ;;  %6101 = vrot.lane.b32.xlu2 %v6100_v49, %s6729_s14  ;;  %v7528_v6 = vpop.permute.xlu1 %5886 }
 0x1cd   : > { %10893 = vst [vmem:[#allocation60_spill] sm:$0xff] %v7528_v6  ;;  %v990_v6 = vld [vmem:[#allocation2 + $0x10a] sm:$0xff]  ;;  %v2417_v63 = vsel %vm2415_vm3, %v5334_v39, 0  ;;  %v5498_v39 = vunpack.i.l.bf16 %v7209_v54 }
 0x1ce   : > { %v7530_v52 = vpop.permute.xlu0 %5866  ;;  %v7532_v3 = vpop.permute.xlu2 %5936  ;;  %2420 = vmatpush.bf16.msra.mxu0 %v2417_v63  ;;  %5456 = vmatpush.bf16.msra.mxu3 %v2417_v63  ;;  %v715_v63 = vld [vmem:[#allocation2] sm:$0xff] }
 0x1cf   : > { %10894 = vst [vmem:[#allocation61_spill] sm:$0xff] %v7530_v52  ;;  %v6130_v52 = vpack.i.bf16 %v1003_v24, %v1002_v40  ;;  %v5444_v40 = vld [vmem:[%s10745_s2 + $0x20] sm:$0xff] }
 0x1d0   : > { %10895 = vst [vmem:[#allocation62_spill] sm:$0xff] %v7532_v3  ;;  %v991_v3 = vld [vmem:[#allocation2 + $0x112] sm:$0xff] }
 0x1d1   : > { %v6105_v50 = vpack.i.bf16 %v991_v3, %v990_v6  ;;  %v5445_v3 = vld [vmem:[%s10745_s2 + $0x28] sm:$0xff]  ;;  %v994_v6 = vld [vmem:[#allocation2 + $0x13a] sm:$0xff] }
 0x1d2   : > { %6111 = vrot.lane.b32.xlu1 %v6110_v42, %s6729_s14  ;;  %2421 = vmatpush.bf16.msra.mxu0 %v5445_v3 }
 0x1d3   : > { %5457 = vmatpush.bf16.msra.mxu3 %v5445_v3  ;;  %v716_v3 = vld [vmem:[#allocation2 + $0x8] sm:$0xff] }
 0x1d4   : > { %6091 = vrot.lane.b32.xlu0 %v6090_v28, %s6728_s13  ;;  %6116 = vrot.lane.b32.xlu2 %v6115_v48, %s6729_s14  ;;  %v7537_v1 = vpop.permute.xlu1 %5901  ;;  %v995_v28 = vld [vmem:[#allocation2 + $0x142] sm:$0xff]  ;;  %v2029_v54 = vsel %vm273_vm0, %v716_v3, %v5499_v18  ;;  %v5513_v3 = vunpack.i.l.bf16 %v7261_v17  ;;  %s6731_s13 = smov 16  }
 0x1d5   : > { %10896 = vst [vmem:[#allocation63_spill] sm:$0xff] %v7537_v1  ;;  %v6120_v48 = vpack.i.bf16 %v995_v28, %v994_v6  ;;  %v5508_v6 = vunpack.i.l.bf16 %v7165_v53  ;;  %v5442_v28 = vld [vmem:[%s10745_s2 + $0x10] sm:$0xff]  ;;  %v10921_v1 = vld [vmem:[#allocation12_spill] sm:$0xff] }
 0x1d6   : > { %v7539_v20 = vpop.permute.xlu0 %5881  ;;  %v7541_v49 = vpop.permute.xlu2 %5951  ;;  %2422 = vmatpush.bf16.msra.mxu0 %v5444_v40 }
 0x1d7   : > { %10897 = vst [vmem:[#allocation64_spill] sm:$0xff] %v7539_v20  ;;  %5458 = vmatpush.bf16.msra.mxu3 %v5444_v40  ;;  %v5509_v40 = vunpack.i.h.bf16 %v7165_v53  ;;  %v5523_v20 = vunpack.i.l.bf16 %v7187_v26  ;;  %v5519_v53 = vunpack.i.h.bf16 %v7241_v9 }
 0x1d8   : > { %10898 = vst [vmem:[#allocation65_spill] sm:$0xff] %v7541_v49  ;;  %v5503_v49 = vunpack.i.l.bf16 %v7134_v21 }
 0x1da   : > { %6126 = vrot.lane.b32.xlu1 %v7379_v2, %s6729_s14  ;;  %2423 = vmatpush.bf16.msra.mxu0 %v5443_v41 }
 0x1db   : > { %5459 = vmatpush.bf16.msra.mxu3 %v5443_v41  ;;  %v5538_v41 = vunpack.i.l.bf16 %v7219_v13 }
 0x1dc   : > { %6106 = vrot.lane.b32.xlu0 %v6105_v50, %s6729_s14  ;;  %v7552_v61 = vpop.permute.xlu1 %5916  ;;  %6131 = vrot.lane.b32.xlu2 %v6130_v52, %s6729_s14 }
 0x1dd   : > { %10899 = vst [vmem:[#allocation66_spill] sm:$0xff] %v7552_v61  ;;  %v2028_v61 = vsel %vm273_vm0, %v715_v63, %v5498_v39  ;;  %v5553_v63 = vunpack.i.l.bf16 %v7243_v8 }
 0x1de   : > { %v7555_v42 = vpop.permute.xlu0 %5896  ;;  %v7557_v2 = vpop.permute.xlu2 %5966  ;;  %2424 = vmatpush.bf16.msra.mxu0 %v5442_v28 }
 0x1df   : > { %10900 = vst [vmem:[#allocation67_spill] sm:$0xff] %v7557_v2  ;;  %v5524_v2 = vunpack.i.h.bf16 %v7187_v26  ;;  %v5441_v26 = vld [vmem:[%s10745_s2 + $0x8] sm:$0xff]  ;;  %5460 = vmatpush.bf16.msra.mxu3 %v5442_v28 }
 0x1e2   : > { %2425 = vmatpush.bf16.msra.mxu0 %v5441_v26 }
 0x1e3   : > { %5461 = vmatpush.bf16.msra.mxu3 %v5441_v26  ;;  %v5593_v26 = vunpack.i.l.bf16 %v7277_v30 }
 0x1e4   : > { %6121 = vrot.lane.b32.xlu0 %v6120_v48, %s6729_s14  ;;  %v7566_v52 = vpop.permute.xlu1 %5931  ;;  %v5504_v48 = vunpack.i.h.bf16 %v7134_v21  ;;  %v7594_v21 = vsel %vm273_vm0, %v7141_v33, %v5508_v6  ;;  %v5514_v33 = vunpack.i.h.bf16 %v7261_v17  ;;  %v7615_v6 = vsel %vm273_vm0, %v7169_v59, %v5524_v2  ;;  %v10908_v2 = vld [vmem:[#allocation6_spill] sm:$0xff] }
 0x1e5   : > { %10901 = vst [vmem:[#allocation68_spill] sm:$0xff] %v7566_v52  ;;  %v5539_v52 = vunpack.i.h.bf16 %v7219_v13  ;;  %v5554_v13 = vunpack.i.h.bf16 %v7243_v8  ;;  %v7625_v8 = vsel %vm273_vm0, %v7167_v58, %v5523_v20  ;;  %v5569_v59 = vunpack.i.h.bf16 %v7263_v16  ;;  %v10910_v20 = vld [vmem:[#allocation18_spill] sm:$0xff] }
 0x1e6   : > { %v7568_v24 = vpop.permute.xlu0 %5911  ;;  %v7570_v50 = vpop.permute.xlu2 %5981  ;;  %v7621_v28 = vsel %vm2060_vm4, %v2029_v54, %v5504_v48  ;;  %v5568_v54 = vunpack.i.l.bf16 %v7263_v16  ;;  %v5529_v58 = vunpack.i.h.bf16 %v7275_v31  ;;  %v10913_v16 = vld [vmem:[#allocation5_spill] sm:$0xff] }
 0x1e7   : > { %10902 = vst [vmem:[#allocation69_spill] sm:$0xff] %v7568_v24  ;;  %v7629_v17 = vsel %vm273_vm0, %v7193_v38, %v5539_v52  ;;  %v5440_v38 = vld [vmem:[%s10745_s2] sm:$0xff]  ;;  %v7647_v52 = vsel %vm273_vm0, %v10910_v20, %v5554_v13  ;;  %v5563_v20 = vunpack.i.l.bf16 %v7285_v27 }
 0x1e8   : > { %10903 = vst [vmem:[#allocation70_spill] sm:$0xff] %v7570_v50  ;;  %v5518_v50 = vunpack.i.l.bf16 %v7241_v9  ;;  %v7611_v9 = vsel %vm273_vm0, %v7143_v37, %v5509_v40  ;;  %v10907_v37 = vld [vmem:[#allocation13_spill] sm:$0xff]  ;;  %2426 = vmatpush.bf16.msra.mxu0 %v5440_v38  ;;  %5462 = vmatpush.bf16.msra.mxu3 %v5440_v38 }
 0x1e9   : > { %v7633_v40 = vsel %vm273_vm0, %v10907_v37, %v5538_v41  ;;  %v10911_v41 = vld [vmem:[#allocation17_spill] sm:$0xff]  ;;  %v10912_v37 = vld [vmem:[#allocation4_spill] sm:$0xff]  ;;  %v2052_v25 = vsel %vm273_vm0, %v10921_v1, %v5563_v20 }
 0x1ec   : > { %v7587_v24 = vpop.permute.xlu1 %5946 }
 0x1ed   : > { %10904 = vst [vmem:[#allocation71_spill] sm:$0xff] %v7587_v24  ;;  %v5594_v24 = vunpack.i.h.bf16 %v7277_v30 }
 0x1ee   : > { %v7598_v18 = vpop.permute.xlu0 %5926  ;;  %v7600_v39 = vpop.permute.xlu2 %5996 }
 0x1ef   : > { %10905 = vst [vmem:[#allocation72_spill] sm:$0xff] %v7598_v18  ;;  %v7618_v18 = vsel %vm2060_vm4, %v2028_v61, %v5503_v49  ;;  %v2034_v49 = vsel %vm273_vm0, %v10908_v2, %v5518_v50  ;;  %v10909_v61 = vld [vmem:[#allocation7_spill] sm:$0xff]  ;;  %v7651_v50 = vsel %vm273_vm0, %v10911_v41, %v5553_v63  ;;  %v2033_v2 = vsel %vm273_vm0, %v10913_v16, %v5514_v33  ;;  %v10917_v41 = vld [vmem:[#allocation9_spill] sm:$0xff] }
 0x1f0   : > { %10906 = vst [vmem:[#allocation73_spill] sm:$0xff] %v7600_v39  ;;  %v2035_v48 = vsel %vm273_vm0, %v10909_v61, %v5519_v53  ;;  %v2032_v53 = vsel %vm273_vm0, %v10912_v37, %v5513_v3  ;;  %v5528_v61 = vunpack.i.l.bf16 %v7275_v31  ;;  %v5564_v39 = vunpack.i.h.bf16 %v7285_v27 }
 0x1f1   : > { %v7665_v63 = vsel %vm273_vm0, %v7247_v11, %v5569_v59  ;;  %v5544_v3 = vunpack.i.h.bf16 %v7287_v51  ;;  %v5543_v33 = vunpack.i.l.bf16 %v7287_v51  ;;  %v7672_v31 = vsel %vm273_vm0, %v7245_v60, %v5568_v54  ;;  %v10919_v54 = vld [vmem:[#allocation8_spill] sm:$0xff] }
 0x1f2   : > { %10915 = vst [vmem:[#allocation6_spill] sm:$0xff] %v7665_v63  ;;  %v2039_v30 = vsel %vm273_vm0, %v10917_v41, %v5529_v58  ;;  %v5589_v37 = vunpack.i.h.bf16 %v7309_v4  ;;  %v5588_v16 = vunpack.i.l.bf16 %v7309_v4  ;;  %v5574_v27 = vunpack.i.h.bf16 %v7311_v14 }
 0x1f3   : > { %10916 = vst [vmem:[#allocation7_spill] sm:$0xff] %v7672_v31  ;;  %v5573_v51 = vunpack.i.l.bf16 %v7311_v14  ;;  %v5639_v60 = vunpack.i.h.bf16 %v7313_v12  ;;  %v5638_v59 = vunpack.i.l.bf16 %v7313_v12  ;;  %v2038_v58 = vsel %vm273_vm0, %v10919_v54, %v5528_v61  ;;  %v10922_v14 = vld [vmem:[#allocation11_spill] sm:$0xff]  ;;  %v10923_v31 = vld [vmem:[#allocation10_spill] sm:$0xff] }
 0x1f4   : > { %v7661_v13 = vpop.permute.xlu1 %5961  ;;  %v7689_v41 = vsel %vm2060_vm4, %v2035_v48, %v5594_v24  ;;  %v7692_v4 = vsel %vm2060_vm4, %v2034_v49, %v5593_v26  ;;  %v2045_v63 = vsel %vm273_vm0, %v10922_v14, %v5544_v3  ;;  %v2044_v12 = vsel %vm273_vm0, %v10923_v31, %v5543_v33  ;;  %v10924_v26 = vld [vmem:[#allocation16_spill] sm:$0xff] }
 0x1f5   : > { %10914 = vst [vmem:[#allocation13_spill] sm:$0xff] %v7661_v13  ;;  %v5603_v61 = vunpack.i.l.bf16 %v7323_v43  ;;  %v2065_v24 = vsel %vm2060_vm4, %v2032_v53, %v5588_v16  ;;  %v2066_v48 = vsel %vm2060_vm4, %v2033_v2, %v5589_v37  ;;  %v5604_v49 = vunpack.i.h.bf16 %v7323_v43 }
 0x1f6   : > { %v7678_v13 = vpop.permute.xlu0 %5941  ;;  %v7680_v11 = vpop.permute.xlu2 %6011  ;;  %v7714_v3 = vsel %vm2060_vm4, %v2052_v25, %v5638_v59  ;;  %v5584_v33 = vunpack.i.h.bf16 %v7325_v15  ;;  %v5583_v53 = vunpack.i.l.bf16 %v7325_v15  ;;  %v5619_v2 = vunpack.i.h.bf16 %v7335_v62 }
 0x1f7   : > { %10918 = vst [vmem:[#allocation18_spill] sm:$0xff] %v7678_v13  ;;  %v10920_v13 = vld [vmem:[#allocation14_spill] sm:$0xff]  ;;  %v5618_v43 = vunpack.i.l.bf16 %v7335_v62  ;;  %v2071_v37 = vsel %vm2060_vm4, %v2038_v58, %v5603_v61  ;;  %v5599_v16 = vunpack.i.h.bf16 %v7337_v22  ;;  %v2072_v25 = vsel %vm2060_vm4, %v2039_v30, %v5604_v49 }
 0x1f8   : > { %v2053_v38 = vsel %vm273_vm0, %v10920_v13, %v5564_v39  ;;  %v2057_v39 = vsel %vm273_vm0, %v10924_v26, %v5574_v27  ;;  %v10925_v13 = vld [vmem:[#allocation15_spill] sm:$0xff]  ;;  %v5598_v27 = vunpack.i.l.bf16 %v7337_v22  ;;  %v5614_v15 = vunpack.i.h.bf16 %v7349_v10 }
 0x1f9   : > { %v2056_v1 = vsel %vm273_vm0, %v10925_v13, %v5573_v51  ;;  %v7711_v20 = vsel %vm2060_vm4, %v2053_v38, %v5639_v60  ;;  %v5669_v51 = vunpack.i.h.bf16 %v7339_v35  ;;  %v5668_v60 = vunpack.i.l.bf16 %v7339_v35 }
 0x1fa   : > { %v5613_v59 = vunpack.i.l.bf16 %v7349_v10  ;;  %v5684_v58 = vunpack.i.h.bf16 %v7351_v45  ;;  %v5683_v38 = vunpack.i.l.bf16 %v7351_v45  ;;  %v5649_v22 = vunpack.i.h.bf16 %v7359_v36 }
 0x1fb   : > { %v5648_v14 = vunpack.i.l.bf16 %v7359_v36  ;;  %v7740_v30 = vsel %vm2060_vm4, %v7594_v21, %v5583_v53  ;;  %v7744_v35 = vsel %vm2060_vm4, %v7611_v9, %v5584_v33  ;;  %v7747_v10 = vsel %vm2060_vm4, %v2044_v12, %v5618_v43 }
 0x1fc   : > { %v7720_v31 = vpop.permute.xlu1 %5976  ;;  %v7750_v61 = vsel %vm2060_vm4, %v2045_v63, %v5619_v2  ;;  %v7754_v45 = vsel %vm2060_vm4, %v7625_v8, %v5598_v27  ;;  %v7758_v36 = vsel %vm2060_vm4, %v7615_v6, %v5599_v16  ;;  %v7761_v21 = vsel %vm2093_vm5, %v2066_v48, %v5669_v51 }
 0x1fd   : > { %v5628_v9 = vunpack.i.l.bf16 %v7361_v23  ;;  %v7765_v49 = vsel %vm2093_vm5, %v2065_v24, %v5668_v60  ;;  %v7769_v63 = vsel %vm2060_vm4, %v7633_v40, %v5613_v59  ;;  %v7773_v8 = vsel %vm2060_vm4, %v7629_v17, %v5614_v15 }
 0x1fe   : > { %v7730_v54 = vpop.permute.xlu0 %5956  ;;  %v7732_v62 = vpop.permute.xlu2 %6026  ;;  %v2105_v6 = vsel %vm2093_vm5, %v2072_v25, %v5684_v58  ;;  %v2104_v12 = vsel %vm2093_vm5, %v2071_v37, %v5683_v38  ;;  %v7778_v48 = vsel %vm2060_vm4, %v2056_v1, %v5648_v14  ;;  %v7781_v26 = vsel %vm2060_vm4, %v2057_v39, %v5649_v22 }
 0x1ff   : > { %v5629_v24 = vunpack.i.h.bf16 %v7361_v23  ;;  %v5699_v40 = vunpack.i.h.bf16 %v7363_v56  ;;  %v5659_v13 = vunpack.i.h.bf16 %v7387_v57  ;;  %v5658_v17 = vunpack.i.l.bf16 %v7387_v57 }
 0x200   : > { %v7791_v53 = vsel %vm2060_vm4, %v7651_v50, %v5628_v9  ;;  %v5698_v1 = vunpack.i.l.bf16 %v7363_v56  ;;  %v5739_v2 = vunpack.i.h.bf16 %v7433_v0  ;;  %v5738_v39 = vunpack.i.l.bf16 %v7433_v0 }
 0x201   : > { %v5664_v43 = vunpack.i.h.bf16 %v7371_v46  ;;  %v5663_v37 = vunpack.i.l.bf16 %v7371_v46  ;;  %v5643_v57 = vunpack.i.l.bf16 %v7373_v34  ;;  %v5819_v50 = vunpack.i.h.bf16 %v7459_v5 }
 0x202   : > { %v5818_v25 = vunpack.i.l.bf16 %v7459_v5  ;;  %v5764_v60 = vunpack.i.h.bf16 %v7466_v32  ;;  %v5763_v0 = vunpack.i.l.bf16 %v7466_v32  ;;  %v2095_v15 = vsel %vm2093_vm5, %v7621_v28, %v5659_v13 }
 0x203   : > { %v2094_v59 = vsel %vm2093_vm5, %v7618_v18, %v5658_v17  ;;  %v5843_v58 = vunpack.i.l.bf16 %v7500_v47  ;;  %v5679_v38 = vunpack.i.h.bf16 %v7385_v44  ;;  %v2128_v14 = vsel %vm2126_vm6, %v2095_v15, %v5739_v2 }
 0x204   : > { %v7787_v33 = vpop.permute.xlu1 %5991  ;;  %v2127_v22 = vsel %vm2126_vm6, %v2094_v59, %v5738_v39  ;;  %v5844_v5 = vunpack.i.h.bf16 %v7500_v47  ;;  %v5924_v9 = vunpack.i.h.bf16 %v7523_v29  ;;  %v5923_v32 = vunpack.i.l.bf16 %v7523_v29 }
 0x205   : > { %v5899_v28 = vunpack.i.h.bf16 %v7555_v42  ;;  %v5898_v13 = vunpack.i.l.bf16 %v7555_v42  ;;  %v2161_v18 = vsel %vm2159_vm7, %v2128_v14, %v5819_v50  ;;  %v2160_v17 = vsel %vm2159_vm7, %v2127_v22, %v5818_v25 }
 0x206   : > { %v7800_v27 = vpop.permute.xlu0 %5971  ;;  %v7802_v51 = vpop.permute.xlu2 %6041  ;;  %v2137_v16 = vsel %vm2126_vm6, %v2104_v12, %v5763_v0  ;;  %v2138_v39 = vsel %vm2126_vm6, %v2105_v6, %v5764_v60  ;;  %v5979_v47 = vunpack.i.h.bf16 %v7720_v31  ;;  %v5978_v15 = vunpack.i.l.bf16 %v7720_v31 }
 0x207   : > { %v2170_v2 = vsel %vm2159_vm7, %v2137_v16, %v5843_v58  ;;  %v2171_v59 = vsel %vm2159_vm7, %v2138_v39, %v5844_v5  ;;  %v6014_v42 = vunpack.i.h.bf16 %v7680_v11  ;;  %v6013_v50 = vunpack.i.l.bf16 %v7680_v11 }
 0x208   : > { %v2203_v12 = vsel %vm2192_vm8, %v2170_v2, %v5923_v32  ;;  %v2204_v6 = vsel %vm2192_vm8, %v2171_v59, %v5924_v9  ;;  %v2193_v16 = vsel %vm2192_vm8, %v2160_v17, %v5898_v13  ;;  %v2194_v25 = vsel %vm2192_vm8, %v2161_v18, %v5899_v28 }
 0x209   : > { %v2226_v22 = vsel %vm2225_vm9, %v2193_v16, %v5978_v15  ;;  %v2227_v14 = vsel %vm2225_vm9, %v2194_v25, %v5979_v47  ;;  %v2236_v32 = vsel %vm2225_vm9, %v2203_v12, %v6013_v50  ;;  %v2237_v9 = vsel %vm2225_vm9, %v2204_v6, %v6014_v42  ;;  %v10928_v12 = vld [vmem:[#allocation6_spill] sm:$0xff] }
 0x20a   : > { %v5678_v18 = vunpack.i.l.bf16 %v7385_v44  ;;  %v2082_v47 = vsel %vm2060_vm4, %v7647_v52, %v5629_v24  ;;  %v5729_v15 = vunpack.i.h.bf16 %v7389_v19  ;;  %v5728_v59 = vunpack.i.l.bf16 %v7389_v19 }
 0x20b   : > { %v7862_v44 = vsel %vm2093_vm5, %v7750_v61, %v5699_v40  ;;  %v7868_v23 = vsel %vm2093_vm5, %v7747_v10, %v5698_v1  ;;  %v5694_v52 = vunpack.i.h.bf16 %v7397_v55  ;;  %v5693_v24 = vunpack.i.l.bf16 %v7397_v55  ;;  %v10926_v55 = vld [vmem:[#allocation7_spill] sm:$0xff] }
 0x20c   : > { %v7828_v29 = vpop.permute.xlu1 %6006  ;;  %v2096_v61 = vsel %vm2093_vm5, %v7740_v30, %v5663_v37  ;;  %v2097_v56 = vsel %vm2093_vm5, %v7744_v35, %v5664_v43  ;;  %v5674_v10 = vunpack.i.h.bf16 %v7399_v7  ;;  %v5673_v40 = vunpack.i.l.bf16 %v7399_v7  ;;  %v10929_v37 = vld [vmem:[#allocation28_spill] sm:$0xff] }
 0x20d   : > { %v2087_v1 = vsel %vm2060_vm4, %v10926_v55, %v5643_v57  ;;  %v10927_v50 = vunpack.i.h.bf16 %v7373_v34  ;;  %v7895_v46 = vsel %vm2093_vm5, %v7754_v45, %v5678_v18  ;;  %v7899_v30 = vsel %vm2093_vm5, %v7758_v36, %v5679_v38  ;;  %v10930_v38 = vld [vmem:[#allocation53_spill] sm:$0xff] }
 0x20e   : > { %v5987_v60 = vpop.permute.xlu0 %5986  ;;  %v6057_v0 = vpop.permute.xlu2 %6056  ;;  %v7905_v43 = vsel %vm2093_vm5, %v7781_v26, %v5729_v15  ;;  %v7909_v34 = vsel %vm2093_vm5, %v7778_v48, %v5728_v59  ;;  %v5744_v57 = vunpack.i.h.bf16 %v10929_v37  ;;  %v5743_v45 = vunpack.i.l.bf16 %v10929_v37 }
 0x20f   : > { %v5989_v31 = vunpack.i.h.bf16 %v5987_v60  ;;  %v5988_v58 = vunpack.i.l.bf16 %v5987_v60  ;;  %v6059_v5 = vunpack.i.h.bf16 %v6057_v0  ;;  %v6058_v11 = vunpack.i.l.bf16 %v6057_v0  ;;  %v10931_v0 = vld [vmem:[#allocation63_spill] sm:$0xff] }
 0x210   : > { %v2088_v6 = vsel %vm2060_vm4, %v10928_v12, %v10927_v50  ;;  %v2108_v16 = vsel %vm2093_vm5, %v7769_v63, %v5693_v24  ;;  %v2109_v36 = vsel %vm2093_vm5, %v7773_v8, %v5694_v52  ;;  %v5824_v25 = vunpack.i.h.bf16 %v10930_v38  ;;  %v10932_v63 = vld [vmem:[#allocation29_spill] sm:$0xff]  ;;  %v10935_v52 = vld [vmem:[#allocation34_spill] sm:$0xff] }
 0x211   : > { %v2259_v13 = vsel %vm2258_vm10, %v2226_v22, %v5988_v58  ;;  %v2260_v28 = vsel %vm2258_vm10, %v2227_v14, %v5989_v31  ;;  %v7845_v39 = vsel %vm2258_vm10, %v2236_v32, %v6058_v11  ;;  %v7848_v2 = vsel %vm2258_vm10, %v2237_v9, %v6059_v5  ;;  %v10933_v14 = vld [vmem:[#allocation70_spill] sm:$0xff] }
 0x212   : > { %v2291_v17 = vpack.c.bf16 %v2260_v28, %v2259_v13  ;;  %v2296_v42 = vpack.c.bf16 %v7848_v2, %v7845_v39  ;;  %v5823_v60 = vunpack.i.l.bf16 %v10930_v38  ;;  %v7921_v26 = vsel %vm2093_vm5, %v7692_v4, %v5673_v40  ;;  %v6704_v39 = vld [vmem:[#allocation2 + $0x90] sm:$0xff] }
 0x213   : > { %v7925_v48 = vsel %vm2093_vm5, %v7689_v41, %v5674_v10  ;;  %v5904_v31 = vunpack.i.h.bf16 %v10931_v0  ;;  %v5903_v58 = vunpack.i.l.bf16 %v10931_v0  ;;  %v5709_v22 = vunpack.i.h.bf16 %v10932_v63  ;;  %v10934_v41 = vld [vmem:[#allocation32_spill] sm:$0xff]  ;;  %v10937_v0 = vld [vmem:[#allocation31_spill] sm:$0xff] }
 0x214   : > { %5335 = vmatmul.msk.bf16.vlgmr.msra.gmra.mxu0 %vm2366_vm11, %v2291_v17  ;;  %v7873_v19 = vpop.permute.xlu1 %6021  ;;  %v5708_v8 = vunpack.i.l.bf16 %v10932_v63  ;;  %v5984_v5 = vunpack.i.h.bf16 %v10933_v14  ;;  %v5983_v11 = vunpack.i.l.bf16 %v10933_v14  ;;  %v2129_v32 = vsel %vm2126_vm6, %v2096_v61, %v5743_v45 }
 0x215   : > { %v2130_v4 = vsel %vm2126_vm6, %v2097_v56, %v5744_v57  ;;  %v5724_v28 = vunpack.i.h.bf16 %v10934_v41  ;;  %v5723_v18 = vunpack.i.l.bf16 %v10934_v41  ;;  %v2162_v17 = vsel %vm2159_vm7, %v2129_v32, %v5823_v60  ;;  %v10936_v57 = vld [vmem:[#allocation35_spill] sm:$0xff] }
 0x216   : > { %v6002_v35 = vpop.permute.xlu0 %6001  ;;  %v7901_v7 = vpop.permute.xlu2 %6071  ;;  %v2163_v15 = vsel %vm2159_vm7, %v2130_v4, %v5824_v25  ;;  %v5774_v24 = vunpack.i.h.bf16 %v10935_v52  ;;  %v5773_v10 = vunpack.i.l.bf16 %v10935_v52  ;;  %v2195_v61 = vsel %vm2192_vm8, %v2162_v17, %v5903_v58  ;;  %v10940_v4 = vld [vmem:[#allocation44_spill] sm:$0xff] }
 0x217   : > { %v6004_v9 = vunpack.i.h.bf16 %v6002_v35  ;;  %v6003_v13 = vunpack.i.l.bf16 %v6002_v35  ;;  %v2196_v56 = vsel %vm2192_vm8, %v2163_v15, %v5904_v31  ;;  %v2114_v40 = vsel %vm2093_vm5, %v7791_v53, %v5708_v8  ;;  %v10938_v31 = vld [vmem:[#allocation36_spill] sm:$0xff] }
 0x218   : > { %v2115_v55 = vsel %vm2093_vm5, %v2082_v47, %v5709_v22  ;;  %v2228_v50 = vsel %vm2225_vm9, %v2195_v61, %v5983_v11  ;;  %v2229_v12 = vsel %vm2225_vm9, %v2196_v56, %v5984_v5  ;;  %v5719_v45 = vunpack.i.h.bf16 %v10936_v57  ;;  %v10939_v11 = vld [vmem:[#allocation41_spill] sm:$0xff] }
 0x219   : > { %v5718_v38 = vunpack.i.l.bf16 %v10936_v57  ;;  %v2261_v25 = vsel %vm2258_vm10, %v2228_v50, %v6003_v13  ;;  %v2262_v60 = vsel %vm2258_vm10, %v2229_v12, %v6004_v9  ;;  %v5759_v53 = vunpack.i.h.bf16 %v10937_v0 }
 0x21a   : > { %v5758_v47 = vunpack.i.l.bf16 %v10937_v0  ;;  %v5789_v58 = vunpack.i.h.bf16 %v10938_v31  ;;  %v5788_v63 = vunpack.i.l.bf16 %v10938_v31  ;;  %v7963_v22 = vsel %vm2093_vm5, %v2087_v1, %v5723_v18 }
 0x21b   : > { %v7966_v8 = vsel %vm2093_vm5, %v2088_v6, %v5724_v28  ;;  %v7969_v14 = vsel %vm2126_vm6, %v2108_v16, %v5773_v10  ;;  %v7972_v5 = vsel %vm2126_vm6, %v2109_v36, %v5774_v24  ;;  %v5748_v32 = vunpack.i.l.bf16 %v10939_v11  ;;  %v10941_v28 = vld [vmem:[#allocation52_spill] sm:$0xff]  ;;  %v10942_v24 = vld [vmem:[#allocation37_spill] sm:$0xff] }
 0x21c   : > { %v7939_v59 = vpop.permute.xlu1 %6036  ;;  %v5799_v9 = vunpack.i.h.bf16 %v10940_v4  ;;  %v5798_v13 = vunpack.i.l.bf16 %v10940_v4  ;;  %v2292_v41 = vpack.c.bf16 %v2262_v60, %v2261_v25  ;;  %v2118_v1 = vsel %vm2093_vm5, %v7714_v3, %v5718_v38 }
 0x21d   : > { %v2119_v6 = vsel %vm2093_vm5, %v7711_v20, %v5719_v45  ;;  %v5879_v18 = vunpack.i.h.bf16 %v10941_v28  ;;  %v5878_v16 = vunpack.i.l.bf16 %v10941_v28  ;;  %v7984_v36 = vsel %vm2126_vm6, %v2114_v40, %v5788_v63  ;;  %v10943_v45 = vld [vmem:[#allocation50_spill] sm:$0xff] }
 0x21e   : > { %v7950_v35 = vpop.permute.xlu0 %6016  ;;  %v7952_v37 = vpop.permute.xlu2 %6086  ;;  %v7987_v17 = vsel %vm2126_vm6, %v2115_v55, %v5789_v58  ;;  %v5959_v15 = vunpack.i.h.bf16 %v7730_v54  ;;  %v5958_v52 = vunpack.i.l.bf16 %v7730_v54  ;;  %v5754_v20 = vunpack.i.h.bf16 %v10942_v24 }
 0x21f   : > { %v5753_v10 = vunpack.i.l.bf16 %v10942_v24  ;;  %v6074_v61 = vunpack.i.h.bf16 %v7901_v7  ;;  %v6073_v56 = vunpack.i.l.bf16 %v7901_v7  ;;  %v5749_v40 = vunpack.i.h.bf16 %v10939_v11  ;;  %v10944_v11 = vld [vmem:[#allocation57_spill] sm:$0xff]  ;;  %v10945_v24 = vld [vmem:[#allocation39_spill] sm:$0xff] }
 0x220   : > { %v2131_v55 = vsel %vm2126_vm6, %v7765_v49, %v5748_v32  ;;  %v2151_v50 = vsel %vm2126_vm6, %v2118_v1, %v5798_v13  ;;  %v2152_v54 = vsel %vm2126_vm6, %v2119_v6, %v5799_v9  ;;  %v5829_v38 = vunpack.i.h.bf16 %v10943_v45 }
 0x221   : > { %v5828_v25 = vunpack.i.l.bf16 %v10943_v45  ;;  %v2184_v60 = vsel %vm2159_vm7, %v2151_v50, %v5878_v16  ;;  %v2185_v7 = vsel %vm2159_vm7, %v2152_v54, %v5879_v18  ;;  %v5909_v32 = vunpack.i.h.bf16 %v10944_v11 }
 0x222   : > { %v2217_v31 = vsel %vm2192_vm8, %v2184_v60, %v5958_v52  ;;  %v2218_v58 = vsel %vm2192_vm8, %v2185_v7, %v5959_v15  ;;  %v5908_v4 = vunpack.i.l.bf16 %v10944_v11  ;;  %v5993_v1 = vunpack.i.l.bf16 %v7787_v33  ;;  %v10947_v7 = vld [vmem:[#allocation45_spill] sm:$0xff] }
 0x223   : > { %v2250_v9 = vsel %vm2225_vm9, %v2217_v31, %v6073_v56  ;;  %v2251_v13 = vsel %vm2225_vm9, %v2218_v58, %v6074_v61  ;;  %v2132_v18 = vsel %vm2126_vm6, %v7761_v21, %v5749_v40  ;;  %v6019_v16 = vunpack.i.h.bf16 %v7950_v35 }
 0x224   : > { %5336 = vmatmul.msk.bf16.gmra.mxu0 %vm2366_vm11, %v2292_v41  ;;  %v7992_v3 = vpop.permute.xlu1 %6051  ;;  %v5994_v41 = vunpack.i.h.bf16 %v7787_v33  ;;  %v6018_v15 = vunpack.i.l.bf16 %v7950_v35  ;;  %v5804_v56 = vunpack.i.h.bf16 %v10945_v24  ;;  %v5803_v61 = vunpack.i.l.bf16 %v10945_v24 }
 0x225   : > { %v2164_v50 = vsel %vm2159_vm7, %v2131_v55, %v5828_v25  ;;  %v2165_v33 = vsel %vm2159_vm7, %v2132_v18, %v5829_v38  ;;  %v2133_v35 = vsel %vm2126_vm6, %v7921_v26, %v5753_v10  ;;  %v5778_v31 = vunpack.i.l.bf16 %v10947_v7  ;;  %v10949_v10 = vld [vmem:[#allocation59_spill] sm:$0xff] }
 0x226   : > { %v8003_v12 = vpop.permute.xlu0 %6031  ;;  %v6102_v57 = vpop.permute.xlu2 %6101  ;;  %v2197_v21 = vsel %vm2192_vm8, %v2164_v50, %v5908_v4  ;;  %v2198_v40 = vsel %vm2192_vm8, %v2165_v33, %v5909_v32  ;;  %v5779_v58 = vunpack.i.h.bf16 %v10947_v7  ;;  %v2134_v4 = vsel %vm2126_vm6, %v7925_v48, %v5754_v20  ;;  %v10950_v48 = vld [vmem:[#allocation68_spill] sm:$0xff]  ;;  %v10951_v50 = vld [vmem:[#allocation61_spill] sm:$0xff] }
 0x227   : > { %v6104_v49 = vunpack.i.h.bf16 %v6102_v57  ;;  %v6103_v63 = vunpack.i.l.bf16 %v6102_v57  ;;  %v10946_v57 = vld [vmem:[#allocation43_spill] sm:$0xff]  ;;  %v2230_v55 = vsel %vm2225_vm9, %v2197_v21, %v5993_v1  ;;  %v2231_v38 = vsel %vm2225_vm9, %v2198_v40, %v5994_v41 }
 0x228   : > { %v5834_v45 = vunpack.i.h.bf16 %v10946_v57  ;;  %v5833_v60 = vunpack.i.l.bf16 %v10946_v57  ;;  %v2263_v11 = vsel %vm2258_vm10, %v2230_v55, %v6018_v15  ;;  %v2264_v32 = vsel %vm2258_vm10, %v2231_v38, %v6019_v16  ;;  %v10954_v38 = vld [vmem:[#allocation69_spill] sm:$0xff] }
 0x229   : > { %v2283_v6 = vsel %vm2258_vm10, %v2250_v9, %v6103_v63  ;;  %v2284_v28 = vsel %vm2258_vm10, %v2251_v13, %v6104_v49  ;;  %v10948_v49 = vld [vmem:[#allocation55_spill] sm:$0xff]  ;;  %v5854_v9 = vunpack.i.h.bf16 %v10949_v10  ;;  %v5853_v13 = vunpack.i.l.bf16 %v10949_v10 }
 0x22a   : > { %v2303_v52 = vpack.c.bf16 %v2284_v28, %v2283_v6  ;;  %v5858_v63 = vunpack.i.l.bf16 %v10948_v49  ;;  %v5859_v26 = vunpack.i.h.bf16 %v10948_v49  ;;  %v2153_v41 = vsel %vm2126_vm6, %v7963_v22, %v5803_v61 }
 0x22b   : > { %v2154_v1 = vsel %vm2126_vm6, %v7966_v8, %v5804_v56  ;;  %v2166_v6 = vsel %vm2159_vm7, %v2133_v35, %v5833_v60  ;;  %v2167_v28 = vsel %vm2159_vm7, %v2134_v4, %v5834_v45  ;;  %v2143_v18 = vsel %vm2126_vm6, %v7868_v23, %v5778_v31  ;;  %v10952_v45 = vld [vmem:[#allocation62_spill] sm:$0xff]  ;;  %v10953_v35 = vld [vmem:[#allocation64_spill] sm:$0xff] }
 0x22c   : > { %v8027_v54 = vpop.permute.xlu1 %6066  ;;  %5347 = vmatmul.msk.bf16.vlgmr.msra.gmra.mxu3 %vm2366_vm11, %v2303_v52  ;;  %v5934_v20 = vunpack.i.h.bf16 %v10950_v48  ;;  %v5933_v16 = vunpack.i.l.bf16 %v10950_v48  ;;  %v2293_v15 = vpack.c.bf16 %v2264_v32, %v2263_v11  ;;  %v2144_v52 = vsel %vm2126_vm6, %v7862_v44, %v5779_v58  ;;  %v10955_v32 = vld [vmem:[#allocation73_spill] sm:$0xff] }
 0x22d   : > { %v2176_v22 = vsel %vm2159_vm7, %v2143_v18, %v5858_v63  ;;  %v6034_v24 = vunpack.i.h.bf16 %v8003_v12  ;;  %v6033_v8 = vunpack.i.l.bf16 %v8003_v12  ;;  %v2177_v56 = vsel %vm2159_vm7, %v2144_v52, %v5859_v26  ;;  %v10956_v18 = vld [vmem:[#allocation13_spill] sm:$0xff] }
 0x22e   : > { %v8039_v25 = vpop.permute.xlu0 %6046  ;;  %v2174_v61 = vsel %vm2159_vm7, %v7969_v14, %v5853_v13  ;;  %v2175_v23 = vsel %vm2159_vm7, %v7972_v5, %v5854_v9  ;;  %v5869_v33 = vunpack.i.h.bf16 %v10951_v50  ;;  %v5868_v44 = vunpack.i.l.bf16 %v10951_v50 }
 0x22f   : > { %v5938_v60 = vunpack.i.l.bf16 %v10952_v45  ;;  %v5939_v12 = vunpack.i.h.bf16 %v10952_v45  ;;  %v5884_v7 = vunpack.i.h.bf16 %v10953_v35  ;;  %v2207_v14 = vsel %vm2192_vm8, %v2174_v61, %v5933_v16  ;;  %v10957_v45 = vld [vmem:[#allocation71_spill] sm:$0xff] }
 0x230   : > { %v2208_v31 = vsel %vm2192_vm8, %v2175_v23, %v5934_v20  ;;  %v5883_v55 = vunpack.i.l.bf16 %v10953_v35  ;;  %v5913_v58 = vunpack.i.l.bf16 %v10954_v38  ;;  %v2240_v49 = vsel %vm2225_vm9, %v2207_v14, %v6033_v8 }
 0x231   : > { %v2241_v63 = vsel %vm2225_vm9, %v2208_v31, %v6034_v24  ;;  %v5914_v11 = vunpack.i.h.bf16 %v10954_v38  ;;  %v5998_v4 = vunpack.i.l.bf16 %v10955_v32  ;;  %v2209_v9 = vsel %vm2192_vm8, %v2176_v22, %v5938_v60 }
 0x232   : > { %v5999_v13 = vunpack.i.h.bf16 %v10955_v32  ;;  %v5963_v48 = vunpack.i.l.bf16 %v10956_v18  ;;  %v6029_v16 = vunpack.i.h.bf16 %v7732_v62  ;;  %v6039_v52 = vunpack.i.h.bf16 %v7939_v59 }
 0x233   : > { %v6038_v24 = vunpack.i.l.bf16 %v7939_v59  ;;  %v2210_v8 = vsel %vm2192_vm8, %v2177_v56, %v5939_v12  ;;  %v2186_v61 = vsel %vm2159_vm7, %v2153_v41, %v5883_v55  ;;  %v2187_v22 = vsel %vm2159_vm7, %v2154_v1, %v5884_v7  ;;  %v6117_v56 = vpop.permute.xlu2 %6116 }
 0x234   : > { %5337 = vmatmul.msk.bf16.gmra.mxu0 %vm2366_vm11, %v2293_v15  ;;  %v6082_v57 = vpop.permute.xlu1 %6081  ;;  %v6028_v15 = vunpack.i.l.bf16 %v7732_v62  ;;  %v2199_v23 = vsel %vm2192_vm8, %v2166_v6, %v5913_v58  ;;  %v5949_v60 = vunpack.i.h.bf16 %v10957_v45  ;;  %v5964_v62 = vunpack.i.h.bf16 %v10956_v18 }
 0x235   : > { %v6084_v21 = vunpack.i.h.bf16 %v6082_v57  ;;  %v6083_v40 = vunpack.i.l.bf16 %v6082_v57  ;;  %v2200_v57 = vsel %vm2192_vm8, %v2167_v28, %v5914_v11  ;;  %v2219_v59 = vsel %vm2192_vm8, %v2186_v61, %v5963_v48 }
 0x236   : > { %v8078_v5 = vpop.permute.xlu0 %6061  ;;  %v2233_v35 = vsel %vm2225_vm9, %v2200_v57, %v5999_v13  ;;  %v2242_v1 = vsel %vm2225_vm9, %v2209_v9, %v6038_v24  ;;  %v2243_v6 = vsel %vm2225_vm9, %v2210_v8, %v6039_v52  ;;  %v6118_v11 = vunpack.i.l.bf16 %v6117_v56  ;;  %v10958_v24 = vld [vmem:[#allocation51_spill] sm:$0xff] }
 0x237   : > { %v8087_v26 = vsel %vm2258_vm10, %v2240_v49, %v6083_v40  ;;  %v8090_v10 = vsel %vm2258_vm10, %v2241_v63, %v6084_v21  ;;  %v2232_v21 = vsel %vm2225_vm9, %v2199_v23, %v5998_v4  ;;  %v2266_v14 = vsel %vm2258_vm10, %v2233_v35, %v6029_v16 }
 0x238   : > { %v2298_v20 = vpack.c.bf16 %v8090_v10, %v8087_v26  ;;  %v2265_v28 = vsel %vm2258_vm10, %v2232_v21, %v6028_v15  ;;  %v2220_v49 = vsel %vm2192_vm8, %v2187_v22, %v5964_v62  ;;  %v6119_v63 = vunpack.i.h.bf16 %v6117_v56  ;;  %v10959_v22 = vld [vmem:[#allocation56_spill] sm:$0xff] }
 0x239   : > { %v5948_v4 = vunpack.i.l.bf16 %v10957_v45  ;;  %v2294_v18 = vpack.c.bf16 %v2266_v14, %v2265_v28  ;;  %v6054_v48 = vunpack.i.h.bf16 %v7992_v3  ;;  %v6053_v16 = vunpack.i.l.bf16 %v7992_v3  ;;  %v10960_v21 = vld [vmem:[#allocation60_spill] sm:$0xff] }
 0x23a   : > { %v5809_v8 = vunpack.i.h.bf16 %v10958_v24  ;;  %v5808_v61 = vunpack.i.l.bf16 %v10958_v24  ;;  %v5839_v23 = vunpack.i.h.bf16 %v10959_v22  ;;  %v5838_v45 = vunpack.i.l.bf16 %v10959_v22  ;;  %v10975_v26 = vld [vmem:[#allocation20_spill] sm:$0xff] }
 0x23b   : > { %v5889_v62 = vunpack.i.h.bf16 %v10960_v21  ;;  %v2180_v3 = vsel %vm2159_vm7, %v7984_v36, %v5868_v44  ;;  %v5549_v10 = vunpack.i.h.bf16 %v10975_v26 }
 0x23c   : > { %v6097_v40 = vpop.permute.xlu1 %6096 }
 0x23d   : > { %v6099_v12 = vunpack.i.h.bf16 %v6097_v40  ;;  %v6098_v41 = vunpack.i.l.bf16 %v6097_v40  ;;  %v2181_v40 = vsel %vm2159_vm7, %v7987_v17, %v5869_v33  ;;  %v10962_v33 = vld [vmem:[#allocation67_spill] sm:$0xff] }
 0x23e   : > { %v6077_v7 = vpop.permute.xlu0 %6076  ;;  %v2214_v56 = vsel %vm2192_vm8, %v2181_v40, %v5949_v60  ;;  %v5968_v14 = vunpack.i.l.bf16 %v10962_v33  ;;  %v10963_v40 = vld [vmem:[#allocation22_spill] sm:$0xff] }
 0x23f   : > { %v6079_v31 = vunpack.i.h.bf16 %v6077_v7  ;;  %v6078_v55 = vunpack.i.l.bf16 %v6077_v7  ;;  %v8116_v38 = vsel %vm2258_vm10, %v2242_v1, %v6098_v41  ;;  %v8119_v58 = vsel %vm2258_vm10, %v2243_v6, %v6099_v12  ;;  %v10961_v6 = vld [vmem:[#allocation66_spill] sm:$0xff] }
 0x240   : > { %v2299_v32 = vpack.c.bf16 %v8119_v58, %v8116_v38  ;;  %v5888_v1 = vunpack.i.l.bf16 %v10960_v21  ;;  %v5919_v36 = vunpack.i.h.bf16 %v10961_v6  ;;  %v2247_v44 = vsel %vm2225_vm9, %v2214_v56, %v6054_v48  ;;  %v6705_v58 = vld [vmem:[#allocation2 + $0xe0] sm:$0xff] }
 0x241   : > { %v2252_v9 = vsel %vm2225_vm9, %v2219_v59, %v6078_v55  ;;  %v2253_v13 = vsel %vm2225_vm9, %v2220_v49, %v6079_v31  ;;  %v2213_v59 = vsel %vm2192_vm8, %v2180_v3, %v5948_v4  ;;  %v5918_v17 = vunpack.i.l.bf16 %v10961_v6 }
 0x242   : > { %v2285_v15 = vsel %vm2258_vm10, %v2252_v9, %v6118_v11  ;;  %v2286_v52 = vsel %vm2258_vm10, %v2253_v13, %v6119_v63  ;;  %v2246_v50 = vsel %vm2225_vm9, %v2213_v59, %v6053_v16  ;;  %v5969_v7 = vunpack.i.h.bf16 %v10962_v33  ;;  %v10964_v59 = vld [vmem:[#allocation25_spill] sm:$0xff]  ;;  %v6701_v33 = vld [vmem:[#allocation2 + $0x170] sm:$0xff] }
 0x243   : > { %v2304_v57 = vpack.c.bf16 %v2286_v52, %v2285_v15  ;;  %v6009_v31 = vunpack.i.h.bf16 %v7828_v29  ;;  %v6008_v55 = vunpack.i.l.bf16 %v7828_v29  ;;  %v2135_v63 = vsel %vm2126_vm6, %v7895_v46, %v5758_v47 }
 0x244   : > { %5338 = vmatmul.msk.bf16.gmra.mxu0 %vm2366_vm11, %v2294_v18  ;;  %v6112_v35 = vpop.permute.xlu1 %6111  ;;  %v2136_v11 = vsel %vm2126_vm6, %v7899_v30, %v5759_v53  ;;  %v2155_v4 = vsel %vm2126_vm6, %v7909_v34, %v5808_v61  ;;  %v2156_v9 = vsel %vm2126_vm6, %v7905_v43, %v5809_v8  ;;  %v2168_v29 = vsel %vm2159_vm7, %v2135_v63, %v5838_v45 }
 0x245   : > { %5348 = vmatmul.msk.bf16.gmra.mxu3 %vm2366_vm11, %v2304_v57  ;;  %v6114_v12 = vunpack.i.h.bf16 %v6112_v35  ;;  %v6113_v41 = vunpack.i.l.bf16 %v6112_v35  ;;  %v2169_v13 = vsel %vm2159_vm7, %v2136_v11, %v5839_v23  ;;  %v6089_v18 = vunpack.i.h.bf16 %v7952_v37 }
 0x246   : > { %v6088_v48 = vunpack.i.l.bf16 %v7952_v37  ;;  %v2188_v46 = vsel %vm2159_vm7, %v2155_v4, %v5888_v1  ;;  %v2189_v0 = vsel %vm2159_vm7, %v2156_v9, %v5889_v62  ;;  %v2201_v30 = vsel %vm2192_vm8, %v2168_v29, %v5918_v17  ;;  %v6092_v17 = vpop.permute.xlu0 %6091 }
 0x247   : > { %v8155_v28 = vsel %vm2258_vm10, %v2246_v50, %v6113_v41  ;;  %v8158_v60 = vsel %vm2258_vm10, %v2247_v44, %v6114_v12  ;;  %v2202_v53 = vsel %vm2192_vm8, %v2169_v13, %v5919_v36  ;;  %v2221_v34 = vsel %vm2192_vm8, %v2188_v46, %v5968_v14  ;;  %v10965_v41 = vld [vmem:[#allocation38_spill] sm:$0xff]  ;;  %v10966_v36 = vld [vmem:[#allocation47_spill] sm:$0xff]  ;;  %v6702_v14 = vld [vmem:[#allocation2 + $0x168] sm:$0xff] }
 0x248   : > { %v2301_v49 = vpack.c.bf16 %v8158_v60, %v8155_v28  ;;  %v2222_v43 = vsel %vm2192_vm8, %v2189_v0, %v5969_v7  ;;  %v2234_v47 = vsel %vm2225_vm9, %v2201_v30, %v6008_v55  ;;  %v2235_v16 = vsel %vm2225_vm9, %v2202_v53, %v6009_v31  ;;  %v10967_v55 = vld [vmem:[#allocation54_spill] sm:$0xff]  ;;  %v6132_v30 = vpop.permute.xlu2 %6131 }
 0x249   : > { %v6044_v52 = vunpack.i.h.bf16 %v7802_v51  ;;  %v6043_v37 = vunpack.i.l.bf16 %v7802_v51  ;;  %v2254_v61 = vsel %vm2225_vm9, %v2221_v34, %v6088_v48  ;;  %v2255_v22 = vsel %vm2225_vm9, %v2222_v43, %v6089_v18  ;;  %v10985_v60 = vld [vmem:[#allocation58_spill] sm:$0xff] }
 0x24a   : > { %v5579_v35 = vunpack.i.h.bf16 %v10963_v40  ;;  %v5578_v51 = vunpack.i.l.bf16 %v10963_v40  ;;  %v5654_v56 = vunpack.i.h.bf16 %v10964_v59  ;;  %v5653_v12 = vunpack.i.l.bf16 %v10964_v59  ;;  %v10970_v40 = vld [vmem:[#allocation30_spill] sm:$0xff]  ;;  %v10971_v59 = vld [vmem:[#allocation40_spill] sm:$0xff] }
 0x24b   : > { %v2267_v23 = vsel %vm2258_vm10, %v2234_v47, %v6043_v37  ;;  %v2268_v57 = vsel %vm2258_vm10, %v2235_v16, %v6044_v52  ;;  %v5734_v1 = vunpack.i.h.bf16 %v10965_v41  ;;  %v5733_v6 = vunpack.i.l.bf16 %v10965_v41  ;;  %v6703_v41 = vld [vmem:[#allocation2 + $0x98] sm:$0xff] }
 0x24c   : > { %v6127_v15 = vpop.permute.xlu1 %6126  ;;  %v2295_v3 = vpack.c.bf16 %v2268_v57, %v2267_v23  ;;  %v5814_v50 = vunpack.i.h.bf16 %v10966_v36  ;;  %v5813_v44 = vunpack.i.l.bf16 %v10966_v36  ;;  %v2059_v7 = vsel %vm273_vm0, %v6701_v33, %v5579_v35  ;;  %v10968_v23 = vld [vmem:[#allocation19_spill] sm:$0xff] }
 0x24d   : > { %v6129_v24 = vunpack.i.h.bf16 %v6127_v15  ;;  %v6128_v8 = vunpack.i.l.bf16 %v6127_v15  ;;  %v2058_v31 = vsel %vm273_vm0, %v6702_v14, %v5578_v51  ;;  %v5894_v63 = vunpack.i.h.bf16 %v10967_v55 }
 0x24e   : > { %v5893_v11 = vunpack.i.l.bf16 %v10967_v55  ;;  %v2092_v4 = vsel %vm2060_vm4, %v2059_v7, %v5654_v56  ;;  %v2091_v9 = vsel %vm2060_vm4, %v2058_v31, %v5653_v12  ;;  %v5974_v29 = vunpack.i.h.bf16 %v7800_v27 }
 0x24f   : > { %v2287_v45 = vsel %vm2258_vm10, %v2254_v61, %v6128_v8  ;;  %v2288_v21 = vsel %vm2258_vm10, %v2255_v22, %v6129_v24  ;;  %v5973_v13 = vunpack.i.l.bf16 %v7800_v27  ;;  %v2124_v18 = vsel %vm2093_vm5, %v2091_v9, %v5733_v6 }
 0x250   : > { %v2305_v62 = vpack.c.bf16 %v2288_v21, %v2287_v45  ;;  %v2125_v48 = vsel %vm2093_vm5, %v2092_v4, %v5734_v1  ;;  %v6094_v46 = vunpack.i.h.bf16 %v6092_v17  ;;  %v6093_v0 = vunpack.i.l.bf16 %v6092_v17  ;;  %v10969_v21 = vld [vmem:[#allocation21_spill] sm:$0xff]  ;;  %v10973_v17 = vld [vmem:[#allocation72_spill] sm:$0xff] }
 0x251   : > { %v2157_v53 = vsel %vm2126_vm6, %v2124_v18, %v5813_v44  ;;  %v2158_v34 = vsel %vm2126_vm6, %v2125_v48, %v5814_v50  ;;  %v6134_v27 = vunpack.i.h.bf16 %v6132_v30  ;;  %v6133_v52 = vunpack.i.l.bf16 %v6132_v30 }
 0x252   : > { %v2190_v43 = vsel %vm2159_vm7, %v2157_v53, %v5893_v11  ;;  %v2191_v47 = vsel %vm2159_vm7, %v2158_v34, %v5894_v63  ;;  %v5534_v57 = vunpack.i.h.bf16 %v10968_v23  ;;  %v5533_v45 = vunpack.i.l.bf16 %v10968_v23  ;;  %v10979_v23 = vld [vmem:[#allocation49_spill] sm:$0xff] }
 0x253   : > { %v2223_v16 = vsel %vm2192_vm8, %v2190_v43, %v5973_v13  ;;  %v2224_v15 = vsel %vm2192_vm8, %v2191_v47, %v5974_v29  ;;  %v5689_v35 = vunpack.i.h.bf16 %v10970_v40  ;;  %v5688_v51 = vunpack.i.l.bf16 %v10970_v40  ;;  %v10976_v47 = vld [vmem:[#allocation24_spill] sm:$0xff]  ;;  %v10980_v40 = vld [vmem:[#allocation18_spill] sm:$0xff] }
 0x254   : > { %5339 = vmatmul.msk.bf16.gmra.mxu0 %vm2366_vm11, %v2295_v3  ;;  %v2256_v37 = vsel %vm2225_vm9, %v2223_v16, %v6093_v0  ;;  %v2257_v24 = vsel %vm2225_vm9, %v2224_v15, %v6094_v46  ;;  %v5608_v3 = vunpack.i.l.bf16 %v10969_v21  ;;  %v5769_v56 = vunpack.i.h.bf16 %v10971_v59 }
 0x255   : > { %5349 = vmatmul.msk.bf16.gmra.mxu3 %vm2366_vm11, %v2305_v62  ;;  %v2289_v8 = vsel %vm2258_vm10, %v2256_v37, %v6133_v52  ;;  %v2290_v61 = vsel %vm2258_vm10, %v2257_v24, %v6134_v27  ;;  %v5609_v62 = vunpack.i.h.bf16 %v10969_v21  ;;  %v5768_v12 = vunpack.i.l.bf16 %v10971_v59  ;;  %v10977_v27 = vld [vmem:[#allocation33_spill] sm:$0xff]  ;;  %v10978_v24 = vld [vmem:[#allocation42_spill] sm:$0xff]  ;;  %v6107_v21 = vpop.permute.xlu0 %6106 }
 0x256   : > { %v2306_v22 = vpack.c.bf16 %v2290_v61, %v2289_v8  ;;  %v2041_v1 = vsel %vm273_vm0, %v6703_v41, %v5534_v57  ;;  %v2040_v2 = vsel %vm273_vm0, %v6704_v39, %v5533_v45  ;;  %v5929_v33 = vunpack.i.h.bf16 %v10973_v17  ;;  %v6706_v61 = vld [vmem:[#allocation2 + $0xd8] sm:$0xff] }
 0x257   : > { %v2074_v50 = vsel %vm2060_vm4, %v2041_v1, %v5609_v62  ;;  %v2073_v44 = vsel %vm2060_vm4, %v2040_v2, %v5608_v3  ;;  %v5928_v7 = vunpack.i.l.bf16 %v10973_v17  ;;  %v6024_v55 = vunpack.i.h.bf16 %v7873_v19 }
 0x258   : > { %v2106_v14 = vsel %vm2093_vm5, %v2073_v44, %v5688_v51  ;;  %v2107_v31 = vsel %vm2093_vm5, %v2074_v50, %v5689_v35  ;;  %v6023_v63 = vunpack.i.l.bf16 %v7873_v19  ;;  %v6069_v9 = vunpack.i.h.bf16 %v8027_v54 }
 0x259   : > { %v2139_v11 = vsel %vm2126_vm6, %v2106_v14, %v5768_v12  ;;  %v2140_v4 = vsel %vm2126_vm6, %v2107_v31, %v5769_v56  ;;  %v6068_v29 = vunpack.i.l.bf16 %v8027_v54  ;;  %v10974_v43 = vmov 0.0  }
 0x25a   : > { %2859 = vst.msk [vmem:[#allocation3 + $0x18] sm:$0xff] %vm2508_vm12, %v10974_v43  ;;  %v5624_v16 = vunpack.i.h.bf16 %v10976_v47  ;;  %v5623_v15 = vunpack.i.l.bf16 %v10976_v47  ;;  %v5704_v52 = vunpack.i.h.bf16 %v10977_v27  ;;  %v5703_v37 = vunpack.i.l.bf16 %v10977_v27  ;;  %v10986_v27 = vld [vmem:[#allocation65_spill] sm:$0xff] }
 0x25b   : > { %2860 = vst.msk [vmem:[#allocation3 + $0x20] sm:$0xff] %vm2508_vm12, %v10974_v43  ;;  %v5784_v8 = vunpack.i.h.bf16 %v10978_v24  ;;  %v5783_v38 = vunpack.i.l.bf16 %v10978_v24  ;;  %v5864_v57 = vunpack.i.h.bf16 %v10979_v23  ;;  %v5863_v45 = vunpack.i.l.bf16 %v10979_v23 }
 0x25c   : > { %2855 = vst.msk [vmem:[#allocation3] sm:$0xff] %vm2508_vm12, %v10974_v43  ;;  %v5944_v35 = vunpack.i.h.bf16 %v10980_v40  ;;  %v5943_v51 = vunpack.i.l.bf16 %v10980_v40  ;;  %v6049_v41 = vunpack.i.h.bf16 %v8039_v25  ;;  %v6048_v1 = vunpack.i.l.bf16 %v8039_v25 }
 0x25d   : > { %2856 = vst.msk [vmem:[#allocation3 + $0x8] sm:$0xff] %vm2508_vm12, %v10974_v43  ;;  %v6122_v47 = vpop.permute.xlu0 %6121 }
 0x25e   : > { %2862 = vst.msk [vmem:[#allocation3 + $0x30] sm:$0xff] %vm2508_vm12, %v10974_v43  ;;  %v6124_v23 = vunpack.i.h.bf16 %v6122_v47 }
 0x25f   : > { %2863 = vst.msk [vmem:[#allocation3 + $0x38] sm:$0xff] %vm2508_vm12, %v10974_v43 }
 0x260   : > { %2865 = vst.msk [vmem:[#allocation3 + $0x48] sm:$0xff] %vm2508_vm12, %v10974_v43 }
 0x261   : > { %2866 = vst.msk [vmem:[#allocation3 + $0x50] sm:$0xff] %vm2508_vm12, %v10974_v43 }
 0x262   : > { %2868 = vst.msk [vmem:[#allocation3 + $0x60] sm:$0xff] %vm2508_vm12, %v10974_v43 }
 0x263   : > { %2869 = vst.msk [vmem:[#allocation3 + $0x68] sm:$0xff] %vm2508_vm12, %v10974_v43 }
 0x264   : > { %5340 = vmatmul.msk.bf16.gmra.mxu0 %vm2366_vm11, %v2296_v42  ;;  %v10972_v42 = vld [vmem:[#allocation46_spill] sm:$0xff]  ;;  %2871 = vst.msk [vmem:[#allocation3 + $0x78] sm:$0xff] %vm2508_vm12, %v10974_v43 }
 0x265   : > { %5350 = vmatmul.msk.bf16.gmra.mxu3 %vm2366_vm11, %v2306_v22  ;;  %v5849_v6 = vunpack.i.h.bf16 %v10972_v42  ;;  %v5848_v36 = vunpack.i.l.bf16 %v10972_v42  ;;  %2872 = vst.msk [vmem:[#allocation3 + $0x80] sm:$0xff] %vm2508_vm12, %v10974_v43  ;;  %v6109_v42 = vunpack.i.h.bf16 %v6107_v21 }
 0x266   : > { %2874 = vst.msk [vmem:[#allocation3 + $0x90] sm:$0xff] %vm2508_vm12, %v10974_v43 }
 0x267   : > { %v2172_v13 = vsel %vm2159_vm7, %v2139_v11, %v5848_v36  ;;  %v2173_v18 = vsel %vm2159_vm7, %v2140_v4, %v5849_v6  ;;  %2875 = vst.msk [vmem:[#allocation3 + $0x98] sm:$0xff] %vm2508_vm12, %v10974_v43  ;;  %v6108_v6 = vunpack.i.l.bf16 %v6107_v21  ;;  %v10981_v4 = vld [vmem:[#allocation23_spill] sm:$0xff] }
 0x268   : > { %v2205_v48 = vsel %vm2192_vm8, %v2172_v13, %v5928_v7  ;;  %v2206_v46 = vsel %vm2192_vm8, %v2173_v18, %v5929_v33  ;;  %2877 = vst.msk [vmem:[#allocation3 + $0xa8] sm:$0xff] %vm2508_vm12, %v10974_v43  ;;  %v10982_v13 = vld [vmem:[#allocation26_spill] sm:$0xff] }
 0x269   : > { %v2238_v0 = vsel %vm2225_vm9, %v2205_v48, %v6023_v63  ;;  %v2239_v19 = vsel %vm2225_vm9, %v2206_v46, %v6024_v55  ;;  %2878 = vst.msk [vmem:[#allocation3 + $0xb0] sm:$0xff] %vm2508_vm12, %v10974_v43  ;;  %v5634_v18 = vunpack.i.h.bf16 %v10982_v13  ;;  %v5633_v48 = vunpack.i.l.bf16 %v10982_v13  ;;  %v10983_v46 = vld [vmem:[#allocation27_spill] sm:$0xff] }
 0x26a   : > { %v2271_v30 = vsel %vm2258_vm10, %v2238_v0, %v6068_v29  ;;  %v2272_v53 = vsel %vm2258_vm10, %v2239_v19, %v6069_v9  ;;  %2880 = vst.msk [vmem:[#allocation3 + $0xc0] sm:$0xff] %vm2508_vm12, %v10974_v43  ;;  %v5559_v9 = vunpack.i.h.bf16 %v10981_v4  ;;  %v5558_v29 = vunpack.i.l.bf16 %v10981_v4 }
 0x26b   : > { %v2297_v34 = vpack.c.bf16 %v2272_v53, %v2271_v30  ;;  %2881 = vst.msk [vmem:[#allocation3 + $0xc8] sm:$0xff] %vm2508_vm12, %v10974_v43  ;;  %v5714_v0 = vunpack.i.h.bf16 %v10983_v46  ;;  %v5713_v19 = vunpack.i.l.bf16 %v10983_v46  ;;  %v10984_v30 = vld [vmem:[#allocation48_spill] sm:$0xff] }
 0x26c   : > { %2883 = vst.msk [vmem:[#allocation3 + $0xd8] sm:$0xff] %vm2508_vm12, %v10974_v43  ;;  %v5794_v53 = vunpack.i.h.bf16 %v10984_v30 }
 0x26d   : > { %2884 = vst.msk [vmem:[#allocation3 + $0xe0] sm:$0xff] %vm2508_vm12, %v10974_v43 }
 0x26e   : > { %2886 = vst.msk [vmem:[#allocation3 + $0xf0] sm:$0xff] %vm2508_vm12, %v10974_v43 }
 0x26f   : > { %2887 = vst.msk [vmem:[#allocation3 + $0xf8] sm:$0xff] %vm2508_vm12, %v10974_v43 }
 0x270   : > { %2889 = vst.msk [vmem:[#allocation3 + $0x108] sm:$0xff] %vm2508_vm12, %v10974_v43 }
 0x271   : > { %2890 = vst.msk [vmem:[#allocation3 + $0x110] sm:$0xff] %vm2508_vm12, %v10974_v43 }
 0x272   : > { %2892 = vst.msk [vmem:[#allocation3 + $0x120] sm:$0xff] %vm2508_vm12, %v10974_v43 }
 0x273   : > { %2893 = vst.msk [vmem:[#allocation3 + $0x128] sm:$0xff] %vm2508_vm12, %v10974_v43 }
 0x274   : > { %5341 = vmatmul.msk.bf16.gmra.mxu0 %vm2366_vm11, %v2297_v34  ;;  %2895 = vst.msk [vmem:[#allocation3 + $0x138] sm:$0xff] %vm2508_vm12, %v10974_v43  ;;  %v5793_v34 = vunpack.i.l.bf16 %v10984_v30 }
 0x275   : > { %2896 = vst.msk [vmem:[#allocation3 + $0x140] sm:$0xff] %vm2508_vm12, %v10974_v43 }
 0x276   : > { %2898 = vst.msk [vmem:[#allocation3 + $0x150] sm:$0xff] %vm2508_vm12, %v10974_v43 }
 0x277   : > { %2899 = vst.msk [vmem:[#allocation3 + $0x158] sm:$0xff] %vm2508_vm12, %v10974_v43 }
 0x278   : > { %2901 = vst.msk [vmem:[#allocation3 + $0x168] sm:$0xff] %vm2508_vm12, %v10974_v43 }
 0x279   : > { %2902 = vst.msk [vmem:[#allocation3 + $0x170] sm:$0xff] %vm2508_vm12, %v10974_v43 }
 0x27a   : > { %2904 = vst.msk [vmem:[#allocation3 + $0x180] sm:$0xff] %vm2508_vm12, %v10974_v43 }
 0x27b   : > { %2905 = vst.msk [vmem:[#allocation3 + $0x188] sm:$0xff] %vm2508_vm12, %v10974_v43 }
 0x27c   : > { %2907 = vst.msk [vmem:[#allocation3 + $0x198] sm:$0xff] %vm2508_vm12, %v10974_v43 }
 0x27d   : > { %2908 = vst.msk [vmem:[#allocation3 + $0x1a0] sm:$0xff] %vm2508_vm12, %v10974_v43 }
 0x27e   : > { %2861 = vst.msk [vmem:[#allocation3 + $0x28] sm:$0x3] %vm2857_vm13, %v10974_v43 }
 0x27f   : > { %2858 = vst.msk [vmem:[#allocation3 + $0x10] sm:$0x3] %vm2857_vm13, %v10974_v43 }
 0x280   : > { %2864 = vst.msk [vmem:[#allocation3 + $0x40] sm:$0x3] %vm2857_vm13, %v10974_v43 }
 0x281   : > { %2867 = vst.msk [vmem:[#allocation3 + $0x58] sm:$0x3] %vm2857_vm13, %v10974_v43 }
 0x282   : > { %2870 = vst.msk [vmem:[#allocation3 + $0x70] sm:$0x3] %vm2857_vm13, %v10974_v43 }
 0x283   : > { %2873 = vst.msk [vmem:[#allocation3 + $0x88] sm:$0x3] %vm2857_vm13, %v10974_v43 }
 0x284   : > { %5342 = vmatmul.msk.bf16.gmra.mxu0 %vm2366_vm11, %v2298_v20  ;;  %v5548_v20 = vunpack.i.l.bf16 %v10975_v26  ;;  %2876 = vst.msk [vmem:[#allocation3 + $0xa0] sm:$0x3] %vm2857_vm13, %v10974_v43 }
 0x285   : > { %2879 = vst.msk [vmem:[#allocation3 + $0xb8] sm:$0x3] %vm2857_vm13, %v10974_v43 }
 0x286   : > { %v2046_v22 = vsel %vm273_vm0, %v6706_v61, %v5548_v20  ;;  %2882 = vst.msk [vmem:[#allocation3 + $0xd0] sm:$0x3] %vm2857_vm13, %v10974_v43  ;;  %v5873_v20 = vunpack.i.l.bf16 %v10985_v60 }
 0x287   : > { %v2079_v3 = vsel %vm2060_vm4, %v2046_v22, %v5623_v15  ;;  %2885 = vst.msk [vmem:[#allocation3 + $0xe8] sm:$0x3] %vm2857_vm13, %v10974_v43 }
 0x288   : > { %v2112_v56 = vsel %vm2093_vm5, %v2079_v3, %v5703_v37  ;;  %2888 = vst.msk [vmem:[#allocation3 + $0x100] sm:$0x3] %vm2857_vm13, %v10974_v43  ;;  %v5953_v37 = vunpack.i.l.bf16 %v10986_v27 }
 0x289   : > { %v2145_v39 = vsel %vm2126_vm6, %v2112_v56, %v5783_v38  ;;  %2891 = vst.msk [vmem:[#allocation3 + $0x118] sm:$0x3] %vm2857_vm13, %v10974_v43 }
 0x28a   : > { %v2178_v36 = vsel %vm2159_vm7, %v2145_v39, %v5863_v45  ;;  %2894 = vst.msk [vmem:[#allocation3 + $0x130] sm:$0x3] %vm2857_vm13, %v10974_v43 }
 0x28b   : > { %v2211_v25 = vsel %vm2192_vm8, %v2178_v36, %v5943_v51  ;;  %2897 = vst.msk [vmem:[#allocation3 + $0x148] sm:$0x3] %vm2857_vm13, %v10974_v43 }
 0x28c   : > { %v2244_v17 = vsel %vm2225_vm9, %v2211_v25, %v6048_v1  ;;  %2900 = vst.msk [vmem:[#allocation3 + $0x160] sm:$0x3] %vm2857_vm13, %v10974_v43 }
 0x28d   : > { %v2277_v7 = vsel %vm2258_vm10, %v2244_v17, %v6108_v6  ;;  %2903 = vst.msk [vmem:[#allocation3 + $0x178] sm:$0x3] %vm2857_vm13, %v10974_v43 }
 0x28e   : > { %2906 = vst.msk [vmem:[#allocation3 + $0x190] sm:$0x3] %vm2857_vm13, %v10974_v43 }
 0x28f   : > { %2909 = vst.msk [vmem:[#allocation3 + $0x1a8] sm:$0x3] %vm2857_vm13, %v10974_v43  ;;  %v6707_v43 = vld [vmem:[#allocation2 + $0x110] sm:$0xff] }
 0x290   : > { %v2051_v26 = vsel %vm273_vm0, %v6707_v43, %v5559_v9 }
 0x291   : > { %v8329_v54 = vpop.f32.mrf.mxu0  ;;  %v2084_v15 = vsel %vm2060_vm4, %v2051_v26, %v5634_v18 }
 0x294   : > { %5343 = vmatmul.msk.bf16.gmra.mxu0 %vm2366_vm11, %v2299_v32  ;;  %v2047_v32 = vsel %vm273_vm0, %v6705_v58, %v5549_v10  ;;  %v6708_v10 = vld [vmem:[#allocation2 + $0x108] sm:$0xff]  ;;  %v6064_v58 = vunpack.i.h.bf16 %v8078_v5 }
 0x295   : > { %v2080_v62 = vsel %vm2060_vm4, %v2047_v32, %v5624_v16  ;;  %v2050_v28 = vsel %vm273_vm0, %v6708_v10, %v5558_v29  ;;  %v6063_v32 = vunpack.i.l.bf16 %v8078_v5 }
 0x296   : > { %v2113_v12 = vsel %vm2093_vm5, %v2080_v62, %v5704_v52  ;;  %v2083_v16 = vsel %vm2060_vm4, %v2050_v28, %v5633_v48  ;;  %v5954_v52 = vunpack.i.h.bf16 %v10986_v27 }
 0x297   : > { %v2146_v2 = vsel %vm2126_vm6, %v2113_v12, %v5784_v8  ;;  %v2117_v8 = vsel %vm2093_vm5, %v2084_v15, %v5714_v0  ;;  %v2116_v38 = vsel %vm2093_vm5, %v2083_v16, %v5713_v19 }
 0x298   : > { %v2179_v50 = vsel %vm2159_vm7, %v2146_v2, %v5864_v57  ;;  %v2149_v61 = vsel %vm2126_vm6, %v2116_v38, %v5793_v34  ;;  %v2150_v22 = vsel %vm2126_vm6, %v2117_v8, %v5794_v53  ;;  %v6123_v57 = vunpack.i.l.bf16 %v6122_v47 }
 0x299   : > { %v8367_v59 = vpop.f32.mrf.mxu0  ;;  %v2212_v44 = vsel %vm2192_vm8, %v2179_v50, %v5944_v35  ;;  %v2182_v45 = vsel %vm2159_vm7, %v2149_v61, %v5873_v20 }
 0x29a   : > { %v2245_v33 = vsel %vm2225_vm9, %v2212_v44, %v6049_v41  ;;  %v2215_v62 = vsel %vm2192_vm8, %v2182_v45, %v5953_v37 }
 0x29b   : > { %v2278_v14 = vsel %vm2258_vm10, %v2245_v33, %v6109_v42  ;;  %v2248_v40 = vsel %vm2225_vm9, %v2215_v62, %v6063_v32  ;;  %v8472_v33 = vld [vmem:[%s10746_s3] ss:$0 sm:$0xff] }
 0x29c   : > { %v2300_v55 = vpack.c.bf16 %v2278_v14, %v2277_v7  ;;  %v2281_v5 = vsel %vm2258_vm10, %v2248_v40, %v6123_v57  ;;  %v8476_v7 = vadd.f32 %v8472_v33, %v8367_v59  ;;  %v8480_v14 = vadd.f32 %v8472_v33, %v8329_v54 }
 0x29e   : > { %v2580_v29 = vmul.f32 %v8476_v7, %v8476_v7  ;;  %v2579_v59 = vmul.f32 %v8480_v14, %v8480_v14  ;;  %v2510_v54 = vsel %vm2508_vm12, %v8476_v7, 0.0 }
 0x2a0   : > { %v2612_v46 = vsel %vm2508_vm12, %v2580_v29, 0.0  ;;  %v2611_v30 = vsel %vm2508_vm12, %v2579_v59, 0.0 }
 0x2a1   : > { %v8401_v31 = vpop.f32.mrf.mxu0 }
 0x2a2   : > { %v8488_v9 = vadd.f32 %v8472_v33, %v8401_v31  ;;  %v2509_v31 = vsel %vm2508_vm12, %v8480_v14, 0.0 }
 0x2a3   : > { %v2511_v53 = vadd.f32 %v2510_v54, %v2509_v31 }
 0x2a4   : > { %5344 = vmatmul.msk.bf16.gmra.mxu0 %vm2366_vm11, %v2300_v55  ;;  %v2581_v18 = vmul.f32 %v8488_v9, %v8488_v9 }
 0x2a6   : > { %v2614_v43 = vsel %vm2508_vm12, %v2581_v18, 0.0 }
 0x2a9   : > { %v2435_v63 = vpop.f32.mrf.mxu0 }
 0x2aa   : > { %v8493_v13 = vadd.f32 %v8472_v33, %v2435_v63  ;;  %v2512_v63 = vsel %vm2508_vm12, %v8488_v9, 0.0 }
 0x2ac   : > { %v2582_v0 = vmul.f32 %v8493_v13, %v8493_v13  ;;  %v2514_v26 = vsel %vm2508_vm12, %v8493_v13, 0.0 }
 0x2ae   : > { %v2616_v20 = vsel %vm2508_vm12, %v2582_v0, 0.0 }
 0x2af   : > { %v8465_v44 = vpop.f32.mrf.mxu3 }
 0x2b1   : > { %v8418_v11 = vpop.f32.mrf.mxu0 }
 0x2b2   : > { %v8503_v48 = vadd.f32 %v8472_v33, %v8418_v11 }
 0x2b4   : > { %5345 = vmatmul.msk.bf16.gmra.mxu0 %vm2366_vm11, %v2301_v49  ;;  %v5874_v49 = vunpack.i.h.bf16 %v10985_v60  ;;  %v2583_v10 = vmul.f32 %v8503_v48, %v8503_v48  ;;  %v2613_v60 = vadd.f32 %v2612_v46, %v2611_v30  ;;  %v2516_v47 = vsel %vm2508_vm12, %v8503_v48, 0.0 }
 0x2b6   : > { %v2183_v21 = vsel %vm2159_vm7, %v2150_v22, %v5874_v49  ;;  %v2513_v49 = vadd.f32 %v2512_v63, %v2511_v53  ;;  %v2615_v27 = vadd.f32 %v2614_v43, %v2613_v60  ;;  %v2618_v37 = vsel %vm2508_vm12, %v2583_v10, 0.0 }
 0x2b7   : > { %v2216_v3 = vsel %vm2192_vm8, %v2183_v21, %v5954_v52  ;;  %v8482_v55 = vpop.f32.mrf.mxu3 }
 0x2b8   : > { %v2249_v35 = vsel %vm2225_vm9, %v2216_v3, %v6064_v58  ;;  %v2515_v52 = vadd.f32 %v2514_v26, %v2513_v49  ;;  %v2617_v58 = vadd.f32 %v2616_v20, %v2615_v27 }
 0x2b9   : > { %v2440_v24 = vpop.f32.mrf.mxu0  ;;  %v2282_v51 = vsel %vm2258_vm10, %v2249_v35, %v6124_v23 }
 0x2ba   : > { %v2302_v12 = vpack.c.bf16 %v2282_v51, %v2281_v5  ;;  %v8513_v19 = vadd.f32 %v8472_v33, %v2440_v24  ;;  %v2517_v32 = vadd.f32 %v2516_v47, %v2515_v52  ;;  %v2619_v45 = vadd.f32 %v2618_v37, %v2617_v58 }
 0x2bc   : > { %v2584_v16 = vmul.f32 %v8513_v19, %v8513_v19  ;;  %v2518_v24 = vsel %vm2508_vm12, %v8513_v19, 0.0 }
 0x2bd   : > { %v2519_v21 = vadd.f32 %v2518_v24, %v2517_v32 }
 0x2be   : > { %v2620_v61 = vsel %vm2508_vm12, %v2584_v16, 0.0 }
 0x2bf   : > { %v2621_v51 = vadd.f32 %v2620_v61, %v2619_v45 }
 0x2c1   : > { %v2443_v56 = vpop.f32.mrf.mxu0 }
 0x2c2   : > { %v8526_v28 = vadd.f32 %v8472_v33, %v2443_v56 }
 0x2c4   : > { %5346 = vmatmul.msk.bf16.gmra.mxu0 %vm2366_vm11, %v2302_v12  ;;  %v2585_v8 = vmul.f32 %v8526_v28, %v8526_v28  ;;  %v2520_v22 = vsel %vm2508_vm12, %v8526_v28, 0.0 }
 0x2c5   : > { %v2521_v56 = vadd.f32 %v2520_v22, %v2519_v21 }
 0x2c6   : > { %v2622_v3 = vsel %vm2508_vm12, %v2585_v8, 0.0 }
 0x2c7   : > { %v2623_v59 = vadd.f32 %v2622_v3, %v2621_v51 }
 0x2c8   : > { %v8516_v34 = vpop.f32.mrf.mxu3 }
 0x2c9   : > { %v2445_v41 = vpop.f32.mrf.mxu0 }
 0x2ca   : > { %v8534_v15 = vadd.f32 %v8472_v33, %v2445_v41 }
 0x2cc   : > { %v2586_v23 = vmul.f32 %v8534_v15, %v8534_v15  ;;  %v2522_v40 = vsel %vm2508_vm12, %v8534_v15, 0.0 }
 0x2cd   : > { %v2523_v54 = vadd.f32 %v2522_v40, %v2521_v56 }
 0x2ce   : > { %v2624_v41 = vsel %vm2508_vm12, %v2586_v23, 0.0 }
 0x2cf   : > { %v2625_v63 = vadd.f32 %v2624_v41, %v2623_v59 }
 0x2d0   : > { %v8560_v12 = vpop.f32.mrf.mxu3 }
 0x2d1   : > { %v2448_v1 = vpop.f32.mrf.mxu0 }
 0x2d2   : > { %v8542_v38 = vadd.f32 %v8472_v33, %v2448_v1 }
 0x2d4   : > { %v2587_v35 = vmul.f32 %v8542_v38, %v8542_v38  ;;  %v2524_v1 = vsel %vm2508_vm12, %v8542_v38, 0.0 }
 0x2d5   : > { %v2525_v0 = vadd.f32 %v2524_v1, %v2523_v54 }
 0x2d8   : > { %v8607_v8 = vpop.f32.mrf.mxu3 }
 0x2d9   : > { %v2450_v39 = vpop.f32.mrf.mxu0 }
 0x2da   : > { %v8550_v57 = vadd.f32 %v8472_v33, %v2450_v39 }
 0x2dc   : > { %v2588_v39 = vmul.f32 %v8550_v57, %v8550_v57  ;;  %v2526_v18 = vsel %vm2508_vm12, %v8550_v57, 0.0 }
 0x2dd   : > { %v2527_v10 = vadd.f32 %v2526_v18, %v2525_v0 }
 0x2de   : > { %v2628_v30 = vsel %vm2508_vm12, %v2588_v39, 0.0 }
 0x2e1   : > { %v2453_v2 = vpop.f32.mrf.mxu0 }
 0x2e2   : > { %v8558_v5 = vadd.f32 %v8472_v33, %v2453_v2  ;;  %v2626_v2 = vsel %vm2508_vm12, %v2587_v35, 0.0 }
 0x2e3   : > { %v2627_v26 = vadd.f32 %v2626_v2, %v2625_v63 }
 0x2e4   : > { %v2589_v31 = vmul.f32 %v8558_v5, %v8558_v5 }
 0x2e5   : > { %v2629_v16 = vadd.f32 %v2628_v30, %v2627_v26 }
 0x2e9   : > { %v8455_v42 = vpop.f32.mrf.mxu0 }
 0x2ea   : > { %v8569_v29 = vadd.f32 %v8472_v33, %v8455_v42  ;;  %v2528_v42 = vsel %vm2508_vm12, %v8558_v5, 0.0 }
 0x2eb   : > { %v2529_v27 = vadd.f32 %v2528_v42, %v2527_v10  ;;  %v2500_v10 = vpop.f32.mrf.mxu3 }
 0x2ec   : > { %v2590_v53 = vmul.f32 %v8569_v29, %v8569_v29  ;;  %v2530_v49 = vsel %vm2508_vm12, %v8569_v29, 0.0 }
 0x2ed   : > { %v2531_v32 = vadd.f32 %v2530_v49, %v2529_v27 }
 0x2f1   : > { %v8457_v6 = vpop.f32.mrf.mxu0 }
 0x2f2   : > { %v8578_v46 = vadd.f32 %v8472_v33, %v8457_v6  ;;  %v2630_v6 = vsel %vm2508_vm12, %v2589_v31, 0.0 }
 0x2f3   : > { %v2631_v58 = vadd.f32 %v2630_v6, %v2629_v16 }
 0x2f4   : > { %v2591_v20 = vmul.f32 %v8578_v46, %v8578_v46  ;;  %v2532_v52 = vsel %vm2508_vm12, %v8578_v46, 0.0 }
 0x2f5   : > { %v2533_v21 = vadd.f32 %v2532_v52, %v2531_v32 }
 0x2f9   : > { %v8459_v36 = vpop.f32.mrf.mxu0 }
 0x2fa   : > { %v8587_v43 = vadd.f32 %v8472_v33, %v8459_v36  ;;  %v2632_v36 = vsel %vm2508_vm12, %v2590_v53, 0.0 }
 0x2fb   : > { %v2633_v45 = vadd.f32 %v2632_v36, %v2631_v58 }
 0x2fc   : > { %v2592_v37 = vmul.f32 %v8587_v43, %v8587_v43  ;;  %v2534_v61 = vsel %vm2508_vm12, %v8587_v43, 0.0 }
 0x2fd   : > { %v2535_v56 = vadd.f32 %v2534_v61, %v2533_v21 }
 0x301   : > { %v8461_v50 = vpop.f32.mrf.mxu0 }
 0x302   : > { %v8596_v47 = vadd.f32 %v8472_v33, %v8461_v50  ;;  %v2634_v50 = vsel %vm2508_vm12, %v2591_v20, 0.0 }
 0x303   : > { %v2635_v51 = vadd.f32 %v2634_v50, %v2633_v45 }
 0x304   : > { %v2593_v22 = vmul.f32 %v8596_v47, %v8596_v47  ;;  %v2536_v3 = vsel %vm2508_vm12, %v8596_v47, 0.0 }
 0x305   : > { %v2537_v2 = vadd.f32 %v2536_v3, %v2535_v56 }
 0x309   : > { %v8463_v25 = vpop.f32.mrf.mxu0 }
 0x30a   : > { %v8605_v24 = vadd.f32 %v8472_v33, %v8463_v25  ;;  %v2636_v25 = vsel %vm2508_vm12, %v2592_v37, 0.0 }
 0x30b   : > { %v2637_v54 = vadd.f32 %v2636_v25, %v2635_v51 }
 0x30c   : > { %v2594_v40 = vmul.f32 %v8605_v24, %v8605_v24  ;;  %v2538_v1 = vsel %vm2508_vm12, %v8605_v24, 0.0 }
 0x30d   : > { %v2539_v30 = vadd.f32 %v2538_v1, %v2537_v2 }
 0x311   : > { %v8467_v17 = vpop.f32.mrf.mxu0 }
 0x312   : > { %v8616_v23 = vadd.f32 %v8472_v33, %v8467_v17  ;;  %v2638_v17 = vsel %vm2508_vm12, %v2593_v22, 0.0 }
 0x313   : > { %v2639_v0 = vadd.f32 %v2638_v17, %v2637_v54 }
 0x314   : > { %v2595_v39 = vmul.f32 %v8616_v23, %v8616_v23  ;;  %v2540_v18 = vsel %vm2508_vm12, %v8616_v23, 0.0 }
 0x315   : > { %v2541_v49 = vadd.f32 %v2540_v18, %v2539_v30  ;;  %v8687_v30 = vadd.f32 %v8472_v33, %v8482_v55 }
 0x316   : > { %v2642_v42 = vsel %vm2508_vm12, %v2595_v39, 0.0  ;;  %v8680_v39 = vadd.f32 %v8472_v33, %v8465_v44 }
 0x319   : > { %v8484_v4 = vpop.f32.mrf.mxu0 }
 0x31a   : > { %v8625_v35 = vadd.f32 %v8472_v33, %v8484_v4  ;;  %v2640_v4 = vsel %vm2508_vm12, %v2594_v40, 0.0 }
 0x31b   : > { %v2641_v6 = vadd.f32 %v2640_v4, %v2639_v0  ;;  %v2503_v4 = vpop.f32.mrf.mxu3 }
 0x31c   : > { %v2596_v31 = vmul.f32 %v8625_v35, %v8625_v35 }
 0x31d   : > { %v2643_v36 = vadd.f32 %v2642_v42, %v2641_v6  ;;  %v2603_v6 = vmul.f32 %v8680_v39, %v8680_v39 }
 0x31e   : > { %v2644_v20 = vsel %vm2508_vm12, %v2596_v31, 0.0 }
 0x31f   : > { %v2645_v61 = vadd.f32 %v2644_v20, %v2643_v36  ;;  %v2556_v36 = vsel %vm2508_vm12, %v8680_v39, 0.0 }
 0x321   : > { %v8518_v11 = vpop.f32.mrf.mxu0 }
 0x322   : > { %v8634_v59 = vadd.f32 %v8472_v33, %v8518_v11  ;;  %v2542_v11 = vsel %vm2508_vm12, %v8625_v35, 0.0 }
 0x323   : > { %v2543_v52 = vadd.f32 %v2542_v11, %v2541_v49  ;;  %v8697_v49 = vadd.f32 %v8472_v33, %v8516_v34 }
 0x324   : > { %v2597_v53 = vmul.f32 %v8634_v59, %v8634_v59 }
 0x329   : > { %v2475_v62 = vpop.f32.mrf.mxu0 }
 0x32a   : > { %v8642_v63 = vadd.f32 %v8472_v33, %v2475_v62  ;;  %v2544_v62 = vsel %vm2508_vm12, %v8634_v59, 0.0 }
 0x32b   : > { %v2545_v22 = vadd.f32 %v2544_v62, %v2543_v52  ;;  %v2604_v52 = vmul.f32 %v8687_v30, %v8687_v30 }
 0x32c   : > { %v2598_v16 = vmul.f32 %v8642_v63, %v8642_v63  ;;  %v2546_v58 = vsel %vm2508_vm12, %v8642_v63, 0.0 }
 0x32d   : > { %v2547_v40 = vadd.f32 %v2546_v58, %v2545_v22  ;;  %v2605_v22 = vmul.f32 %v8697_v49, %v8697_v49 }
 0x32e   : > { %v2648_v45 = vsel %vm2508_vm12, %v2598_v16, 0.0 }
 0x331   : > { %v2478_v60 = vpop.f32.mrf.mxu0 }
 0x332   : > { %v8650_v26 = vadd.f32 %v8472_v33, %v2478_v60  ;;  %v2646_v60 = vsel %vm2508_vm12, %v2597_v53, 0.0 }
 0x333   : > { %v2647_v3 = vadd.f32 %v2646_v60, %v2645_v61  ;;  %v2558_v61 = vsel %vm2508_vm12, %v8687_v30, 0.0 }
 0x334   : > { %v2599_v32 = vmul.f32 %v8650_v26, %v8650_v26  ;;  %v2548_v21 = vsel %vm2508_vm12, %v8650_v26, 0.0 }
 0x335   : > { %v2649_v17 = vadd.f32 %v2648_v45, %v2647_v3  ;;  %v2549_v1 = vadd.f32 %v2548_v21, %v2547_v40  ;;  %v8719_v45 = vadd.f32 %v8472_v33, %v8607_v8  ;;  %v2560_v3 = vsel %vm2508_vm12, %v8697_v49, 0.0 }
 0x336   : > { %v2650_v51 = vsel %vm2508_vm12, %v2599_v32, 0.0  ;;  %v2658_v32 = vsel %vm2508_vm12, %v2603_v6, 0.0 }
 0x337   : > { %v2651_v18 = vadd.f32 %v2650_v51, %v2649_v17  ;;  %v8727_v51 = vadd.f32 %v8472_v33, %v2500_v10  ;;  %v2564_v10 = vsel %vm2508_vm12, %v8719_v45, 0.0 }
 0x339   : > { %v2480_v41 = vpop.f32.mrf.mxu0 }
 0x33a   : > { %v8658_v27 = vadd.f32 %v8472_v33, %v2480_v41 }
 0x33c   : > { %v2600_v25 = vmul.f32 %v8658_v27, %v8658_v27  ;;  %v2550_v56 = vsel %vm2508_vm12, %v8658_v27, 0.0 }
 0x33d   : > { %v2551_v31 = vadd.f32 %v2550_v56, %v2549_v1  ;;  %v2505_v56 = vpop.f32.mrf.mxu3  ;;  %v2662_v1 = vsel %vm2508_vm12, %v2605_v22, 0.0 }
 0x33e   : > { %v2652_v54 = vsel %vm2508_vm12, %v2600_v25, 0.0 }
 0x33f   : > { %v2653_v44 = vadd.f32 %v2652_v54, %v2651_v18  ;;  %v2607_v54 = vmul.f32 %v8719_v45, %v8719_v45 }
 0x341   : > { %v2483_v37 = vpop.f32.mrf.mxu0 }
 0x342   : > { %v8666_v50 = vadd.f32 %v8472_v33, %v2483_v37  ;;  %v8709_v37 = vadd.f32 %v8472_v33, %v8560_v12  ;;  %v2660_v12 = vsel %vm2508_vm12, %v2604_v52, 0.0 }
 0x344   : > { %v2601_v41 = vmul.f32 %v8666_v50, %v8666_v50  ;;  %v2552_v2 = vsel %vm2508_vm12, %v8666_v50, 0.0  ;;  %v2606_v40 = vmul.f32 %v8709_v37, %v8709_v37  ;;  %v2562_v8 = vsel %vm2508_vm12, %v8709_v37, 0.0 }
 0x345   : > { %v2553_v53 = vadd.f32 %v2552_v2, %v2551_v31  ;;  %v8735_v2 = vadd.f32 %v8472_v33, %v2503_v4  ;;  %v2566_v4 = vsel %vm2508_vm12, %v8727_v51, 0.0 }
 0x346   : > { %v2654_v42 = vsel %vm2508_vm12, %v2601_v41, 0.0 }
 0x347   : > { %v2655_v62 = vadd.f32 %v2654_v42, %v2653_v44  ;;  %v2608_v42 = vmul.f32 %v8727_v51, %v8727_v51  ;;  %v8743_v44 = vadd.f32 %v8472_v33, %v2505_v56  ;;  %v2568_v52 = vsel %vm2508_vm12, %v8735_v2, 0.0 }
 0x349   : > { %v2485_v0 = vpop.f32.mrf.mxu0 }
 0x34a   : > { %v8691_v11 = vadd.f32 %v8472_v33, %v2485_v0  ;;  %v2664_v0 = vsel %vm2508_vm12, %v2606_v40, 0.0  ;;  %v2610_v33 = vmul.f32 %v8743_v44, %v8743_v44 }
 0x34c   : > { %v2554_v20 = vsel %vm2508_vm12, %v8691_v11, 0.0  ;;  %v2602_v55 = vmul.f32 %v8691_v11, %v8691_v11 }
 0x34d   : > { %v2555_v16 = vadd.f32 %v2554_v20, %v2553_v53  ;;  %v2666_v20 = vsel %vm2508_vm12, %v2607_v54, 0.0 }
 0x34e   : > { %v2656_v34 = vsel %vm2508_vm12, %v2602_v55, 0.0  ;;  %v2609_v55 = vmul.f32 %v8735_v2, %v8735_v2 }
 0x34f   : > { %v2557_v60 = vadd.f32 %v2556_v36, %v2555_v16  ;;  %v2657_v58 = vadd.f32 %v2656_v34, %v2655_v62  ;;  %v2668_v36 = vsel %vm2508_vm12, %v2608_v42, 0.0 }
 0x351   : > { %v2559_v21 = vadd.f32 %v2558_v61, %v2557_v60  ;;  %v2659_v25 = vadd.f32 %v2658_v32, %v2657_v58  ;;  %v2670_v58 = vsel %vm2508_vm12, %v2609_v55, 0.0  ;;  %v2570_v32 = vsel %vm2508_vm12, %v8743_v44, 0.0 }
 0x353   : > { %v2561_v41 = vadd.f32 %v2560_v3, %v2559_v21  ;;  %v2661_v17 = vadd.f32 %v2660_v12, %v2659_v25  ;;  %v2672_v21 = vsel %vm2508_vm12, %v2610_v33, 0.0  ;;  %v2975_v33 = vld [vmem:[#allocation3 + $0x1] sm:$0xff] }
 0x355   : > { %v2563_v18 = vadd.f32 %v2562_v8, %v2561_v41  ;;  %v2663_v31 = vadd.f32 %v2662_v1, %v2661_v17 }
 0x357   : > { %v2565_v53 = vadd.f32 %v2564_v10, %v2563_v18  ;;  %v2665_v6 = vadd.f32 %v2664_v0, %v2663_v31 }
 0x359   : > { %v2567_v62 = vadd.f32 %v2566_v4, %v2565_v53  ;;  %v2667_v16 = vadd.f32 %v2666_v20, %v2665_v6 }
 0x35b   : > { %v2569_v34 = vadd.f32 %v2568_v52, %v2567_v62  ;;  %v2669_v60 = vadd.f32 %v2668_v36, %v2667_v16  ;;  %v3007_v16 = vld [vmem:[#allocation3 + $0x2] sm:$0xff]  ;;  %v3008_v36 = vld [vmem:[#allocation3 + $0xa] sm:$0xff] }
 0x35d   : > { %v2571_v61 = vadd.f32 %v2570_v32, %v2569_v34  ;;  %v2671_v22 = vadd.f32 %v2670_v58, %v2669_v60  ;;  %v2976_v34 = vld [vmem:[#allocation3 + $0x9] sm:$0xff]  ;;  %v6140_v60 = vpack.i.bf16 %v3008_v36, %v3007_v16 }
 0x35e   : > { %v6135_v58 = vpack.i.bf16 %v2976_v34, %v2975_v33 }
 0x35f   : > { %v2572_v25 = vrot.slane %v2571_v61, 4  ;;  %v2673_v12 = vadd.f32 %v2672_v21, %v2671_v22  ;;  %6141 = vrot.lane.b32.xlu1 %v6140_v60, %s6730_s12 }
 0x360   : > { %6136 = vrot.lane.b32.xlu0 %v6135_v58, %s6731_s13 }
 0x361   : > { %v2573_v3 = vadd.f32 %v2572_v25, %v2571_v61  ;;  %v2674_v40 = vrot.slane %v2673_v12, 4  ;;  %v5455_v25 = vld [vmem:[%s10747_s4 + $0x40] sm:$0xff] }
 0x362   : > { %4608 = vmatpush.bf16.msra.mxu2 %v5455_v25 }
 0x363   : > { %v2574_v56 = vrot.slane %v2573_v3, 2  ;;  %v2675_v41 = vadd.f32 %v2674_v40, %v2673_v12 }
 0x365   : > { %v2575_v17 = vadd.f32 %v2574_v56, %v2573_v3  ;;  %v2676_v1 = vrot.slane %v2675_v41, 2 }
 0x367   : > { %v2576_v8 = vrot.slane %v2575_v17, 1  ;;  %v2677_v54 = vadd.f32 %v2676_v1, %v2675_v41 }
 0x369   : > { %v2577_v18 = vadd.f32 %v2576_v8, %v2575_v17  ;;  %v2678_v31 = vrot.slane %v2677_v54, 1 }
 0x36b   : > { %v8759_v0 = vmul.f32 0.00390625, %v2577_v18  ;;  %v2679_v10 = vadd.f32 %v2678_v31, %v2677_v54 }
 0x36d   : > { %v2680_v42 = vmul.f32 0.00390625, %v2679_v10  ;;  %v2681_v53 = vmul.f32 %v8759_v0, %v8759_v0  ;;  %v2704_v55 = vsub.f32 %v8650_v26, %v8759_v0  ;;  %v2705_v62 = vsub.f32 %v8658_v27, %v8759_v0 }
 0x36e   : > { %v2706_v52 = vsub.f32 %v8666_v50, %v8759_v0  ;;  %v2707_v40 = vsub.f32 %v8691_v11, %v8759_v0  ;;  %v2684_v8 = vsub.f32 %v8480_v14, %v8759_v0  ;;  %v2685_v54 = vsub.f32 %v8476_v7, %v8759_v0 }
 0x36f   : > { %v2682_v6 = vsub.f32 %v2680_v42, %v2681_v53  ;;  %v2686_v18 = vsub.f32 %v8488_v9, %v8759_v0  ;;  %v2687_v11 = vsub.f32 %v8493_v13, %v8759_v0  ;;  %v2688_v31 = vsub.f32 %v8503_v48, %v8759_v0 }
 0x370   : > { %v2689_v10 = vsub.f32 %v8513_v19, %v8759_v0  ;;  %v2690_v42 = vsub.f32 %v8526_v28, %v8759_v0  ;;  %v2691_v14 = vsub.f32 %v8534_v15, %v8759_v0  ;;  %v2692_v7 = vsub.f32 %v8542_v38, %v8759_v0 }
 0x371   : > { %v2683_v20 = vmax.f32 %v2682_v6, 0.0  ;;  %v2693_v9 = vsub.f32 %v8550_v57, %v8759_v0  ;;  %v2694_v13 = vsub.f32 %v8558_v5, %v8759_v0  ;;  %v2695_v48 = vsub.f32 %v8569_v29, %v8759_v0 }
 0x372   : > { %v2696_v19 = vsub.f32 %v8578_v46, %v8759_v0  ;;  %v2697_v28 = vsub.f32 %v8587_v43, %v8759_v0  ;;  %v2698_v15 = vsub.f32 %v8596_v47, %v8759_v0  ;;  %v2699_v38 = vsub.f32 %v8605_v24, %v8759_v0 }
 0x373   : > { %v2716_v4 = vadd.f32 1e-05, %v2683_v20  ;;  %v2700_v57 = vsub.f32 %v8616_v23, %v8759_v0  ;;  %v2701_v5 = vsub.f32 %v8625_v35, %v8759_v0  ;;  %v2702_v29 = vsub.f32 %v8634_v59, %v8759_v0 }
 0x374   : > { %v2703_v46 = vsub.f32 %v8642_v63, %v8759_v0  ;;  %v2708_v47 = vsub.f32 %v8680_v39, %v8759_v0  ;;  %v2709_v24 = vsub.f32 %v8687_v30, %v8759_v0  ;;  %v2710_v23 = vsub.f32 %v8697_v49, %v8759_v0 }
 0x375   : > { %6697 = vrsqrt.f32 %v2716_v4  ;;  %vm2723_vm15 = vweird.f32 %v2716_v4  ;;  %v2711_v35 = vsub.f32 %v8709_v37, %v8759_v0  ;;  %v2712_v59 = vsub.f32 %v8719_v45, %v8759_v0 }
 0x376   : > { %v2713_v63 = vsub.f32 %v8727_v51, %v8759_v0  ;;  %v2714_v20 = vsub.f32 %v8735_v2, %v8759_v0 }
 0x37b   : > { %v6698_v32 = vpop.eup %6697 }
 0x37c   : > { %v2718_v61 = vmul.f32 %v6698_v32, %v2716_v4  ;;  %vm2724_vm14 = vweird.f32 %v6698_v32  ;;  %v2715_v4 = vsub.f32 %v8743_v44, %v8759_v0 }
 0x37d   : > { %vm2725_vm0 = vmor %vm2723_vm15, %vm2724_vm14 }
 0x37e   : > { %v2719_v22 = vmul.f32 %v6698_v32, %v2718_v61 }
 0x380   : > { %v2720_v21 = vmul.f32 0.5, %v2719_v22 }
 0x382   : > { %v2721_v12 = vsub.f32 1.5, %v2720_v21 }
 0x384   : > { %v2722_v3 = vmul.f32 %v6698_v32, %v2721_v12 }
 0x386   : > { %v8776_v56 = vsel %vm2725_vm0, %v6698_v32, %v2722_v3 }
 0x387   : > { %v2750_v41 = vmul.f32 %v8776_v56, %v2707_v40  ;;  %v2731_v43 = vmul.f32 %v8776_v56, %v2688_v31  ;;  %v2732_v53 = vmul.f32 %v8776_v56, %v2689_v10  ;;  %v2727_v6 = vmul.f32 %v8776_v56, %v2684_v8 }
 0x388   : > { %v2728_v16 = vmul.f32 %v8776_v56, %v2685_v54  ;;  %v2729_v36 = vmul.f32 %v8776_v56, %v2686_v18  ;;  %v2730_v33 = vmul.f32 %v8776_v56, %v2687_v11  ;;  %v2733_v34 = vmul.f32 %v8776_v56, %v2690_v42 }
 0x389   : > { %vm2782_vm1 = vcmp.ge.f32.partialorder %v2750_v41, 0.0  ;;  %v2814_v17 = vmul.f32 0.01, %v2750_v41  ;;  %v2734_v60 = vmul.f32 %v8776_v56, %v2691_v14  ;;  %v2795_v58 = vmul.f32 0.01, %v2731_v43 }
 0x38a   : > { %v2735_v32 = vmul.f32 %v8776_v56, %v2692_v7  ;;  %v2736_v61 = vmul.f32 %v8776_v56, %v2693_v9  ;;  %vm2763_vm2 = vcmp.ge.f32.partialorder %v2731_v43, 0.0  ;;  %v2796_v22 = vmul.f32 0.01, %v2732_v53 }
 0x38b   : > { %v2846_v1 = vsel %vm2782_vm1, %v2750_v41, %v2814_v17  ;;  %v2737_v21 = vmul.f32 %v8776_v56, %v2694_v13  ;;  %v8848_v25 = vmul.f32 %v8776_v56, %v2695_v48  ;;  %vm2764_vm3 = vcmp.ge.f32.partialorder %v2732_v53, 0.0 }
 0x38c   : > { %2934 = vst.msk [vmem:[#allocation3 + $0x129] sm:$0xff] %vm2508_vm12, %v2846_v1  ;;  %v2791_v12 = vmul.f32 0.01, %v2727_v6  ;;  %v8851_v3 = vmul.f32 %v8776_v56, %v2696_v19  ;;  %v8854_v40 = vmul.f32 %v8776_v56, %v2697_v28  ;;  %vm2759_vm4 = vcmp.ge.f32.partialorder %v2727_v6, 0.0 }
 0x38d   : > { %v2792_v41 = vmul.f32 0.01, %v2728_v16  ;;  %v8857_v17 = vmul.f32 %v8776_v56, %v2698_v15  ;;  %vm2760_vm5 = vcmp.ge.f32.partialorder %v2728_v16, 0.0  ;;  %v2793_v1 = vmul.f32 0.01, %v2729_v36 }
 0x38e   : > { %v2827_v8 = vsel %vm2763_vm2, %v2731_v43, %v2795_v58  ;;  %v8860_v54 = vmul.f32 %v8776_v56, %v2699_v38  ;;  %vm2761_vm7 = vcmp.ge.f32.partialorder %v2729_v36, 0.0  ;;  %v2794_v18 = vmul.f32 0.01, %v2730_v33 }
 0x38f   : > { %v2828_v11 = vsel %vm2764_vm3, %v2732_v53, %v2796_v22  ;;  %v8863_v31 = vmul.f32 %v8776_v56, %v2700_v57  ;;  %vm2762_vm8 = vcmp.ge.f32.partialorder %v2730_v33, 0.0  ;;  %v2797_v10 = vmul.f32 0.01, %v2733_v34  ;;  %2915 = vst.msk [vmem:[#allocation3 + $0x49] sm:$0xff] %vm2508_vm12, %v2827_v8 }
 0x390   : > { %v2823_v42 = vsel %vm2759_vm4, %v2727_v6, %v2791_v12  ;;  %v8866_v14 = vmul.f32 %v8776_v56, %v2701_v5  ;;  %vm2765_vm9 = vcmp.ge.f32.partialorder %v2733_v34, 0.0  ;;  %v2798_v7 = vmul.f32 0.01, %v2734_v60  ;;  %2916 = vst.msk [vmem:[#allocation3 + $0x51] sm:$0xff] %vm2508_vm12, %v2828_v11 }
 0x391   : > { %v2824_v9 = vsel %vm2760_vm5, %v2728_v16, %v2792_v41  ;;  %v8870_v13 = vmul.f32 %v8776_v56, %v2702_v29  ;;  %vm2766_vm11 = vcmp.ge.f32.partialorder %v2734_v60, 0.0  ;;  %v2799_v48 = vmul.f32 0.01, %v2735_v32  ;;  %2911 = vst.msk [vmem:[#allocation3 + $0x19] sm:$0xff] %vm2508_vm12, %v2823_v42 }
 0x392   : > { %v2825_v19 = vsel %vm2761_vm7, %v2729_v36, %v2793_v1  ;;  %v8874_v28 = vmul.f32 %v8776_v56, %v2703_v46  ;;  %vm2767_vm13 = vcmp.ge.f32.partialorder %v2735_v32, 0.0  ;;  %v2800_v15 = vmul.f32 0.01, %v2736_v61  ;;  %2912 = vst.msk [vmem:[#allocation3 + $0x21] sm:$0xff] %vm2508_vm12, %v2824_v9 }
 0x393   : > { %v2826_v38 = vsel %vm2762_vm8, %v2730_v33, %v2794_v18  ;;  %v8882_v57 = vmul.f32 %v8776_v56, %v2704_v55  ;;  %vm2768_vm14 = vcmp.ge.f32.partialorder %v2736_v61, 0.0  ;;  %v2801_v5 = vmul.f32 0.01, %v2737_v21  ;;  %2913 = vst.msk [vmem:[#allocation3 + $0x31] sm:$0xff] %vm2508_vm12, %v2825_v19 }
 0x394   : > { %v2829_v29 = vsel %vm2765_vm9, %v2733_v34, %v2797_v10  ;;  %v8890_v46 = vmul.f32 %v8776_v56, %v2705_v62  ;;  %vm2769_vm15 = vcmp.ge.f32.partialorder %v2737_v21, 0.0  ;;  %v2802_v43 = vmul.f32 0.01, %v8848_v25  ;;  %2914 = vst.msk [vmem:[#allocation3 + $0x39] sm:$0xff] %vm2508_vm12, %v2826_v38 }
 0x395   : > { %v2830_v26 = vsel %vm2766_vm11, %v2734_v60, %v2798_v7  ;;  %v8899_v55 = vmul.f32 %v8776_v56, %v2706_v52  ;;  %vm2770_vm0 = vcmp.ge.f32.partialorder %v8848_v25, 0.0  ;;  %v2803_v27 = vmul.f32 0.01, %v8851_v3  ;;  %2917 = vst.msk [vmem:[#allocation3 + $0x61] sm:$0xff] %vm2508_vm12, %v2829_v29 }
 0x396   : > { %v2831_v62 = vsel %vm2767_vm13, %v2735_v32, %v2799_v48  ;;  %v8909_v53 = vmul.f32 %v8776_v56, %v2708_v47  ;;  %vm2771_vm1 = vcmp.ge.f32.partialorder %v8851_v3, 0.0  ;;  %v2804_v50 = vmul.f32 0.01, %v8854_v40  ;;  %v2981_v16 = vld [vmem:[#allocation3 + $0x49] sm:$0xff]  ;;  %2918 = vst.msk [vmem:[#allocation3 + $0x69] sm:$0xff] %vm2508_vm12, %v2830_v26 }
 0x397   : > { %v2832_v52 = vsel %vm2768_vm14, %v2736_v61, %v2800_v15  ;;  %v8919_v6 = vmul.f32 %v8776_v56, %v2709_v24  ;;  %vm2772_vm2 = vcmp.ge.f32.partialorder %v8854_v40, 0.0  ;;  %v2805_v39 = vmul.f32 0.01, %v8857_v17  ;;  %v2982_v24 = vld [vmem:[#allocation3 + $0x51] sm:$0xff]  ;;  %2919 = vst.msk [vmem:[#allocation3 + $0x79] sm:$0xff] %vm2508_vm12, %v2831_v62 }
 0x398   : > { %v2833_v47 = vsel %vm2769_vm15, %v2737_v21, %v2801_v5  ;;  %vm2773_vm3 = vcmp.ge.f32.partialorder %v8857_v17, 0.0  ;;  %vm2774_vm4 = vcmp.ge.f32.partialorder %v8860_v54, 0.0  ;;  %v2806_v36 = vmul.f32 0.01, %v8860_v54  ;;  %2920 = vst.msk [vmem:[#allocation3 + $0x81] sm:$0xff] %vm2508_vm12, %v2832_v52  ;;  %v2977_v58 = vld [vmem:[#allocation3 + $0x19] sm:$0xff] }
 0x399   : > { %v2834_v30 = vsel %vm2770_vm0, %v8848_v25, %v2802_v43  ;;  %vm2775_vm5 = vcmp.ge.f32.partialorder %v8863_v31, 0.0  ;;  %v2807_v33 = vmul.f32 0.01, %v8863_v31  ;;  %v2835_v34 = vsel %vm2771_vm1, %v8851_v3, %v2803_v27  ;;  %2921 = vst.msk [vmem:[#allocation3 + $0x91] sm:$0xff] %vm2508_vm12, %v2833_v47  ;;  %v2978_v22 = vld [vmem:[#allocation3 + $0x21] sm:$0xff] }
 0x39a   : > { %v8937_v60 = vpack.i.bf16 %v2982_v24, %v2981_v16  ;;  %vm2776_vm7 = vcmp.ge.f32.partialorder %v8866_v14, 0.0  ;;  %vm2777_vm8 = vcmp.ge.f32.partialorder %v8870_v13, 0.0  ;;  %v2808_v32 = vmul.f32 0.01, %v8866_v14  ;;  %2922 = vst.msk [vmem:[#allocation3 + $0x99] sm:$0xff] %vm2508_vm12, %v2834_v30  ;;  %v2979_v12 = vld [vmem:[#allocation3 + $0x31] sm:$0xff] }
 0x39b   : > { %v2836_v61 = vsel %vm2772_vm2, %v8854_v40, %v2804_v50  ;;  %vm2778_vm9 = vcmp.ge.f32.partialorder %v8874_v28, 0.0  ;;  %v2809_v21 = vmul.f32 0.01, %v8870_v13  ;;  %v2837_v25 = vsel %vm2773_vm3, %v8857_v17, %v2805_v39  ;;  %2923 = vst.msk [vmem:[#allocation3 + $0xa9] sm:$0xff] %vm2508_vm12, %v2835_v34  ;;  %v8974_v8 = vld [vmem:[#allocation3 + $0x32] sm:$0xff]  ;;  %v8976_v49 = vld [vmem:[#allocation3 + $0x3a] sm:$0xff] }
 0x39c   : > { %6156 = vrot.lane.b32.xlu0 %v8937_v60, %s6731_s13  ;;  %v8955_v3 = vpack.i.bf16 %v2978_v22, %v2977_v58  ;;  %v8961_v40 = vmul.f32 %v8776_v56, %v2710_v23  ;;  %v8967_v41 = vmul.f32 %v8776_v56, %v2711_v35  ;;  %v2810_v17 = vmul.f32 0.01, %v8874_v28  ;;  %v2980_v23 = vld [vmem:[#allocation3 + $0x39] sm:$0xff]  ;;  %2924 = vst.msk [vmem:[#allocation3 + $0xb1] sm:$0xff] %vm2508_vm12, %v2836_v61  ;;  %v2983_v9 = vld [vmem:[#allocation3 + $0x61] sm:$0xff] }
 0x39d   : > { %v2838_v1 = vsel %vm2774_vm4, %v8860_v54, %v2806_v36  ;;  %v2811_v18 = vmul.f32 0.01, %v8882_v57  ;;  %v2839_v37 = vsel %vm2775_vm5, %v8863_v31, %v2807_v33  ;;  %v4357_v35 = vpack.c.bf16 %v8976_v49, %v8974_v8  ;;  %2925 = vst.msk [vmem:[#allocation3 + $0xc1] sm:$0xff] %vm2508_vm12, %v2837_v25  ;;  %v9077_v36 = vld [vmem:[#allocation3 + $0x4a] sm:$0xff]  ;;  %v9079_v30 = vld [vmem:[#allocation3 + $0x52] sm:$0xff] }
 0x39e   : > { %v8985_v11 = vpack.i.bf16 %v2980_v23, %v2979_v12  ;;  %6146 = vrot.lane.b32.xlu1 %v8955_v3, %s6731_s13  ;;  %v2755_v54 = vmul.f32 %v8776_v56, %v2712_v59  ;;  %vm2779_vm11 = vcmp.ge.f32.partialorder %v8882_v57, 0.0  ;;  %v2812_v10 = vmul.f32 0.01, %v8890_v46  ;;  %2926 = vst.msk [vmem:[#allocation3 + $0xc9] sm:$0xff] %vm2508_vm12, %v2838_v1  ;;  %v2985_v5 = vld [vmem:[#allocation3 + $0x79] sm:$0xff]  ;;  %v9091_v25 = vld [vmem:[#allocation3 + $0x12a] sm:$0xff] }
 0x39f   : > { %v2840_v31 = vsel %vm2776_vm7, %v8866_v14, %v2808_v32  ;;  %vm2780_vm13 = vcmp.ge.f32.partialorder %v8890_v46, 0.0  ;;  %vm2781_vm14 = vcmp.ge.f32.partialorder %v8899_v55, 0.0  ;;  %v2813_v42 = vmul.f32 0.01, %v8899_v55  ;;  %5387 = vmatmul.msk.bf16.vlgmr.msra.gmra.mxu2 %vm2508_vm12, %v4357_v35  ;;  %2927 = vst.msk [vmem:[#allocation3 + $0xd9] sm:$0xff] %vm2508_vm12, %v2839_v37  ;;  %v2986_v29 = vld [vmem:[#allocation3 + $0x81] sm:$0xff] }
 0x3a0   : > { %v2841_v45 = vsel %vm2777_vm8, %v8870_v13, %v2809_v21  ;;  %6151 = vrot.lane.b32.xlu2 %v8985_v11, %s6731_s13  ;;  %v2756_v59 = vmul.f32 %v8776_v56, %v2713_v63  ;;  %vm2783_vm15 = vcmp.ge.f32.partialorder %v8909_v53, 0.0  ;;  %v2815_v14 = vmul.f32 0.01, %v8909_v53  ;;  %v2984_v13 = vld [vmem:[#allocation3 + $0x69] sm:$0xff]  ;;  %2928 = vst.msk [vmem:[#allocation3 + $0xe1] sm:$0xff] %vm2508_vm12, %v2840_v31  ;;  %v2987_v48 = vld [vmem:[#allocation3 + $0x91] sm:$0xff] }
 0x3a1   : > { %v2842_v7 = vsel %vm2778_vm9, %v8874_v28, %v2810_v17  ;;  %vm2784_vm0 = vcmp.ge.f32.partialorder %v8919_v6, 0.0  ;;  %vm2785_vm1 = vcmp.ge.f32.partialorder %v8961_v40, 0.0  ;;  %v2816_v51 = vmul.f32 0.01, %v8919_v6  ;;  %2929 = vst.msk [vmem:[#allocation3 + $0xf1] sm:$0xff] %vm2508_vm12, %v2841_v45  ;;  %v3000_v35 = vld [vmem:[#allocation3 + $0x129] sm:$0xff] }
 0x3a2   : > { %v2843_v63 = vsel %vm2779_vm11, %v8882_v57, %v2811_v18  ;;  %v2757_v19 = vmul.f32 %v8776_v56, %v2714_v20  ;;  %v2758_v28 = vmul.f32 %v8776_v56, %v2715_v4  ;;  %v2817_v15 = vmul.f32 0.01, %v8961_v40  ;;  %v2988_v57 = vld [vmem:[#allocation3 + $0x99] sm:$0xff]  ;;  %2930 = vst.msk [vmem:[#allocation3 + $0xf9] sm:$0xff] %vm2508_vm12, %v2842_v7  ;;  %v2989_v50 = vld [vmem:[#allocation3 + $0xa9] sm:$0xff] }
 0x3a3   : > { %v2844_v38 = vsel %vm2780_vm13, %v8890_v46, %v2812_v10  ;;  %v2818_v2 = vmul.f32 0.01, %v8967_v41  ;;  %v2845_v20 = vsel %vm2781_vm14, %v8899_v55, %v2813_v42  ;;  %v9044_v44 = vpack.i.bf16 %v2988_v57, %v2987_v48  ;;  %2931 = vst.msk [vmem:[#allocation3 + $0x109] sm:$0xff] %vm2508_vm12, %v2843_v63  ;;  %v2990_v47 = vld [vmem:[#allocation3 + $0xb1] sm:$0xff] }
 0x3a4   : > { %v9046_v0 = vpack.i.bf16 %v2984_v13, %v2983_v9  ;;  %vm2786_vm2 = vcmp.ge.f32.partialorder %v8967_v41, 0.0  ;;  %v2819_v56 = vmul.f32 0.01, %v2755_v54  ;;  %v2847_v4 = vsel %vm2783_vm15, %v8909_v53, %v2815_v14  ;;  %2932 = vst.msk [vmem:[#allocation3 + $0x111] sm:$0xff] %vm2508_vm12, %v2844_v38  ;;  %v2991_v24 = vld [vmem:[#allocation3 + $0xc1] sm:$0xff]  ;;  %v9297_v37 = vld [vmem:[#allocation3 + $0xb0] sm:$0xff] }
 0x3a5   : > { %vm2787_vm3 = vcmp.ge.f32.partialorder %v2755_v54, 0.0  ;;  %v2820_v46 = vmul.f32 0.01, %v2756_v59  ;;  %v2848_v43 = vsel %vm2784_vm0, %v8919_v6, %v2816_v51  ;;  %6171 = vrot.lane.b32.xlu0 %v9044_v44, %s6731_s13  ;;  %v9059_v26 = vpack.i.bf16 %v2986_v29, %v2985_v5  ;;  %2933 = vst.msk [vmem:[#allocation3 + $0x121] sm:$0xff] %vm2508_vm12, %v2845_v20  ;;  %v2992_v34 = vld [vmem:[#allocation3 + $0xc9] sm:$0xff] }
 0x3a6   : > { %6161 = vrot.lane.b32.xlu1 %v9046_v0, %s6731_s13  ;;  %vm2788_vm4 = vcmp.ge.f32.partialorder %v2756_v59, 0.0  ;;  %v2821_v55 = vmul.f32 0.01, %v2757_v19  ;;  %v2849_v27 = vsel %vm2785_vm1, %v8961_v40, %v2817_v15  ;;  %vm2789_vm5 = vcmp.ge.f32.partialorder %v2757_v19, 0.0  ;;  %2935 = vst.msk [vmem:[#allocation3 + $0x139] sm:$0xff] %vm2508_vm12, %v2847_v4  ;;  %v2993_v6 = vld [vmem:[#allocation3 + $0xd9] sm:$0xff] }
 0x3a7   : > { %v2822_v62 = vmul.f32 0.01, %v2758_v28  ;;  %v2850_v53 = vsel %vm2786_vm2, %v8967_v41, %v2818_v2  ;;  %vm2790_vm7 = vcmp.ge.f32.partialorder %v2758_v28, 0.0  ;;  %v2851_v52 = vsel %vm2787_vm3, %v2755_v54, %v2819_v56  ;;  %2936 = vst.msk [vmem:[#allocation3 + $0x141] sm:$0xff] %vm2508_vm12, %v2848_v43  ;;  %v2994_v39 = vld [vmem:[#allocation3 + $0xe1] sm:$0xff]  ;;  %v3205_v56 = vld [vmem:[#allocation3 + $0x6a] sm:$0xff] }
 0x3a8   : > { %6166 = vrot.lane.b32.xlu2 %v9059_v26, %s6731_s13  ;;  %v2852_v16 = vsel %vm2788_vm4, %v2756_v59, %v2820_v46  ;;  %2937 = vst.msk [vmem:[#allocation3 + $0x151] sm:$0xff] %vm2508_vm12, %v2849_v27  ;;  %v2853_v33 = vsel %vm2789_vm5, %v2757_v19, %v2821_v55  ;;  %v6185_v22 = vpack.i.bf16 %v2994_v39, %v2993_v6  ;;  %v2995_v42 = vld [vmem:[#allocation3 + $0xf1] sm:$0xff]  ;;  %v3204_v20 = vld [vmem:[#allocation3 + $0x62] sm:$0xff]  ;;  %v3009_v6 = vld [vmem:[#allocation3 + $0x1a] sm:$0xff]  ;;  %vm4160_vm8 = vcmask 261120  }
 0x3a9   : > { %2938 = vst.msk [vmem:[#allocation3 + $0x159] sm:$0xff] %vm2508_vm12, %v2850_v53  ;;  %v9083_v58 = vld [vmem:[#allocation3 + $0xf2] sm:$0xff]  ;;  %v9085_v32 = vld [vmem:[#allocation3 + $0xfa] sm:$0xff]  ;;  %v2854_v61 = vsel %vm2790_vm7, %v2758_v28, %v2822_v62  ;;  %v9089_v21 = vpack.i.bf16 %v2990_v47, %v2989_v50  ;;  %v4359_v17 = vpack.c.bf16 %v9079_v30, %v9077_v36  ;;  %v9104_v1 = vpack.i.bf16 %v2992_v34, %v2991_v24  ;;  %v3010_v39 = vld [vmem:[#allocation3 + $0x22] sm:$0xff] }
 0x3aa   : > { %2939 = vst.msk [vmem:[#allocation3 + $0x169] sm:$0xff] %vm2508_vm12, %v2851_v52  ;;  %v2996_v45 = vld [vmem:[#allocation3 + $0xf9] sm:$0xff]  ;;  %v2997_v9 = vld [vmem:[#allocation3 + $0x109] sm:$0xff]  ;;  %v4361_v62 = vpack.c.bf16 %v3205_v56, %v3204_v20  ;;  %v9157_v47 = vpack.i.bf16 %v8976_v49, %v8974_v8  ;;  %v9165_v24 = vpack.i.bf16 %v3010_v39, %v3009_v6  ;;  %vm4225_vm9 = vcmask 523264  }
 0x3ab   : > { %2940 = vst.msk [vmem:[#allocation3 + $0x171] sm:$0xff] %vm2508_vm12, %v2852_v16  ;;  %v9096_v40 = vld [vmem:[#allocation3 + $0x10a] sm:$0xff]  ;;  %v9098_v41 = vld [vmem:[#allocation3 + $0x112] sm:$0xff]  ;;  %v6190_v48 = vpack.i.bf16 %v2996_v45, %v2995_v42  ;;  %v9161_v16 = vpack.i.bf16 %v9079_v30, %v9077_v36  ;;  %v3207_v34 = vld [vmem:[#allocation3 + $0x82] sm:$0xff]  ;;  %v9177_v30 = vpack.i.bf16 %v3205_v56, %v3204_v20  ;;  %vm4258_vm11 = vcmask 654336  }
 0x3ac   : > { %2941 = vst.msk [vmem:[#allocation3 + $0x181] sm:$0xff] %vm2508_vm12, %v2853_v33  ;;  %v9108_v23 = vld [vmem:[#allocation3 + $0x122] sm:$0xff]  ;;  %v2998_v13 = vld [vmem:[#allocation3 + $0x111] sm:$0xff]  ;;  %v3206_v33 = vld [vmem:[#allocation3 + $0x7a] sm:$0xff]  ;;  %vm4323_vm13 = vcmask 916480  }
 0x3ad   : > { %6186 = vrot.lane.b32.xlu0 %v6185_v22, %s6731_s13  ;;  %2942 = vst.msk [vmem:[#allocation3 + $0x189] sm:$0xff] %vm2508_vm12, %v2854_v61  ;;  %v2999_v31 = vld [vmem:[#allocation3 + $0x121] sm:$0xff]  ;;  %v6195_v38 = vpack.i.bf16 %v2998_v13, %v2997_v9  ;;  %v3001_v57 = vld [vmem:[#allocation3 + $0x139] sm:$0xff]  ;;  %v9171_v49 = vpack.i.bf16 %v3207_v34, %v3206_v33  ;;  %v4363_v36 = vpack.c.bf16 %v3207_v34, %v3206_v33  ;;  %v3021_v45 = vld [vmem:[#allocation3 + $0xaa] sm:$0xff] }
 0x3ae   : > { %6176 = vrot.lane.b32.xlu1 %v9089_v21, %s6731_s13  ;;  %v9118_v54 = vld [vmem:[#allocation3 + $0x13a] sm:$0xff]  ;;  %v9120_v10 = vld [vmem:[#allocation3 + $0x142] sm:$0xff]  ;;  %v6200_v63 = vpack.i.bf16 %v3000_v35, %v2999_v31  ;;  %v3019_v61 = vld [vmem:[#allocation3 + $0x92] sm:$0xff] }
 0x3af   : > { %5388 = vmatmul.msk.bf16.gmra.mxu2 %vm2508_vm12, %v4359_v17  ;;  %v3002_v2 = vld [vmem:[#allocation3 + $0x141] sm:$0xff]  ;;  %v3003_v4 = vld [vmem:[#allocation3 + $0x151] sm:$0xff]  ;;  %v9225_v56 = vpack.i.bf16 %v9120_v10, %v9118_v54 }
 0x3b0   : > { %6181 = vrot.lane.b32.xlu2 %v9104_v1, %s6731_s13  ;;  %v9124_v14 = vld [vmem:[#allocation3 + $0x152] sm:$0xff]  ;;  %v9126_v7 = vld [vmem:[#allocation3 + $0x15a] sm:$0xff]  ;;  %v9139_v55 = vpack.i.bf16 %v3002_v2, %v3001_v57  ;;  %v9184_v17 = vld [vmem:[#allocation3 + $0xc2] sm:$0xff]  ;;  %v6275_v57 = vpack.i.bf16 %v9091_v25, %v9108_v23 }
 0x3b1   : > { %10987 = vst [vmem:[#allocation17_spill] sm:$0xff] %v9124_v14  ;;  %v3005_v5 = vld [vmem:[#allocation3 + $0x169] sm:$0xff]  ;;  %v3004_v46 = vld [vmem:[#allocation3 + $0x159] sm:$0xff]  ;;  %v9217_v2 = vpack.i.bf16 %v9126_v7, %v9124_v14 }
 0x3b2   : > { %10988 = vst [vmem:[#allocation4_spill] sm:$0xff] %v9126_v7  ;;  %v9130_v19 = vld [vmem:[#allocation3 + $0x16a] sm:$0xff]  ;;  %v9132_v28 = vld [vmem:[#allocation3 + $0x172] sm:$0xff]  ;;  %v9144_v53 = vpack.i.bf16 %v3004_v46, %v3003_v4  ;;  %v3020_v8 = vld [vmem:[#allocation3 + $0x9a] sm:$0xff] }
 0x3b3   : > { %10989 = vst [vmem:[#allocation5_spill] sm:$0xff] %v9130_v19  ;;  %v3006_v29 = vld [vmem:[#allocation3 + $0x171] sm:$0xff]  ;;  %v9173_v22 = vpack.i.bf16 %v3020_v8, %v3019_v61  ;;  %v9188_v31 = vld [vmem:[#allocation3 + $0xda] sm:$0xff]  ;;  %v9190_v42 = vld [vmem:[#allocation3 + $0xe2] sm:$0xff]  ;;  %v6290_v20 = vpack.i.bf16 %v9132_v28, %v9130_v19 }
 0x3b4   : > { %10990 = vst [vmem:[#allocation9_spill] sm:$0xff] %v9132_v28  ;;  %v6215_v43 = vpack.i.bf16 %v3006_v29, %v3005_v5  ;;  %v9141_v27 = vld [vmem:[#allocation3 + $0x182] sm:$0xff]  ;;  %v9148_v50 = vld [vmem:[#allocation3 + $0x18a] sm:$0xff]  ;;  %v3022_v9 = vld [vmem:[#allocation3 + $0xb2] sm:$0xff]  ;;  %v4365_v5 = vpack.c.bf16 %v3020_v8, %v3019_v61  ;;  %v6265_v29 = vpack.i.bf16 %v9085_v32, %v9083_v58 }
 0x3b5   : > { %6201 = vrot.lane.b32.xlu0 %v6200_v63, %s6731_s13  ;;  %10991 = vst [vmem:[#allocation8_spill] sm:$0xff] %v9139_v55  ;;  %v9186_v35 = vld [vmem:[#allocation3 + $0xca] sm:$0xff]  ;;  %v6260_v63 = vpack.i.bf16 %v9190_v42, %v9188_v31  ;;  %v9238_v6 = vld [vmem:[#allocation3 + $0x18] sm:$0xff]  ;;  %v9240_v39 = vld [vmem:[#allocation3 + $0x20] sm:$0xff]  ;;  %v4367_v61 = vpack.c.bf16 %v3022_v9, %v3021_v45 }
 0x3b6   : > { %6191 = vrot.lane.b32.xlu1 %v6190_v48, %s6731_s13  ;;  %10992 = vst [vmem:[#allocation14_spill] sm:$0xff] %v9141_v27  ;;  %v9194_v13 = vpack.i.bf16 %v9186_v35, %v9184_v17  ;;  %v9200_v48 = vpack.i.bf16 %v3022_v9, %v3021_v45  ;;  %v9230_v4 = vld [vmem:[#allocation3 + $0x48] sm:$0xff]  ;;  %v9232_v46 = vld [vmem:[#allocation3 + $0x30] sm:$0xff]  ;;  %v6295_v8 = vpack.i.bf16 %v9240_v39, %v9238_v6  ;;  %v9264_v45 = vld [vmem:[#allocation3 + $0x98] sm:$0xff] }
 0x3b7   : > { %10993 = vst [vmem:[#allocation12_spill] sm:$0xff] %v9144_v53  ;;  %v9266_v9 = vld [vmem:[#allocation3 + $0x60] sm:$0xff]  ;;  %v9289_v52 = vld [vmem:[#allocation3 + $0xd8] sm:$0xff]  ;;  %v9295_v59 = vld [vmem:[#allocation3 + $0xa8] sm:$0xff] }
 0x3b8   : > { %6196 = vrot.lane.b32.xlu2 %v6195_v38, %s6731_s13  ;;  %10994 = vst [vmem:[#allocation11_spill] sm:$0xff] %v9148_v50  ;;  %v6270_v38 = vpack.i.bf16 %v9098_v41, %v9096_v40  ;;  %v9291_v15 = vld [vmem:[#allocation3 + $0xe0] sm:$0xff]  ;;  %v4369_v50 = vpack.c.bf16 %v9186_v35, %v9184_v17  ;;  %v9313_v19 = vpack.i.bf16 %v9297_v37, %v9295_v59  ;;  %v2944_v17 = vld [vmem:[#allocation3 + $0x8] sm:$0xff]  ;;  %v9322_v7 = vld [vmem:[#allocation3 + $0xf0] sm:$0xff] }
 0x3b9   : > { %10995 = vst [vmem:[#allocation10_spill] sm:$0xff] %v9194_v13  ;;  %v9305_v12 = vpack.i.bf16 %v9291_v15, %v9289_v52  ;;  %v2943_v14 = vld [vmem:[#allocation3] sm:$0xff] }
 0x3ba   : > { %10996 = vst [vmem:[#allocation16_spill] sm:$0xff] %v9217_v2 }
 0x3bb   : > { %10997 = vst [vmem:[#allocation15_spill] sm:$0xff] %v9225_v56 }
 0x3bc   : > { %10999 = vst [vmem:[#allocation6_spill] sm:$0xff] %v9305_v12 }
 0x3bd   : > { %6216 = vrot.lane.b32.xlu0 %v6215_v43, %s6731_s13  ;;  %v9234_v43 = vld [vmem:[#allocation3 + $0x38] sm:$0xff] }
 0x3be   : > { %6206 = vrot.lane.b32.xlu1 %v9139_v55, %s6731_s13  ;;  %v9244_v33 = vpack.i.bf16 %v9234_v43, %v9232_v46 }
 0x3bf   : > { %5389 = vmatmul.msk.bf16.gmra.mxu2 %vm2508_vm12, %v4361_v62  ;;  %v9236_v62 = vld [vmem:[#allocation3 + $0x50] sm:$0xff] }
 0x3c0   : > { %6211 = vrot.lane.b32.xlu2 %v9144_v53, %s6731_s13  ;;  %v9248_v34 = vpack.i.bf16 %v9236_v62, %v9230_v4 }
 0x3c5   : > { %6226 = vrot.lane.b32.xlu0 %v9157_v47, %s6730_s12 }
 0x3c6   : > { %6231 = vrot.lane.b32.xlu1 %v9161_v16, %s6730_s12 }
 0x3c8   : > { %6221 = vrot.lane.b32.xlu2 %v9165_v24, %s6730_s12 }
 0x3cd   : > { %6241 = vrot.lane.b32.xlu0 %v9171_v49, %s6730_s12 }
 0x3ce   : > { %6246 = vrot.lane.b32.xlu1 %v9173_v22, %s6730_s12 }
 0x3cf   : > { %5390 = vmatmul.msk.bf16.gmra.mxu2 %vm2508_vm12, %v4363_v36  ;;  %v9258_v36 = vld [vmem:[#allocation3 + $0x78] sm:$0xff] }
 0x3d0   : > { %6236 = vrot.lane.b32.xlu2 %v9177_v30, %s6730_s12 }
 0x3d1   : > { %v6142_v28 = vpop.permute.xlu1 %6141 }
 0x3d2   : > { %v6137_v27 = vpop.permute.xlu0 %6136  ;;  %v6144_v55 = vunpack.i.h.bf16 %v6142_v28 }
 0x3d3   : > { %v6138_v53 = vunpack.i.l.bf16 %v6137_v27 }
 0x3d5   : > { %6256 = vrot.lane.b32.xlu0 %v9194_v13, %s6730_s12  ;;  %v9324_v13 = vld [vmem:[#allocation3 + $0x138] sm:$0xff] }
 0x3d6   : > { %6261 = vrot.lane.b32.xlu1 %v6260_v63, %s6730_s12  ;;  %v9260_v63 = vld [vmem:[#allocation3 + $0x80] sm:$0xff] }
 0x3d8   : > { %6251 = vrot.lane.b32.xlu2 %v9200_v48, %s6730_s12 }
 0x3dd   : > { %6271 = vrot.lane.b32.xlu0 %v6270_v38, %s6730_s12  ;;  %v9262_v38 = vld [vmem:[#allocation3 + $0x90] sm:$0xff] }
 0x3de   : > { %6276 = vrot.lane.b32.xlu1 %v6275_v57, %s6730_s12  ;;  %v9268_v57 = vld [vmem:[#allocation3 + $0x68] sm:$0xff] }
 0x3df   : > { %5391 = vmatmul.msk.bf16.gmra.mxu2 %vm2508_vm12, %v4365_v5  ;;  %v9272_v5 = vpack.i.bf16 %v9260_v63, %v9258_v36 }
 0x3e0   : > { %6266 = vrot.lane.b32.xlu2 %v6265_v29, %s6730_s12  ;;  %v9276_v29 = vpack.i.bf16 %v9264_v45, %v9262_v38 }
 0x3e5   : > { %6286 = vrot.lane.b32.xlu0 %v9217_v2, %s6730_s12  ;;  %v6139_v2 = vunpack.i.h.bf16 %v6137_v27  ;;  %v6340_v27 = vpack.i.bf16 %v9324_v13, %v9322_v7 }
 0x3e6   : > { %6291 = vrot.lane.b32.xlu1 %v6290_v20, %s6730_s12  ;;  %v6310_v20 = vpack.i.bf16 %v9268_v57, %v9266_v9 }
 0x3e8   : > { %6281 = vrot.lane.b32.xlu2 %v9225_v56, %s6730_s12  ;;  %v6143_v56 = vunpack.i.l.bf16 %v6142_v28 }
 0x3ed   : > { %6301 = vrot.lane.b32.xlu0 %v9244_v33, %s6725_s10 }
 0x3ee   : > { %6306 = vrot.lane.b32.xlu1 %v9248_v34, %s6725_s10 }
 0x3ef   : > { %5392 = vmatmul.msk.bf16.gmra.mxu2 %vm2508_vm12, %v4367_v61  ;;  %v9285_v61 = vld [vmem:[#allocation3 + $0xc0] sm:$0xff] }
 0x3f0   : > { %6296 = vrot.lane.b32.xlu2 %v6295_v8, %s6725_s10  ;;  %v9287_v8 = vld [vmem:[#allocation3 + $0xc8] sm:$0xff] }
 0x3f1   : > { %v9301_v18 = vpack.i.bf16 %v9287_v8, %v9285_v61 }
 0x3f3   : > { %10998 = vst [vmem:[#allocation7_spill] sm:$0xff] %v9301_v18 }
 0x3f5   : > { %6316 = vrot.lane.b32.xlu0 %v9272_v5, %s6725_s10 }
 0x3f6   : > { %6321 = vrot.lane.b32.xlu1 %v9276_v29, %s6725_s10 }
 0x3f8   : > { %6311 = vrot.lane.b32.xlu2 %v6310_v20, %s6725_s10 }
 0x3fa   : > { %v9293_v51 = vpop.permute.xlu2 %6151 }
 0x3fd   : > { %6331 = vrot.lane.b32.xlu0 %v9301_v18, %s6725_s10 }
 0x3fe   : > { %6336 = vrot.lane.b32.xlu1 %v9305_v12, %s6725_s10  ;;  %v4129_v12 = vsel %vm2508_vm12, %v2944_v17, %v6139_v2 }
 0x3ff   : > { %5393 = vmatmul.msk.bf16.gmra.mxu2 %vm2508_vm12, %v4369_v50  ;;  %v4128_v50 = vsel %vm2508_vm12, %v2943_v14, %v6138_v53  ;;  %v9338_v28 = vsel %vm4160_vm8, %v4129_v12, %v6144_v55 }
 0x400   : > { %6326 = vrot.lane.b32.xlu2 %v9313_v19, %s6725_s10  ;;  %v9335_v18 = vsel %vm4160_vm8, %v4128_v50, %v6143_v56  ;;  %v11000_v56 = vpack.c.bf16 %v9085_v32, %v9083_v58 }
 0x402   : > { %v9320_v35 = vpop.permute.xlu2 %6166 }
 0x405   : > { %6346 = vrot.lane.b32.xlu0 %v8955_v3, %s6732_s17  ;;  %v4371_v3 = vpack.c.bf16 %v9190_v42, %v9188_v31 }
 0x406   : > { %6351 = vrot.lane.b32.xlu1 %v9165_v24, %s6733_s18 }
 0x408   : > { %6341 = vrot.lane.b32.xlu2 %v6340_v27, %s6725_s10 }
 0x40a   : > { %v9341_v14 = vpop.permute.xlu2 %6181 }
 0x40d   : > { %6361 = vrot.lane.b32.xlu0 %v8985_v11, %s6734_s19 }
 0x40e   : > { %6366 = vrot.lane.b32.xlu1 %v8985_v11, %s6732_s17  ;;  %v9349_v53 = vpop.permute.xlu0 %6156 }
 0x40f   : > { %5394 = vmatmul.msk.bf16.gmra.mxu2 %vm2508_vm12, %v4371_v3 }
 0x410   : > { %6356 = vrot.lane.b32.xlu2 %v9244_v33, %s6729_s14  ;;  %v6147_v12 = vpop.permute.xlu1 %6146 }
 0x411   : > { %v6149_v42 = vunpack.i.h.bf16 %v6147_v12  ;;  %v6148_v2 = vunpack.i.l.bf16 %v6147_v12 }
 0x412   : > { %v9354_v55 = vpop.permute.xlu2 %6196 }
 0x415   : > { %6376 = vrot.lane.b32.xlu0 %v9248_v34, %s6729_s14 }
 0x416   : > { %6381 = vrot.lane.b32.xlu1 %v8937_v60, %s6734_s19 }
 0x417   : > { %v9362_v11 = vpop.permute.xlu0 %6171 }
 0x418   : > { %6371 = vrot.lane.b32.xlu2 %v9157_v47, %s6733_s18  ;;  %v6162_v24 = vpop.permute.xlu1 %6161 }
 0x419   : > { %v6163_v32 = vunpack.i.l.bf16 %v6162_v24 }
 0x41a   : > { %v9364_v31 = vpop.permute.xlu2 %6211 }
 0x41d   : > { %6391 = vrot.lane.b32.xlu0 %v9161_v16, %s6733_s18  ;;  %v4130_v16 = vsel %vm2508_vm12, %v9238_v6, %v6148_v2 }
 0x41e   : > { %6396 = vrot.lane.b32.xlu1 %v6310_v20, %s6729_s14  ;;  %v4131_v20 = vsel %vm2508_vm12, %v9240_v39, %v6149_v42 }
 0x41f   : > { %5395 = vmatmul.msk.bf16.gmra.mxu2 %vm2508_vm12, %v11000_v56  ;;  %v9375_v47 = vpop.permute.xlu0 %6186  ;;  %v4136_v56 = vsel %vm2508_vm12, %v9266_v9, %v6163_v32  ;;  %v6159_v32 = vunpack.i.h.bf16 %v9349_v53 }
 0x420   : > { %6386 = vrot.lane.b32.xlu2 %v8937_v60, %s6732_s17  ;;  %v6177_v33 = vpop.permute.xlu1 %6176  ;;  %v6164_v60 = vunpack.i.h.bf16 %v6162_v24 }
 0x421   : > { %v6178_v24 = vunpack.i.l.bf16 %v6177_v33 }
 0x422   : > { %v6222_v34 = vpop.permute.xlu2 %6221  ;;  %v4137_v2 = vsel %vm2508_vm12, %v9268_v57, %v6164_v60  ;;  %v11001_v57 = vpack.c.bf16 %v9098_v41, %v9096_v40  ;;  %v6153_v60 = vunpack.i.l.bf16 %v9293_v51 }
 0x423   : > { %v6224_v17 = vunpack.i.h.bf16 %v6222_v34  ;;  %v6223_v50 = vunpack.i.l.bf16 %v6222_v34 }
 0x425   : > { %v9382_v27 = vsel %vm4160_vm8, %v4130_v16, %v6223_v50  ;;  %v9385_v58 = vsel %vm4160_vm8, %v4131_v20, %v6224_v17  ;;  %6406 = vrot.lane.b32.xlu0 %v9046_v0, %s6732_s17 }
 0x426   : > { %6411 = vrot.lane.b32.xlu1 %v9177_v30, %s6733_s18 }
 0x427   : > { %v9393_v6 = vpop.permute.xlu0 %6201 }
 0x428   : > { %6401 = vrot.lane.b32.xlu2 %v9046_v0, %s6734_s19  ;;  %v6192_v39 = vpop.permute.xlu1 %6191  ;;  %v6179_v0 = vunpack.i.h.bf16 %v6177_v33  ;;  %v4142_v33 = vsel %vm2508_vm12, %v9295_v59, %v6178_v24 }
 0x429   : > { %v6193_v59 = vunpack.i.l.bf16 %v6192_v39 }
 0x42a   : > { %v6237_v3 = vpop.permute.xlu2 %6236 }
 0x42b   : > { %v6239_v12 = vunpack.i.h.bf16 %v6237_v3  ;;  %v6238_v42 = vunpack.i.l.bf16 %v6237_v3  ;;  %v6158_v3 = vunpack.i.l.bf16 %v9349_v53  ;;  %v4132_v53 = vsel %vm2508_vm12, %v9232_v46, %v6153_v60 }
 0x42c   : > { %v6169_v60 = vunpack.i.h.bf16 %v9320_v35 }
 0x42d   : > { %v9400_v34 = vsel %vm4160_vm8, %v4136_v56, %v6238_v42  ;;  %v9403_v30 = vsel %vm4160_vm8, %v4137_v2, %v6239_v12  ;;  %6421 = vrot.lane.b32.xlu0 %v9059_v26, %s6734_s19  ;;  %v4134_v24 = vsel %vm2508_vm12, %v9230_v4, %v6158_v3  ;;  %v4148_v4 = vsel %vm2508_vm12, %v9322_v7, %v6193_v59 }
 0x42e   : > { %6426 = vrot.lane.b32.xlu1 %v9059_v26, %s6732_s17  ;;  %v4143_v26 = vsel %vm2508_vm12, %v9297_v37, %v6179_v0  ;;  %v6194_v37 = vunpack.i.h.bf16 %v6192_v39  ;;  %v4135_v39 = vsel %vm2508_vm12, %v9236_v62, %v6159_v32  ;;  %v6168_v32 = vunpack.i.l.bf16 %v9320_v35 }
 0x42f   : > { %5396 = vmatmul.msk.bf16.gmra.mxu2 %vm2508_vm12, %v11001_v57  ;;  %v9415_v9 = vpop.permute.xlu0 %6216  ;;  %v6174_v3 = vunpack.i.h.bf16 %v9362_v11 }
 0x430   : > { %6416 = vrot.lane.b32.xlu2 %v9272_v5, %s6729_s14  ;;  %v9417_v17 = vpop.permute.xlu1 %6206  ;;  %v6154_v5 = vunpack.i.h.bf16 %v9293_v51 }
 0x431   : > { %v6209_v59 = vunpack.i.h.bf16 %v9417_v17 }
 0x432   : > { %v6252_v50 = vpop.permute.xlu2 %6251 }
 0x433   : > { %v6254_v16 = vunpack.i.h.bf16 %v6252_v50  ;;  %v6253_v20 = vunpack.i.l.bf16 %v6252_v50 }
 0x435   : > { %v9424_v40 = vsel %vm4160_vm8, %v4142_v33, %v6253_v20  ;;  %v9427_v41 = vsel %vm4160_vm8, %v4143_v26, %v6254_v16  ;;  %6436 = vrot.lane.b32.xlu0 %v9276_v29, %s6729_s14  ;;  %v4133_v29 = vsel %vm2508_vm12, %v9234_v43, %v6154_v5 }
 0x436   : > { %6441 = vrot.lane.b32.xlu1 %v9044_v44, %s6734_s19 }
 0x437   : > { %v6227_v12 = vpop.permute.xlu0 %6226 }
 0x438   : > { %6431 = vrot.lane.b32.xlu2 %v9171_v49, %s6733_s18  ;;  %v6232_v42 = vpop.permute.xlu1 %6231  ;;  %v6229_v2 = vunpack.i.h.bf16 %v6227_v12  ;;  %v6228_v56 = vunpack.i.l.bf16 %v6227_v12  ;;  %v9447_v49 = vld [vmem:[#allocation3 + $0xf8] sm:$0xff]  ;;  %v6208_v12 = vunpack.i.l.bf16 %v9417_v17  ;;  %v4138_v17 = vsel %vm2508_vm12, %v9258_v36, %v6168_v32 }
 0x439   : > { %v6234_v51 = vunpack.i.h.bf16 %v6232_v42  ;;  %v6233_v0 = vunpack.i.l.bf16 %v6232_v42  ;;  %v4149_v43 = vsel %vm2508_vm12, %v9447_v49, %v6194_v37  ;;  %v6173_v37 = vunpack.i.l.bf16 %v9362_v11 }
 0x43a   : > { %v6267_v57 = vpop.permute.xlu2 %6266  ;;  %v9450_v50 = vsel %vm4160_vm8, %v4132_v53, %v6228_v56  ;;  %v9453_v16 = vsel %vm4160_vm8, %v4133_v29, %v6229_v2  ;;  %v11002_v42 = vpack.c.bf16 %v9091_v25, %v9108_v23  ;;  %v4141_v25 = vsel %vm2508_vm12, %v9264_v45, %v6174_v3  ;;  %v5454_v3 = vld [vmem:[%s10747_s4 + $0x38] sm:$0xff] }
 0x43b   : > { %v6269_v20 = vunpack.i.h.bf16 %v6267_v57  ;;  %v6268_v46 = vunpack.i.l.bf16 %v6267_v57  ;;  %v9460_v26 = vsel %vm4160_vm8, %v4135_v39, %v6234_v51  ;;  %v9463_v62 = vsel %vm4160_vm8, %v4134_v24, %v6233_v0  ;;  %4512 = vmatpush.bf16.msra.mxu1 %v5454_v3  ;;  %5463 = vmatpush.bf16.msrb.mxu3 %v5454_v3 }
 0x43c   : > { %v4140_v23 = vsel %vm2508_vm12, %v9262_v38, %v6173_v37  ;;  %v4154_v36 = vsel %vm2508_vm12, %v9324_v13, %v6208_v12  ;;  %v6189_v13 = vunpack.i.h.bf16 %v9375_v47 }
 0x43d   : > { %v9466_v33 = vsel %vm4160_vm8, %v4148_v4, %v6268_v46  ;;  %v9469_v5 = vsel %vm4160_vm8, %v4149_v43, %v6269_v20  ;;  %6451 = vrot.lane.b32.xlu0 %v9173_v22, %s6733_s18  ;;  %v6184_v46 = vunpack.i.h.bf16 %v9341_v14  ;;  %v6183_v43 = vunpack.i.l.bf16 %v9341_v14  ;;  %v9529_v14 = vld [vmem:[#allocation3 + $0x150] sm:$0xff] }
 0x43e   : > { %6456 = vrot.lane.b32.xlu1 %v9313_v19, %s6729_s14  ;;  %v4139_v19 = vsel %vm2508_vm12, %v9260_v63, %v6169_v60  ;;  %v6188_v4 = vunpack.i.l.bf16 %v9375_v47 }
 0x43f   : > { %5397 = vmatmul.msk.bf16.gmra.mxu2 %vm2508_vm12, %v11002_v42  ;;  %v6242_v35 = vpop.permute.xlu0 %6241  ;;  %v4144_v47 = vsel %vm2508_vm12, %v9285_v61, %v6183_v43 }
 0x440   : > { %6446 = vrot.lane.b32.xlu2 %v9044_v44, %s6732_s17  ;;  %v6247_v11 = vpop.permute.xlu1 %6246  ;;  %v6244_v2 = vunpack.i.h.bf16 %v6242_v35  ;;  %v6243_v56 = vunpack.i.l.bf16 %v6242_v35  ;;  %v2970_v44 = vld [vmem:[#allocation3 + $0x140] sm:$0xff] }
 0x441   : > { %v6249_v22 = vunpack.i.h.bf16 %v6247_v11  ;;  %v6248_v51 = vunpack.i.l.bf16 %v6247_v11  ;;  %v4155_v63 = vsel %vm2508_vm12, %v2970_v44, %v6209_v59  ;;  %v4146_v11 = vsel %vm2508_vm12, %v9289_v52, %v6188_v4 }
 0x442   : > { %v6282_v0 = vpop.permute.xlu2 %6281  ;;  %v9496_v53 = vsel %vm4160_vm8, %v4138_v17, %v6243_v56  ;;  %v9499_v29 = vsel %vm4160_vm8, %v4139_v19, %v6244_v2  ;;  %v6199_v52 = vunpack.i.h.bf16 %v9354_v55  ;;  %v6204_v19 = vunpack.i.h.bf16 %v9393_v6 }
 0x443   : > { %v6284_v24 = vunpack.i.h.bf16 %v6282_v0  ;;  %v6283_v39 = vunpack.i.l.bf16 %v6282_v0  ;;  %v9505_v45 = vsel %vm4160_vm8, %v4141_v25, %v6249_v22  ;;  %v9508_v38 = vsel %vm4160_vm8, %v4140_v23, %v6248_v51  ;;  %v2965_v25 = vld [vmem:[#allocation3 + $0x108] sm:$0xff]  ;;  %v2966_v23 = vld [vmem:[#allocation3 + $0x110] sm:$0xff] }
 0x444   : > { %v6485_v22 = vpack.i.bf16 %v9529_v14, %v2970_v44  ;;  %v6198_v51 = vunpack.i.l.bf16 %v9354_v55  ;;  %v6203_v17 = vunpack.i.l.bf16 %v9393_v6  ;;  %v11003_v0 = vpack.c.bf16 %v9120_v10, %v9118_v54  ;;  %v11004_v55 = vld [vmem:[#allocation7_spill] sm:$0xff]  ;;  %v9573_v6 = vld [vmem:[#allocation3 + $0x158] sm:$0xff] }
 0x445   : > { %v9511_v57 = vsel %vm4160_vm8, %v4154_v36, %v6283_v39  ;;  %v9514_v20 = vsel %vm4160_vm8, %v4155_v63, %v6284_v24  ;;  %6466 = vrot.lane.b32.xlu0 %v9089_v21, %s6732_s17  ;;  %v9575_v39 = vpop.f32.mrf.mxu2  ;;  %v2967_v63 = vld [vmem:[#allocation3 + $0x120] sm:$0xff]  ;;  %v2968_v36 = vld [vmem:[#allocation3 + $0x128] sm:$0xff] }
 0x446   : > { %6471 = vrot.lane.b32.xlu1 %v9200_v48, %s6733_s18  ;;  %v4145_v48 = vsel %vm2508_vm12, %v9287_v8, %v6184_v46  ;;  %v4150_v4 = vsel %vm2508_vm12, %v2965_v25, %v6198_v51  ;;  %v6213_v51 = vunpack.i.l.bf16 %v9364_v31  ;;  %v11005_v25 = vld [vmem:[#allocation15_spill] sm:$0xff] }
 0x447   : > { %v6257_v60 = vpop.permute.xlu0 %6256 }
 0x448   : > { %6461 = vrot.lane.b32.xlu2 %v9089_v21, %s6734_s19  ;;  %v6262_v32 = vpop.permute.xlu1 %6261  ;;  %v6259_v37 = vunpack.i.h.bf16 %v6257_v60  ;;  %v6258_v59 = vunpack.i.l.bf16 %v6257_v60  ;;  %v4147_v21 = vsel %vm2508_vm12, %v9291_v15, %v6189_v13  ;;  %v5453_v15 = vld [vmem:[%s10747_s4 + $0x30] sm:$0xff]  ;;  %v4151_v13 = vsel %vm2508_vm12, %v2966_v23, %v6199_v52 }
 0x449   : > { %v6264_v12 = vunpack.i.h.bf16 %v6262_v32  ;;  %v6263_v42 = vunpack.i.l.bf16 %v6262_v32  ;;  %4513 = vmatpush.bf16.msra.mxu1 %v5453_v15  ;;  %5464 = vmatpush.bf16.msrb.mxu3 %v5453_v15  ;;  %v4153_v60 = vsel %vm2508_vm12, %v2968_v36, %v6204_v19  ;;  %v4152_v32 = vsel %vm2508_vm12, %v2967_v63, %v6203_v17  ;;  %v3085_v63 = vld [vmem:[#allocation3 + $0xc1] sm:$0xff]  ;;  %v3086_v36 = vld [vmem:[#allocation3 + $0xc9] sm:$0xff] }
 0x44a   : > { %v9535_v35 = vpop.permute.xlu2 %6296  ;;  %v9542_v2 = vsel %vm4160_vm8, %v4144_v47, %v6258_v59  ;;  %v9545_v56 = vsel %vm4160_vm8, %v4145_v48, %v6259_v37  ;;  %v6214_v52 = vunpack.i.h.bf16 %v9364_v31  ;;  %v6219_v19 = vunpack.i.h.bf16 %v9415_v9  ;;  %v5450_v31 = vld [vmem:[%s10747_s4 + $0x18] sm:$0xff] }
 0x44b   : > { %v9548_v8 = vsel %vm4160_vm8, %v4147_v21, %v6264_v12  ;;  %v9551_v61 = vsel %vm4160_vm8, %v4146_v11, %v6263_v42  ;;  %v6500_v21 = vpack.i.bf16 %v9573_v6, %v9529_v14  ;;  %v5451_v11 = vld [vmem:[%s10747_s4 + $0x20] sm:$0xff]  ;;  %v6218_v17 = vunpack.i.l.bf16 %v9415_v9 }
 0x44d   : > { %6481 = vrot.lane.b32.xlu0 %v9104_v1, %s6734_s19  ;;  %v5452_v1 = vld [vmem:[%s10747_s4 + $0x28] sm:$0xff] }
 0x44e   : > { %6486 = vrot.lane.b32.xlu1 %v6485_v22, %s6725_s10  ;;  %4514 = vmatpush.bf16.msra.mxu1 %v5452_v1 }
 0x44f   : > { %5398 = vmatmul.msk.bf16.gmra.mxu2 %vm2508_vm12, %v11003_v0  ;;  %v6272_v44 = vpop.permute.xlu0 %6271  ;;  %5465 = vmatpush.bf16.msrb.mxu3 %v5452_v1 }
 0x450   : > { %6476 = vrot.lane.b32.xlu2 %v11004_v55, %s6729_s14  ;;  %v6277_v24 = vpop.permute.xlu1 %6276  ;;  %v6274_v46 = vunpack.i.h.bf16 %v6272_v44  ;;  %v6273_v43 = vunpack.i.l.bf16 %v6272_v44  ;;  %v9620_v55 = vld [vmem:[#allocation3 + $0x170] sm:$0xff] }
 0x451   : > { %v6279_v54 = vunpack.i.h.bf16 %v6277_v24  ;;  %v6278_v10 = vunpack.i.l.bf16 %v6277_v24 }
 0x452   : > { %v6312_v3 = vpop.permute.xlu2 %6311  ;;  %v9582_v37 = vsel %vm4160_vm8, %v4150_v4, %v6273_v43  ;;  %v9585_v59 = vsel %vm4160_vm8, %v4151_v13, %v6274_v46  ;;  %4515 = vmatpush.bf16.msra.mxu1 %v5451_v11  ;;  %v4157_v46 = vsel %vm2508_vm12, %v9573_v6, %v6214_v52  ;;  %v4156_v43 = vsel %vm2508_vm12, %v9529_v14, %v6213_v51  ;;  %v9630_v4 = vpop.f32.mrf.mxu2  ;;  %v5449_v51 = vld [vmem:[%s10747_s4 + $0x10] sm:$0xff] }
 0x453   : > { %v6314_v12 = vunpack.i.h.bf16 %v6312_v3  ;;  %v6313_v42 = vunpack.i.l.bf16 %v6312_v3  ;;  %v9588_v48 = vsel %vm4160_vm8, %v4153_v60, %v6279_v54  ;;  %v9591_v47 = vsel %vm4160_vm8, %v4152_v32, %v6278_v10  ;;  %5466 = vmatpush.bf16.msrb.mxu3 %v5451_v11 }
 0x454   : > { %v4159_v54 = vsel %vm2508_vm12, %v9620_v55, %v6219_v19  ;;  %v11007_v19 = vld [vmem:[#allocation10_spill] sm:$0xff] }
 0x455   : > { %v9600_v22 = vsel %vm2126_vm6, %v9463_v62, %v6313_v42  ;;  %v9604_v15 = vsel %vm2126_vm6, %v9460_v26, %v6314_v12  ;;  %6496 = vrot.lane.b32.xlu0 %v11005_v25, %s6733_s18  ;;  %v9613_v62 = vld [vmem:[#allocation3 + $0x168] sm:$0xff]  ;;  %v11006_v26 = vld [vmem:[#allocation8_spill] sm:$0xff]  ;;  %v11009_v25 = vld [vmem:[#allocation17_spill] sm:$0xff] }
 0x456   : > { %6501 = vrot.lane.b32.xlu1 %v6500_v21, %s6729_s14  ;;  %v4158_v10 = vsel %vm2508_vm12, %v9613_v62, %v6218_v17  ;;  %4516 = vmatpush.bf16.msra.mxu1 %v5450_v31  ;;  %v6510_v21 = vpack.i.bf16 %v3086_v36, %v3085_v63  ;;  %v11008_v17 = vld [vmem:[#allocation4_spill] sm:$0xff] }
 0x457   : > { %v6287_v23 = vpop.permute.xlu0 %6286  ;;  %5467 = vmatpush.bf16.msrb.mxu3 %v5450_v31  ;;  %v3182_v31 = vld [vmem:[#allocation3 + $0xd9] sm:$0xff]  ;;  %v5447_v63 = vld [vmem:[%s10747_s4] sm:$0xff] }
 0x458   : > { %6491 = vrot.lane.b32.xlu2 %v11006_v26, %s6732_s17  ;;  %v6292_v0 = vpop.permute.xlu1 %6291  ;;  %v6289_v9 = vunpack.i.h.bf16 %v6287_v23  ;;  %v6288_v44 = vunpack.i.l.bf16 %v6287_v23  ;;  %v11010_v26 = vpack.c.bf16 %v11008_v17, %v11009_v25 }
 0x459   : > { %v6294_v24 = vunpack.i.h.bf16 %v6292_v0  ;;  %v6293_v1 = vunpack.i.l.bf16 %v6292_v0  ;;  %v5448_v0 = vld [vmem:[%s10747_s4 + $0x8] sm:$0xff] }
 0x45a   : > { %v6327_v13 = vpop.permute.xlu2 %6326  ;;  %v9633_v60 = vsel %vm4160_vm8, %v4156_v43, %v6288_v44  ;;  %v9636_v32 = vsel %vm4160_vm8, %v4157_v46, %v6289_v9  ;;  %4517 = vmatpush.bf16.msra.mxu1 %v5449_v51  ;;  %v3183_v9 = vld [vmem:[#allocation3 + $0xe1] sm:$0xff]  ;;  %v6530_v46 = vpack.i.bf16 %v9613_v62, %v9573_v6  ;;  %v9676_v43 = vpop.f32.mrf.mxu2 }
 0x45b   : > { %v6329_v3 = vunpack.i.h.bf16 %v6327_v13  ;;  %v6328_v12 = vunpack.i.l.bf16 %v6327_v13  ;;  %v9639_v14 = vsel %vm4160_vm8, %v4159_v54, %v6294_v24  ;;  %v9642_v42 = vsel %vm4160_vm8, %v4158_v10, %v6293_v1  ;;  %5468 = vmatpush.bf16.msrb.mxu3 %v5449_v51  ;;  %v11012_v13 = vld [vmem:[#allocation6_spill] sm:$0xff] }
 0x45c   : > { %v6525_v36 = vpack.i.bf16 %v3183_v9, %v3182_v31  ;;  %v6545_v9 = vpack.i.bf16 %v9620_v55, %v9613_v62 }
 0x45d   : > { %v9646_v11 = vsel %vm2126_vm6, %v9508_v38, %v6328_v12  ;;  %v9650_v52 = vsel %vm2126_vm6, %v9505_v45, %v6329_v3  ;;  %6511 = vrot.lane.b32.xlu0 %v6510_v21, %s6732_s17  ;;  %v11011_v38 = vld [vmem:[#allocation12_spill] sm:$0xff] }
 0x45e   : > { %6516 = vrot.lane.b32.xlu1 %v11007_v19, %s6733_s18  ;;  %4518 = vmatpush.bf16.msra.mxu1 %v5448_v0 }
 0x45f   : > { %5399 = vmatmul.msk.bf16.gmra.mxu2 %vm2508_vm12, %v11010_v26  ;;  %v9664_v45 = vpop.permute.xlu0 %6301  ;;  %5469 = vmatpush.bf16.msrb.mxu3 %v5448_v0  ;;  %v3097_v26 = vld [vmem:[#allocation3 + $0x151] sm:$0xff] }
 0x460   : > { %6506 = vrot.lane.b32.xlu2 %v11011_v38, %s6734_s19  ;;  %v9666_v23 = vpop.permute.xlu1 %6306  ;;  %v3098_v38 = vld [vmem:[#allocation3 + $0x159] sm:$0xff] }
 0x462   : > { %v6342_v44 = vpop.permute.xlu2 %6341  ;;  %4519 = vmatpush.bf16.msra.mxu1 %v5447_v63 }
 0x463   : > { %v6344_v24 = vunpack.i.h.bf16 %v6342_v44  ;;  %v6343_v1 = vunpack.i.l.bf16 %v6342_v44  ;;  %5470 = vmatpush.bf16.msrb.mxu3 %v5447_v63  ;;  %v6535_v44 = vpack.i.bf16 %v3098_v38, %v3097_v26  ;;  %v3195_v26 = vld [vmem:[#allocation3 + $0x171] sm:$0xff] }
 0x465   : > { %v9680_v54 = vsel %vm2126_vm6, %v9551_v61, %v6343_v1  ;;  %v9684_v10 = vsel %vm2126_vm6, %v9591_v47, %v6344_v24  ;;  %6526 = vrot.lane.b32.xlu0 %v6525_v36, %s6734_s19  ;;  %v6709_v61 = vld [vmem:[%s10747_s4 + $0x40] sm:$0xff]  ;;  %v11014_v24 = vld [vmem:[#allocation9_spill] sm:$0xff] }
 0x466   : > { %6531 = vrot.lane.b32.xlu1 %v6530_v46, %s6725_s10  ;;  %v11015_v1 = vld [vmem:[#allocation5_spill] sm:$0xff] }
 0x467   : > { %v6317_v6 = vpop.permute.xlu0 %6316  ;;  %5471 = vmatpush.bf16.msra.mxu3 %v6709_v61  ;;  %v11016_v63 = vpack.c.bf16 %v11014_v24, %v11015_v1  ;;  %v3120_v61 = vld [vmem:[#allocation3 + $0xe2] sm:$0xff] }
 0x468   : > { %6521 = vrot.lane.b32.xlu2 %v11012_v13, %s6729_s14  ;;  %v6322_v3 = vpop.permute.xlu1 %6321  ;;  %v6319_v12 = vunpack.i.h.bf16 %v6317_v6  ;;  %v6318_v21 = vunpack.i.l.bf16 %v6317_v6 }
 0x469   : > { %v6324_v47 = vunpack.i.h.bf16 %v6322_v3  ;;  %v6323_v51 = vunpack.i.l.bf16 %v6322_v3  ;;  %v3119_v3 = vld [vmem:[#allocation3 + $0xda] sm:$0xff] }
 0x46a   : > { %v9693_v19 = vpop.permute.xlu2 %6356  ;;  %v9697_v17 = vsel %vm2126_vm6, %v9400_v34, %v6318_v21  ;;  %v9701_v25 = vsel %vm2126_vm6, %v9403_v30, %v6319_v12  ;;  %v11013_v34 = vld [vmem:[#allocation16_spill] sm:$0xff]  ;;  %v9716_v30 = vpop.f32.mrf.mxu2 }
 0x46b   : > { %v9705_v0 = vsel %vm2126_vm6, %v9499_v29, %v6324_v47  ;;  %v9709_v31 = vsel %vm2126_vm6, %v9496_v53, %v6323_v51  ;;  %v3194_v51 = vld [vmem:[#allocation3 + $0x169] sm:$0xff] }
 0x46d   : > { %6541 = vrot.lane.b32.xlu0 %v11013_v34, %s6733_s18  ;;  %v6560_v34 = vpack.i.bf16 %v3120_v61, %v3119_v3 }
 0x46e   : > { %6546 = vrot.lane.b32.xlu1 %v6545_v9, %s6729_s14 }
 0x46f   : > { %5400 = vmatmul.msk.bf16.gmra.mxu2 %vm2508_vm12, %v11016_v63  ;;  %v6332_v53 = vpop.permute.xlu0 %6331  ;;  %v3185_v63 = vld [vmem:[#allocation3 + $0xf9] sm:$0xff] }
 0x470   : > { %6536 = vrot.lane.b32.xlu2 %v6535_v44, %s6732_s17  ;;  %v6337_v29 = vpop.permute.xlu1 %6336  ;;  %v6334_v46 = vunpack.i.h.bf16 %v6332_v53  ;;  %v6333_v13 = vunpack.i.l.bf16 %v6332_v53  ;;  %v6550_v44 = vpack.i.bf16 %v3195_v26, %v3194_v51  ;;  %v6565_v51 = vpack.i.bf16 %v9447_v49, %v9322_v7  ;;  %v3164_v7 = vld [vmem:[#allocation3 + $0x180] sm:$0xff] }
 0x471   : > { %v6339_v62 = vunpack.i.h.bf16 %v6337_v29  ;;  %v6338_v6 = vunpack.i.l.bf16 %v6337_v29 }
 0x472   : > { %v9723_v12 = vpop.permute.xlu2 %6371  ;;  %v9727_v21 = vsel %vm2126_vm6, %v9424_v40, %v6333_v13  ;;  %v9731_v47 = vsel %vm2126_vm6, %v9427_v41, %v6334_v46  ;;  %v6299_v40 = vunpack.i.h.bf16 %v9535_v35  ;;  %v6298_v41 = vunpack.i.l.bf16 %v9535_v35 }
 0x473   : > { %v9735_v38 = vsel %vm2126_vm6, %v9545_v56, %v6339_v62  ;;  %v9739_v9 = vsel %vm2126_vm6, %v9542_v2, %v6338_v6  ;;  %v3184_v56 = vld [vmem:[#allocation3 + $0xf1] sm:$0xff] }
 0x474   : > { %v9748_v46 = vpack.i.bf16 %v3185_v63, %v3184_v56  ;;  %v4194_v13 = vsel %vm2126_vm6, %v9338_v28, %v6299_v40  ;;  %v4193_v35 = vsel %vm2126_vm6, %v9335_v18, %v6298_v41  ;;  %v6359_v40 = vunpack.i.h.bf16 %v9693_v19  ;;  %v3132_v56 = vld [vmem:[#allocation3 + $0x172] sm:$0xff] }
 0x475   : > { %6556 = vrot.lane.b32.xlu0 %v6525_v36, %s6732_s17  ;;  %v6575_v36 = vpack.i.bf16 %v9447_v49, %v9620_v55  ;;  %v6358_v41 = vunpack.i.l.bf16 %v9693_v19  ;;  %v3165_v49 = vld [vmem:[#allocation3 + $0x188] sm:$0xff]  ;;  %v6304_v63 = vunpack.i.h.bf16 %v9664_v45 }
 0x476   : > { %6561 = vrot.lane.b32.xlu1 %v6560_v34, %s6733_s18  ;;  %v3131_v34 = vld [vmem:[#allocation3 + $0x16a] sm:$0xff] }
 0x477   : > { %v6347_v24 = vpop.permute.xlu0 %6346 }
 0x478   : > { %6551 = vrot.lane.b32.xlu2 %v6550_v44, %s6734_s19  ;;  %v6352_v1 = vpop.permute.xlu1 %6351  ;;  %v6349_v53 = vunpack.i.h.bf16 %v6347_v24  ;;  %v6348_v29 = vunpack.i.l.bf16 %v6347_v24 }
 0x479   : > { %v6354_v62 = vunpack.i.h.bf16 %v6352_v1  ;;  %v6353_v6 = vunpack.i.l.bf16 %v6352_v1 }
 0x47a   : > { %v9746_v2 = vpop.permute.xlu2 %6386  ;;  %v4226_v3 = vsel %vm4225_vm9, %v4193_v35, %v6348_v29  ;;  %v4227_v61 = vsel %vm4225_vm9, %v4194_v13, %v6349_v53  ;;  %v6303_v53 = vunpack.i.l.bf16 %v9664_v45  ;;  %v4196_v45 = vsel %vm2126_vm6, %v9385_v58, %v6304_v63  ;;  %v3122_v58 = vld [vmem:[#allocation3 + $0xfa] sm:$0xff] }
 0x47b   : > { %v4260_v28 = vsel %vm4258_vm11, %v4227_v61, %v6354_v62  ;;  %v4259_v55 = vsel %vm4258_vm11, %v4226_v3, %v6353_v6  ;;  %v6585_v6 = vpack.i.bf16 %v3132_v56, %v3131_v34  ;;  %v9774_v3 = vpack.i.bf16 %v3165_v49, %v3164_v7 }
 0x47c   : > { %v4291_v35 = vsel %vm2258_vm10, %v4259_v55, %v6358_v41  ;;  %v4292_v62 = vsel %vm2258_vm10, %v4260_v28, %v6359_v40  ;;  %v6373_v34 = vunpack.i.l.bf16 %v9723_v12  ;;  %v3121_v41 = vld [vmem:[#allocation3 + $0xf2] sm:$0xff] }
 0x47d   : > { %6571 = vrot.lane.b32.xlu0 %v9748_v46, %s6734_s19 }
 0x47e   : > { %6576 = vrot.lane.b32.xlu1 %v6575_v36, %s6725_s10 }
 0x47f   : > { %v6362_v18 = vpop.permute.xlu0 %6361 }
 0x480   : > { %6566 = vrot.lane.b32.xlu2 %v6565_v51, %s6729_s14  ;;  %v6367_v26 = vpop.permute.xlu1 %6366  ;;  %v6364_v24 = vunpack.i.h.bf16 %v6362_v18  ;;  %v6363_v1 = vunpack.i.l.bf16 %v6362_v18  ;;  %v4195_v18 = vsel %vm2126_vm6, %v9382_v27, %v6303_v53 }
 0x481   : > { %v6369_v36 = vunpack.i.h.bf16 %v6367_v26  ;;  %v6368_v13 = vunpack.i.l.bf16 %v6367_v26  ;;  %v6374_v26 = vunpack.i.h.bf16 %v9723_v12 }
 0x482   : > { %v9770_v29 = vpop.permute.xlu2 %6401  ;;  %v4324_v19 = vsel %vm4323_vm13, %v4291_v35, %v6363_v1  ;;  %v4325_v61 = vsel %vm4323_vm13, %v4292_v62, %v6364_v24  ;;  %v6605_v35 = vpack.i.bf16 %v3122_v58, %v3121_v41  ;;  %v6309_v62 = vunpack.i.h.bf16 %v9666_v23  ;;  %v3186_v58 = vld [vmem:[#allocation3 + $0x109] sm:$0xff] }
 0x483   : > { %v4356_v51 = vpack.c.bf16 %v4325_v61, %v4324_v19  ;;  %v4228_v28 = vsel %vm4225_vm9, %v4195_v18, %v6368_v13  ;;  %v4229_v55 = vsel %vm4225_vm9, %v4196_v45, %v6369_v36  ;;  %v3196_v36 = vld [vmem:[#allocation3 + $0x181] sm:$0xff]  ;;  %v3197_v13 = vld [vmem:[#allocation3 + $0x189] sm:$0xff]  ;;  %v6389_v18 = vunpack.i.h.bf16 %v9746_v2 }
 0x484   : > { %v4261_v63 = vsel %vm4258_vm11, %v4228_v28, %v6373_v34  ;;  %v4262_v53 = vsel %vm4258_vm11, %v4229_v55, %v6374_v26  ;;  %v6388_v45 = vunpack.i.l.bf16 %v9746_v2  ;;  %v6595_v28 = vpack.i.bf16 %v3197_v13, %v3196_v36  ;;  %v3155_v36 = vld [vmem:[#allocation3 + $0x110] sm:$0xff] }
 0x485   : > { %6586 = vrot.lane.b32.xlu0 %v6585_v6, %s6733_s18  ;;  %4520 = vmatmul.bf16.vlgmr.msra.gmra.mxu1 %v4356_v51  ;;  %v6308_v6 = vunpack.i.l.bf16 %v9666_v23  ;;  %v4198_v55 = vsel %vm2126_vm6, %v9453_v16, %v6309_v62  ;;  %v6404_v16 = vunpack.i.h.bf16 %v9770_v29 }
 0x486   : > { %6591 = vrot.lane.b32.xlu1 %v9774_v3, %s6729_s14 }
 0x487   : > { %v6377_v27 = vpop.permute.xlu0 %6376  ;;  %v4197_v23 = vsel %vm2126_vm6, %v9450_v50, %v6308_v6  ;;  %v6403_v50 = vunpack.i.l.bf16 %v9770_v29 }
 0x488   : > { %6581 = vrot.lane.b32.xlu2 %v6550_v44, %s6732_s17  ;;  %v6382_v40 = vpop.permute.xlu1 %6381  ;;  %v6379_v24 = vunpack.i.h.bf16 %v6377_v27  ;;  %v6378_v1 = vunpack.i.l.bf16 %v6377_v27 }
 0x489   : > { %v6384_v56 = vunpack.i.h.bf16 %v6382_v40  ;;  %v6383_v7 = vunpack.i.l.bf16 %v6382_v40 }
 0x48a   : > { %v9790_v49 = vpop.permute.xlu2 %6416  ;;  %v4293_v12 = vsel %vm2258_vm10, %v4261_v63, %v6378_v1  ;;  %v4294_v44 = vsel %vm2258_vm10, %v4262_v53, %v6379_v24  ;;  %v3187_v24 = vld [vmem:[#allocation3 + $0x111] sm:$0xff]  ;;  %v4231_v1 = vsel %vm4225_vm9, %v4198_v55, %v6389_v18  ;;  %v3154_v53 = vld [vmem:[#allocation3 + $0x108] sm:$0xff] }
 0x48b   : > { %v4326_v19 = vsel %vm4323_vm13, %v4293_v12, %v6383_v7  ;;  %v4327_v61 = vsel %vm4323_vm13, %v4294_v44, %v6384_v56  ;;  %v6615_v13 = vpack.i.bf16 %v3187_v24, %v3186_v58  ;;  %v6610_v6 = vpack.i.bf16 %v3155_v36, %v3154_v53  ;;  %v3198_v24 = vld [vmem:[#allocation3 + $0x199] sm:$0xff] }
 0x48c   : > { %v4358_v51 = vpack.c.bf16 %v4327_v61, %v4326_v19  ;;  %v3166_v19 = vld [vmem:[#allocation3 + $0x198] sm:$0xff]  ;;  %v3167_v61 = vld [vmem:[#allocation3 + $0x1a0] sm:$0xff] }
 0x48d   : > { %6601 = vrot.lane.b32.xlu0 %v9748_v46, %s6732_s17  ;;  %v4230_v46 = vsel %vm4225_vm9, %v4197_v23, %v6388_v45 }
 0x48e   : > { %6606 = vrot.lane.b32.xlu1 %v6605_v35, %s6733_s18 }
 0x48f   : > { %v6392_v26 = vpop.permute.xlu0 %6391 }
 0x490   : > { %6596 = vrot.lane.b32.xlu2 %v6595_v28, %s6734_s19  ;;  %v6397_v34 = vpop.permute.xlu1 %6396  ;;  %v6394_v27 = vunpack.i.h.bf16 %v6392_v26  ;;  %v6393_v40 = vunpack.i.l.bf16 %v6392_v26 }
 0x491   : > { %v6399_v41 = vunpack.i.h.bf16 %v6397_v34  ;;  %v6398_v2 = vunpack.i.l.bf16 %v6397_v34  ;;  %v6635_v34 = vpack.i.bf16 %v3167_v61, %v3166_v19 }
 0x492   : > { %v9812_v56 = vpop.permute.xlu2 %6431  ;;  %v4263_v7 = vsel %vm4258_vm11, %v4230_v46, %v6393_v40  ;;  %v4264_v63 = vsel %vm4258_vm11, %v4231_v1, %v6394_v27  ;;  %v3199_v46 = vld [vmem:[#allocation3 + $0x1a1] sm:$0xff] }
 0x493   : > { %v4295_v35 = vsel %vm2258_vm10, %v4263_v7, %v6398_v2  ;;  %v4296_v12 = vsel %vm2258_vm10, %v4264_v63, %v6399_v41  ;;  %v6710_v41 = vld [vmem:[#allocation3 + $0x182] sm:$0xff]  ;;  %v6711_v2 = vld [vmem:[#allocation3 + $0x18a] sm:$0xff]  ;;  %v6419_v63 = vunpack.i.h.bf16 %v9790_v49 }
 0x494   : > { %v4328_v44 = vsel %vm4323_vm13, %v4295_v35, %v6403_v50  ;;  %v4329_v62 = vsel %vm4323_vm13, %v4296_v12, %v6404_v16  ;;  %v6630_v58 = vpack.i.bf16 %v6711_v2, %v6710_v41  ;;  %v6645_v35 = vpack.i.bf16 %v3199_v46, %v3198_v24  ;;  %v3123_v46 = vld [vmem:[#allocation3 + $0x10a] sm:$0xff] }
 0x495   : > { %6616 = vrot.lane.b32.xlu0 %v6615_v13, %s6734_s19  ;;  %v4360_v29 = vpack.c.bf16 %v4329_v62, %v4328_v44  ;;  %4525 = vmatmul.bf16.gmra.mxu1 %v4358_v51 }
 0x496   : > { %6621 = vrot.lane.b32.xlu1 %v9774_v3, %s6725_s10 }
 0x497   : > { %v6407_v18 = vpop.permute.xlu0 %6406 }
 0x498   : > { %6611 = vrot.lane.b32.xlu2 %v6610_v6, %s6729_s14  ;;  %v6412_v45 = vpop.permute.xlu1 %6411  ;;  %v6409_v55 = vunpack.i.h.bf16 %v6407_v18  ;;  %v6408_v23 = vunpack.i.l.bf16 %v6407_v18 }
 0x499   : > { %v6414_v27 = vunpack.i.h.bf16 %v6412_v45  ;;  %v6413_v40 = vunpack.i.l.bf16 %v6412_v45 }
 0x49a   : > { %v9826_v26 = vpop.permute.xlu2 %6446  ;;  %v4232_v3 = vsel %vm4225_vm9, %v9600_v22, %v6408_v23  ;;  %v4233_v51 = vsel %vm4225_vm9, %v9604_v15, %v6409_v55  ;;  %v6418_v22 = vunpack.i.l.bf16 %v9790_v49  ;;  %v6434_v55 = vunpack.i.h.bf16 %v9812_v56 }
 0x49b   : > { %v4265_v1 = vsel %vm4258_vm11, %v4232_v3, %v6413_v40  ;;  %v4266_v16 = vsel %vm4258_vm11, %v4233_v51, %v6414_v27  ;;  %v6433_v23 = vunpack.i.l.bf16 %v9812_v56  ;;  %v3156_v40 = vld [vmem:[#allocation3 + $0x120] sm:$0xff]  ;;  %v3157_v3 = vld [vmem:[#allocation3 + $0x128] sm:$0xff]  ;;  %v3124_v56 = vld [vmem:[#allocation3 + $0x112] sm:$0xff] }
 0x49c   : > { %v4297_v62 = vsel %vm2258_vm10, %v4265_v1, %v6418_v22  ;;  %v4298_v19 = vsel %vm2258_vm10, %v4266_v16, %v6419_v63  ;;  %v3188_v51 = vld [vmem:[#allocation3 + $0x121] sm:$0xff]  ;;  %v6660_v16 = vpack.i.bf16 %v3157_v3, %v3156_v40 }
 0x49d   : > { %6631 = vrot.lane.b32.xlu0 %v6630_v58, %s6733_s18 }
 0x49e   : > { %6636 = vrot.lane.b32.xlu1 %v6635_v34, %s6729_s14 }
 0x49f   : > { %v6422_v50 = vpop.permute.xlu0 %6421 }
 0x4a0   : > { %6626 = vrot.lane.b32.xlu2 %v6595_v28, %s6732_s17  ;;  %v6427_v7 = vpop.permute.xlu1 %6426  ;;  %v6424_v53 = vunpack.i.h.bf16 %v6422_v50  ;;  %v6423_v15 = vunpack.i.l.bf16 %v6422_v50 }
 0x4a1   : > { %v6429_v12 = vunpack.i.h.bf16 %v6427_v7  ;;  %v6428_v44 = vunpack.i.l.bf16 %v6427_v7 }
 0x4a2   : > { %v9839_v36 = vpop.permute.xlu2 %6461  ;;  %v4330_v61 = vsel %vm4323_vm13, %v4297_v62, %v6423_v15  ;;  %v4331_v28 = vsel %vm4323_vm13, %v4298_v19, %v6424_v53  ;;  %v6449_v53 = vunpack.i.h.bf16 %v9826_v26  ;;  %v6448_v15 = vunpack.i.l.bf16 %v9826_v26 }
 0x4a3   : > { %v4362_v18 = vpack.c.bf16 %v4331_v28, %v4330_v61  ;;  %v4234_v49 = vsel %vm4225_vm9, %v9697_v17, %v6428_v44  ;;  %v4235_v45 = vsel %vm4225_vm9, %v9701_v25, %v6429_v12  ;;  %v3189_v17 = vld [vmem:[#allocation3 + $0x129] sm:$0xff] }
 0x4a4   : > { %v4267_v25 = vsel %vm4258_vm11, %v4234_v49, %v6433_v23  ;;  %v6665_v50 = vpack.i.bf16 %v3189_v17, %v3188_v51  ;;  %v3125_v49 = vld [vmem:[#allocation3 + $0x122] sm:$0xff]  ;;  %v4237_v26 = vsel %vm4225_vm9, %v9705_v0, %v6449_v53  ;;  %v3190_v17 = vld [vmem:[#allocation3 + $0x139] sm:$0xff] }
 0x4a5   : > { %6646 = vrot.lane.b32.xlu0 %v6645_v35, %s6734_s19  ;;  %4530 = vmatmul.bf16.gmra.mxu1 %v4360_v29  ;;  %v4268_v29 = vsel %vm4258_vm11, %v4235_v45, %v6434_v55  ;;  %v6655_v35 = vpack.i.bf16 %v3124_v56, %v3123_v46  ;;  %v3126_v45 = vld [vmem:[#allocation3 + $0x12a] sm:$0xff]  ;;  %v4236_v55 = vsel %vm4225_vm9, %v9709_v31, %v6448_v15 }
 0x4a6   : > { %6651 = vrot.lane.b32.xlu1 %v6615_v13, %s6732_s17 }
 0x4a7   : > { %v6437_v34 = vpop.permute.xlu0 %6436 }
 0x4a8   : > { %6641 = vrot.lane.b32.xlu2 %v6610_v6, %s6725_s10  ;;  %v6442_v27 = vpop.permute.xlu1 %6441  ;;  %v6439_v41 = vunpack.i.h.bf16 %v6437_v34  ;;  %v6438_v2 = vunpack.i.l.bf16 %v6437_v34  ;;  %v6464_v34 = vunpack.i.h.bf16 %v9839_v36 }
 0x4a9   : > { %v6444_v58 = vunpack.i.h.bf16 %v6442_v27  ;;  %v6443_v13 = vunpack.i.l.bf16 %v6442_v27  ;;  %v6463_v27 = vunpack.i.l.bf16 %v9839_v36 }
 0x4aa   : > { %v9854_v24 = vpop.permute.xlu2 %6476  ;;  %v4299_v6 = vsel %vm2258_vm10, %v4267_v25, %v6438_v2  ;;  %v4300_v1 = vsel %vm2258_vm10, %v4268_v29, %v6439_v41  ;;  %v6680_v2 = vpack.i.bf16 %v3126_v45, %v3125_v49  ;;  %v3191_v25 = vld [vmem:[#allocation3 + $0x141] sm:$0xff] }
 0x4ab   : > { %v9861_v7 = vsel %vm4323_vm13, %v4299_v6, %v6443_v13  ;;  %v9864_v63 = vsel %vm4323_vm13, %v4300_v1, %v6444_v58  ;;  %v3158_v6 = vld [vmem:[#allocation3 + $0x138] sm:$0xff]  ;;  %v3159_v1 = vld [vmem:[#allocation3 + $0x140] sm:$0xff]  ;;  %v6690_v53 = vpack.i.bf16 %v3191_v25, %v3190_v17  ;;  %v6479_v49 = vunpack.i.h.bf16 %v9854_v24 }
 0x4ac   : > { %v4364_v22 = vpack.c.bf16 %v9864_v63, %v9861_v7 }
 0x4ad   : > { %6661 = vrot.lane.b32.xlu0 %v6660_v16, %s6729_s14 }
 0x4ae   : > { %6666 = vrot.lane.b32.xlu1 %v6665_v50, %s6734_s19 }
 0x4af   : > { %v6452_v12 = vpop.permute.xlu0 %6451 }
 0x4b0   : > { %6656 = vrot.lane.b32.xlu2 %v6655_v35, %s6733_s18  ;;  %v6457_v44 = vpop.permute.xlu1 %6456  ;;  %v6454_v62 = vunpack.i.h.bf16 %v6452_v12  ;;  %v6453_v19 = vunpack.i.l.bf16 %v6452_v12 }
 0x4b1   : > { %v6459_v61 = vunpack.i.h.bf16 %v6457_v44  ;;  %v6458_v28 = vunpack.i.l.bf16 %v6457_v44 }
 0x4b2   : > { %v6492_v23 = vpop.permute.xlu2 %6491  ;;  %v4269_v40 = vsel %vm4258_vm11, %v4236_v55, %v6453_v19  ;;  %v4270_v41 = vsel %vm4258_vm11, %v4237_v26, %v6454_v62 }
 0x4b3   : > { %v4301_v58 = vsel %vm2258_vm10, %v4269_v40, %v6458_v28  ;;  %v4302_v13 = vsel %vm2258_vm10, %v4270_v41, %v6459_v61  ;;  %v6493_v40 = vunpack.i.l.bf16 %v6492_v23 }
 0x4b4   : > { %v9884_v3 = vsel %vm4323_vm13, %v4301_v58, %v6463_v27  ;;  %v9887_v31 = vsel %vm4323_vm13, %v4302_v13, %v6464_v34 }
 0x4b5   : > { %6676 = vrot.lane.b32.xlu0 %v6665_v50, %s6732_s17  ;;  %v4366_v0 = vpack.c.bf16 %v9887_v31, %v9884_v3  ;;  %4535 = vmatmul.bf16.gmra.mxu1 %v4362_v18 }
 0x4b6   : > { %6681 = vrot.lane.b32.xlu1 %v6680_v2, %s6733_s18  ;;  %v6494_v2 = vunpack.i.h.bf16 %v6492_v23 }
 0x4b7   : > { %v6467_v36 = vpop.permute.xlu0 %6466 }
 0x4b8   : > { %6671 = vrot.lane.b32.xlu2 %v6660_v16, %s6725_s10  ;;  %v6472_v51 = vpop.permute.xlu1 %6471  ;;  %v6469_v29 = vunpack.i.h.bf16 %v6467_v36  ;;  %v6468_v46 = vunpack.i.l.bf16 %v6467_v36  ;;  %v6685_v16 = vpack.i.bf16 %v3159_v1, %v3158_v6 }
 0x4b9   : > { %v6474_v15 = vunpack.i.h.bf16 %v6472_v51  ;;  %v6473_v50 = vunpack.i.l.bf16 %v6472_v51 }
 0x4ba   : > { %v6507_v56 = vpop.permute.xlu2 %6506  ;;  %v4238_v35 = vsel %vm4225_vm9, %v9646_v11, %v6468_v46  ;;  %v4239_v18 = vsel %vm4225_vm9, %v9650_v52, %v6469_v29  ;;  %v6478_v11 = vunpack.i.l.bf16 %v9854_v24  ;;  %v4250_v29 = vsel %vm4225_vm9, %v9684_v10, %v6493_v40 }
 0x4bb   : > { %v4271_v62 = vsel %vm4258_vm11, %v4238_v35, %v6473_v50  ;;  %v4272_v19 = vsel %vm4258_vm11, %v4239_v18, %v6474_v15  ;;  %v6509_v1 = vunpack.i.h.bf16 %v6507_v56 }
 0x4bc   : > { %v4303_v55 = vsel %vm2258_vm10, %v4271_v62, %v6478_v11  ;;  %v4304_v26 = vsel %vm2258_vm10, %v4272_v19, %v6479_v49 }
 0x4bd   : > { %6691 = vrot.lane.b32.xlu0 %v6690_v53, %s6734_s19  ;;  %v6508_v53 = vunpack.i.l.bf16 %v6507_v56  ;;  %s10558_s19 = scalar_lea.vmem %s10749_s6, %s6778_s23 }
 0x4bf   : > { %v6482_v12 = vpop.permute.xlu0 %6481 }
 0x4c0   : > { %6686 = vrot.lane.b32.xlu2 %v6685_v16, %s6729_s14  ;;  %v9900_v44 = vpop.permute.xlu1 %6486  ;;  %v6484_v61 = vunpack.i.h.bf16 %v6482_v12  ;;  %v6483_v28 = vunpack.i.l.bf16 %v6482_v12 }
 0x4c1   : > { %v6488_v52 = vunpack.i.l.bf16 %v9900_v44  ;;  %v6489_v31 = vunpack.i.h.bf16 %v9900_v44 }
 0x4c2   : > { %v6522_v45 = vpop.permute.xlu2 %6521  ;;  %v9910_v34 = vsel %vm4323_vm13, %v4303_v55, %v6483_v28  ;;  %v9913_v27 = vsel %vm4323_vm13, %v4304_v26, %v6484_v61 }
 0x4c3   : > { %v4368_v41 = vpack.c.bf16 %v9913_v27, %v9910_v34  ;;  %v4218_v24 = vsel %vm2126_vm6, %v9588_v48, %v6488_v52  ;;  %v6524_v55 = vunpack.i.h.bf16 %v6522_v45  ;;  %v6523_v26 = vunpack.i.l.bf16 %v6522_v45 }
 0x4c4   : > { %v4251_v46 = vsel %vm4225_vm9, %v4218_v24, %v6494_v2  ;;  %v9942_v2 = vpop.f32.mrf.mxu2 }
 0x4c5   : > { %4540 = vmatmul.bf16.gmra.mxu1 %v4364_v22 }
 0x4c7   : > { %v6497_v58 = vpop.permute.xlu0 %6496 }
 0x4c8   : > { %v6502_v13 = vpop.permute.xlu1 %6501  ;;  %v6499_v36 = vunpack.i.h.bf16 %v6497_v58  ;;  %v6498_v51 = vunpack.i.l.bf16 %v6497_v58 }
 0x4c9   : > { %v6504_v17 = vunpack.i.h.bf16 %v6502_v13  ;;  %v6503_v25 = vunpack.i.l.bf16 %v6502_v13 }
 0x4ca   : > { %v6537_v6 = vpop.permute.xlu2 %6536  ;;  %v4283_v48 = vsel %vm4258_vm11, %v4250_v29, %v6498_v51  ;;  %v4284_v7 = vsel %vm4258_vm11, %v4251_v46, %v6499_v36 }
 0x4cb   : > { %v4315_v63 = vsel %vm2258_vm10, %v4283_v48, %v6503_v25  ;;  %v4316_v22 = vsel %vm2258_vm10, %v4284_v7, %v6504_v17  ;;  %v6538_v51 = vunpack.i.l.bf16 %v6537_v6  ;;  %v4219_v17 = vsel %vm2126_vm6, %v9511_v57, %v6489_v31 }
 0x4cc   : > { %v4348_v23 = vsel %vm4323_vm13, %v4315_v63, %v6508_v53  ;;  %v4349_v15 = vsel %vm4323_vm13, %v4316_v22, %v6509_v1  ;;  %v6539_v25 = vunpack.i.h.bf16 %v6537_v6  ;;  %v9960_v6 = vpop.f32.mrf.mxu2 }
 0x4cd   : > { %v4380_v50 = vpack.c.bf16 %v4349_v15, %v4348_v23  ;;  %v4252_v7 = vsel %vm4225_vm9, %v4219_v17, %v6538_v51 }
 0x4cf   : > { %v6512_v35 = vpop.permute.xlu0 %6511  ;;  %4580 = vmatmul.bf16.vlgmr.msrb.gmra.mxu3 %v4380_v50 }
 0x4d0   : > { %v6517_v10 = vpop.permute.xlu1 %6516  ;;  %v6514_v18 = vunpack.i.h.bf16 %v6512_v35  ;;  %v6513_v16 = vunpack.i.l.bf16 %v6512_v35 }
 0x4d1   : > { %v6519_v56 = vunpack.i.h.bf16 %v6517_v10  ;;  %v6518_v62 = vunpack.i.l.bf16 %v6517_v10 }
 0x4d2   : > { %v6552_v12 = vpop.permute.xlu2 %6551  ;;  %v4240_v19 = vsel %vm4225_vm9, %v9727_v21, %v6513_v16  ;;  %v4241_v61 = vsel %vm4225_vm9, %v9731_v47, %v6514_v18 }
 0x4d3   : > { %v4273_v28 = vsel %vm4258_vm11, %v4240_v19, %v6518_v62  ;;  %v4274_v49 = vsel %vm4258_vm11, %v4241_v61, %v6519_v56  ;;  %v6554_v22 = vunpack.i.h.bf16 %v6552_v12  ;;  %v6553_v23 = vunpack.i.l.bf16 %v6552_v12 }
 0x4d4   : > { %v4305_v47 = vsel %vm2258_vm10, %v4273_v28, %v6523_v26  ;;  %v4306_v3 = vsel %vm2258_vm10, %v4274_v49, %v6524_v55  ;;  %v9971_v55 = vpop.f32.mrf.mxu2 }
 0x4d5   : > { %4545 = vmatmul.bf16.gmra.mxu1 %v4366_v0 }
 0x4d7   : > { %v6527_v11 = vpop.permute.xlu0 %6526 }
 0x4d8   : > { %v9940_v52 = vpop.permute.xlu1 %6531  ;;  %v6529_v40 = vunpack.i.h.bf16 %v6527_v11  ;;  %v6528_v24 = vunpack.i.l.bf16 %v6527_v11 }
 0x4d9   : > { %v6533_v21 = vunpack.i.l.bf16 %v9940_v52 }
 0x4da   : > { %v4338_v0 = vsel %vm4323_vm13, %v4305_v47, %v6528_v24  ;;  %v4339_v58 = vsel %vm4323_vm13, %v4306_v3, %v6529_v40  ;;  %v6567_v13 = vpop.permute.xlu2 %6566 }
 0x4db   : > { %v4370_v36 = vpack.c.bf16 %v4339_v58, %v4338_v0  ;;  %v4220_v45 = vsel %vm2126_vm6, %v9514_v20, %v6533_v21  ;;  %v6569_v40 = vunpack.i.h.bf16 %v6567_v13  ;;  %v6568_v24 = vunpack.i.l.bf16 %v6567_v13 }
 0x4dc   : > { %v4253_v63 = vsel %vm4225_vm9, %v4220_v45, %v6539_v25 }
 0x4df   : > { %v6542_v29 = vpop.permute.xlu0 %6541 }
 0x4e0   : > { %v6547_v46 = vpop.permute.xlu1 %6546  ;;  %v6544_v1 = vunpack.i.h.bf16 %v6542_v29  ;;  %v6543_v53 = vunpack.i.l.bf16 %v6542_v29 }
 0x4e1   : > { %v6549_v48 = vunpack.i.h.bf16 %v6547_v46  ;;  %v6548_v44 = vunpack.i.l.bf16 %v6547_v46 }
 0x4e2   : > { %v4285_v15 = vsel %vm4258_vm11, %v4252_v7, %v6543_v53  ;;  %v4286_v20 = vsel %vm4258_vm11, %v4253_v63, %v6544_v1  ;;  %v6582_v16 = vpop.permute.xlu2 %6581  ;;  %v9984_v53 = vpop.f32.mrf.mxu2 }
 0x4e3   : > { %v4317_v50 = vsel %vm2258_vm10, %v4285_v15, %v6548_v44  ;;  %v4318_v57 = vsel %vm2258_vm10, %v4286_v20, %v6549_v48  ;;  %v6583_v17 = vunpack.i.l.bf16 %v6582_v16  ;;  %v6584_v29 = vunpack.i.h.bf16 %v6582_v16 }
 0x4e4   : > { %v4350_v35 = vsel %vm4323_vm13, %v4317_v50, %v6553_v23  ;;  %v4351_v10 = vsel %vm4323_vm13, %v4318_v57, %v6554_v22 }
 0x4e5   : > { %v4382_v18 = vpack.c.bf16 %v4351_v10, %v4350_v35  ;;  %4550 = vmatmul.bf16.gmra.mxu1 %v4368_v41 }
 0x4e7   : > { %v6557_v12 = vpop.permute.xlu0 %6556  ;;  %4585 = vmatmul.bf16.gmra.mxu3 %v4382_v18 }
 0x4e8   : > { %v6562_v56 = vpop.permute.xlu1 %6561  ;;  %v6559_v62 = vunpack.i.h.bf16 %v6557_v12  ;;  %v6558_v19 = vunpack.i.l.bf16 %v6557_v12 }
 0x4e9   : > { %v6564_v61 = vunpack.i.h.bf16 %v6562_v56  ;;  %v6563_v28 = vunpack.i.l.bf16 %v6562_v56 }
 0x4ea   : > { %v4242_v49 = vsel %vm4225_vm9, %v9739_v9, %v6558_v19  ;;  %v4243_v11 = vsel %vm4225_vm9, %v9735_v38, %v6559_v62  ;;  %v6597_v21 = vpop.permute.xlu2 %6596  ;;  %v6534_v38 = vunpack.i.h.bf16 %v9940_v52  ;;  %v9994_v19 = vpop.f32.mrf.mxu2 }
 0x4eb   : > { %v4275_v26 = vsel %vm4258_vm11, %v4242_v49, %v6563_v28  ;;  %v4276_v34 = vsel %vm4258_vm11, %v4243_v11, %v6564_v61  ;;  %v6599_v23 = vunpack.i.h.bf16 %v6597_v21  ;;  %v6598_v15 = vunpack.i.l.bf16 %v6597_v21 }
 0x4ec   : > { %v4307_v0 = vsel %vm2258_vm10, %v4275_v26, %v6568_v24  ;;  %v4308_v9 = vsel %vm2258_vm10, %v4276_v34, %v6569_v40  ;;  %v4221_v13 = vsel %vm2126_vm6, %v9633_v60, %v6534_v38 }
 0x4ed   : > { %v4254_v63 = vsel %vm4225_vm9, %v4221_v13, %v6583_v17 }
 0x4ef   : > { %v6572_v27 = vpop.permute.xlu0 %6571 }
 0x4f0   : > { %v6577_v41 = vpop.permute.xlu1 %6576  ;;  %v6574_v47 = vunpack.i.h.bf16 %v6572_v27  ;;  %v6573_v3 = vunpack.i.l.bf16 %v6572_v27 }
 0x4f1   : > { %v6578_v31 = vunpack.i.l.bf16 %v6577_v41  ;;  %v6579_v18 = vunpack.i.h.bf16 %v6577_v41 }
 0x4f2   : > { %v4340_v58 = vsel %vm4323_vm13, %v4307_v0, %v6573_v3  ;;  %v4341_v51 = vsel %vm4323_vm13, %v4308_v9, %v6574_v47 }
 0x4f3   : > { %v4372_v45 = vpack.c.bf16 %v4341_v51, %v4340_v58  ;;  %v4222_v25 = vsel %vm2126_vm6, %v9636_v32, %v6578_v31  ;;  %v6612_v32 = vpop.permute.xlu2 %6611  ;;  %v4212_v28 = vsel %vm2126_vm6, %v9548_v8, %v6579_v18  ;;  %v10011_v51 = vpop.f32.mrf.mxu2 }
 0x4f4   : > { %v4255_v22 = vsel %vm4225_vm9, %v4222_v25, %v6584_v29  ;;  %v6613_v40 = vunpack.i.l.bf16 %v6612_v32  ;;  %v6614_v3 = vunpack.i.h.bf16 %v6612_v32 }
 0x4f5   : > { %4555 = vmatmul.bf16.gmra.mxu1 %v4370_v36 }
 0x4f7   : > { %v6587_v46 = vpop.permute.xlu0 %6586 }
 0x4f8   : > { %v6592_v1 = vpop.permute.xlu1 %6591  ;;  %v6589_v48 = vunpack.i.h.bf16 %v6587_v46  ;;  %v6588_v52 = vunpack.i.l.bf16 %v6587_v46 }
 0x4f9   : > { %v6594_v44 = vunpack.i.h.bf16 %v6592_v1  ;;  %v6593_v7 = vunpack.i.l.bf16 %v6592_v1 }
 0x4fa   : > { %v4287_v36 = vsel %vm4258_vm11, %v4254_v63, %v6588_v52  ;;  %v4288_v60 = vsel %vm4258_vm11, %v4255_v22, %v6589_v48 }
 0x4fb   : > { %v4319_v20 = vsel %vm2258_vm10, %v4287_v36, %v6593_v7  ;;  %v4320_v50 = vsel %vm2258_vm10, %v4288_v60, %v6594_v44  ;;  %v6627_v34 = vpop.permute.xlu2 %6626  ;;  %v10020_v32 = vpop.f32.mrf.mxu2 }
 0x4fc   : > { %v4352_v57 = vsel %vm4323_vm13, %v4319_v20, %v6598_v15  ;;  %v4353_v35 = vsel %vm4323_vm13, %v4320_v50, %v6599_v23  ;;  %v6628_v52 = vunpack.i.l.bf16 %v6627_v34  ;;  %v6629_v22 = vunpack.i.h.bf16 %v6627_v34 }
 0x4fd   : > { %v4384_v10 = vpack.c.bf16 %v4353_v35, %v4352_v57 }
 0x4ff   : > { %v6602_v16 = vpop.permute.xlu0 %6601  ;;  %4590 = vmatmul.bf16.gmra.mxu3 %v4384_v10 }
 0x500   : > { %v6607_v12 = vpop.permute.xlu1 %6606  ;;  %v6604_v56 = vunpack.i.h.bf16 %v6602_v16  ;;  %v6603_v62 = vunpack.i.l.bf16 %v6602_v16 }
 0x501   : > { %v6608_v61 = vunpack.i.l.bf16 %v6607_v12  ;;  %v6609_v11 = vunpack.i.h.bf16 %v6607_v12 }
 0x502   : > { %v4244_v49 = vsel %vm4225_vm9, %v9680_v54, %v6603_v62  ;;  %v10000_v26 = vpop.f32.mrf.mxu1  ;;  %v4245_v27 = vsel %vm4225_vm9, %v4212_v28, %v6604_v56 }
 0x503   : > { %v4277_v41 = vsel %vm4258_vm11, %v4244_v49, %v6608_v61  ;;  %v4278_v24 = vsel %vm4258_vm11, %v4245_v27, %v6609_v11  ;;  %v6642_v17 = vpop.permute.xlu2 %6641 }
 0x504   : > { %v4309_v0 = vsel %vm2258_vm10, %v4277_v41, %v6613_v40  ;;  %v4310_v54 = vsel %vm2258_vm10, %v4278_v24, %v6614_v3  ;;  %v6644_v18 = vunpack.i.h.bf16 %v6642_v17  ;;  %v6643_v16 = vunpack.i.l.bf16 %v6642_v17 }
 0x505   : > { %4560 = vmatmul.bf16.gmra.mxu1 %v4372_v45 }
 0x506   : > { %v4213_v27 = vsel %vm2126_vm6, %v9466_v33, %v6643_v16  ;;  %v4214_v41 = vsel %vm2126_vm6, %v9469_v5, %v6644_v18  ;;  %v11017_v16 = vld [vmem:[#allocation11_spill] sm:$0xff] }
 0x507   : > { %v6617_v21 = vpop.permute.xlu0 %6616 }
 0x508   : > { %v6622_v47 = vpop.permute.xlu1 %6621  ;;  %v6619_v31 = vunpack.i.h.bf16 %v6617_v21  ;;  %v6618_v8 = vunpack.i.l.bf16 %v6617_v21 }
 0x509   : > { %v6623_v25 = vunpack.i.l.bf16 %v6622_v47  ;;  %v6624_v13 = vunpack.i.h.bf16 %v6622_v47 }
 0x50a   : > { %v4342_v9 = vsel %vm4323_vm13, %v4309_v0, %v6618_v8  ;;  %v10008_v38 = vpop.f32.mrf.mxu1  ;;  %v4343_v58 = vsel %vm4323_vm13, %v4310_v54, %v6619_v31  ;;  %v10037_v54 = vpop.f32.mrf.mxu2 }
 0x50b   : > { %v4374_v45 = vpack.c.bf16 %v4343_v58, %v4342_v9  ;;  %v4223_v1 = vsel %vm2126_vm6, %v9642_v42, %v6623_v25  ;;  %v4224_v44 = vsel %vm2126_vm6, %v9639_v14, %v6624_v13  ;;  %v6657_v14 = vpop.permute.xlu2 %6656 }
 0x50c   : > { %v4256_v23 = vsel %vm4225_vm9, %v4223_v1, %v6628_v52  ;;  %v4257_v36 = vsel %vm4225_vm9, %v4224_v44, %v6629_v22  ;;  %v6659_v21 = vunpack.i.h.bf16 %v6657_v14  ;;  %v6658_v47 = vunpack.i.l.bf16 %v6657_v14 }
 0x50f   : > { %v6632_v29 = vpop.permute.xlu0 %6631 }
 0x510   : > { %v6637_v46 = vpop.permute.xlu1 %6636  ;;  %v6633_v48 = vunpack.i.l.bf16 %v6632_v29  ;;  %v6634_v7 = vunpack.i.h.bf16 %v6632_v29 }
 0x511   : > { %v6638_v15 = vunpack.i.l.bf16 %v6637_v46  ;;  %v6639_v20 = vunpack.i.h.bf16 %v6637_v46 }
 0x512   : > { %v10017_v63 = vpop.f32.mrf.mxu1  ;;  %v4289_v60 = vsel %vm4258_vm11, %v4256_v23, %v6633_v48  ;;  %v4290_v42 = vsel %vm4258_vm11, %v4257_v36, %v6634_v7 }
 0x513   : > { %v4321_v12 = vsel %vm2258_vm10, %v4289_v60, %v6638_v15  ;;  %v4322_v61 = vsel %vm2258_vm10, %v4290_v42, %v6639_v20  ;;  %v6672_v5 = vpop.permute.xlu2 %6671  ;;  %v10051_v42 = vpop.f32.mrf.mxu2 }
 0x514   : > { %v6674_v48 = vunpack.i.h.bf16 %v6672_v5  ;;  %v6673_v52 = vunpack.i.l.bf16 %v6672_v5 }
 0x515   : > { %4565 = vmatmul.bf16.gmra.mxu1 %v4374_v45 }
 0x516   : > { %v4216_v15 = vsel %vm2126_vm6, %v9585_v59, %v6674_v48  ;;  %v4215_v36 = vsel %vm2126_vm6, %v9582_v37, %v6673_v52 }
 0x517   : > { %v6647_v50 = vpop.permute.xlu0 %6646 }
 0x518   : > { %v6652_v57 = vpop.permute.xlu1 %6651  ;;  %v6649_v35 = vunpack.i.h.bf16 %v6647_v50  ;;  %v6648_v10 = vunpack.i.l.bf16 %v6647_v50 }
 0x519   : > { %v6654_v56 = vunpack.i.h.bf16 %v6652_v57  ;;  %v6653_v62 = vunpack.i.l.bf16 %v6652_v57 }
 0x51a   : > { %v4354_v28 = vsel %vm4323_vm13, %v4321_v12, %v6648_v10  ;;  %v10028_v49 = vpop.f32.mrf.mxu1  ;;  %v4355_v11 = vsel %vm4323_vm13, %v4322_v61, %v6649_v35  ;;  %v11018_v12 = vld [vmem:[#allocation14_spill] sm:$0xff] }
 0x51b   : > { %v4386_v34 = vpack.c.bf16 %v4355_v11, %v4354_v28  ;;  %v4246_v40 = vsel %vm4225_vm9, %v4213_v27, %v6653_v62  ;;  %v4247_v24 = vsel %vm4225_vm9, %v4214_v41, %v6654_v56  ;;  %v6687_v35 = vpop.permute.xlu2 %6686  ;;  %v11019_v59 = vpack.c.bf16 %v11017_v16, %v11018_v12 }
 0x51c   : > { %v4279_v33 = vsel %vm4258_vm11, %v4246_v40, %v6658_v47  ;;  %v4280_v45 = vsel %vm4258_vm11, %v4247_v24, %v6659_v21  ;;  %v6689_v37 = vunpack.i.h.bf16 %v6687_v35  ;;  %v6688_v56 = vunpack.i.l.bf16 %v6687_v35  ;;  %v10065_v21 = vpop.f32.mrf.mxu2  ;;  %v3230_v47 = vld [vmem:[#allocation3 + $0x19a] sm:$0xff] }
 0x51d   : > { %4595 = vmatmul.bf16.gmra.mxu3 %v4386_v34 }
 0x51f   : > { %v6662_v3 = vpop.permute.xlu0 %6661 }
 0x520   : > { %v6667_v31 = vpop.permute.xlu1 %6666  ;;  %v6664_v8 = vunpack.i.h.bf16 %v6662_v3  ;;  %v6663_v0 = vunpack.i.l.bf16 %v6662_v3  ;;  %v3231_v3 = vld [vmem:[#allocation3 + $0x1a2] sm:$0xff] }
 0x521   : > { %v6669_v9 = vunpack.i.h.bf16 %v6667_v31  ;;  %v6668_v58 = vunpack.i.l.bf16 %v6667_v31  ;;  %v4387_v31 = vpack.c.bf16 %v3231_v3, %v3230_v47 }
 0x522   : > { %v4311_v17 = vsel %vm2258_vm10, %v4279_v33, %v6663_v0  ;;  %v4312_v25 = vsel %vm2258_vm10, %v4280_v45, %v6664_v8  ;;  %v10043_v13 = vpop.f32.mrf.mxu1 }
 0x523   : > { %v4344_v29 = vsel %vm4323_vm13, %v4311_v17, %v6668_v58  ;;  %v4345_v46 = vsel %vm4323_vm13, %v4312_v25, %v6669_v9 }
 0x524   : > { %v4376_v1 = vpack.c.bf16 %v4345_v46, %v4344_v29  ;;  %v10068_v0 = vpop.f32.mrf.mxu2 }
 0x526   : > { %4570 = vmatmul.bf16.gmra.mxu1 %v4376_v1 }
 0x527   : > { %v6677_v44 = vpop.permute.xlu0 %6676 }
 0x528   : > { %v6682_v7 = vpop.permute.xlu1 %6681  ;;  %v6679_v22 = vunpack.i.h.bf16 %v6677_v44  ;;  %v6678_v23 = vunpack.i.l.bf16 %v6677_v44 }
 0x529   : > { %v6684_v60 = vunpack.i.h.bf16 %v6682_v7  ;;  %v6683_v20 = vunpack.i.l.bf16 %v6682_v7 }
 0x52a   : > { %v4248_v50 = vsel %vm4225_vm9, %v4215_v36, %v6678_v23  ;;  %v4249_v57 = vsel %vm4225_vm9, %v4216_v15, %v6679_v22  ;;  %v4533_v14 = vpop.f32.mrf.mxu1  ;;  %vm5068_vm9 = vcmask 125952  }
 0x52b   : > { %v4282_v10 = vsel %vm4258_vm11, %v4249_v57, %v6684_v60  ;;  %v4281_v18 = vsel %vm4258_vm11, %v4248_v50, %v6683_v20  ;;  %v10107_v20 = vld [vmem:[%s10748_s5] ss:$0 sm:$0xff] }
 0x52c   : > { %v4313_v11 = vsel %vm2258_vm10, %v4281_v18, %v6688_v56  ;;  %v4314_v34 = vsel %vm2258_vm10, %v4282_v10, %v6689_v37  ;;  %v10070_v58 = vpop.f32.mrf.mxu2  ;;  %v4524_v50 = vadd.f32 %v10107_v20, %v10008_v38  ;;  %v4522_v35 = vadd.f32 %v10107_v20, %v10000_v26 }
 0x52d   : > { %5401 = vmatmul.msk.bf16.vlgmr.msra.gmra.mxu3 %vm2508_vm12, %v11019_v59  ;;  %v4527_v10 = vadd.f32 %v10107_v20, %v10017_v63  ;;  %v4529_v12 = vadd.f32 %v10107_v20, %v10028_v49  ;;  %v4532_v26 = vadd.f32 %v10107_v20, %v10043_v13  ;;  %v4534_v49 = vadd.f32 %v10107_v20, %v4533_v14 }
 0x52e   : > { %v10118_v18 = vadd.f32 %v9630_v4, %v4524_v50  ;;  %v10125_v59 = vadd.f32 %v9575_v39, %v4522_v35 }
 0x52f   : > { %v6692_v62 = vpop.permute.xlu0 %6691  ;;  %v10128_v38 = vadd.f32 %v9676_v43, %v4527_v10  ;;  %v10139_v56 = vadd.f32 %v9716_v30, %v4529_v12 }
 0x530   : > { %v6694_v61 = vunpack.i.h.bf16 %v6692_v62  ;;  %v6693_v28 = vunpack.i.l.bf16 %v6692_v62  ;;  %v4761_v4 = vmul.f32 %v10118_v18, %v10118_v18  ;;  %v4760_v39 = vmul.f32 %v10125_v59, %v10125_v59 }
 0x531   : > { %v4691_v13 = vsel %vm2508_vm12, %v10118_v18, 0.0  ;;  %v4762_v62 = vmul.f32 %v10128_v38, %v10128_v38  ;;  %v4690_v30 = vsel %vm2508_vm12, %v10125_v59, 0.0  ;;  %v4695_v3 = vsel %vm2508_vm12, %v10139_v56, 0.0 }
 0x532   : > { %v4346_v27 = vsel %vm4323_vm13, %v4313_v11, %v6693_v28  ;;  %v4347_v41 = vsel %vm4323_vm13, %v4314_v34, %v6694_v61  ;;  %v4536_v40 = vpop.f32.mrf.mxu1  ;;  %v10150_v61 = vadd.f32 %v9942_v2, %v4532_v26  ;;  %v4793_v28 = vsel %vm2508_vm12, %v4761_v4, 0.0 }
 0x533   : > { %v4378_v24 = vpack.c.bf16 %v4347_v41, %v4346_v27  ;;  %v4537_v43 = vadd.f32 %v10107_v20, %v4536_v40  ;;  %v4693_v11 = vsel %vm2508_vm12, %v10128_v38, 0.0  ;;  %v4763_v34 = vmul.f32 %v10139_v56, %v10139_v56 }
 0x534   : > { %v10072_v45 = vpop.f32.mrf.mxu2  ;;  %v10162_v27 = vadd.f32 %v9960_v6, %v4534_v49  ;;  %v4792_v2 = vsel %vm2508_vm12, %v4760_v39, 0.0  ;;  %v4692_v40 = vadd.f32 %v4691_v13, %v4690_v30  ;;  %v4795_v47 = vsel %vm2508_vm12, %v4762_v62, 0.0 }
 0x535   : > { %v4794_v6 = vadd.f32 %v4793_v28, %v4792_v2  ;;  %v4797_v10 = vsel %vm2508_vm12, %v4763_v34, 0.0 }
 0x536   : > { %4575 = vmatmul.bf16.gmra.mxu1 %v4378_v24  ;;  %v10167_v24 = vadd.f32 %v9971_v55, %v4537_v43  ;;  %v4694_v35 = vadd.f32 %v4693_v11, %v4692_v40  ;;  %v4697_v55 = vsel %vm2508_vm12, %v10150_v61, 0.0  ;;  %v4765_v12 = vmul.f32 %v10162_v27, %v10162_v27 }
 0x537   : > { %v4796_v49 = vadd.f32 %v4795_v47, %v4794_v6  ;;  %v4699_v13 = vsel %vm2508_vm12, %v10162_v27, 0.0 }
 0x538   : > { %v4696_v39 = vadd.f32 %v4695_v3, %v4694_v35  ;;  %v4701_v2 = vsel %vm2508_vm12, %v10167_v24, 0.0 }
 0x539   : > { %v4798_v30 = vadd.f32 %v4797_v10, %v4796_v49 }
 0x53a   : > { %v4538_v8 = vpop.f32.mrf.mxu1  ;;  %v4698_v28 = vadd.f32 %v4697_v55, %v4696_v39 }
 0x53b   : > { %v4539_v41 = vadd.f32 %v10107_v20, %v4538_v8 }
 0x53c   : > { %v10078_v25 = vpop.f32.mrf.mxu2 }
 0x53d   : > { %5402 = vmatmul.msk.bf16.gmra.mxu3 %vm2508_vm12, %v4387_v31  ;;  %v4764_v31 = vmul.f32 %v10150_v61, %v10150_v61  ;;  %v10182_v26 = vadd.f32 %v9984_v53, %v4539_v41  ;;  %v4801_v41 = vsel %vm2508_vm12, %v4765_v12, 0.0 }
 0x53f   : > { %v4767_v40 = vmul.f32 %v10182_v26, %v10182_v26 }
 0x541   : > { %v4805_v10 = vsel %vm2508_vm12, %v4767_v40, 0.0 }
 0x542   : > { %v4541_v9 = vpop.f32.mrf.mxu1 }
 0x543   : > { %v4542_v50 = vadd.f32 %v10107_v20, %v4541_v9  ;;  %v4766_v9 = vmul.f32 %v10167_v24, %v10167_v24 }
 0x544   : > { %v10082_v46 = vpop.f32.mrf.mxu2 }
 0x545   : > { %v10194_v62 = vadd.f32 %v9994_v19, %v4542_v50  ;;  %v4803_v3 = vsel %vm2508_vm12, %v4766_v9, 0.0 }
 0x547   : > { %v4705_v55 = vsel %vm2508_vm12, %v10194_v62, 0.0 }
 0x54a   : > { %v4543_v33 = vpop.f32.mrf.mxu1 }
 0x54b   : > { %v4544_v8 = vadd.f32 %v10107_v20, %v4543_v33  ;;  %v4799_v33 = vsel %vm2508_vm12, %v4764_v31, 0.0  ;;  %v4768_v31 = vmul.f32 %v10194_v62, %v10194_v62 }
 0x54c   : > { %v10088_v52 = vpop.f32.mrf.mxu2  ;;  %v4800_v47 = vadd.f32 %v4799_v33, %v4798_v30 }
 0x54d   : > { %v10199_v11 = vadd.f32 %v10011_v51, %v4544_v8  ;;  %v4703_v51 = vsel %vm2508_vm12, %v10182_v26, 0.0  ;;  %v4807_v33 = vsel %vm2508_vm12, %v4768_v31, 0.0 }
 0x54e   : > { %v4802_v35 = vadd.f32 %v4801_v41, %v4800_v47 }
 0x550   : > { %v4804_v49 = vadd.f32 %v4803_v3, %v4802_v35 }
 0x552   : > { %v10074_v5 = vpop.f32.mrf.mxu1  ;;  %v10084_v1 = vpop.f32.mrf.mxu3 }
 0x553   : > { %v4547_v53 = vadd.f32 %v10107_v20, %v10074_v5  ;;  %v4700_v5 = vadd.f32 %v4699_v13, %v4698_v28  ;;  %v4707_v13 = vsel %vm2508_vm12, %v10199_v11, 0.0 }
 0x554   : > { %v10094_v22 = vpop.f32.mrf.mxu2 }
 0x555   : > { %v10216_v50 = vadd.f32 %v10020_v32, %v4547_v53  ;;  %v4702_v8 = vadd.f32 %v4701_v2, %v4700_v5 }
 0x557   : > { %v4704_v39 = vadd.f32 %v4703_v51, %v4702_v8  ;;  %v4770_v53 = vmul.f32 %v10216_v50, %v10216_v50  ;;  %v4709_v2 = vsel %vm2508_vm12, %v10216_v50, 0.0 }
 0x559   : > { %v4706_v28 = vadd.f32 %v4705_v55, %v4704_v39  ;;  %v4811_v51 = vsel %vm2508_vm12, %v4770_v53, 0.0 }
 0x55a   : > { %v10076_v17 = vpop.f32.mrf.mxu1  ;;  %v10092_v7 = vpop.f32.mrf.mxu3 }
 0x55b   : > { %v4549_v19 = vadd.f32 %v10107_v20, %v10076_v17  ;;  %v4769_v17 = vmul.f32 %v10199_v11, %v10199_v11  ;;  %v4708_v5 = vadd.f32 %v4707_v13, %v4706_v28 }
 0x55c   : > { %v10102_v60 = vpop.f32.mrf.mxu2 }
 0x55d   : > { %v10226_v12 = vadd.f32 %v10037_v54, %v4549_v19  ;;  %v4809_v41 = vsel %vm2508_vm12, %v4769_v17, 0.0  ;;  %v4710_v8 = vadd.f32 %v4709_v2, %v4708_v5 }
 0x55f   : > { %v4771_v40 = vmul.f32 %v10226_v12, %v10226_v12  ;;  %v4711_v31 = vsel %vm2508_vm12, %v10226_v12, 0.0 }
 0x561   : > { %v4813_v17 = vsel %vm2508_vm12, %v4771_v40, 0.0 }
 0x562   : > { %v10080_v29 = vpop.f32.mrf.mxu1 }
 0x563   : > { %v4552_v6 = vadd.f32 %v10107_v20, %v10080_v29 }
 0x564   : > { %v10132_v37 = vpop.f32.mrf.mxu2 }
 0x565   : > { %v10240_v54 = vadd.f32 %v10051_v42, %v4552_v6 }
 0x567   : > { %v4772_v6 = vmul.f32 %v10240_v54, %v10240_v54 }
 0x56a   : > { %v10086_v48 = vpop.f32.mrf.mxu1  ;;  %v10098_v15 = vpop.f32.mrf.mxu3 }
 0x56b   : > { %v4554_v32 = vadd.f32 %v10107_v20, %v10086_v48  ;;  %v4806_v48 = vadd.f32 %v4805_v10, %v4804_v49  ;;  %v4712_v49 = vadd.f32 %v4711_v31, %v4710_v8 }
 0x56c   : > { %v10184_v4 = vpop.f32.mrf.mxu2 }
 0x56d   : > { %v10250_v19 = vadd.f32 %v10065_v21, %v4554_v32  ;;  %v4808_v47 = vadd.f32 %v4807_v33, %v4806_v48 }
 0x56f   : > { %v4810_v35 = vadd.f32 %v4809_v41, %v4808_v47  ;;  %v4773_v10 = vmul.f32 %v10250_v19, %v10250_v19 }
 0x571   : > { %v4812_v32 = vadd.f32 %v4811_v51, %v4810_v35  ;;  %v4817_v41 = vsel %vm2508_vm12, %v4773_v10, 0.0 }
 0x572   : > { %v10090_v44 = vpop.f32.mrf.mxu1  ;;  %v10111_v57 = vpop.f32.mrf.mxu3 }
 0x573   : > { %v4557_v29 = vadd.f32 %v10107_v20, %v10090_v44 }
 0x574   : > { %v10242_v30 = vpop.f32.mrf.mxu2 }
 0x575   : > { %v10255_v3 = vadd.f32 %v10068_v0, %v4557_v29  ;;  %v4713_v0 = vsel %vm2508_vm12, %v10240_v54, 0.0  ;;  %v4715_v29 = vsel %vm2508_vm12, %v10250_v19, 0.0 }
 0x576   : > { %v4714_v53 = vadd.f32 %v4713_v0, %v4712_v49 }
 0x577   : > { %v4717_v2 = vsel %vm2508_vm12, %v10255_v3, 0.0 }
 0x57a   : > { %v10096_v23 = vpop.f32.mrf.mxu1 }
 0x57b   : > { %v4559_v42 = vadd.f32 %v10107_v20, %v10096_v23 }
 0x57d   : > { %v10272_v55 = vadd.f32 %v10070_v58, %v4559_v42  ;;  %v4814_v58 = vadd.f32 %v4813_v17, %v4812_v32  ;;  %v4672_v42 = vpop.f32.mrf.mxu2 }
 0x57f   : > { %v4775_v40 = vmul.f32 %v10272_v55, %v10272_v55 }
 0x581   : > { %v4821_v8 = vsel %vm2508_vm12, %v4775_v40, 0.0 }
 0x582   : > { %v10100_v36 = vpop.f32.mrf.mxu1  ;;  %v10136_v63 = vpop.f32.mrf.mxu3 }
 0x583   : > { %v4562_v21 = vadd.f32 %v10107_v20, %v10100_v36  ;;  %v4774_v36 = vmul.f32 %v10255_v3, %v10255_v3 }
 0x585   : > { %v10282_v33 = vadd.f32 %v10072_v45, %v4562_v21  ;;  %v4819_v5 = vsel %vm2508_vm12, %v4774_v36, 0.0 }
 0x587   : > { %v4776_v51 = vmul.f32 %v10282_v33, %v10282_v33 }
 0x58a   : > { %v10120_v16 = vpop.f32.mrf.mxu1  ;;  %v10188_v43 = vpop.f32.mrf.mxu3 }
 0x58b   : > { %v4564_v23 = vadd.f32 %v10107_v20, %v10120_v16  ;;  %v4815_v16 = vsel %vm2508_vm12, %v4772_v6, 0.0 }
 0x58c   : > { %v4816_v47 = vadd.f32 %v4815_v16, %v4814_v58 }
 0x58d   : > { %v10287_v48 = vadd.f32 %v10078_v25, %v4564_v23  ;;  %v4719_v25 = vsel %vm2508_vm12, %v10272_v55, 0.0  ;;  %v4721_v23 = vsel %vm2508_vm12, %v10282_v33, 0.0 }
 0x58e   : > { %v4818_v21 = vadd.f32 %v4817_v41, %v4816_v47 }
 0x58f   : > { %v4723_v49 = vsel %vm2508_vm12, %v10287_v48, 0.0 }
 0x590   : > { %v4820_v10 = vadd.f32 %v4819_v5, %v4818_v21 }
 0x592   : > { %v10155_v14 = vpop.f32.mrf.mxu1 }
 0x593   : > { %v4567_v13 = vadd.f32 %v10107_v20, %v10155_v14  ;;  %v4716_v14 = vadd.f32 %v4715_v29, %v4714_v53  ;;  %v4822_v29 = vadd.f32 %v4821_v8, %v4820_v10  ;;  %v4584_v8 = vadd.f32 %v10107_v20, %v10092_v7 }
 0x595   : > { %v10302_v31 = vadd.f32 %v10082_v46, %v4567_v13  ;;  %v4718_v35 = vadd.f32 %v4717_v2, %v4716_v14 }
 0x597   : > { %v4720_v46 = vadd.f32 %v4719_v25, %v4718_v35  ;;  %v4778_v36 = vmul.f32 %v10302_v31, %v10302_v31  ;;  %v4725_v53 = vsel %vm2508_vm12, %v10302_v31, 0.0  ;;  %v4675_v25 = vpop.f32.mrf.mxu2 }
 0x59a   : > { %v10201_v34 = vpop.f32.mrf.mxu1 }
 0x59b   : > { %v4569_v45 = vadd.f32 %v10107_v20, %v10201_v34  ;;  %v4777_v34 = vmul.f32 %v10287_v48, %v10287_v48 }
 0x59d   : > { %v10311_v17 = vadd.f32 %v10088_v52, %v4569_v45  ;;  %v4722_v52 = vadd.f32 %v4721_v23, %v4720_v46  ;;  %v4825_v13 = vsel %vm2508_vm12, %v4777_v34, 0.0 }
 0x59f   : > { %v4724_v45 = vadd.f32 %v4723_v49, %v4722_v52  ;;  %v4727_v47 = vsel %vm2508_vm12, %v10311_v17, 0.0 }
 0x5a0   : > { %v10232_v9 = vpop.f32.mrf.mxu3 }
 0x5a3   : > { %v4571_v44 = vpop.f32.mrf.mxu1 }
 0x5a4   : > { %v4572_v6 = vadd.f32 %v10107_v20, %v4571_v44  ;;  %v4823_v44 = vsel %vm2508_vm12, %v4776_v51, 0.0 }
 0x5a5   : > { %v4824_v40 = vadd.f32 %v4823_v44, %v4822_v29  ;;  %v4587_v44 = vadd.f32 %v10107_v20, %v10098_v15  ;;  %v4589_v15 = vadd.f32 %v10107_v20, %v10111_v57 }
 0x5a6   : > { %v10322_v16 = vadd.f32 %v10094_v22, %v4572_v6  ;;  %v4827_v22 = vsel %vm2508_vm12, %v4778_v36, 0.0  ;;  %v4726_v6 = vadd.f32 %v4725_v53, %v4724_v45  ;;  %v10364_v53 = vadd.f32 %v4672_v42, %v4584_v8 }
 0x5a7   : > { %v4826_v51 = vadd.f32 %v4825_v13, %v4824_v40 }
 0x5a8   : > { %v10276_v39 = vpop.f32.mrf.mxu3  ;;  %v4780_v14 = vmul.f32 %v10322_v16, %v10322_v16  ;;  %v4729_v35 = vsel %vm2508_vm12, %v10322_v16, 0.0  ;;  %v4785_v57 = vmul.f32 %v10364_v53, %v10364_v53 }
 0x5a9   : > { %v4828_v23 = vadd.f32 %v4827_v22, %v4826_v51 }
 0x5aa   : > { %v4831_v10 = vsel %vm2508_vm12, %v4780_v14, 0.0 }
 0x5ab   : > { %v4573_v28 = vpop.f32.mrf.mxu1 }
 0x5ac   : > { %v4574_v0 = vadd.f32 %v10107_v20, %v4573_v28  ;;  %v4779_v28 = vmul.f32 %v10311_v17, %v10311_v17 }
 0x5ae   : > { %v10330_v41 = vadd.f32 %v10102_v60, %v4574_v0  ;;  %v4582_v60 = vadd.f32 %v10107_v20, %v10084_v1  ;;  %v4829_v21 = vsel %vm2508_vm12, %v4779_v28, 0.0 }
 0x5af   : > { %v4830_v49 = vadd.f32 %v4829_v21, %v4828_v23 }
 0x5b0   : > { %v10314_v32 = vpop.f32.mrf.mxu3  ;;  %v4781_v34 = vmul.f32 %v10330_v41, %v10330_v41  ;;  %v4731_v46 = vsel %vm2508_vm12, %v10330_v41, 0.0  ;;  %v10358_v52 = vadd.f32 %v10242_v30, %v4582_v60  ;;  %v10372_v30 = vadd.f32 %v4675_v25, %v4587_v44 }
 0x5b1   : > { %v4832_v28 = vadd.f32 %v4831_v10, %v4830_v49  ;;  %v4594_v44 = vadd.f32 %v10107_v20, %v10188_v43 }
 0x5b2   : > { %v4833_v7 = vsel %vm2508_vm12, %v4781_v34, 0.0  ;;  %v4784_v14 = vmul.f32 %v10358_v52, %v10358_v52  ;;  %v4737_v25 = vsel %vm2508_vm12, %v10358_v52, 0.0  ;;  %v4592_v34 = vadd.f32 %v10107_v20, %v10136_v63 }
 0x5b3   : > { %v4576_v58 = vpop.f32.mrf.mxu1  ;;  %v4834_v22 = vadd.f32 %v4833_v7, %v4832_v28  ;;  %v4786_v23 = vmul.f32 %v10372_v30, %v10372_v30  ;;  %v4841_v63 = vsel %vm2508_vm12, %v4785_v57, 0.0  ;;  %v4741_v7 = vsel %vm2508_vm12, %v10372_v30, 0.0 }
 0x5b4   : > { %v4577_v2 = vadd.f32 %v10107_v20, %v4576_v58  ;;  %v10397_v49 = vadd.f32 %v10314_v32, %v4592_v34 }
 0x5b5   : > { %v4843_v43 = vsel %vm2508_vm12, %v4786_v23, 0.0 }
 0x5b6   : > { %v10339_v5 = vadd.f32 %v10132_v37, %v4577_v2  ;;  %v4728_v37 = vadd.f32 %v4727_v47, %v4726_v6  ;;  %v4677_v6 = vpop.f32.mrf.mxu2 }
 0x5b8   : > { %v4682_v0 = vpop.f32.mrf.mxu3  ;;  %v4782_v1 = vmul.f32 %v10339_v5, %v10339_v5  ;;  %v4730_v36 = vadd.f32 %v4729_v35, %v4728_v37  ;;  %v4733_v13 = vsel %vm2508_vm12, %v10339_v5, 0.0  ;;  %v10384_v35 = vadd.f32 %v4677_v6, %v4589_v15 }
 0x5b9   : > { %v10406_v28 = vadd.f32 %v4682_v0, %v4594_v44 }
 0x5ba   : > { %v4732_v2 = vadd.f32 %v4731_v46, %v4730_v36  ;;  %v4835_v40 = vsel %vm2508_vm12, %v4782_v1, 0.0  ;;  %v4839_v46 = vsel %vm2508_vm12, %v4784_v14, 0.0  ;;  %v4739_v1 = vsel %vm2508_vm12, %v10364_v53, 0.0 }
 0x5bb   : > { %v4578_v29 = vpop.f32.mrf.mxu1  ;;  %v4836_v60 = vadd.f32 %v4835_v40, %v4834_v22  ;;  %v4743_v15 = vsel %vm2508_vm12, %v10384_v35, 0.0  ;;  %v4599_v40 = vadd.f32 %v10107_v20, %v10276_v39  ;;  %v4788_v22 = vmul.f32 %v10397_v49, %v10397_v49 }
 0x5bc   : > { %v4579_v58 = vadd.f32 %v10107_v20, %v4578_v29  ;;  %v4734_v47 = vadd.f32 %v4733_v13, %v4732_v2  ;;  %v4787_v13 = vmul.f32 %v10384_v35, %v10384_v35  ;;  %v4789_v6 = vmul.f32 %v10406_v28, %v10406_v28 }
 0x5bd   : > { %v4847_v39 = vsel %vm2508_vm12, %v4788_v22, 0.0 }
 0x5be   : > { %v10370_v45 = vadd.f32 %v10184_v4, %v4579_v58  ;;  %v4597_v58 = vadd.f32 %v10107_v20, %v10232_v9  ;;  %v4845_v0 = vsel %vm2508_vm12, %v4787_v13, 0.0 }
 0x5c0   : > { %v4735_v42 = vsel %vm2508_vm12, %v10370_v45, 0.0  ;;  %v4783_v51 = vmul.f32 %v10370_v45, %v10370_v45  ;;  %v4685_v21 = vpop.f32.mrf.mxu3 }
 0x5c1   : > { %v4736_v4 = vadd.f32 %v4735_v42, %v4734_v47  ;;  %v10415_v47 = vadd.f32 %v4685_v21, %v4597_v58 }
 0x5c2   : > { %v4837_v8 = vsel %vm2508_vm12, %v4783_v51, 0.0  ;;  %v4745_v51 = vsel %vm2508_vm12, %v10397_v49, 0.0 }
 0x5c3   : > { %v4738_v37 = vadd.f32 %v4737_v25, %v4736_v4  ;;  %v4838_v10 = vadd.f32 %v4837_v8, %v4836_v60  ;;  %v4747_v4 = vsel %vm2508_vm12, %v10406_v28, 0.0  ;;  %v4790_v21 = vmul.f32 %v10415_v47, %v10415_v47 }
 0x5c4   : > { %v4849_v8 = vsel %vm2508_vm12, %v4789_v6, 0.0  ;;  %v4749_v23 = vsel %vm2508_vm12, %v10415_v47, 0.0 }
 0x5c5   : > { %v4740_v36 = vadd.f32 %v4739_v1, %v4738_v37  ;;  %v4840_v29 = vadd.f32 %v4839_v46, %v4838_v10  ;;  %v4851_v1 = vsel %vm2508_vm12, %v4790_v21, 0.0 }
 0x5c7   : > { %v4842_v2 = vadd.f32 %v4841_v63, %v4840_v29  ;;  %v4742_v32 = vadd.f32 %v4741_v7, %v4740_v36 }
 0x5c8   : > { %v4687_v9 = vpop.f32.mrf.mxu3 }
 0x5c9   : > { %v4744_v14 = vadd.f32 %v4743_v15, %v4742_v32  ;;  %v4844_v42 = vadd.f32 %v4843_v43, %v4842_v2  ;;  %v10422_v57 = vadd.f32 %v4687_v9, %v4599_v40 }
 0x5cb   : > { %v4746_v60 = vadd.f32 %v4745_v51, %v4744_v14  ;;  %v4846_v20 = vadd.f32 %v4845_v0, %v4844_v42  ;;  %v4791_v37 = vmul.f32 %v10422_v57, %v10422_v57  ;;  %v4751_v44 = vsel %vm2508_vm12, %v10422_v57, 0.0 }
 0x5cd   : > { %v4748_v25 = vadd.f32 %v4747_v4, %v4746_v60  ;;  %v4848_v34 = vadd.f32 %v4847_v39, %v4846_v20  ;;  %v4853_v29 = vsel %vm2508_vm12, %v4791_v37, 0.0 }
 0x5cf   : > { %v4750_v10 = vadd.f32 %v4749_v23, %v4748_v25  ;;  %v4850_v46 = vadd.f32 %v4849_v8, %v4848_v34 }
 0x5d1   : > { %v4852_v63 = vadd.f32 %v4851_v1, %v4850_v46  ;;  %v4752_v36 = vadd.f32 %v4751_v44, %v4750_v10 }
 0x5d3   : > { %v4753_v7 = vrot.slane %v4752_v36, 4  ;;  %v4854_v13 = vadd.f32 %v4853_v29, %v4852_v63 }
 0x5d5   : > { %v4754_v58 = vadd.f32 %v4753_v7, %v4752_v36  ;;  %v4855_v43 = vrot.slane %v4854_v13, 4 }
 0x5d7   : > { %v4755_v2 = vrot.slane %v4754_v58, 2  ;;  %v4856_v32 = vadd.f32 %v4855_v43, %v4854_v13 }
 0x5d9   : > { %v4756_v15 = vadd.f32 %v4755_v2, %v4754_v58  ;;  %v4857_v40 = vrot.slane %v4856_v32, 2 }
 0x5db   : > { %v4757_v22 = vrot.slane %v4756_v15, 1  ;;  %v4858_v14 = vadd.f32 %v4857_v40, %v4856_v32 }
 0x5dd   : > { %v4758_v42 = vadd.f32 %v4757_v22, %v4756_v15  ;;  %v4859_v9 = vrot.slane %v4858_v14, 1 }
 0x5df   : > { %v10438_v0 = vmul.f32 0.00390625, %v4758_v42  ;;  %v4860_v51 = vadd.f32 %v4859_v9, %v4858_v14 }
 0x5e1   : > { %v4861_v6 = vmul.f32 0.00390625, %v4860_v51  ;;  %v4862_v60 = vmul.f32 %v10438_v0, %v10438_v0  ;;  %v4865_v37 = vsub.f32 %v10125_v59, %v10438_v0  ;;  %v4866_v10 = vsub.f32 %v10118_v18, %v10438_v0 }
 0x5e2   : > { %v4867_v46 = vsub.f32 %v10128_v38, %v10438_v0  ;;  %v4868_v1 = vsub.f32 %v10139_v56, %v10438_v0  ;;  %v4869_v44 = vsub.f32 %v10150_v61, %v10438_v0  ;;  %v4870_v63 = vsub.f32 %v10162_v27, %v10438_v0 }
 0x5e3   : > { %v4863_v20 = vsub.f32 %v4861_v6, %v4862_v60  ;;  %v4871_v36 = vsub.f32 %v10167_v24, %v10438_v0  ;;  %v4872_v18 = vsub.f32 %v10182_v26, %v10438_v0  ;;  %v4873_v59 = vsub.f32 %v10194_v62, %v10438_v0 }
 0x5e4   : > { %v4874_v38 = vsub.f32 %v10199_v11, %v10438_v0  ;;  %v4875_v56 = vsub.f32 %v10216_v50, %v10438_v0  ;;  %v4876_v61 = vsub.f32 %v10226_v12, %v10438_v0  ;;  %v4877_v27 = vsub.f32 %v10240_v54, %v10438_v0 }
 0x5e5   : > { %v4864_v39 = vmax.f32 %v4863_v20, 0.0  ;;  %v4878_v24 = vsub.f32 %v10250_v19, %v10438_v0  ;;  %v4879_v26 = vsub.f32 %v10255_v3, %v10438_v0  ;;  %v4880_v62 = vsub.f32 %v10272_v55, %v10438_v0 }
 0x5e6   : > { %v4881_v11 = vsub.f32 %v10282_v33, %v10438_v0  ;;  %v4882_v50 = vsub.f32 %v10287_v48, %v10438_v0  ;;  %v4883_v12 = vsub.f32 %v10302_v31, %v10438_v0  ;;  %v4884_v54 = vsub.f32 %v10311_v17, %v10438_v0 }
 0x5e7   : > { %v4897_v4 = vadd.f32 1e-05, %v4864_v39  ;;  %v4885_v19 = vsub.f32 %v10322_v16, %v10438_v0  ;;  %v4886_v55 = vsub.f32 %v10330_v41, %v10438_v0  ;;  %v4887_v33 = vsub.f32 %v10339_v5, %v10438_v0 }
 0x5e8   : > { %v4888_v48 = vsub.f32 %v10370_v45, %v10438_v0  ;;  %v4889_v7 = vsub.f32 %v10358_v52, %v10438_v0  ;;  %v4890_v31 = vsub.f32 %v10364_v53, %v10438_v0  ;;  %v4891_v17 = vsub.f32 %v10372_v30, %v10438_v0 }
 0x5e9   : > { %6699 = vrsqrt.f32 %v4897_v4  ;;  %vm4904_vm10 = vweird.f32 %v4897_v4  ;;  %v4892_v16 = vsub.f32 %v10384_v35, %v10438_v0  ;;  %v4893_v41 = vsub.f32 %v10397_v49, %v10438_v0 }
 0x5ea   : > { %v4894_v5 = vsub.f32 %v10406_v28, %v10438_v0  ;;  %v4895_v45 = vsub.f32 %v10415_v47, %v10438_v0  ;;  %v4896_v52 = vsub.f32 %v10422_v57, %v10438_v0 }
 0x5ef   : > { %v6700_v21 = vpop.eup %6699 }
 0x5f0   : > { %v4899_v25 = vmul.f32 %v6700_v21, %v4897_v4  ;;  %vm4905_vm6 = vweird.f32 %v6700_v21 }
 0x5f1   : > { %vm4906_vm12 = vmor %vm4904_vm10, %vm4905_vm6 }
 0x5f2   : > { %v4900_v34 = vmul.f32 %v6700_v21, %v4899_v25 }
 0x5f4   : > { %v4901_v8 = vmul.f32 0.5, %v4900_v34 }
 0x5f6   : > { %v4902_v23 = vsub.f32 1.5, %v4901_v8 }
 0x5f8   : > { %v4903_v29 = vmul.f32 %v6700_v21, %v4902_v23 }
 0x5fa   : > { %v4907_v3 = vsel %vm4906_vm12, %v6700_v21, %v4903_v29 }
 0x5fb   : > { %v4908_v13 = vmul.f32 %v4907_v3, %v4865_v37  ;;  %v4909_v53 = vmul.f32 %v4907_v3, %v4866_v10  ;;  %v4910_v58 = vmul.f32 %v4907_v3, %v4867_v46  ;;  %v4911_v43 = vmul.f32 %v4907_v3, %v4868_v1 }
 0x5fc   : > { %v4912_v30 = vmul.f32 %v4907_v3, %v4869_v44  ;;  %v4913_v2 = vmul.f32 %v4907_v3, %v4870_v63  ;;  %v4914_v32 = vmul.f32 %v4907_v3, %v4871_v36  ;;  %v4915_v35 = vmul.f32 %v4907_v3, %v4872_v18 }
 0x5fd   : > { %v10506_v15 = vmul.f32 %v4907_v3, %v4873_v59  ;;  %v10508_v49 = vmul.f32 %v4907_v3, %v4874_v38  ;;  %v10510_v40 = vmul.f32 %v4907_v3, %v4875_v56  ;;  %v10512_v28 = vmul.f32 %v4907_v3, %v4876_v61 }
 0x5fe   : > { %v10514_v47 = vmul.f32 %v4907_v3, %v4877_v27  ;;  %v10516_v22 = vmul.f32 %v4907_v3, %v4878_v24  ;;  %v10518_v57 = vmul.f32 %v4907_v3, %v4879_v26  ;;  %v10520_v14 = vmul.f32 %v4907_v3, %v4880_v62 }
 0x5ff   : > { %v10522_v42 = vmul.f32 %v4907_v3, %v4881_v11  ;;  %v10524_v9 = vmul.f32 %v4907_v3, %v4882_v50  ;;  %v10526_v0 = vmul.f32 %v4907_v3, %v4883_v12  ;;  %v10528_v51 = vmul.f32 %v4907_v3, %v4884_v54 }
 0x600   : > { %v10530_v6 = vmul.f32 %v4907_v3, %v4885_v19  ;;  %v10532_v60 = vmul.f32 %v4907_v3, %v4886_v55  ;;  %v10534_v20 = vmul.f32 %v4907_v3, %v4887_v33  ;;  %v10536_v39 = vmul.f32 %v4907_v3, %v4888_v48 }
 0x601   : > { %v4972_v4 = vmul.f32 0.01, %v4908_v13  ;;  %v10538_v21 = vmul.f32 %v4907_v3, %v4889_v7  ;;  %v10540_v25 = vmul.f32 %v4907_v3, %v4890_v31  ;;  %vm4940_vm14 = vcmp.ge.f32.partialorder %v4908_v13, 0.0 }
 0x602   : > { %v4973_v34 = vmul.f32 0.01, %v4909_v53  ;;  %v10542_v8 = vmul.f32 %v4907_v3, %v4891_v17  ;;  %v10544_v23 = vmul.f32 %v4907_v3, %v4892_v16  ;;  %vm4941_vm15 = vcmp.ge.f32.partialorder %v4909_v53, 0.0 }
 0x603   : > { %v4974_v37 = vmul.f32 0.01, %v4910_v58  ;;  %v10546_v10 = vmul.f32 %v4907_v3, %v4893_v41  ;;  %v10548_v46 = vmul.f32 %v4907_v3, %v4894_v5  ;;  %vm4942_vm0 = vcmp.ge.f32.partialorder %v4910_v58, 0.0 }
 0x604   : > { %v4975_v1 = vmul.f32 0.01, %v4911_v43  ;;  %v10550_v44 = vmul.f32 %v4907_v3, %v4895_v45  ;;  %vm4943_vm1 = vcmp.ge.f32.partialorder %v4911_v43, 0.0  ;;  %v4976_v63 = vmul.f32 0.01, %v4912_v30 }
 0x605   : > { %v5004_v36 = vsel %vm4940_vm14, %v4908_v13, %v4972_v4  ;;  %v10552_v29 = vmul.f32 %v4907_v3, %v4896_v52  ;;  %vm4944_vm2 = vcmp.ge.f32.partialorder %v4912_v30, 0.0  ;;  %v4977_v18 = vmul.f32 0.01, %v4913_v2 }
 0x606   : > { %v5005_v59 = vsel %vm4941_vm15, %v4909_v53, %v4973_v34  ;;  %vm4945_vm3 = vcmp.ge.f32.partialorder %v4913_v2, 0.0  ;;  %vm4946_vm4 = vcmp.ge.f32.partialorder %v4914_v32, 0.0  ;;  %v4978_v38 = vmul.f32 0.01, %v4914_v32 }
 0x607   : > { %v5006_v56 = vsel %vm4942_vm0, %v4910_v58, %v4974_v37  ;;  %vm4947_vm5 = vcmp.ge.f32.partialorder %v4915_v35, 0.0  ;;  %v4979_v61 = vmul.f32 0.01, %v4915_v35  ;;  %v5007_v27 = vsel %vm4943_vm1, %v4911_v43, %v4975_v1 }
 0x608   : > { %v5036_v24 = vpack.c.bf16 %v5004_v36, %v5004_v36  ;;  %vm4948_vm7 = vcmp.ge.f32.partialorder %v10506_v15, 0.0  ;;  %v4980_v26 = vmul.f32 0.01, %v10506_v15  ;;  %v5008_v62 = vsel %vm4944_vm2, %v4912_v30, %v4976_v63 }
 0x609   : > { %v5037_v11 = vpack.c.bf16 %v5005_v59, %v5005_v59  ;;  %vm4949_vm8 = vcmp.ge.f32.partialorder %v10508_v49, 0.0  ;;  %v4981_v50 = vmul.f32 0.01, %v10508_v49  ;;  %v5009_v12 = vsel %vm4945_vm3, %v4913_v2, %v4977_v18 }
 0x60a   : > { %v5038_v54 = vpack.c.bf16 %v5006_v56, %v5006_v56  ;;  %v4982_v19 = vmul.f32 0.01, %v10510_v40  ;;  %v5010_v3 = vsel %vm4946_vm4, %v4914_v32, %v4978_v38  ;;  %v5039_v55 = vpack.c.bf16 %v5007_v27, %v5007_v27  ;;  %5069 = vst.msk [vmem:[%s10558_s19] sm:$0xf] %vm5068_vm9, %v5036_v24 }
 0x60b   : > { %vm4950_vm11 = vcmp.ge.f32.partialorder %v10510_v40, 0.0  ;;  %v4983_v33 = vmul.f32 0.01, %v10512_v28  ;;  %v5011_v48 = vsel %vm4947_vm5, %v4915_v35, %v4979_v61  ;;  %v5040_v7 = vpack.c.bf16 %v5008_v62, %v5008_v62  ;;  %5070 = vst.msk [vmem:[%s10558_s19 + $0x4] sm:$0xf] %vm5068_vm9, %v5037_v11 }
 0x60c   : > { %vm4951_vm13 = vcmp.ge.f32.partialorder %v10512_v28, 0.0  ;;  %v4984_v31 = vmul.f32 0.01, %v10514_v47  ;;  %v5012_v17 = vsel %vm4948_vm7, %v10506_v15, %v4980_v26  ;;  %v5041_v16 = vpack.c.bf16 %v5009_v12, %v5009_v12  ;;  %5071 = vst.msk [vmem:[%s10558_s19 + $0x8] sm:$0xf] %vm5068_vm9, %v5038_v54 }
 0x60d   : > { %vm4952_vm6 = vcmp.ge.f32.partialorder %v10514_v47, 0.0  ;;  %v4985_v41 = vmul.f32 0.01, %v10516_v22  ;;  %v5013_v5 = vsel %vm4949_vm8, %v10508_v49, %v4981_v50  ;;  %v5042_v45 = vpack.c.bf16 %v5010_v3, %v5010_v3  ;;  %5072 = vst.msk [vmem:[%s10558_s19 + $0xc] sm:$0xf] %vm5068_vm9, %v5039_v55 }
 0x60e   : > { %vm4953_vm10 = vcmp.ge.f32.partialorder %v10516_v22, 0.0  ;;  %v4986_v52 = vmul.f32 0.01, %v10518_v57  ;;  %v5014_v13 = vsel %vm4950_vm11, %v10510_v40, %v4982_v19  ;;  %v5043_v53 = vpack.c.bf16 %v5011_v48, %v5011_v48  ;;  %5073 = vst.msk [vmem:[%s10558_s19 + $0x10] sm:$0xf] %vm5068_vm9, %v5040_v7 }
 0x60f   : > { %vm4954_vm12 = vcmp.ge.f32.partialorder %v10518_v57, 0.0  ;;  %v4987_v58 = vmul.f32 0.01, %v10520_v14  ;;  %v5015_v43 = vsel %vm4951_vm13, %v10512_v28, %v4983_v33  ;;  %v5044_v30 = vpack.c.bf16 %v5012_v17, %v5012_v17  ;;  %5074 = vst.msk [vmem:[%s10558_s19 + $0x14] sm:$0xf] %vm5068_vm9, %v5041_v16 }
 0x610   : > { %vm4955_vm14 = vcmp.ge.f32.partialorder %v10520_v14, 0.0  ;;  %v4988_v2 = vmul.f32 0.01, %v10522_v42  ;;  %v5016_v32 = vsel %vm4952_vm6, %v10514_v47, %v4984_v31  ;;  %v5045_v35 = vpack.c.bf16 %v5013_v5, %v5013_v5  ;;  %5075 = vst.msk [vmem:[%s10558_s19 + $0x18] sm:$0xf] %vm5068_vm9, %v5042_v45 }
 0x611   : > { %vm4956_vm15 = vcmp.ge.f32.partialorder %v10522_v42, 0.0  ;;  %v4989_v15 = vmul.f32 0.01, %v10524_v9  ;;  %v5017_v49 = vsel %vm4953_vm10, %v10516_v22, %v4985_v41  ;;  %v5046_v40 = vpack.c.bf16 %v5014_v13, %v5014_v13  ;;  %5076 = vst.msk [vmem:[%s10558_s19 + $0x1c] sm:$0xf] %vm5068_vm9, %v5043_v53 }
 0x612   : > { %vm4957_vm0 = vcmp.ge.f32.partialorder %v10524_v9, 0.0  ;;  %v4990_v28 = vmul.f32 0.01, %v10526_v0  ;;  %v5018_v47 = vsel %vm4954_vm12, %v10518_v57, %v4986_v52  ;;  %v5047_v4 = vpack.c.bf16 %v5015_v43, %v5015_v43  ;;  %5077 = vst.msk [vmem:[%s10558_s19 + $0x20] sm:$0xf] %vm5068_vm9, %v5044_v30 }
 0x613   : > { %vm4958_vm1 = vcmp.ge.f32.partialorder %v10526_v0, 0.0  ;;  %v4991_v22 = vmul.f32 0.01, %v10528_v51  ;;  %v5019_v34 = vsel %vm4955_vm14, %v10520_v14, %v4987_v58  ;;  %v5048_v37 = vpack.c.bf16 %v5016_v32, %v5016_v32  ;;  %5078 = vst.msk [vmem:[%s10558_s19 + $0x24] sm:$0xf] %vm5068_vm9, %v5045_v35 }
 0x614   : > { %vm4959_vm2 = vcmp.ge.f32.partialorder %v10528_v51, 0.0  ;;  %v4992_v57 = vmul.f32 0.01, %v10530_v6  ;;  %v5020_v1 = vsel %vm4956_vm15, %v10522_v42, %v4988_v2  ;;  %v5049_v63 = vpack.c.bf16 %v5017_v49, %v5017_v49  ;;  %5079 = vst.msk [vmem:[%s10558_s19 + $0x28] sm:$0xf] %vm5068_vm9, %v5046_v40 }
 0x615   : > { %vm4960_vm3 = vcmp.ge.f32.partialorder %v10530_v6, 0.0  ;;  %v4993_v14 = vmul.f32 0.01, %v10532_v60  ;;  %v5021_v36 = vsel %vm4957_vm0, %v10524_v9, %v4989_v15  ;;  %v5050_v18 = vpack.c.bf16 %v5018_v47, %v5018_v47  ;;  %5080 = vst.msk [vmem:[%s10558_s19 + $0x2c] sm:$0xf] %vm5068_vm9, %v5047_v4 }
 0x616   : > { %vm4961_vm4 = vcmp.ge.f32.partialorder %v10532_v60, 0.0  ;;  %v4994_v42 = vmul.f32 0.01, %v10534_v20  ;;  %v5022_v59 = vsel %vm4958_vm1, %v10526_v0, %v4990_v28  ;;  %v5051_v38 = vpack.c.bf16 %v5019_v34, %v5019_v34  ;;  %5081 = vst.msk [vmem:[%s10558_s19 + $0x30] sm:$0xf] %vm5068_vm9, %v5048_v37 }
 0x617   : > { %vm4962_vm5 = vcmp.ge.f32.partialorder %v10534_v20, 0.0  ;;  %v4995_v9 = vmul.f32 0.01, %v10536_v39  ;;  %v5023_v56 = vsel %vm4959_vm2, %v10528_v51, %v4991_v22  ;;  %v5052_v61 = vpack.c.bf16 %v5020_v1, %v5020_v1  ;;  %5082 = vst.msk [vmem:[%s10558_s19 + $0x34] sm:$0xf] %vm5068_vm9, %v5049_v63 }
 0x618   : > { %vm4963_vm7 = vcmp.ge.f32.partialorder %v10536_v39, 0.0  ;;  %v4996_v0 = vmul.f32 0.01, %v10538_v21  ;;  %v5024_v27 = vsel %vm4960_vm3, %v10530_v6, %v4992_v57  ;;  %v5053_v24 = vpack.c.bf16 %v5021_v36, %v5021_v36  ;;  %5083 = vst.msk [vmem:[%s10558_s19 + $0x38] sm:$0xf] %vm5068_vm9, %v5050_v18 }
 0x619   : > { %vm4964_vm8 = vcmp.ge.f32.partialorder %v10538_v21, 0.0  ;;  %v4997_v51 = vmul.f32 0.01, %v10540_v25  ;;  %v5025_v26 = vsel %vm4961_vm4, %v10532_v60, %v4993_v14  ;;  %v5054_v62 = vpack.c.bf16 %v5022_v59, %v5022_v59  ;;  %5084 = vst.msk [vmem:[%s10558_s19 + $0x3c] sm:$0xf] %vm5068_vm9, %v5051_v38 }
 0x61a   : > { %vm4965_vm11 = vcmp.ge.f32.partialorder %v10540_v25, 0.0  ;;  %v4998_v6 = vmul.f32 0.01, %v10542_v8  ;;  %v5026_v11 = vsel %vm4962_vm5, %v10534_v20, %v4994_v42  ;;  %v5055_v50 = vpack.c.bf16 %v5023_v56, %v5023_v56  ;;  %5085 = vst.msk [vmem:[%s10558_s19 + $0x40] sm:$0xf] %vm5068_vm9, %v5052_v61 }
 0x61b   : > { %vm4966_vm13 = vcmp.ge.f32.partialorder %v10542_v8, 0.0  ;;  %v4999_v60 = vmul.f32 0.01, %v10544_v23  ;;  %v5027_v12 = vsel %vm4963_vm7, %v10536_v39, %v4995_v9  ;;  %v5056_v54 = vpack.c.bf16 %v5024_v27, %v5024_v27  ;;  %5086 = vst.msk [vmem:[%s10558_s19 + $0x44] sm:$0xf] %vm5068_vm9, %v5053_v24 }
 0x61c   : > { %vm4967_vm6 = vcmp.ge.f32.partialorder %v10544_v23, 0.0  ;;  %v5000_v20 = vmul.f32 0.01, %v10546_v10  ;;  %v5028_v19 = vsel %vm4964_vm8, %v10538_v21, %v4996_v0  ;;  %v5057_v3 = vpack.c.bf16 %v5025_v26, %v5025_v26  ;;  %5087 = vst.msk [vmem:[%s10558_s19 + $0x48] sm:$0xf] %vm5068_vm9, %v5054_v62 }
 0x61d   : > { %vm4968_vm10 = vcmp.ge.f32.partialorder %v10546_v10, 0.0  ;;  %v5001_v39 = vmul.f32 0.01, %v10548_v46  ;;  %v5029_v55 = vsel %vm4965_vm11, %v10540_v25, %v4997_v51  ;;  %v5058_v33 = vpack.c.bf16 %v5026_v11, %v5026_v11  ;;  %5088 = vst.msk [vmem:[%s10558_s19 + $0x4c] sm:$0xf] %vm5068_vm9, %v5055_v50 }
 0x61e   : > { %vm4969_vm12 = vcmp.ge.f32.partialorder %v10548_v46, 0.0  ;;  %v5002_v21 = vmul.f32 0.01, %v10550_v44  ;;  %v5030_v48 = vsel %vm4966_vm13, %v10542_v8, %v4998_v6  ;;  %v5059_v7 = vpack.c.bf16 %v5027_v12, %v5027_v12  ;;  %5089 = vst.msk [vmem:[%s10558_s19 + $0x50] sm:$0xf] %vm5068_vm9, %v5056_v54 }
 0x61f   : > { %vm4970_vm14 = vcmp.ge.f32.partialorder %v10550_v44, 0.0  ;;  %v5003_v25 = vmul.f32 0.01, %v10552_v29  ;;  %v5031_v31 = vsel %vm4967_vm6, %v10544_v23, %v4999_v60  ;;  %v5060_v17 = vpack.c.bf16 %v5028_v19, %v5028_v19  ;;  %5090 = vst.msk [vmem:[%s10558_s19 + $0x54] sm:$0xf] %vm5068_vm9, %v5057_v3 }
 0x620   : > { %vm4971_vm15 = vcmp.ge.f32.partialorder %v10552_v29, 0.0  ;;  %v5032_v8 = vsel %vm4968_vm10, %v10546_v10, %v5000_v20  ;;  %v5061_v16 = vpack.c.bf16 %v5029_v55, %v5029_v55  ;;  %v5033_v41 = vsel %vm4969_vm12, %v10548_v46, %v5001_v39  ;;  %5091 = vst.msk [vmem:[%s10558_s19 + $0x58] sm:$0xf] %vm5068_vm9, %v5058_v33 }
 0x621   : > { %v5062_v23 = vpack.c.bf16 %v5030_v48, %v5030_v48  ;;  %v5034_v5 = vsel %vm4970_vm14, %v10550_v44, %v5002_v21  ;;  %v5063_v45 = vpack.c.bf16 %v5031_v31, %v5031_v31  ;;  %5092 = vst.msk [vmem:[%s10558_s19 + $0x5c] sm:$0xf] %vm5068_vm9, %v5059_v7  ;;  %v5035_v10 = vsel %vm4971_vm15, %v10552_v29, %v5003_v25 }
 0x622   : > { %v5064_v52 = vpack.c.bf16 %v5032_v8, %v5032_v8  ;;  %5093 = vst.msk [vmem:[%s10558_s19 + $0x60] sm:$0xf] %vm5068_vm9, %v5060_v17  ;;  %v5065_v13 = vpack.c.bf16 %v5033_v41, %v5033_v41  ;;  %v5066_v46 = vpack.c.bf16 %v5034_v5, %v5034_v5  ;;  %v5067_v53 = vpack.c.bf16 %v5035_v10, %v5035_v10 }
 0x623   : > { %5094 = vst.msk [vmem:[%s10558_s19 + $0x64] sm:$0xf] %vm5068_vm9, %v5061_v16 }
 0x624   : > { %5095 = vst.msk [vmem:[%s10558_s19 + $0x68] sm:$0xf] %vm5068_vm9, %v5062_v23 }
 0x625   : > { %5096 = vst.msk [vmem:[%s10558_s19 + $0x6c] sm:$0xf] %vm5068_vm9, %v5063_v45 }
 0x626   : > { %5097 = vst.msk [vmem:[%s10558_s19 + $0x70] sm:$0xf] %vm5068_vm9, %v5064_v52 }
 0x627   : > { %5098 = vst.msk [vmem:[%s10558_s19 + $0x74] sm:$0xf] %vm5068_vm9, %v5065_v13 }
 0x628   : > { %5099 = vst.msk [vmem:[%s10558_s19 + $0x78] sm:$0xf] %vm5068_vm9, %v5066_v46 }
 0x629   : > { %5100 = vst.msk [vmem:[%s10558_s19 + $0x7c] sm:$0xf] %vm5068_vm9, %v5067_v53 }
 0x62a PF: > { %s16_s21 = sadd.s32 1, %s6718_s21  }
 0x62b   : > { %p13_p4 = scmp.ge.s32.totalorder %s16_s21, 4  }
 0x62d   :  { %15 = sbr.rel (!%p13_p4) target bundleno = 1 (0x1), region = 81 }

</bundles_post_ra>
